<compile_context>
chip_gen: v6e
topology: v6e:2x2x1
jax: 0.10.0
libtpu: 0.0.40
codegen_flags: <defaults>
</compile_context>

<pallas_src>
import jax
import jax.numpy as jnp
from jax.experimental import pallas as pl
from jax.experimental.pallas import tpu as pltpu

H1 = 1024                  # hidden size of first Linear (fixed by the module)
H2 = 4096                  # hidden size of second Linear (fixed by the module)
NC = 2                     # parallel output partitions (v7x has 2 TCs; free on 1-TC chips)
TK = 2048                  # tile width over the H2 hidden dimension
KSTEPS = H2 // (NC * TK)   # reduction steps per partition (== 1: one slab per core)
assert H2 == NC * KSTEPS * TK


def decoder_kernel(x_ref, w1_ref, b1_ref, w2_ref, b2_ref, w3_ref, o_ref, h1_sc):
    k = pl.program_id(1)   # reduction step within this partition

    @pl.when(k == 0)
    def _():
        # Layer 1 (computed once per partition; h1 stays resident in VMEM).
        h1 = jnp.dot(x_ref[...].astype(jnp.bfloat16), w1_ref[...],
                     preferred_element_type=jnp.float32) + b1_ref[...]
        h1_sc[...] = jnp.tanh(h1).astype(jnp.bfloat16)

    # Layer 2 slab (TK wide) + its contribution to layer 3 (f32 accumulation).
    h2 = jnp.tanh(jnp.dot(h1_sc[...], w2_ref[...],
                          preferred_element_type=jnp.float32) + b2_ref[...])
    partial = jnp.dot(h2.astype(jnp.bfloat16), w3_ref[...],
                      preferred_element_type=jnp.float32)

    @pl.when(k == 0)
    def _():
        o_ref[...] = partial            # first slab: write directly, no zero-init

    @pl.when(k > 0)
    def _():
        o_ref[...] += partial           # remaining slabs: accumulate in place


def _partial_decoder(x, w1, b1, w2, b2, w3):
    """Pallas call producing per-partition partial sums of shape (NC, B, out)."""
    B, input_dim = x.shape
    output_dim = w3.shape[1]

    flops = 2 * B * (input_dim * H1 + H1 * H2 + H2 * output_dim)
    transcendentals = B * (H1 + H2)
    bytes_accessed = (
        x.size * x.dtype.itemsize
        + w1.size * w1.dtype.itemsize + b1.size * b1.dtype.itemsize
        + w2.size * w2.dtype.itemsize + b2.size * b2.dtype.itemsize
        + w3.size * w3.dtype.itemsize
        + NC * B * output_dim * 4
    )

    return pl.pallas_call(
        decoder_kernel,
        out_shape=jax.ShapeDtypeStruct((NC, B, output_dim), jnp.float32),
        grid_spec=pltpu.PrefetchScalarGridSpec(
            num_scalar_prefetch=0,
            grid=(NC, KSTEPS),
            in_specs=[
                pl.BlockSpec((B, input_dim), lambda c, k: (0, 0)),    # x (full)
                pl.BlockSpec((input_dim, H1), lambda c, k: (0, 0)),   # W1 (full)
                pl.BlockSpec((1, H1), lambda c, k: (0, 0)),           # b1 (full)
                pl.BlockSpec((H1, TK), lambda c, k: (0, c * KSTEPS + k)),          # W2 slab
                pl.BlockSpec((1, TK), lambda c, k: (0, c * KSTEPS + k)),           # b2 slab
                pl.BlockSpec((TK, output_dim), lambda c, k: (c * KSTEPS + k, 0)),  # W3 slab
            ],
            out_specs=pl.BlockSpec((None, B, output_dim), lambda c, k: (c, 0, 0)),
            scratch_shapes=[
                pltpu.VMEM((B, H1), jnp.bfloat16),   # h1 cache (bf16 MXU input)
            ],
        ),
        compiler_params=pltpu.CompilerParams(
            dimension_semantics=("parallel", "arbitrary"),
            vmem_limit_bytes=32 * 1024 * 1024,
        ),
        cost_estimate=pl.CostEstimate(
            flops=flops,
            transcendentals=transcendentals,
            bytes_accessed=bytes_accessed,
        ),
    )(x, w1, b1, w2, b2, w3)


def prepare_params(w1, b1, w2, b2, w3, b3):
    """One-time weight prep, hoisted out of the per-call path (review item #1).

    Large weight matrices are stored in bf16 once; biases stay f32 (tiny)."""
    return (w1.astype(jnp.bfloat16), b1,
            w2.astype(jnp.bfloat16), b2,
            w3.astype(jnp.bfloat16), b3)


@jax.jit
def decoder_forward(x, params):
    w1, b1, w2, b2, w3, b3 = params
    partials = _partial_decoder(x, w1, b1, w2, b2, w3)
    # Tiny epilogue (~16 KiB): combine per-core partials, add bias, sigmoid.
    return jax.nn.sigmoid(jnp.sum(partials, axis=0) + b3)


def reference_forward(x, w1, b1, w2, b2, w3, b3):
    h1 = jnp.tanh(x @ w1 + b1)
    h2 = jnp.tanh(h1 @ w2 + b2)
    return jax.nn.sigmoid(h2 @ w3 + b3)


if __name__ == "__main__":
    # Small, module-consistent shapes.  (Runtime is flat in B until the
    # hundreds -- callers should batch documents into one call.)
    B = 8
    input_dim = 32
    output_dim = 256

    key = jax.random.PRNGKey(0)
    keys = jax.random.split(key, 8)

    # Deterministic synthetic parameters (small scale to avoid saturating
    # tanh / sigmoid).
    x  = jax.random.normal(keys[0], (B, input_dim), dtype=jnp.float32)
    w1 = 0.02 * jax.random.normal(keys[1], (input_dim, H1), dtype=jnp.float32)
    b1 = 0.01 * jax.random.normal(keys[2], (1, H1), dtype=jnp.float32)
    w2 = 0.02 * jax.random.normal(keys[3], (H1, H2), dtype=jnp.float32)
    b2 = 0.01 * jax.random.normal(keys[4], (1, H2), dtype=jnp.float32)
    w3 = 0.02 * jax.random.normal(keys[5], (H2, output_dim), dtype=jnp.float32)
    b3 = 0.01 * jax.random.normal(keys[6], (1, output_dim), dtype=jnp.float32)

    # One-time parameter prep (bf16 weights live on device; the jitted forward
    # never re-casts them).
    params = prepare_params(w1, b1, w2, b2, w3, b3)
    params = tuple(jax.block_until_ready(p) for p in params)

    out = decoder_forward(x, params)
    out = jax.block_until_ready(out)

    ref = reference_forward(x, w1, b1, w2, b2, w3, b3)
    assert out.shape == (B, output_dim)
    # Tolerance loosened vs the pure-f32 reference because weights are
    # intentionally streamed / multiplied in bf16 (f32 accumulation).
    assert jnp.allclose(out, ref, atol=3e-3, rtol=3e-3), "mismatch vs JAX reference"

    # TODO(synk): the ZeroShotTM inference network (reparameterization sampling,
    # batchnorm, dropout) and calculate_loss (KL + reconstruction loss), plus the
    # host-side get_topic_lists / evaluate_TM utilities, are training-time or
    # stochastic / host pieces and are not implemented here.
    print("KERNEL_OK")
</pallas_src>

<mosaic_0001>
module attributes {stable_mosaic.version = 11 : i64} {
  func.func @decoder_kernel(%arg0: i32, %arg1: i32, %arg2: memref<8x32xf32, #tpu.memory_space<vmem>>, %arg3: memref<32x1024xbf16, #tpu.memory_space<vmem>>, %arg4: memref<1x1024xf32, #tpu.memory_space<vmem>>, %arg5: memref<1024x2048xbf16, #tpu.memory_space<vmem>>, %arg6: memref<1x2048xf32, #tpu.memory_space<vmem>>, %arg7: memref<2048x256xbf16, #tpu.memory_space<vmem>>, %arg8: memref<1x8x256xf32, #tpu.memory_space<vmem>>, %arg9: memref<8x1024xbf16, #tpu.memory_space<vmem>>) attributes {dimension_semantics = [#tpu.dimension_semantics<parallel>, #tpu.dimension_semantics<arbitrary>], iteration_bounds = array<i64: 2, 1>, scalar_prefetch = 0 : i64, scratch_operands = 1 : i64, tpu.core_type = #tpu.core_type<tc>, window_params = [{pipeline_mode = #tpu.pipeline_mode<synchronous>, transform_indices = @transform_0, window_bounds = array<i64: 8, 32>}, {pipeline_mode = #tpu.pipeline_mode<synchronous>, transform_indices = @transform_1, window_bounds = array<i64: 32, 1024>}, {pipeline_mode = #tpu.pipeline_mode<synchronous>, transform_indices = @transform_2, window_bounds = array<i64: 1, 1024>}, {transform_indices = @transform_3, window_bounds = array<i64: 1024, 2048>}, {transform_indices = @transform_4, window_bounds = array<i64: 1, 2048>}, {transform_indices = @transform_5, window_bounds = array<i64: 2048, 256>}, {transform_indices = @transform_6, window_bounds = array<i64: 1, 8, 256>}]} {
    %c0_i32 = arith.constant 0 : i32
    %0 = arith.cmpi eq, %arg1, %c0_i32 : i32
    %1 = arith.extui %0 : i1 to i32
    %c0_i32_0 = arith.constant 0 : i32
    %2 = arith.cmpi ne, %1, %c0_i32_0 : i32
    scf.if %2 {
      %c0_13 = arith.constant 0 : index
      %c0_14 = arith.constant 0 : index
      %19 = vector.load %arg2[%c0_13, %c0_14] : memref<8x32xf32, #tpu.memory_space<vmem>>, vector<8x32xf32>
      %20 = arith.truncf %19 : vector<8x32xf32> to vector<8x32xbf16>
      %c0_15 = arith.constant 0 : index
      %c0_16 = arith.constant 0 : index
      %21 = vector.load %arg3[%c0_15, %c0_16] : memref<32x1024xbf16, #tpu.memory_space<vmem>>, vector<32x1024xbf16>
      %cst_17 = arith.constant dense<0.000000e+00> : vector<8x1024xf32>
      %22 = tpu.matmul %20, %21, %cst_17 {dimension_numbers = #tpu.dot_dimension_numbers<[1], [0], [0], [1], [0, 0, 1, 1], [], []>} : vector<8x32xbf16>, vector<32x1024xbf16>, vector<8x1024xf32> -> vector<8x1024xf32>
      %c0_18 = arith.constant 0 : index
      %c0_19 = arith.constant 0 : index
      %23 = vector.load %arg4[%c0_18, %c0_19] : memref<1x1024xf32, #tpu.memory_space<vmem>>, vector<1x1024xf32>
      %24 = vector.broadcast %23 : vector<1x1024xf32> to vector<8x1024xf32>
      %25 = arith.addf %22, %24 : vector<8x1024xf32>
      %26 = math.tanh %25 : vector<8x1024xf32>
      %27 = arith.truncf %26 : vector<8x1024xf32> to vector<8x1024xbf16>
      %c0_20 = arith.constant 0 : index
      %c0_21 = arith.constant 0 : index
      %28 = vector.load %arg9[%c0_20, %c0_21] : memref<8x1024xbf16, #tpu.memory_space<vmem>>, vector<8x1024xbf16>
      tpu.vector_store %arg9[%c0_20, %c0_21], %27 {strides = array<i32>} : memref<8x1024xbf16, #tpu.memory_space<vmem>>, vector<8x1024xbf16>,
    } else {
    }
    %c0 = arith.constant 0 : index
    %c0_1 = arith.constant 0 : index
    %3 = vector.load %arg9[%c0, %c0_1] : memref<8x1024xbf16, #tpu.memory_space<vmem>>, vector<8x1024xbf16>
    %c0_2 = arith.constant 0 : index
    %c0_3 = arith.constant 0 : index
    %4 = vector.load %arg5[%c0_2, %c0_3] : memref<1024x2048xbf16, #tpu.memory_space<vmem>>, vector<1024x2048xbf16>
    %cst = arith.constant dense<0.000000e+00> : vector<8x2048xf32>
    %5 = tpu.matmul %3, %4, %cst {dimension_numbers = #tpu.dot_dimension_numbers<[1], [0], [0], [1], [0, 0, 1, 1], [], []>} : vector<8x1024xbf16>, vector<1024x2048xbf16>, vector<8x2048xf32> -> vector<8x2048xf32>
    %c0_4 = arith.constant 0 : index
    %c0_5 = arith.constant 0 : index
    %6 = vector.load %arg6[%c0_4, %c0_5] : memref<1x2048xf32, #tpu.memory_space<vmem>>, vector<1x2048xf32>
    %7 = vector.broadcast %6 : vector<1x2048xf32> to vector<8x2048xf32>
    %8 = arith.addf %5, %7 : vector<8x2048xf32>
    %9 = math.tanh %8 : vector<8x2048xf32>
    %10 = arith.truncf %9 : vector<8x2048xf32> to vector<8x2048xbf16>
    %c0_6 = arith.constant 0 : index
    %c0_7 = arith.constant 0 : index
    %11 = vector.load %arg7[%c0_6, %c0_7] : memref<2048x256xbf16, #tpu.memory_space<vmem>>, vector<2048x256xbf16>
    %cst_8 = arith.constant dense<0.000000e+00> : vector<8x256xf32>
    %12 = tpu.matmul %10, %11, %cst_8 {dimension_numbers = #tpu.dot_dimension_numbers<[1], [0], [0], [1], [0, 0, 1, 1], [], []>} : vector<8x2048xbf16>, vector<2048x256xbf16>, vector<8x256xf32> -> vector<8x256xf32>
    %c0_i32_9 = arith.constant 0 : i32
    %13 = arith.cmpi eq, %arg1, %c0_i32_9 : i32
    %14 = arith.extui %13 : i1 to i32
    %c0_i32_10 = arith.constant 0 : i32
    %15 = arith.cmpi ne, %14, %c0_i32_10 : i32
    scf.if %15 {
      %c0_13 = arith.constant 0 : index
      %c0_14 = arith.constant 0 : index
      %c0_15 = arith.constant 0 : index
      %19 = vector.load %arg8[%c0_13, %c0_14, %c0_15] : memref<1x8x256xf32, #tpu.memory_space<vmem>>, vector<1x8x256xf32>
      %20 = vector.shape_cast %19 : vector<1x8x256xf32> to vector<8x256xf32>
      %21 = vector.shape_cast %12 : vector<8x256xf32> to vector<1x8x256xf32>
      tpu.vector_store %arg8[%c0_13, %c0_14, %c0_15], %21 {strides = array<i32>} : memref<1x8x256xf32, #tpu.memory_space<vmem>>, vector<1x8x256xf32>,
    } else {
    }
    %c0_i32_11 = arith.constant 0 : i32
    %16 = arith.cmpi sgt, %arg1, %c0_i32_11 : i32
    %17 = arith.extui %16 : i1 to i32
    %c0_i32_12 = arith.constant 0 : i32
    %18 = arith.cmpi ne, %17, %c0_i32_12 : i32
    scf.if %18 {
      %c0_13 = arith.constant 0 : index
      %c0_14 = arith.constant 0 : index
      %c0_15 = arith.constant 0 : index
      %19 = vector.load %arg8[%c0_13, %c0_14, %c0_15] : memref<1x8x256xf32, #tpu.memory_space<vmem>>, vector<1x8x256xf32>
      %20 = vector.shape_cast %19 : vector<1x8x256xf32> to vector<8x256xf32>
      %21 = arith.addf %20, %12 : vector<8x256xf32>
      %c0_16 = arith.constant 0 : index
      %c0_17 = arith.constant 0 : index
      %c0_18 = arith.constant 0 : index
      %22 = vector.load %arg8[%c0_16, %c0_17, %c0_18] : memref<1x8x256xf32, #tpu.memory_space<vmem>>, vector<1x8x256xf32>
      %23 = vector.shape_cast %22 : vector<1x8x256xf32> to vector<8x256xf32>
      %24 = vector.shape_cast %21 : vector<8x256xf32> to vector<1x8x256xf32>
      tpu.vector_store %arg8[%c0_16, %c0_17, %c0_18], %24 {strides = array<i32>} : memref<1x8x256xf32, #tpu.memory_space<vmem>>, vector<1x8x256xf32>,
    } else {
    }
    return
  }
  func.func @transform_0(%arg0: i32, %arg1: i32) -> (i32, i32) {
    %c0_i32 = arith.constant 0 : i32
    %c0_i32_0 = arith.constant 0 : i32
    %c0_i32_1 = arith.constant 0 : i32
    return %c0_i32, %c0_i32_0 : i32, i32
  }
  func.func @transform_1(%arg0: i32, %arg1: i32) -> (i32, i32) {
    %c0_i32 = arith.constant 0 : i32
    %c0_i32_0 = arith.constant 0 : i32
    %c0_i32_1 = arith.constant 0 : i32
    return %c0_i32, %c0_i32_0 : i32, i32
  }
  func.func @transform_2(%arg0: i32, %arg1: i32) -> (i32, i32) {
    %c0_i32 = arith.constant 0 : i32
    %c0_i32_0 = arith.constant 0 : i32
    %c0_i32_1 = arith.constant 0 : i32
    return %c0_i32, %c0_i32_0 : i32, i32
  }
  func.func @transform_3(%arg0: i32, %arg1: i32) -> (i32, i32) {
    %c1_i32 = arith.constant 1 : i32
    %0 = arith.muli %arg0, %c1_i32 : i32
    %1 = arith.addi %0, %arg1 : i32
    %c0_i32 = arith.constant 0 : i32
    %c0_i32_0 = arith.constant 0 : i32
    return %c0_i32, %1 : i32, i32
  }
  func.func @transform_4(%arg0: i32, %arg1: i32) -> (i32, i32) {
    %c1_i32 = arith.constant 1 : i32
    %0 = arith.muli %arg0, %c1_i32 : i32
    %1 = arith.addi %0, %arg1 : i32
    %c0_i32 = arith.constant 0 : i32
    %c0_i32_0 = arith.constant 0 : i32
    return %c0_i32, %1 : i32, i32
  }
  func.func @transform_5(%arg0: i32, %arg1: i32) -> (i32, i32) {
    %c1_i32 = arith.constant 1 : i32
    %0 = arith.muli %arg0, %c1_i32 : i32
    %1 = arith.addi %0, %arg1 : i32
    %c0_i32 = arith.constant 0 : i32
    %c0_i32_0 = arith.constant 0 : i32
    return %1, %c0_i32 : i32, i32
  }
  func.func @transform_6(%arg0: i32, %arg1: i32) -> (i32, i32, i32) {
    %c0_i32 = arith.constant 0 : i32
    %c0_i32_0 = arith.constant 0 : i32
    %c0_i32_1 = arith.constant 0 : i32
    return %arg0, %c0_i32, %c0_i32_0 : i32, i32, i32
  }
}

</mosaic_0001>

<bundles_post_ra>
// kernel: decoder_forward.1
= control target key start
LH: loop header
LB: loop body
LE: loop exit
PB: predicated region body
PF: predicated region fallthrough
CT: control target
= control target key end

     0   :  { %s14348_s0 = inlined_call_operand.hbm [shape: f32[8,32], index: 0, kind: input, shape index: {}]   ;;  %s14349_s1 = inlined_call_operand.hbm [shape: bf16[32,1024], index: 1, kind: input, shape index: {}]   ;;  %s14350_s2 = inlined_call_operand.hbm [shape: f32[1,1024], index: 2, kind: input, shape index: {}]   ;;  %s14351_s3 = inlined_call_operand.hbm [shape: bf16[1024,4096], index: 3, kind: input, shape index: {}]   ;;  %s14352_s4 = inlined_call_operand.hbm [shape: f32[1,4096], index: 4, kind: input, shape index: {}]   ;;  %s14353_s5 = inlined_call_operand.hbm [shape: bf16[4096,256], index: 5, kind: input, shape index: {}]   ;;  %s14354_s6 = inlined_call_operand.vmem [shape: f32[2,8,256], index: 6, kind: output, shape index: {}]  }
   0x1   :  { %14358 = sst [smem:[#allocation18_spill]] %s14349_s1 }
   0x2   :  { %11 = vsyncpa [#allocation4], 0 }
   0x3   :  { %12 = vsyncpa [#allocation6], 0 }
   0x4   :  { %13 = vsyncpa [#allocation9], 0 }
   0x5   :  { %15 = vsyncpa [#allocation9 + $0x1], 0 }
   0x6   :  { %16 = vsyncpa [#allocation12], 0 }
   0x7   :  { %18 = vsyncpa [#allocation12 + $0x1], 0  ;;  %s12577_s21 = smov 0   ;;  %s12579_s22 = smov 0  }
   0x8   :  { %s12581_s23 = smov 0   ;;  %s12583_s24 = smov 0  }
   0x9   :  { %s12585_s25 = smov 0   ;;  %s12587_s26 = smov 0  }
   0xa LB: > { %s14356_s27 = sadd.s32 4294967295, %s12526_s26   ;;  %p115_p0 = scmp.ne.s32.totalorder %s12514_s23, %s12510_s22  ;;  %s12526_s26 = sphi %s12587_s26, %s24_s26   ;;  %s12522_s25 = sphi %s12585_s25, %s14374_s25   ;;  %s12518_s24 = sphi %s12583_s24, %s14373_s24   ;;  %s12514_s23 = sphi %s12581_s23, %s14372_s23   ;;  %s12510_s22 = sphi %s12579_s22, %s14371_s22   ;;  %s12506_s21 = sphi %s12577_s21, %s14370_s21  }
   0xb   : > { %p116_p1 = scmp.eq.s32.totalorder %s12526_s26, 0  ;;  %p121_p2 = scmp.ne.s32.totalorder %s12510_s22, %s12506_s21 }
   0xc   : > { %p12613_p3 = scmp.eq.s32.totalorder %s14356_s27, 0  ;;  %p10409_p5 = scmp.ge.s32.totalorder %s12526_s26, 1 }
   0xd   : > { %p117_p4 = por %p116_p1, %p115_p0  ;;  %p214_p7 = scmp.lt.s32.totalorder %s12526_s26, 3 }
   0xe   : > { %p12620_p6 = por %p12613_p3, %p121_p2  ;;  %s12528_s8 = smov [#allocation5]  }
   0xf   : > { %p12625_p8 = pnand %p10409_p5, %p214_p7  ;;  %s237_s9 = sshll.u32 %s12528_s8, 4  ;;  %s238_s9 = int_to_ptr.vmem [resolvable:$true] %s237_s9 }
  0x10   : > { %s14360_s30 = scalar_select %p12620_p6, 1, 0 }
  0x11   : > { %p11782_p9 = pneg %p12625_p8  ;;  %p11805_p10 = scmp.lt.s32.totalorder %s12526_s26, 2 }
  0x12   : > { %s36_s12 = sadd.s32 1, %s12522_s25  ;;  %s12313_s13 = scalar_lea.vmem %s238_s9, 2048 }
  0x13   : > { %p12634_p11 = pnand %p11782_p9, %p12613_p3  ;;  %p12638_p12 = pnand %p11805_p10, %p117_p4 }
  0x14   : > { %p12314_p0 = scmp.ne.s32.totalorder %s238_s9, %s12313_s13  ;;  %p12321_p5 = scmp.lt.s32.totalorder %s238_s9, %s238_s9 }
  0x15   : > { %p12304_p13 = pneg %p12634_p11  ;;  %p12322_p7 = scmp.lt.s32.totalorder %s12313_s13, %s12313_s13 }
  0x17   : > { %p12316_p1 = pnand %p12314_p0, %p12304_p13  ;;  %p12323_p9 = por %p12322_p7, %p12321_p5 }
  0x19   : > { %p12317_p2 = pneg %p12316_p1 }
  0x1b   : > { %p12324_p6 = pnand %p12323_p9, %p12317_p2 }
  0x1d   : > { %12327 = shalt.err (!%p12324_p6)
}
  0x1e   : > { %s12529_s14 = smov 512   ;;  %s12530_s15 = smov 32  }
  0x1f   : > { %s14364_s1 = sld [smem:[#allocation18_spill]]  ;;  %p38_p4 = scmp.ge.s32.totalorder %s36_s12, 2 }
  0x20   : > { %s262_s18 = sand.u32 1, %s12526_s26   ;;  %s12655_s19 = sand.u32 1, %s12514_s23  }
  0x21   : > { %s14376_s12 = smov (%p38_p4, %s36_s12), 0  ;;  %s10414_s20 = sshll.u32 %s12655_s19, 13 }
  0x22   : > { %14365 = sst [smem:[#allocation17_spill]] %s14376_s12  ;;  %s105_s21 = ssub.s32 %s12522_s25, %s14376_s12 }
  0x23   : > { %p106_p6 = scmp.eq.s32.totalorder %s105_s21, 0  ;;  %s11747_s8 = sshll.u32 %s12522_s25, 10 }
  0x24   : > { %s273_s28 = scalar_lea.hbm %s14351_s3, %s11747_s8  ;;  %s266_s16 = scalar_lea.vmem [#allocation8], %s10414_s20 }
  0x25   : > { %11788 = dma.hbm_to_vmem [thread:$0]  (!%p12634_p11), %s14364_s1, 2048, %s238_s9, [#allocation6], %s12529_s14, %s12529_s14, %s12530_s15  }
  0x26   : > { %s274_s17 = sshll.u32 %s266_s16, 4  ;;  %s14366_s9 = sadd.s32 1, %s12514_s23  ;;  %s275_s17 = int_to_ptr.vmem [resolvable:$true] %s274_s17 }
  0x27   : > { %s12669_s14 = scalar_select %p106_p6, %s12514_s23, %s14366_s9  }
  0x28   : > { %s12671_s15 = scalar_lea.sflag [#allocation9], %s262_s18  ;;  %p12330_p10 = pneg %p12638_p12 }
  0x29   : > { %s12341_s1 = scalar_lea.vmem %s275_s17, 131072  ;;  %s12531_s21 = smov [#allocation8]  }
  0x2a   : > { %p12342_p0 = scmp.ne.s32.totalorder %s275_s17, %s12341_s1  ;;  %s12346_s12 = sshll.u32 %s12531_s21, 4  ;;  %s12347_s12 = int_to_ptr.vmem [resolvable:$false] %s12346_s12 }
  0x2b   : > { %s12348_s27 = scalar_lea.vmem %s12347_s12, 262144  ;;  %p12349_p5 = scmp.lt.s32.totalorder %s275_s17, %s12347_s12 }
  0x2c   : > { %p12344_p1 = pnand %p12342_p0, %p12330_p10  ;;  %p12350_p7 = scmp.lt.s32.totalorder %s12348_s27, %s12341_s1 }
  0x2e   : > { %p12345_p2 = pneg %p12344_p1  ;;  %p12351_p9 = por %p12350_p7, %p12349_p5 }
  0x30   : > { %p12352_p4 = pnand %p12351_p9, %p12345_p2 }
  0x32   : > { %12355 = shalt.err (!%p12352_p4)
}
  0x33   : > { %s12532_s20 = smov 2048   ;;  %s12533_s18 = smov 1024  }
  0x34   : > { %s12534_s8 = smov 64   ;;  %s12535_s13 = smov [#allocation3]  }
  0x35   : > { %11795 = dma.hbm_to_vmem [thread:$0]  (!%p12638_p12), %s273_s28, 131072, %s275_s17, %s12671_s15, %s12532_s20, %s12533_s18, %s12534_s8  }
  0x36   : > { %s227_s16 = sshll.u32 %s12535_s13, 4  ;;  %s228_s16 = int_to_ptr.vmem [resolvable:$true] %s227_s16 }
  0x37   : > { %s12367_s9 = scalar_lea.vmem %s228_s16, 128  ;;  %p12375_p5 = scmp.lt.s32.totalorder %s228_s16, %s228_s16 }
  0x38   : > { %p12368_p6 = scmp.ne.s32.totalorder %s228_s16, %s12367_s9  ;;  %p12376_p2 = scmp.lt.s32.totalorder %s12367_s9, %s12367_s9 }
  0x3a   : > { %p12370_p0 = pnand %p12368_p6, %p12304_p13  ;;  %p12377_p7 = por %p12376_p2, %p12375_p5 }
  0x3c   : > { %p12371_p1 = pneg %p12370_p0 }
  0x3e   : > { %p12378_p9 = pnand %p12377_p7, %p12371_p1 }
  0x40   : > { %12381 = shalt.err (!%p12378_p9)
}
  0x41   : > { %11785 = dma.hbm_to_vmem [thread:$0]  (!%p12634_p11), %s14348_s0, 128, %s228_s16, [#allocation4]  }
  0x42   : > { %s12536_s28 = smov [#allocation7]   ;;  %s10417_s21 = sshll.u32 %s12655_s19, 4 }
  0x43   : > { %s251_s17 = sshll.u32 %s12536_s28, 4  ;;  %s252_s17 = int_to_ptr.vmem [resolvable:$true] %s251_s17 }
  0x44   : > { %s12393_s27 = scalar_lea.vmem %s252_s17, 128  ;;  %p12401_p1 = scmp.lt.s32.totalorder %s252_s17, %s252_s17 }
  0x45   : > { %p12394_p4 = scmp.ne.s32.totalorder %s252_s17, %s12393_s27  ;;  %p12402_p5 = scmp.lt.s32.totalorder %s12393_s27, %s12393_s27 }
  0x47   : > { %p12396_p6 = pnand %p12394_p4, %p12304_p13  ;;  %p12403_p2 = por %p12402_p5, %p12401_p1 }
  0x49   : > { %p12397_p0 = pneg %p12396_p6 }
  0x4b   : > { %p12404_p7 = pnand %p12403_p2, %p12397_p0 }
  0x4d   : > { %12407 = shalt.err (!%p12404_p7)
}
  0x4e   : > { %11791 = dma.hbm_to_vmem [thread:$0]  (!%p12634_p11), %s14350_s2, 128, %s252_s17, [#allocation6]  }
  0x4f   : > { %s11748_s8 = sshll.u32 %s12522_s25, 8  ;;  %s288_s13 = scalar_lea.vmem [#allocation10], %s10417_s21 }
  0x50   : > { %s297_s16 = sshll.u32 %s288_s13, 4  ;;  %s295_s12 = scalar_lea.hbm %s14352_s4, %s11748_s8  ;;  %s298_s16 = int_to_ptr.vmem [resolvable:$true] %s297_s16 }
  0x51   : > { %s12421_s28 = scalar_lea.vmem %s298_s16, 256  ;;  %s12537_s10 = smov [#allocation10]  }
  0x52   : > { %p12422_p13 = scmp.ne.s32.totalorder %s298_s16, %s12421_s28  ;;  %s12426_s27 = sshll.u32 %s12537_s10, 4  ;;  %s12427_s27 = int_to_ptr.vmem [resolvable:$false] %s12426_s27 }
  0x53   : > { %s12428_s20 = scalar_lea.vmem %s12427_s27, 512  ;;  %p12429_p6 = scmp.lt.s32.totalorder %s298_s16, %s12427_s27 }
  0x54   : > { %p12424_p9 = pnand %p12422_p13, %p12330_p10  ;;  %p12430_p11 = scmp.lt.s32.totalorder %s12428_s20, %s12421_s28 }
  0x56   : > { %p12425_p4 = pneg %p12424_p9  ;;  %p12431_p0 = por %p12430_p11, %p12429_p6 }
  0x58   : > { %p12432_p1 = pnand %p12431_p0, %p12425_p4 }
  0x5a   : > { %12435 = shalt.err (!%p12432_p1)
}
  0x5b   : > { %11798 = dma.hbm_to_vmem [thread:$0]  (!%p12638_p12), %s295_s12, 256, %s298_s16, %s12671_s15  }
  0x5c   : > { %s10420_s17 = sshll.u32 %s12655_s19, 11  ;;  %s11750_s21 = sshll.u32 %s12522_s25, 15 }
  0x5d   : > { %s316_s13 = scalar_lea.hbm %s14353_s5, %s11750_s21  ;;  %s308_s9 = scalar_lea.vmem [#allocation11], %s10420_s17 }
  0x5e   : > { %s317_s1 = sshll.u32 %s308_s9, 4  ;;  %s305_s28 = scalar_lea.sflag [#allocation12], %s12655_s19  ;;  %s318_s1 = int_to_ptr.vmem [resolvable:$true] %s317_s1 }
  0x5f   : > { %s12449_s10 = scalar_lea.vmem %s318_s1, 32768  ;;  %s12538_s27 = smov [#allocation11]  }
  0x60   : > { %p12450_p5 = scmp.ne.s32.totalorder %s318_s1, %s12449_s10  ;;  %s12454_s20 = sshll.u32 %s12538_s27, 4  ;;  %s12455_s20 = int_to_ptr.vmem [resolvable:$false] %s12454_s20 }
  0x61   : > { %s12456_s15 = scalar_lea.vmem %s12455_s20, 65536  ;;  %p12457_p13 = scmp.lt.s32.totalorder %s318_s1, %s12455_s20 }
  0x62   : > { %p12452_p2 = pnand %p12450_p5, %p12330_p10  ;;  %p12458_p9 = scmp.lt.s32.totalorder %s12456_s15, %s12449_s10 }
  0x64   : > { %p12453_p7 = pneg %p12452_p2  ;;  %p12459_p4 = por %p12458_p9, %p12457_p13 }
  0x66   : > { %p12460_p6 = pnand %p12459_p4, %p12453_p7 }
  0x68   : > { %12463 = shalt.err (!%p12460_p6)
}
  0x69   : > { %s12539_s16 = smov 128   ;;  %s12540_s12 = smov 8  }
  0x6a   : > { %11801 = dma.hbm_to_vmem [thread:$0]  (!%p12638_p12), %s316_s13, 32768, %s318_s1, %s305_s28, %s12539_s16, %s12539_s16, %s12540_s12  }
  0x6b   : > { %329 = sbr.rel (%p12625_p8) target bundleno = 1767 (0x6e7), region = 44 }
  0x70   : > { %12489 = dma.done.wait (%p12613_p3), [#allocation4], 128  }
  0x71   : > { %12491 = vsyncadd (%p12613_p3), [#allocation4], 4294967168 }
  0x72   : > { %12493 = dma.done.wait (%p12613_p3), [#allocation6], 2176  }
  0x73   : > { %12495 = vsyncadd (%p12613_p3), [#allocation6], 4294965120  ;;  %s14367_s19 = sadd.s32 4294967295, %s12526_s26   ;;  %s345_s17 = sand.u32 1, %s12510_s22  }
  0x74   : > { %s343_s11 = sand.u32 1, %s14367_s19   ;;  %s10428_s7 = sshll.u32 %s345_s17, 13 }
  0x75   : > { %s344_s21 = scalar_lea.sflag [#allocation9], %s343_s11  ;;  %s12732_s18 = scalar_lea.vmem [#allocation8], %s10428_s7 }
  0x76   : > { %p14368_p8 = scmp.ne.s32.totalorder %s14360_s30, 0 }
  0x78   : > { %12497 = dma.done.wait (%p14368_p8), %s344_s21, 131328  }
  0x79   : > { %12499 = vsyncadd (%p14368_p8), %s344_s21, 4294835968  ;;  %s10429_s8 = sshll.u32 %s345_s17, 4  ;;  %s10430_s13 = sshll.u32 %s345_s17, 11 }
  0x7a   : > { %s12738_s29 = scalar_lea.vmem [#allocation10], %s10429_s8  ;;  %s362_s9 = scalar_lea.sflag [#allocation12], %s345_s17 }
  0x7b   : > { %s12740_s1 = scalar_lea.vmem [#allocation11], %s10430_s13 }
  0x7c   : > { %12501 = dma.done.wait (%p14368_p8), %s362_s9, 32768  }
  0x7d   : > { %12503 = vsyncadd (%p14368_p8), %s362_s9, 4294934528  ;;  %v12541_v0 = vmov 0   ;;  %v430_v1 = vld [vmem:[#allocation5 + $0x40] sm:$0xff]  ;;  %v431_v3 = vld [vmem:[#allocation5 + $0x48] sm:$0xff]  ;;  %vm560_vm0 = vcmask 261120   ;;  %p410_p3 = scmp.lt.s32.totalorder %s12518_s24, 1 }
  0x7e   : > { %596 = vmatprep.mubr.bf16.mxu0 %v12541_v0  ;;  %637 = vmatprep.mubr.bf16.mxu1 %v12541_v0  ;;  %v434_v2 = vld [vmem:[#allocation5 + $0x60] sm:$0xff]  ;;  %v435_v5 = vld [vmem:[#allocation5 + $0x68] sm:$0xff]  ;;  %v432_v15 = vld [vmem:[#allocation5 + $0x50] sm:$0xff] }
  0x7f   : > { %v10442_v4 = vcombine.high %v430_v1, %v434_v2  ;;  %v10441_v6 = vcombine.low %v430_v1, %v434_v2  ;;  %v422_v7 = vld [vmem:[#allocation5] sm:$0xff]  ;;  %v10444_v9 = vcombine.high %v431_v3, %v435_v5  ;;  %v10443_v10 = vcombine.low %v431_v3, %v435_v5  ;;  %v423_v12 = vld [vmem:[#allocation5 + $0x8] sm:$0xff]  ;;  %v436_v16 = vld [vmem:[#allocation5 + $0x70] sm:$0xff]  ;;  %s14378_s24 = smov (!%p410_p3, %s12518_s24), 1 }
  0x80   : > { %v426_v8 = vld [vmem:[#allocation5 + $0x20] sm:$0xff]  ;;  %v427_v13 = vld [vmem:[#allocation5 + $0x28] sm:$0xff]  ;;  %v433_v17 = vld [vmem:[#allocation5 + $0x58] sm:$0xff]  ;;  %v10446_v22 = vcombine.high %v432_v15, %v436_v16  ;;  %v10445_v29 = vcombine.low %v432_v15, %v436_v16  ;;  %s11751_s30 = sshll.u32 %s14378_s24, 4 }
  0x81   : > { %v10434_v11 = vcombine.high %v422_v7, %v426_v8  ;;  %576 = vmatprep.subr.bf16.mxu0 %v10442_v4  ;;  %v10436_v14 = vcombine.high %v423_v12, %v427_v13  ;;  %617 = vmatprep.subr.bf16.mxu1 %v10444_v9  ;;  %v10433_v18 = vcombine.low %v422_v7, %v426_v8  ;;  %v420_v19 = vld [vmem:[#allocation3] sm:$0xff]  ;;  %v424_v24 = vld [vmem:[#allocation5 + $0x10] sm:$0xff]  ;;  %v888_v33 = vld [vmem:[%s12732_s18 + $0x380] sm:$0xff]  ;;  %s414_s27 = scalar_lea.vmem %s14354_s6, %s11751_s30 }
  0x82   : > { %577 = vmatpush1.bf16.msra.mxu0 %v10441_v6  ;;  %v437_v20 = vld [vmem:[#allocation5 + $0x78] sm:$0xff]  ;;  %618 = vmatpush1.bf16.msra.mxu1 %v10443_v10  ;;  %v10435_v21 = vcombine.low %v423_v12, %v427_v13  ;;  %v428_v25 = vld [vmem:[#allocation5 + $0x30] sm:$0xff]  ;;  %v421_v26 = vpack.c.bf16 %v420_v19, %v420_v19  ;;  %v896_v34 = vld [vmem:[%s12732_s18 + $0x3c0] sm:$0xff] }
  0x83   : > { %578 = vmatprep.subr.bf16.mxu0 %v10434_v11  ;;  %619 = vmatprep.subr.bf16.mxu1 %v10436_v14  ;;  %v10448_v23 = vcombine.high %v433_v17, %v437_v20  ;;  %v425_v27 = vld [vmem:[#allocation5 + $0x18] sm:$0xff]  ;;  %v10447_v30 = vcombine.low %v433_v17, %v437_v20  ;;  %v10438_v31 = vcombine.high %v424_v24, %v428_v25  ;;  %v1144_v35 = vld [vmem:[%s12732_s18 + $0xb80] sm:$0xff] }
  0x84   : > { %v429_v28 = vld [vmem:[#allocation5 + $0x38] sm:$0xff]  ;;  %v1152_v36 = vld [vmem:[%s12732_s18 + $0xbc0] sm:$0xff]  ;;  %v10437_v37 = vcombine.low %v424_v24, %v428_v25  ;;  %v10578_v39 = vcombine.high %v888_v33, %v896_v34  ;;  %v10577_v45 = vcombine.low %v888_v33, %v896_v34 }
  0x85   : > { %v10440_v32 = vcombine.high %v425_v27, %v429_v28  ;;  %v10439_v38 = vcombine.low %v425_v27, %v429_v28  ;;  %v10834_v40 = vcombine.high %v1144_v35, %v1152_v36  ;;  %v872_v41 = vld [vmem:[%s12732_s18 + $0x300] sm:$0xff]  ;;  %v10833_v46 = vcombine.low %v1144_v35, %v1152_v36 }
  0x86   : > { %579 = vmatpush1.bf16.msra.mxu0 %v10433_v18  ;;  %620 = vmatpush1.bf16.msra.mxu1 %v10435_v21  ;;  %v880_v42 = vld [vmem:[%s12732_s18 + $0x340] sm:$0xff] }
  0x87   : > { %658 = vmatprep.subr.bf16.mxu0 %v10446_v22  ;;  %699 = vmatprep.subr.bf16.mxu1 %v10448_v23  ;;  %v1128_v43 = vld [vmem:[%s12732_s18 + $0xb00] sm:$0xff]  ;;  %v10562_v47 = vcombine.high %v872_v41, %v880_v42  ;;  %v10561_v53 = vcombine.low %v872_v41, %v880_v42 }
  0x88   : > { %v1136_v44 = vld [vmem:[%s12732_s18 + $0xb40] sm:$0xff] }
  0x89   : > { %10449 = vmatmul.mubr.msk.bf16.vlgmr.msra.gmra.mxu0 %vm560_vm0, %v421_v26  ;;  %10450 = vmatmul.mubr.msk.bf16.vlgmr.msra.gmra.mxu1 %vm560_vm0, %v421_v26  ;;  %v10818_v48 = vcombine.high %v1128_v43, %v1136_v44  ;;  %v856_v49 = vld [vmem:[%s12732_s18 + $0x280] sm:$0xff]  ;;  %v10817_v56 = vcombine.low %v1128_v43, %v1136_v44 }
  0x8a   : > { %659 = vmatpush1.bf16.msra.mxu0 %v10445_v29  ;;  %700 = vmatpush1.bf16.msra.mxu1 %v10447_v30  ;;  %v864_v50 = vld [vmem:[%s12732_s18 + $0x2c0] sm:$0xff] }
  0x8b   : > { %660 = vmatprep.subr.bf16.mxu0 %v10438_v31  ;;  %701 = vmatprep.subr.bf16.mxu1 %v10440_v32  ;;  %v1112_v51 = vld [vmem:[%s12732_s18 + $0xa80] sm:$0xff]  ;;  %v10546_v57 = vcombine.high %v856_v49, %v864_v50  ;;  %v10545_v61 = vcombine.low %v856_v49, %v864_v50 }
  0x8c   : > { %678 = vmatprep.mubr.bf16.mxu0 %v12541_v0  ;;  %719 = vmatprep.mubr.bf16.mxu1 %v12541_v0  ;;  %v1120_v52 = vld [vmem:[%s12732_s18 + $0xac0] sm:$0xff] }
  0x8d   : > { %v840_v54 = vld [vmem:[%s12732_s18 + $0x200] sm:$0xff]  ;;  %v10802_v60 = vcombine.high %v1112_v51, %v1120_v52  ;;  %v10801_v0 = vcombine.low %v1112_v51, %v1120_v52 }
  0x8e   : > { %661 = vmatpush1.bf16.msra.mxu0 %v10437_v37  ;;  %702 = vmatpush1.bf16.msra.mxu1 %v10439_v38  ;;  %v848_v55 = vld [vmem:[%s12732_s18 + $0x240] sm:$0xff] }
  0x8f   : > { %7032 = vmatprep.subr.bf16.mxu0 %v10578_v39  ;;  %7073 = vmatprep.subr.bf16.mxu1 %v10834_v40  ;;  %v1096_v58 = vld [vmem:[%s12732_s18 + $0xa00] sm:$0xff]  ;;  %v10530_v1 = vcombine.high %v840_v54, %v848_v55  ;;  %v10529_v5 = vcombine.low %v840_v54, %v848_v55 }
  0x90   : > { %v1104_v59 = vld [vmem:[%s12732_s18 + $0xa40] sm:$0xff] }
  0x91   : > { %10451 = vmatmul.mubr.msk.bf16.vlgmr.msra.gmra.mxu0 %vm560_vm0, %v421_v26  ;;  %10452 = vmatmul.mubr.msk.bf16.vlgmr.msra.gmra.mxu1 %vm560_vm0, %v421_v26  ;;  %v824_v62 = vld [vmem:[%s12732_s18 + $0x180] sm:$0xff]  ;;  %v10786_v4 = vcombine.high %v1096_v58, %v1104_v59  ;;  %v10785_v8 = vcombine.low %v1096_v58, %v1104_v59 }
  0x92   : > { %7033 = vmatpush1.bf16.msra.mxu0 %v10577_v45  ;;  %7074 = vmatpush1.bf16.msra.mxu1 %v10833_v46  ;;  %v832_v63 = vld [vmem:[%s12732_s18 + $0x1c0] sm:$0xff] }
  0x93   : > { %7034 = vmatprep.subr.bf16.mxu0 %v10562_v47  ;;  %7075 = vmatprep.subr.bf16.mxu1 %v10818_v48  ;;  %v1080_v2 = vld [vmem:[%s12732_s18 + $0x980] sm:$0xff]  ;;  %v10514_v9 = vcombine.high %v824_v62, %v832_v63  ;;  %v10513_v13 = vcombine.low %v824_v62, %v832_v63 }
  0x94   : > { %v1088_v3 = vld [vmem:[%s12732_s18 + $0x9c0] sm:$0xff] }
  0x95   : > { %v808_v6 = vld [vmem:[%s12732_s18 + $0x100] sm:$0xff]  ;;  %v10770_v12 = vcombine.high %v1080_v2, %v1088_v3  ;;  %v10769_v16 = vcombine.low %v1080_v2, %v1088_v3 }
  0x96   : > { %7035 = vmatpush1.bf16.msra.mxu0 %v10561_v53  ;;  %7076 = vmatpush1.bf16.msra.mxu1 %v10817_v56  ;;  %v816_v7 = vld [vmem:[%s12732_s18 + $0x140] sm:$0xff] }
  0x97   : > { %7036 = vmatprep.subr.bf16.mxu0 %v10546_v57  ;;  %7077 = vmatprep.subr.bf16.mxu1 %v10802_v60  ;;  %v1064_v10 = vld [vmem:[%s12732_s18 + $0x900] sm:$0xff]  ;;  %v10498_v17 = vcombine.high %v808_v6, %v816_v7  ;;  %v10497_v21 = vcombine.low %v808_v6, %v816_v7 }
  0x98   : > { %v1072_v11 = vld [vmem:[%s12732_s18 + $0x940] sm:$0xff] }
  0x99   : > { %v792_v14 = vld [vmem:[%s12732_s18 + $0x80] sm:$0xff]  ;;  %v10754_v20 = vcombine.high %v1064_v10, %v1072_v11  ;;  %v10753_v24 = vcombine.low %v1064_v10, %v1072_v11 }
  0x9a   : > { %7037 = vmatpush1.bf16.msra.mxu0 %v10545_v61  ;;  %7078 = vmatpush1.bf16.msra.mxu1 %v10801_v0  ;;  %v800_v15 = vld [vmem:[%s12732_s18 + $0xc0] sm:$0xff] }
  0x9b   : > { %7038 = vmatprep.subr.bf16.mxu0 %v10530_v1  ;;  %7079 = vmatprep.subr.bf16.mxu1 %v10786_v4  ;;  %v1048_v18 = vld [vmem:[%s12732_s18 + $0x880] sm:$0xff]  ;;  %v10482_v25 = vcombine.high %v792_v14, %v800_v15  ;;  %v10481_v29 = vcombine.low %v792_v14, %v800_v15 }
  0x9c   : > { %v1056_v19 = vld [vmem:[%s12732_s18 + $0x8c0] sm:$0xff] }
  0x9d   : > { %v776_v22 = vld [vmem:[%s12732_s18] sm:$0xff]  ;;  %v10738_v28 = vcombine.high %v1048_v18, %v1056_v19  ;;  %v10737_v32 = vcombine.low %v1048_v18, %v1056_v19 }
  0x9e   : > { %7039 = vmatpush1.bf16.msra.mxu0 %v10529_v5  ;;  %7080 = vmatpush1.bf16.msra.mxu1 %v10785_v8  ;;  %v784_v23 = vld [vmem:[%s12732_s18 + $0x40] sm:$0xff] }
  0x9f   : > { %7040 = vmatprep.subr.bf16.mxu0 %v10514_v9  ;;  %7081 = vmatprep.subr.bf16.mxu1 %v10770_v12  ;;  %v1032_v26 = vld [vmem:[%s12732_s18 + $0x800] sm:$0xff]  ;;  %v10466_v33 = vcombine.high %v776_v22, %v784_v23  ;;  %v10465_v37 = vcombine.low %v776_v22, %v784_v23 }
  0xa0   : > { %v1040_v27 = vld [vmem:[%s12732_s18 + $0x840] sm:$0xff] }
  0xa1   : > { %v1016_v30 = vld [vmem:[%s12732_s18 + $0x780] sm:$0xff]  ;;  %v10722_v36 = vcombine.high %v1032_v26, %v1040_v27  ;;  %v10721_v40 = vcombine.low %v1032_v26, %v1040_v27 }
  0xa2   : > { %7041 = vmatpush1.bf16.msra.mxu0 %v10513_v13  ;;  %7082 = vmatpush1.bf16.msra.mxu1 %v10769_v16  ;;  %v1024_v31 = vld [vmem:[%s12732_s18 + $0x7c0] sm:$0xff] }
  0xa3   : > { %7042 = vmatprep.subr.bf16.mxu0 %v10498_v17  ;;  %7083 = vmatprep.subr.bf16.mxu1 %v10754_v20  ;;  %v1272_v34 = vld [vmem:[%s12732_s18 + $0xf80] sm:$0xff]  ;;  %v10706_v41 = vcombine.high %v1016_v30, %v1024_v31  ;;  %v10705_v45 = vcombine.low %v1016_v30, %v1024_v31 }
  0xa4   : > { %v1280_v35 = vld [vmem:[%s12732_s18 + $0xfc0] sm:$0xff] }
  0xa5   : > { %v1000_v38 = vld [vmem:[%s12732_s18 + $0x700] sm:$0xff]  ;;  %v10962_v44 = vcombine.high %v1272_v34, %v1280_v35  ;;  %v10961_v48 = vcombine.low %v1272_v34, %v1280_v35 }
  0xa6   : > { %7043 = vmatpush1.bf16.msra.mxu0 %v10497_v21  ;;  %7084 = vmatpush1.bf16.msra.mxu1 %v10753_v24  ;;  %v1008_v39 = vld [vmem:[%s12732_s18 + $0x740] sm:$0xff] }
  0xa7   : > { %7044 = vmatprep.subr.bf16.mxu0 %v10482_v25  ;;  %7085 = vmatprep.subr.bf16.mxu1 %v10738_v28  ;;  %v1256_v42 = vld [vmem:[%s12732_s18 + $0xf00] sm:$0xff]  ;;  %v10690_v49 = vcombine.high %v1000_v38, %v1008_v39  ;;  %v10689_v53 = vcombine.low %v1000_v38, %v1008_v39 }
  0xa8   : > { %v1264_v43 = vld [vmem:[%s12732_s18 + $0xf40] sm:$0xff] }
  0xa9   : > { %v984_v46 = vld [vmem:[%s12732_s18 + $0x680] sm:$0xff]  ;;  %v10946_v52 = vcombine.high %v1256_v42, %v1264_v43  ;;  %v10945_v54 = vcombine.low %v1256_v42, %v1264_v43  ;;  %v440_v43 = vlaneseq }
  0xaa   : > { %7045 = vmatpush1.bf16.msra.mxu0 %v10481_v29  ;;  %7086 = vmatpush1.bf16.msra.mxu1 %v10737_v32  ;;  %v992_v47 = vld [vmem:[%s12732_s18 + $0x6c0] sm:$0xff] }
  0xab   : > { %7046 = vmatprep.subr.bf16.mxu0 %v10466_v33  ;;  %7087 = vmatprep.subr.bf16.mxu1 %v10722_v36  ;;  %v1240_v50 = vld [vmem:[%s12732_s18 + $0xe80] sm:$0xff]  ;;  %v10674_v55 = vcombine.high %v984_v46, %v992_v47  ;;  %v10673_v57 = vcombine.low %v984_v46, %v992_v47  ;;  %v12839_v46 = vld [vmem:[#allocation7] sm:$0xff] }
  0xac   : > { %v1248_v51 = vld [vmem:[%s12732_s18 + $0xec0] sm:$0xff] }
  0xad   : > { %v10930_v56 = vcombine.high %v1240_v50, %v1248_v51  ;;  %v10929_v58 = vcombine.low %v1240_v50, %v1248_v51  ;;  %v968_v59 = vld [vmem:[%s12732_s18 + $0x600] sm:$0xff] }
  0xae   : > { %7047 = vmatpush1.bf16.msra.mxu0 %v10465_v37  ;;  %7088 = vmatpush1.bf16.msra.mxu1 %v10721_v40  ;;  %v976_v60 = vld [vmem:[%s12732_s18 + $0x640] sm:$0xff] }
  0xaf   : > { %7048 = vmatprep.subr.bf16.mxu0 %v10706_v41  ;;  %7089 = vmatprep.subr.bf16.mxu1 %v10962_v44  ;;  %v1224_v61 = vld [vmem:[%s12732_s18 + $0xe00] sm:$0xff]  ;;  %v10658_v62 = vcombine.high %v968_v59, %v976_v60  ;;  %v10657_v0 = vcombine.low %v968_v59, %v976_v60  ;;  %v12834_v44 = vshrl.u32 %v440_v43, 7 }
  0xb0   : > { %v1232_v63 = vld [vmem:[%s12732_s18 + $0xe40] sm:$0xff] }
  0xb1   : > { %v10913_v1 = vcombine.low %v1224_v61, %v1232_v63  ;;  %v10914_v2 = vcombine.high %v1224_v61, %v1232_v63  ;;  %v952_v3 = vld [vmem:[%s12732_s18 + $0x580] sm:$0xff]  ;;  %v12842_v47 = vsub.s32 2, %v12834_v44  ;;  %v12859_v61 = vsub.s32 5, %v12834_v44 }
  0xb2   : > { %7049 = vmatpush2.bf16.msra.mxu0 %v10705_v45  ;;  %7090 = vmatpush2.bf16.msra.mxu1 %v10961_v48  ;;  %v960_v4 = vld [vmem:[%s12732_s18 + $0x5c0] sm:$0xff]  ;;  %v12837_v45 = vsub.s32 0, %v12834_v44  ;;  %v12845_v48 = vsub.s32 1, %v12834_v44 }
  0xb3   : > { %7050 = vmatprep.subr.bf16.mxu0 %v10690_v49  ;;  %7091 = vmatprep.subr.bf16.mxu1 %v10946_v52  ;;  %v1208_v5 = vld [vmem:[%s12732_s18 + $0xd80] sm:$0xff]  ;;  %v10642_v6 = vcombine.high %v952_v3, %v960_v4  ;;  %v10641_v8 = vcombine.low %v952_v3, %v960_v4  ;;  %v12848_v49 = vsub.s32 3, %v12834_v44  ;;  %v451_v51 = vrot.slane %v12839_v46, %v12842_v47 }
  0xb4   : > { %v1216_v7 = vld [vmem:[%s12732_s18 + $0xdc0] sm:$0xff]  ;;  %v443_v50 = vrot.slane %v12839_v46, %v12837_v45  ;;  %v447_v52 = vrot.slane %v12839_v46, %v12845_v48  ;;  %v463_v4 = vrot.slane %v12839_v46, %v12859_v61 }
  0xb5   : > { %v10897_v9 = vcombine.low %v1208_v5, %v1216_v7  ;;  %v10898_v10 = vcombine.high %v1208_v5, %v1216_v7  ;;  %v936_v11 = vld [vmem:[%s12732_s18 + $0x500] sm:$0xff] }
  0xb6   : > { %7051 = vmatpush2.bf16.msra.mxu0 %v10689_v53  ;;  %7092 = vmatpush2.bf16.msra.mxu1 %v10945_v54  ;;  %v944_v12 = vld [vmem:[%s12732_s18 + $0x540] sm:$0xff]  ;;  %v455_v54 = vrot.slane %v12839_v46, %v12848_v49 }
  0xb7   : > { %7052 = vmatprep.subr.bf16.mxu0 %v10674_v55  ;;  %7093 = vmatprep.subr.bf16.mxu1 %v10930_v56  ;;  %v1192_v13 = vld [vmem:[%s12732_s18 + $0xd00] sm:$0xff]  ;;  %v10626_v14 = vcombine.high %v936_v11, %v944_v12  ;;  %v10625_v16 = vcombine.low %v936_v11, %v944_v12 }
  0xb8   : > { %v1200_v15 = vld [vmem:[%s12732_s18 + $0xd40] sm:$0xff] }
  0xb9   : > { %v10881_v17 = vcombine.low %v1192_v13, %v1200_v15  ;;  %v10882_v18 = vcombine.high %v1192_v13, %v1200_v15  ;;  %v920_v19 = vld [vmem:[%s12732_s18 + $0x480] sm:$0xff] }
  0xba   : > { %7053 = vmatpush2.bf16.msra.mxu0 %v10673_v57  ;;  %7094 = vmatpush2.bf16.msra.mxu1 %v10929_v58  ;;  %v928_v20 = vld [vmem:[%s12732_s18 + $0x4c0] sm:$0xff] }
  0xbb   : > { %7054 = vmatprep.subr.bf16.mxu0 %v10658_v62  ;;  %7095 = vmatprep.subr.bf16.mxu1 %v10914_v2  ;;  %v1176_v21 = vld [vmem:[%s12732_s18 + $0xc80] sm:$0xff]  ;;  %v10610_v22 = vcombine.high %v920_v19, %v928_v20  ;;  %v10609_v24 = vcombine.low %v920_v19, %v928_v20 }
  0xbc   : > { %v1184_v23 = vld [vmem:[%s12732_s18 + $0xcc0] sm:$0xff] }
  0xbd   : > { %v10865_v25 = vcombine.low %v1176_v21, %v1184_v23  ;;  %v10866_v26 = vcombine.high %v1176_v21, %v1184_v23  ;;  %v904_v27 = vld [vmem:[%s12732_s18 + $0x400] sm:$0xff] }
  0xbe   : > { %7055 = vmatpush2.bf16.msra.mxu0 %v10657_v0  ;;  %7096 = vmatpush2.bf16.msra.mxu1 %v10913_v1  ;;  %v912_v28 = vld [vmem:[%s12732_s18 + $0x440] sm:$0xff]  ;;  %v12862_v0 = vsub.s32 7, %v12834_v44 }
  0xbf   : > { %7056 = vmatprep.subr.bf16.mxu0 %v10642_v6  ;;  %7097 = vmatprep.subr.bf16.mxu1 %v10898_v10  ;;  %v1160_v29 = vld [vmem:[%s12732_s18 + $0xc00] sm:$0xff]  ;;  %v10594_v30 = vcombine.high %v904_v27, %v912_v28  ;;  %v10593_v32 = vcombine.low %v904_v27, %v912_v28 }
  0xc0   : > { %v1168_v31 = vld [vmem:[%s12732_s18 + $0xc40] sm:$0xff]  ;;  %v471_v6 = vrot.slane %v12839_v46, %v12862_v0 }
  0xc1   : > { %v10849_v33 = vcombine.low %v1160_v29, %v1168_v31  ;;  %v10850_v34 = vcombine.high %v1160_v29, %v1168_v31  ;;  %v12815_v35 = vld [vmem:[%s12732_s18 + $0x1380] sm:$0xff] }
  0xc2   : > { %7057 = vmatpush2.bf16.msra.mxu0 %v10641_v8  ;;  %7098 = vmatpush2.bf16.msra.mxu1 %v10897_v9  ;;  %v12818_v36 = vld [vmem:[%s12732_s18 + $0x13c0] sm:$0xff] }
  0xc3   : > { %7058 = vmatprep.subr.bf16.mxu0 %v10626_v14  ;;  %7099 = vmatprep.subr.bf16.mxu1 %v10882_v18  ;;  %v12821_v37 = vld [vmem:[%s12732_s18 + $0x1b80] sm:$0xff]  ;;  %v11090_v38 = vcombine.high %v12815_v35, %v12818_v36  ;;  %v11089_v40 = vcombine.low %v12815_v35, %v12818_v36 }
  0xc4   : > { %v12826_v39 = vld [vmem:[%s12732_s18 + $0x1bc0] sm:$0xff] }
  0xc5   : > { %v11345_v41 = vcombine.low %v12821_v37, %v12826_v39  ;;  %v11346_v42 = vcombine.high %v12821_v37, %v12826_v39  ;;  %v1384_v18 = vld [vmem:[%s12732_s18 + $0x1300] sm:$0xff] }
  0xc6   : > { %7059 = vmatpush2.bf16.msra.mxu0 %v10625_v16  ;;  %7100 = vmatpush2.bf16.msra.mxu1 %v10881_v17  ;;  %v1392_v19 = vld [vmem:[%s12732_s18 + $0x1340] sm:$0xff] }
  0xc7   : > { %7060 = vmatprep.subr.bf16.mxu0 %v10610_v22  ;;  %7101 = vmatprep.subr.bf16.mxu1 %v10866_v26  ;;  %v1640_v21 = vld [vmem:[%s12732_s18 + $0x1b00] sm:$0xff]  ;;  %v11074_v27 = vcombine.high %v1384_v18, %v1392_v19 }
  0xc8   : > { %v1648_v22 = vld [vmem:[%s12732_s18 + $0x1b40] sm:$0xff] }
  0xc9   : > { %v11330_v29 = vcombine.high %v1640_v21, %v1648_v22  ;;  %v1376_v31 = vld [vmem:[%s12732_s18 + $0x12c0] sm:$0xff] }
  0xca   : > { %7061 = vmatpush2.bf16.msra.mxu0 %v10609_v24  ;;  %7102 = vmatpush2.bf16.msra.mxu1 %v10865_v25 }
  0xcb   : > { %7062 = vmatprep.subr.bf16.mxu0 %v10594_v30  ;;  %7103 = vmatprep.subr.bf16.mxu1 %v10850_v34  ;;  %v1368_v30 = vld [vmem:[%s12732_s18 + $0x1280] sm:$0xff]  ;;  %v11073_v34 = vcombine.low %v1384_v18, %v1392_v19 }
  0xcc   : > { %v11057_v36 = vcombine.low %v1368_v30, %v1376_v31 }
  0xce   : > { %7063 = vmatpush2.bf16.msra.mxu0 %v10593_v32  ;;  %7104 = vmatpush2.bf16.msra.mxu1 %v10849_v33  ;;  %v1624_v32 = vld [vmem:[%s12732_s18 + $0x1a80] sm:$0xff] }
  0xcf   : > { %7114 = vmatprep.subr.bf16.mxu0 %v11090_v38  ;;  %7155 = vmatprep.subr.bf16.mxu1 %v11346_v42  ;;  %v1632_v33 = vld [vmem:[%s12732_s18 + $0x1ac0] sm:$0xff]  ;;  %v11329_v38 = vcombine.low %v1640_v21, %v1648_v22  ;;  %v11058_v42 = vcombine.high %v1368_v30, %v1376_v31 }
  0xd0   : > { %v11314_v43 = vcombine.high %v1624_v32, %v1632_v33  ;;  %v11313_v37 = vcombine.low %v1624_v32, %v1632_v33  ;;  %v1296_v21 = vld [vmem:[%s12732_s18 + $0x1040] sm:$0xff] }
  0xd1   : > { %v1544_v22 = vld [vmem:[%s12732_s18 + $0x1800] sm:$0xff] }
  0xd2   : > { %v1528_v32 = vld [vmem:[%s12732_s18 + $0x1780] sm:$0xff] }
  0xd3   : > { %v1536_v33 = vld [vmem:[%s12732_s18 + $0x17c0] sm:$0xff] }
 0x149   : > { %v598_v53 = vpop.f32.mrf.mxu0  ;;  %v639_v56 = vpop.f32.mrf.mxu1 }
 0x14a   : > { %v599_v55 = vadd.f32 %v598_v53, %v443_v50  ;;  %v640_v57 = vadd.f32 %v639_v56, %v451_v51  ;;  %v1352_v50 = vld [vmem:[%s12732_s18 + $0x1200] sm:$0xff] }
 0x14b   : > { %v600_v58 = vpop.f32.mrf.mxu0  ;;  %v641_v60 = vpop.f32.mrf.mxu1  ;;  %v1360_v51 = vld [vmem:[%s12732_s18 + $0x1240] sm:$0xff] }
 0x14c   : > { %12252 = vtanh.f32 %v599_v55  ;;  %v601_v59 = vadd.f32 %v600_v58, %v447_v52  ;;  %v642_v62 = vadd.f32 %v641_v60, %v455_v54  ;;  %v1608_v53 = vld [vmem:[%s12732_s18 + $0x1a00] sm:$0xff]  ;;  %v11042_v39 = vcombine.high %v1352_v50, %v1360_v51 }
 0x14d   : > { %12254 = vtanh.f32 %v640_v57  ;;  %v602_v63 = vpop.f32.mrf.mxu0  ;;  %v643_v1 = vpop.f32.mrf.mxu1  ;;  %v1616_v54 = vld [vmem:[%s12732_s18 + $0x1a40] sm:$0xff]  ;;  %v11041_v60 = vcombine.low %v1352_v50, %v1360_v51  ;;  %v11218_v50 = vcombine.high %v1528_v32, %v1536_v33 }
 0x14e   : > { %12256 = vtanh.f32 %v601_v59  ;;  %v11298_v55 = vcombine.high %v1608_v53, %v1616_v54  ;;  %v1336_v56 = vld [vmem:[%s12732_s18 + $0x1180] sm:$0xff] }
 0x14f   : > { %12258 = vtanh.f32 %v642_v62  ;;  %v603_v2 = vpop.f32.mrf.mxu0  ;;  %v644_v3 = vpop.f32.mrf.mxu1  ;;  %v1344_v57 = vld [vmem:[%s12732_s18 + $0x11c0] sm:$0xff]  ;;  %v11297_v62 = vcombine.low %v1608_v53, %v1616_v54 }
 0x150   : > { %v1592_v58 = vld [vmem:[%s12732_s18 + $0x1980] sm:$0xff]  ;;  %v11026_v63 = vcombine.high %v1336_v56, %v1344_v57 }
 0x151   : > { %v12866_v5 = vpop.f32.mrf.mxu0  ;;  %v12870_v7 = vpop.f32.mrf.mxu1  ;;  %v1600_v59 = vld [vmem:[%s12732_s18 + $0x19c0] sm:$0xff] }
 0x152   : > { %v11282_v1 = vcombine.high %v1592_v58, %v1600_v59  ;;  %v1320_v2 = vld [vmem:[%s12732_s18 + $0x1100] sm:$0xff] }
 0x153   : > { %v682_v8 = vpop.f32.mrf.mxu0  ;;  %v723_v10 = vpop.f32.mrf.mxu1  ;;  %v1328_v3 = vld [vmem:[%s12732_s18 + $0x1140] sm:$0xff] }
 0x154   : > { %v683_v9 = vadd.f32 %v682_v8, %v463_v4  ;;  %v724_v11 = vadd.f32 %v723_v10, %v471_v6  ;;  %v1576_v4 = vld [vmem:[%s12732_s18 + $0x1900] sm:$0xff]  ;;  %v11025_v8 = vcombine.low %v1336_v56, %v1344_v57  ;;  %v11010_v10 = vcombine.high %v1320_v2, %v1328_v3 }
 0x155   : > { %v684_v12 = vpop.f32.mrf.mxu0  ;;  %v725_v13 = vpop.f32.mrf.mxu1  ;;  %v1584_v6 = vld [vmem:[%s12732_s18 + $0x1940] sm:$0xff] }
 0x156   : > { %12260 = vtanh.f32 %v683_v9  ;;  %v11281_v9 = vcombine.low %v1592_v58, %v1600_v59  ;;  %v1304_v12 = vld [vmem:[%s12732_s18 + $0x1080] sm:$0xff] }
 0x157   : > { %12262 = vtanh.f32 %v724_v11  ;;  %v685_v14 = vpop.f32.mrf.mxu0  ;;  %v726_v15 = vpop.f32.mrf.mxu1  ;;  %v11266_v11 = vcombine.high %v1576_v4, %v1584_v6  ;;  %v1312_v13 = vld [vmem:[%s12732_s18 + $0x10c0] sm:$0xff] }
 0x158   : > { %v1560_v14 = vld [vmem:[%s12732_s18 + $0x1880] sm:$0xff]  ;;  %v10994_v18 = vcombine.high %v1304_v12, %v1312_v13 }
 0x159   : > { %v12253_v16 = vpop.eup %12252  ;;  %v1568_v15 = vld [vmem:[%s12732_s18 + $0x18c0] sm:$0xff] }
 0x15a   : > { %v12255_v17 = vpop.eup %12254  ;;  %v12878_v25 = vpack.c.bf16 %v12253_v16, %v12253_v16  ;;  %v11009_v16 = vcombine.low %v1320_v2, %v1328_v3  ;;  %v11250_v19 = vcombine.high %v1560_v14, %v1568_v15  ;;  %v1520_v53 = vld [vmem:[%s12732_s18 + $0x1740] sm:$0xff] }
 0x15b   : > { %v12257_v20 = vpop.eup %12256  ;;  %v12882_v28 = vpack.c.bf16 %v12255_v17, %v12255_v17  ;;  %v11265_v17 = vcombine.low %v1576_v4, %v1584_v6  ;;  %v1768_v54 = vld [vmem:[%s12732_s18 + $0x1f00] sm:$0xff] }
 0x15c   : > { %v12259_v23 = vpop.eup %12258  ;;  %v12876_v24 = vpack.c.bf16 %v12257_v20, %v12257_v20  ;;  %v1288_v20 = vld [vmem:[%s12732_s18 + $0x1000] sm:$0xff] }
 0x15d   : > { %v12880_v26 = vpack.c.bf16 %v12259_v23, %v12259_v23  ;;  %v1552_v23 = vld [vmem:[%s12732_s18 + $0x1840] sm:$0xff]  ;;  %v10978_v30 = vcombine.high %v1288_v20, %v1296_v21 }
 0x15e   : > { %7064 = vmatprep.mubr.bf16.mxu0 %v12876_v24  ;;  %v11234_v31 = vcombine.high %v1544_v22, %v1552_v23  ;;  %v1496_v56 = vld [vmem:[%s12732_s18 + $0x1680] sm:$0xff] }
 0x15f   : > { %7105 = vmatprep.mubr.bf16.mxu1 %v12880_v26  ;;  %7065 = vmatmul.mubr.bf16.vlgmr.msra.gmra.mxu0 %v12878_v25  ;;  %v1504_v57 = vld [vmem:[%s12732_s18 + $0x16c0] sm:$0xff] }
 0x160   : > { %7106 = vmatmul.mubr.bf16.vlgmr.msra.gmra.mxu1 %v12882_v28  ;;  %7115 = vmatpush1.bf16.msra.mxu0 %v11089_v40  ;;  %v1752_v58 = vld [vmem:[%s12732_s18 + $0x1e80] sm:$0xff]  ;;  %v11186_v2 = vcombine.high %v1496_v56, %v1504_v57 }
 0x161   : > { %7156 = vmatpush1.bf16.msra.mxu1 %v11345_v41  ;;  %7116 = vmatprep.subr.bf16.mxu0 %v11074_v27  ;;  %v10993_v27 = vcombine.low %v1304_v12, %v1312_v13  ;;  %v1760_v59 = vld [vmem:[%s12732_s18 + $0x1ec0] sm:$0xff] }
 0x162   : > { %7157 = vmatprep.subr.bf16.mxu1 %v11330_v29  ;;  %v11249_v29 = vcombine.low %v1560_v14, %v1568_v15  ;;  %v11442_v3 = vcombine.high %v1752_v58, %v1760_v59  ;;  %v1480_v4 = vld [vmem:[%s12732_s18 + $0x1600] sm:$0xff]  ;;  %v11441_v12 = vcombine.low %v1752_v58, %v1760_v59  ;;  %v889_v58 = vld [vmem:[%s12732_s18 + $0x388] sm:$0xff] }
 0x163   : > { %v12261_v52 = vpop.eup %12260  ;;  %v1488_v6 = vld [vmem:[%s12732_s18 + $0x1640] sm:$0xff]  ;;  %v897_v59 = vld [vmem:[%s12732_s18 + $0x3c8] sm:$0xff] }
 0x164   : > { %v12263_v35 = vpop.eup %12262  ;;  %7117 = vmatpush1.bf16.msra.mxu0 %v11073_v34  ;;  %v12902_v40 = vpack.c.bf16 %v12261_v52, %v12261_v52  ;;  %v1784_v34 = vld [vmem:[%s12732_s18 + $0x1f80] sm:$0xff]  ;;  %v11170_v13 = vcombine.high %v1480_v4, %v1488_v6 }
 0x165   : > { %7158 = vmatpush1.bf16.msra.mxu1 %v11329_v38  ;;  %7118 = vmatprep.subr.bf16.mxu0 %v11058_v42  ;;  %v12904_v41 = vpack.c.bf16 %v12263_v35, %v12263_v35  ;;  %v1792_v38 = vld [vmem:[%s12732_s18 + $0x1fc0] sm:$0xff]  ;;  %v10977_v42 = vcombine.low %v1288_v20, %v1296_v21  ;;  %v11169_v20 = vcombine.low %v1480_v4, %v1488_v6 }
 0x166   : > { %7159 = vmatprep.subr.bf16.mxu1 %v11314_v43  ;;  %7146 = vmatprep.mubr.bf16.mxu0 %v12902_v40  ;;  %v11233_v43 = vcombine.low %v1544_v22, %v1552_v23  ;;  %v11474_v51 = vcombine.high %v1784_v34, %v1792_v38  ;;  %v1512_v52 = vld [vmem:[%s12732_s18 + $0x1700] sm:$0xff]  ;;  %v10580_v6 = vcombine.high %v889_v58, %v897_v59 }
 0x167   : > { %7187 = vmatprep.mubr.bf16.mxu1 %v12904_v41  ;;  %v1776_v35 = vld [vmem:[%s12732_s18 + $0x1f40] sm:$0xff] }
 0x168   : > { %7119 = vmatpush1.bf16.msra.mxu0 %v11057_v36  ;;  %v11217_v36 = vcombine.low %v1528_v32, %v1536_v33  ;;  %v1464_v15 = vld [vmem:[%s12732_s18 + $0x1580] sm:$0xff] }
 0x169   : > { %7160 = vmatpush1.bf16.msra.mxu1 %v11313_v37  ;;  %7120 = vmatprep.subr.bf16.mxu0 %v11042_v39  ;;  %v11473_v37 = vcombine.low %v1784_v34, %v1792_v38  ;;  %v11202_v39 = vcombine.high %v1512_v52, %v1520_v53  ;;  %v1432_v34 = vld [vmem:[%s12732_s18 + $0x1480] sm:$0xff] }
 0x16a   : > { %7161 = vmatprep.subr.bf16.mxu1 %v11298_v55  ;;  %v11458_v55 = vcombine.high %v1768_v54, %v1776_v35  ;;  %v1440_v38 = vld [vmem:[%s12732_s18 + $0x14c0] sm:$0xff] }
 0x16c   : > { %7121 = vmatpush1.bf16.msra.mxu0 %v11041_v60  ;;  %v11201_v60 = vcombine.low %v1512_v52, %v1520_v53  ;;  %v11122_v52 = vcombine.high %v1432_v34, %v1440_v38 }
 0x16d   : > { %7162 = vmatpush1.bf16.msra.mxu1 %v11297_v62  ;;  %7122 = vmatprep.subr.bf16.mxu0 %v11026_v63  ;;  %v12937_v62 = vsub.s32 6, %v12834_v44  ;;  %v11457_v63 = vcombine.low %v1768_v54, %v1776_v35  ;;  %v1416_v54 = vld [vmem:[%s12732_s18 + $0x1400] sm:$0xff] }
 0x16e   : > { %7163 = vmatprep.subr.bf16.mxu1 %v11282_v1  ;;  %v12940_v1 = vsub.s32 4, %v12834_v44  ;;  %v1424_v35 = vld [vmem:[%s12732_s18 + $0x1440] sm:$0xff] }
 0x170   : > { %7123 = vmatpush1.bf16.msra.mxu0 %v11025_v8  ;;  %v1736_v8 = vld [vmem:[%s12732_s18 + $0x1e00] sm:$0xff]  ;;  %v459_v44 = vrot.slane %v12839_v46, %v12940_v1 }
 0x171   : > { %7164 = vmatpush1.bf16.msra.mxu1 %v11281_v9  ;;  %7124 = vmatprep.subr.bf16.mxu0 %v11010_v10  ;;  %v1744_v9 = vld [vmem:[%s12732_s18 + $0x1e40] sm:$0xff]  ;;  %v467_v10 = vrot.slane %v12839_v46, %v12937_v62 }
 0x172   : > { %7165 = vmatprep.subr.bf16.mxu1 %v11266_v11  ;;  %v11185_v11 = vcombine.low %v1496_v56, %v1504_v57  ;;  %v11426_v14 = vcombine.high %v1736_v8, %v1744_v9  ;;  %v681_v46 = vadd.f32 %v12866_v5, %v459_v44  ;;  %v11425_v21 = vcombine.low %v1736_v8, %v1744_v9 }
 0x173   : > { %v11106_v56 = vcombine.high %v1416_v54, %v1424_v35 }
 0x174   : > { %7125 = vmatpush1.bf16.msra.mxu0 %v11009_v16  ;;  %v1472_v16 = vld [vmem:[%s12732_s18 + $0x15c0] sm:$0xff] }
 0x175   : > { %7166 = vmatpush1.bf16.msra.mxu1 %v11265_v17  ;;  %7126 = vmatprep.subr.bf16.mxu0 %v10994_v18  ;;  %v1720_v17 = vld [vmem:[%s12732_s18 + $0x1d80] sm:$0xff]  ;;  %v11154_v22 = vcombine.high %v1464_v15, %v1472_v16 }
 0x176   : > { %7167 = vmatprep.subr.bf16.mxu1 %v11250_v19  ;;  %v1728_v18 = vld [vmem:[%s12732_s18 + $0x1dc0] sm:$0xff]  ;;  %v722_v19 = vadd.f32 %v12870_v7, %v467_v10  ;;  %v11153_v7 = vcombine.low %v1464_v15, %v1472_v16  ;;  %v873_v10 = vld [vmem:[%s12732_s18 + $0x308] sm:$0xff] }
 0x177   : > { %v11410_v23 = vcombine.high %v1720_v17, %v1728_v18  ;;  %v11409_v5 = vcombine.low %v1720_v17, %v1728_v18  ;;  %v857_v18 = vld [vmem:[%s12732_s18 + $0x288] sm:$0xff] }
 0x178   : > { %7127 = vmatpush1.bf16.msra.mxu0 %v10993_v27  ;;  %v1448_v27 = vld [vmem:[%s12732_s18 + $0x1500] sm:$0xff]  ;;  %12264 = vtanh.f32 %v722_v19  ;;  %v865_v19 = vld [vmem:[%s12732_s18 + $0x2c8] sm:$0xff] }
 0x179   : > { %7168 = vmatpush1.bf16.msra.mxu1 %v11249_v29  ;;  %7128 = vmatprep.subr.bf16.mxu0 %v10978_v30  ;;  %v1456_v29 = vld [vmem:[%s12732_s18 + $0x1540] sm:$0xff]  ;;  %12266 = vtanh.f32 %v681_v46  ;;  %v1113_v46 = vld [vmem:[%s12732_s18 + $0xa88] sm:$0xff] }
 0x17a   : > { %7169 = vmatprep.subr.bf16.mxu1 %v11234_v31  ;;  %v1704_v30 = vld [vmem:[%s12732_s18 + $0x1d00] sm:$0xff]  ;;  %v11138_v32 = vcombine.high %v1448_v27, %v1456_v29 }
 0x17b   : > { %v1712_v31 = vld [vmem:[%s12732_s18 + $0x1d40] sm:$0xff] }
 0x17c   : > { %7129 = vmatpush1.bf16.msra.mxu0 %v10977_v42  ;;  %v11394_v33 = vcombine.high %v1704_v30, %v1712_v31  ;;  %v1688_v42 = vld [vmem:[%s12732_s18 + $0x1c80] sm:$0xff] }
 0x17d   : > { %7170 = vmatpush1.bf16.msra.mxu1 %v11233_v43  ;;  %7130 = vmatprep.subr.bf16.mxu0 %v11218_v50  ;;  %v1696_v43 = vld [vmem:[%s12732_s18 + $0x1cc0] sm:$0xff]  ;;  %v11137_v50 = vcombine.low %v1448_v27, %v1456_v29  ;;  %v10548_v27 = vcombine.high %v857_v18, %v865_v19 }
 0x17e   : > { %7171 = vmatprep.subr.bf16.mxu1 %v11474_v51  ;;  %v11393_v51 = vcombine.low %v1704_v30, %v1712_v31  ;;  %v11378_v53 = vcombine.high %v1688_v42, %v1696_v43  ;;  %v841_v30 = vld [vmem:[%s12732_s18 + $0x208] sm:$0xff] }
 0x17f   : > { %v849_v31 = vld [vmem:[%s12732_s18 + $0x248] sm:$0xff] }
 0x180   : > { %7131 = vmatpush2.bf16.msra.mxu0 %v11217_v36  ;;  %v1672_v36 = vld [vmem:[%s12732_s18 + $0x1c00] sm:$0xff] }
 0x181   : > { %7172 = vmatpush2.bf16.msra.mxu1 %v11473_v37  ;;  %7132 = vmatprep.subr.bf16.mxu0 %v11202_v39  ;;  %v1680_v37 = vld [vmem:[%s12732_s18 + $0x1c40] sm:$0xff]  ;;  %v11121_v39 = vcombine.low %v1432_v34, %v1440_v38  ;;  %v10532_v34 = vcombine.high %v841_v30, %v849_v31 }
 0x182   : > { %7173 = vmatprep.subr.bf16.mxu1 %v11458_v55  ;;  %v11377_v55 = vcombine.low %v1688_v42, %v1696_v43  ;;  %v11362_v57 = vcombine.high %v1672_v36, %v1680_v37  ;;  %v11361_v4 = vcombine.low %v1672_v36, %v1680_v37  ;;  %v825_v42 = vld [vmem:[%s12732_s18 + $0x188] sm:$0xff] }
 0x183   : > { %v833_v43 = vld [vmem:[%s12732_s18 + $0x1c8] sm:$0xff] }
 0x184   : > { %7133 = vmatpush2.bf16.msra.mxu0 %v11201_v60  ;;  %v1145_v60 = vld [vmem:[%s12732_s18 + $0xb88] sm:$0xff] }
 0x185   : > { %7174 = vmatpush2.bf16.msra.mxu1 %v11457_v63  ;;  %7134 = vmatprep.subr.bf16.mxu0 %v11186_v2  ;;  %v1153_v63 = vld [vmem:[%s12732_s18 + $0xbc8] sm:$0xff]  ;;  %v11105_v2 = vcombine.low %v1416_v54, %v1424_v35  ;;  %v10516_v54 = vcombine.high %v825_v42, %v833_v43 }
 0x186   : > { %7175 = vmatprep.subr.bf16.mxu1 %v11442_v3  ;;  %v12265_v3 = vpop.eup %12264  ;;  %v10836_v9 = vcombine.high %v1145_v60, %v1153_v63  ;;  %v10835_v16 = vcombine.low %v1145_v60, %v1153_v63  ;;  %v809_v36 = vld [vmem:[%s12732_s18 + $0x108] sm:$0xff] }
 0x187   : > { %v12267_v8 = vpop.eup %12266  ;;  %v12974_v44 = vpack.c.bf16 %v12265_v3, %v12265_v3  ;;  %v817_v37 = vld [vmem:[%s12732_s18 + $0x148] sm:$0xff] }
 0x188   : > { %7135 = vmatpush2.bf16.msra.mxu0 %v11185_v11  ;;  %v881_v11 = vld [vmem:[%s12732_s18 + $0x348] sm:$0xff]  ;;  %v12978_v15 = vpack.c.bf16 %v12267_v8, %v12267_v8 }
 0x189   : > { %7176 = vmatpush2.bf16.msra.mxu1 %v11441_v12  ;;  %7136 = vmatprep.subr.bf16.mxu0 %v11170_v13  ;;  %v10579_v12 = vcombine.low %v889_v58, %v897_v59  ;;  %v1129_v13 = vld [vmem:[%s12732_s18 + $0xb08] sm:$0xff]  ;;  %v10564_v17 = vcombine.high %v873_v10, %v881_v11  ;;  %v10500_v58 = vcombine.high %v809_v36, %v817_v37 }
 0x18a   : > { %7177 = vmatprep.subr.bf16.mxu1 %v11426_v14  ;;  %v1137_v14 = vld [vmem:[%s12732_s18 + $0xb48] sm:$0xff] }
 0x18b   : > { %v793_v60 = vld [vmem:[%s12732_s18 + $0x88] sm:$0xff] }
 0x18c   : > { %7137 = vmatpush2.bf16.msra.mxu0 %v11169_v20  ;;  %v10820_v20 = vcombine.high %v1129_v13, %v1137_v14  ;;  %v801_v63 = vld [vmem:[%s12732_s18 + $0xc8] sm:$0xff] }
 0x18d   : > { %7178 = vmatpush2.bf16.msra.mxu1 %v11425_v21  ;;  %7138 = vmatprep.subr.bf16.mxu0 %v11154_v22  ;;  %v1121_v21 = vld [vmem:[%s12732_s18 + $0xac8] sm:$0xff]  ;;  %v10563_v22 = vcombine.low %v873_v10, %v881_v11  ;;  %v10484_v8 = vcombine.high %v793_v60, %v801_v63 }
 0x18e   : > { %7179 = vmatprep.subr.bf16.mxu1 %v11410_v23  ;;  %v10819_v23 = vcombine.low %v1129_v13, %v1137_v14  ;;  %v10804_v29 = vcombine.high %v1113_v46, %v1121_v21  ;;  %v1057_v3 = vld [vmem:[%s12732_s18 + $0x8c8] sm:$0xff]  ;;  %v10483_v14 = vcombine.low %v793_v60, %v801_v63 }
 0x18f   : > { %v777_v10 = vld [vmem:[%s12732_s18 + $0x8] sm:$0xff] }
 0x190   : > { %7139 = vmatpush2.bf16.msra.mxu0 %v11153_v7  ;;  %v1097_v7 = vld [vmem:[%s12732_s18 + $0xa08] sm:$0xff] }
 0x191   : > { %7180 = vmatpush2.bf16.msra.mxu1 %v11409_v5  ;;  %7140 = vmatprep.subr.bf16.mxu0 %v11138_v32  ;;  %v1105_v5 = vld [vmem:[%s12732_s18 + $0xa48] sm:$0xff]  ;;  %v10547_v32 = vcombine.low %v857_v18, %v865_v19 }
 0x192   : > { %7181 = vmatprep.subr.bf16.mxu1 %v11394_v33  ;;  %v10803_v33 = vcombine.low %v1113_v46, %v1121_v21  ;;  %v10788_v38 = vcombine.high %v1097_v7, %v1105_v5  ;;  %v785_v11 = vld [vmem:[%s12732_s18 + $0x48] sm:$0xff] }
 0x193   : > { %v1041_v13 = vld [vmem:[%s12732_s18 + $0x848] sm:$0xff] }
 0x194   : > { %7141 = vmatpush2.bf16.msra.mxu0 %v11137_v50  ;;  %v1081_v50 = vld [vmem:[%s12732_s18 + $0x988] sm:$0xff] }
 0x195   : > { %7182 = vmatpush2.bf16.msra.mxu1 %v11393_v51  ;;  %7142 = vmatprep.subr.bf16.mxu0 %v11122_v52  ;;  %v1089_v51 = vld [vmem:[%s12732_s18 + $0x9c8] sm:$0xff]  ;;  %v10531_v52 = vcombine.low %v841_v30, %v849_v31 }
 0x196   : > { %7183 = vmatprep.subr.bf16.mxu1 %v11378_v53  ;;  %v10787_v53 = vcombine.low %v1097_v7, %v1105_v5  ;;  %v10772_v35 = vcombine.high %v1081_v50, %v1089_v51  ;;  %v1017_v19 = vld [vmem:[%s12732_s18 + $0x788] sm:$0xff] }
 0x197   : > { %v1273_v46 = vld [vmem:[%s12732_s18 + $0xf88] sm:$0xff] }
 0x198   : > { %7143 = vmatpush2.bf16.msra.mxu0 %v11121_v39  ;;  %v1065_v39 = vld [vmem:[%s12732_s18 + $0x908] sm:$0xff] }
 0x199   : > { %7184 = vmatpush2.bf16.msra.mxu1 %v11377_v55  ;;  %7144 = vmatprep.subr.bf16.mxu0 %v11106_v56  ;;  %v1073_v55 = vld [vmem:[%s12732_s18 + $0x948] sm:$0xff]  ;;  %v10515_v56 = vcombine.low %v825_v42, %v833_v43 }
 0x19a   : > { %7185 = vmatprep.subr.bf16.mxu1 %v11362_v57  ;;  %v10771_v57 = vcombine.low %v1081_v50, %v1089_v51  ;;  %v10756_v59 = vcombine.high %v1065_v39, %v1073_v55  ;;  %v1281_v21 = vld [vmem:[%s12732_s18 + $0xfc8] sm:$0xff] }
 0x19b   : > { %v1001_v30 = vld [vmem:[%s12732_s18 + $0x708] sm:$0xff] }
 0x19c   : > { %7145 = vmatpush2.bf16.msra.mxu0 %v11105_v2  ;;  %v1049_v2 = vld [vmem:[%s12732_s18 + $0x888] sm:$0xff] }
 0x19d   : > { %7186 = vmatpush2.bf16.msra.mxu1 %v11361_v4  ;;  %7196 = vmatprep.subr.bf16.mxu0 %v10580_v6  ;;  %v10499_v4 = vcombine.low %v809_v36, %v817_v37  ;;  %v10755_v6 = vcombine.low %v1065_v39, %v1073_v55  ;;  %v1009_v31 = vld [vmem:[%s12732_s18 + $0x748] sm:$0xff] }
 0x19e   : > { %7237 = vmatprep.subr.bf16.mxu1 %v10836_v9  ;;  %v10740_v9 = vcombine.high %v1049_v2, %v1057_v3  ;;  %v1257_v7 = vld [vmem:[%s12732_s18 + $0xf08] sm:$0xff] }
 0x19f   : > { %7147 = vmatmul.mubr.bf16.vlgmr.msra.gmra.mxu0 %v12978_v15  ;;  %v1265_v5 = vld [vmem:[%s12732_s18 + $0xf48] sm:$0xff] }
 0x1a0   : > { %7188 = vmatmul.mubr.bf16.vlgmr.msra.gmra.mxu1 %v12974_v44  ;;  %7197 = vmatpush1.bf16.msra.mxu0 %v10579_v12  ;;  %v1033_v12 = vld [vmem:[%s12732_s18 + $0x808] sm:$0xff] }
 0x1a1   : > { %7228 = vmatprep.mubr.bf16.mxu0 %v12876_v24  ;;  %7238 = vmatpush1.bf16.msra.mxu1 %v10835_v16  ;;  %v10739_v16 = vcombine.low %v1049_v2, %v1057_v3  ;;  %v10724_v18 = vcombine.high %v1033_v12, %v1041_v13  ;;  %v985_v42 = vld [vmem:[%s12732_s18 + $0x688] sm:$0xff] }
 0x1a2   : > { %7269 = vmatprep.mubr.bf16.mxu1 %v12880_v26  ;;  %7198 = vmatprep.subr.bf16.mxu0 %v10564_v17  ;;  %v10468_v17 = vcombine.high %v777_v10, %v785_v11  ;;  %v993_v43 = vld [vmem:[%s12732_s18 + $0x6c8] sm:$0xff] }
 0x1a3   : > { %7239 = vmatprep.subr.bf16.mxu1 %v10820_v20  ;;  %v1025_v20 = vld [vmem:[%s12732_s18 + $0x7c8] sm:$0xff] }
 0x1a4   : > { %7199 = vmatpush1.bf16.msra.mxu0 %v10563_v22  ;;  %v10467_v22 = vcombine.low %v777_v10, %v785_v11  ;;  %v1241_v50 = vld [vmem:[%s12732_s18 + $0xe88] sm:$0xff] }
 0x1a5   : > { %7240 = vmatpush1.bf16.msra.mxu1 %v10819_v23  ;;  %7200 = vmatprep.subr.bf16.mxu0 %v10548_v27  ;;  %v10723_v23 = vcombine.low %v1033_v12, %v1041_v13  ;;  %v10708_v27 = vcombine.high %v1017_v19, %v1025_v20  ;;  %v1249_v51 = vld [vmem:[%s12732_s18 + $0xec8] sm:$0xff] }
 0x1a6   : > { %7241 = vmatprep.subr.bf16.mxu1 %v10804_v29  ;;  %v10964_v29 = vcombine.high %v1273_v46, %v1281_v21  ;;  %v969_v36 = vld [vmem:[%s12732_s18 + $0x608] sm:$0xff] }
 0x1a7   : > { %v977_v37 = vld [vmem:[%s12732_s18 + $0x648] sm:$0xff] }
 0x1a8   : > { %7201 = vmatpush1.bf16.msra.mxu0 %v10547_v32  ;;  %v10707_v32 = vcombine.low %v1017_v19, %v1025_v20  ;;  %v1225_v39 = vld [vmem:[%s12732_s18 + $0xe08] sm:$0xff] }
 0x1a9   : > { %7242 = vmatpush1.bf16.msra.mxu1 %v10803_v33  ;;  %7202 = vmatprep.subr.bf16.mxu0 %v10532_v34  ;;  %v10963_v33 = vcombine.low %v1273_v46, %v1281_v21  ;;  %v10692_v34 = vcombine.high %v1001_v30, %v1009_v31  ;;  %v1233_v55 = vld [vmem:[%s12732_s18 + $0xe48] sm:$0xff] }
 0x1aa   : > { %7243 = vmatprep.subr.bf16.mxu1 %v10788_v38  ;;  %v10948_v38 = vcombine.high %v1257_v7, %v1265_v5  ;;  %v953_v60 = vld [vmem:[%s12732_s18 + $0x588] sm:$0xff] }
 0x1ab   : > { %v961_v63 = vld [vmem:[%s12732_s18 + $0x5c8] sm:$0xff] }
 0x1ac   : > { %7203 = vmatpush1.bf16.msra.mxu0 %v10531_v52  ;;  %v10691_v52 = vcombine.low %v1001_v30, %v1009_v31  ;;  %v1209_v2 = vld [vmem:[%s12732_s18 + $0xd88] sm:$0xff] }
 0x1ad   : > { %7244 = vmatpush1.bf16.msra.mxu1 %v10787_v53  ;;  %7204 = vmatprep.subr.bf16.mxu0 %v10516_v54  ;;  %v10947_v53 = vcombine.low %v1257_v7, %v1265_v5  ;;  %v10676_v54 = vcombine.high %v985_v42, %v993_v43  ;;  %v1217_v3 = vld [vmem:[%s12732_s18 + $0xdc8] sm:$0xff] }
 0x1ae   : > { %7245 = vmatprep.subr.bf16.mxu1 %v10772_v35  ;;  %v10932_v35 = vcombine.high %v1241_v50, %v1249_v51  ;;  %v937_v10 = vld [vmem:[%s12732_s18 + $0x508] sm:$0xff] }
 0x1af   : > { %v945_v11 = vld [vmem:[%s12732_s18 + $0x548] sm:$0xff] }
 0x1b0   : > { %7205 = vmatpush1.bf16.msra.mxu0 %v10515_v56  ;;  %v10675_v56 = vcombine.low %v985_v42, %v993_v43  ;;  %v1193_v12 = vld [vmem:[%s12732_s18 + $0xd08] sm:$0xff] }
 0x1b1   : > { %7246 = vmatpush1.bf16.msra.mxu1 %v10771_v57  ;;  %7206 = vmatprep.subr.bf16.mxu0 %v10500_v58  ;;  %v10931_v57 = vcombine.low %v1241_v50, %v1249_v51  ;;  %v10660_v58 = vcombine.high %v969_v36, %v977_v37  ;;  %v1201_v13 = vld [vmem:[%s12732_s18 + $0xd48] sm:$0xff] }
 0x1b2   : > { %7247 = vmatprep.subr.bf16.mxu1 %v10756_v59  ;;  %v10916_v59 = vcombine.high %v1225_v39, %v1233_v55  ;;  %v921_v19 = vld [vmem:[%s12732_s18 + $0x488] sm:$0xff] }
 0x1b3   : > { %v929_v20 = vld [vmem:[%s12732_s18 + $0x4c8] sm:$0xff] }
 0x1b4   : > { %7207 = vmatpush1.bf16.msra.mxu0 %v10499_v4  ;;  %v10659_v4 = vcombine.low %v969_v36, %v977_v37  ;;  %v1177_v46 = vld [vmem:[%s12732_s18 + $0xc88] sm:$0xff] }
 0x1b5   : > { %7248 = vmatpush1.bf16.msra.mxu1 %v10755_v6  ;;  %7208 = vmatprep.subr.bf16.mxu0 %v10484_v8  ;;  %v10915_v6 = vcombine.low %v1225_v39, %v1233_v55  ;;  %v10644_v8 = vcombine.high %v953_v60, %v961_v63  ;;  %v1185_v21 = vld [vmem:[%s12732_s18 + $0xcc8] sm:$0xff] }
 0x1b6   : > { %7249 = vmatprep.subr.bf16.mxu1 %v10740_v9  ;;  %v10900_v9 = vcombine.high %v1209_v2, %v1217_v3  ;;  %v905_v30 = vld [vmem:[%s12732_s18 + $0x408] sm:$0xff] }
 0x1b7   : > { %v913_v31 = vld [vmem:[%s12732_s18 + $0x448] sm:$0xff] }
 0x1b8   : > { %7209 = vmatpush1.bf16.msra.mxu0 %v10483_v14  ;;  %v10643_v14 = vcombine.low %v953_v60, %v961_v63  ;;  %v1161_v7 = vld [vmem:[%s12732_s18 + $0xc08] sm:$0xff] }
 0x1b9   : > { %7250 = vmatpush1.bf16.msra.mxu1 %v10739_v16  ;;  %7210 = vmatprep.subr.bf16.mxu0 %v10468_v17  ;;  %v10899_v16 = vcombine.low %v1209_v2, %v1217_v3  ;;  %v10628_v17 = vcombine.high %v937_v10, %v945_v11  ;;  %v1169_v5 = vld [vmem:[%s12732_s18 + $0xc48] sm:$0xff] }
 0x1ba   : > { %7251 = vmatprep.subr.bf16.mxu1 %v10724_v18  ;;  %v10884_v18 = vcombine.high %v1193_v12, %v1201_v13  ;;  %v1401_v42 = vld [vmem:[%s12732_s18 + $0x1388] sm:$0xff] }
 0x1bb   : > { %v1409_v43 = vld [vmem:[%s12732_s18 + $0x13c8] sm:$0xff] }
 0x1bc   : > { %7211 = vmatpush1.bf16.msra.mxu0 %v10467_v22  ;;  %v10627_v22 = vcombine.low %v937_v10, %v945_v11  ;;  %v1657_v50 = vld [vmem:[%s12732_s18 + $0x1b88] sm:$0xff]  ;;  %v11091_v39 = vcombine.low %v1401_v42, %v1409_v43 }
 0x1bd   : > { %7252 = vmatpush1.bf16.msra.mxu1 %v10723_v23  ;;  %7212 = vmatprep.subr.bf16.mxu0 %v10708_v27  ;;  %v10883_v23 = vcombine.low %v1193_v12, %v1201_v13  ;;  %v10612_v27 = vcombine.high %v921_v19, %v929_v20  ;;  %v1665_v51 = vld [vmem:[%s12732_s18 + $0x1bc8] sm:$0xff] }
 0x1be   : > { %7253 = vmatprep.subr.bf16.mxu1 %v10964_v29  ;;  %v10868_v29 = vcombine.high %v1177_v46, %v1185_v21  ;;  %v1385_v36 = vld [vmem:[%s12732_s18 + $0x1308] sm:$0xff] }
 0x1bf   : > { %v1393_v37 = vld [vmem:[%s12732_s18 + $0x1348] sm:$0xff] }
 0x1c0   : > { %7213 = vmatpush2.bf16.msra.mxu0 %v10707_v32  ;;  %v10611_v32 = vcombine.low %v921_v19, %v929_v20  ;;  %v1641_v55 = vld [vmem:[%s12732_s18 + $0x1b08] sm:$0xff] }
 0x1c1   : > { %7254 = vmatpush2.bf16.msra.mxu1 %v10963_v33  ;;  %7214 = vmatprep.subr.bf16.mxu0 %v10692_v34  ;;  %v10867_v33 = vcombine.low %v1177_v46, %v1185_v21  ;;  %v10596_v34 = vcombine.high %v905_v30, %v913_v31  ;;  %v1377_v60 = vld [vmem:[%s12732_s18 + $0x12c8] sm:$0xff] }
 0x1c2   : > { %7255 = vmatprep.subr.bf16.mxu1 %v10948_v38  ;;  %v10852_v38 = vcombine.high %v1161_v7, %v1169_v5  ;;  %v1625_v2 = vld [vmem:[%s12732_s18 + $0x1a88] sm:$0xff] }
 0x1c3   : > { %v1633_v3 = vld [vmem:[%s12732_s18 + $0x1ac8] sm:$0xff] }
 0x1c4   : > { %7215 = vmatpush2.bf16.msra.mxu0 %v10691_v52  ;;  %v10595_v52 = vcombine.low %v905_v30, %v913_v31  ;;  %v1353_v10 = vld [vmem:[%s12732_s18 + $0x1208] sm:$0xff] }
 0x1c5   : > { %7256 = vmatpush2.bf16.msra.mxu1 %v10947_v53  ;;  %7216 = vmatprep.subr.bf16.mxu0 %v10676_v54  ;;  %v10851_v53 = vcombine.low %v1161_v7, %v1169_v5  ;;  %v11092_v54 = vcombine.high %v1401_v42, %v1409_v43  ;;  %v1361_v11 = vld [vmem:[%s12732_s18 + $0x1248] sm:$0xff] }
 0x1c6   : > { %7257 = vmatprep.subr.bf16.mxu1 %v10932_v35  ;;  %v11348_v35 = vcombine.high %v1657_v50, %v1665_v51  ;;  %v1609_v12 = vld [vmem:[%s12732_s18 + $0x1a08] sm:$0xff] }
 0x1c7   : > { %v1617_v13 = vld [vmem:[%s12732_s18 + $0x1a48] sm:$0xff] }
 0x1c8   : > { %7217 = vmatpush2.bf16.msra.mxu0 %v10675_v56  ;;  %v1649_v56 = vld [vmem:[%s12732_s18 + $0x1b48] sm:$0xff] }
 0x1c9   : > { %7258 = vmatpush2.bf16.msra.mxu1 %v10931_v57  ;;  %7218 = vmatprep.subr.bf16.mxu0 %v10660_v58  ;;  %v11347_v57 = vcombine.low %v1657_v50, %v1665_v51  ;;  %v11076_v58 = vcombine.high %v1385_v36, %v1393_v37  ;;  %v11332_v63 = vcombine.high %v1641_v55, %v1649_v56  ;;  %v1337_v19 = vld [vmem:[%s12732_s18 + $0x1188] sm:$0xff] }
 0x1ca   : > { %7259 = vmatprep.subr.bf16.mxu1 %v10916_v59  ;;  %v1369_v59 = vld [vmem:[%s12732_s18 + $0x1288] sm:$0xff] }
 0x1cb   : > { %v1345_v20 = vld [vmem:[%s12732_s18 + $0x11c8] sm:$0xff] }
 0x1cc   : > { %7219 = vmatpush2.bf16.msra.mxu0 %v10659_v4  ;;  %v11075_v4 = vcombine.low %v1385_v36, %v1393_v37  ;;  %v1593_v46 = vld [vmem:[%s12732_s18 + $0x1988] sm:$0xff] }
 0x1cd   : > { %7260 = vmatpush2.bf16.msra.mxu1 %v10915_v6  ;;  %7220 = vmatprep.subr.bf16.mxu0 %v10644_v8  ;;  %v11331_v6 = vcombine.low %v1641_v55, %v1649_v56  ;;  %v11060_v8 = vcombine.high %v1369_v59, %v1377_v60  ;;  %v1601_v21 = vld [vmem:[%s12732_s18 + $0x19c8] sm:$0xff] }
 0x1ce   : > { %7261 = vmatprep.subr.bf16.mxu1 %v10900_v9  ;;  %v11316_v9 = vcombine.high %v1625_v2, %v1633_v3  ;;  %v1321_v30 = vld [vmem:[%s12732_s18 + $0x1108] sm:$0xff] }
 0x1cf   : > { %v1329_v31 = vld [vmem:[%s12732_s18 + $0x1148] sm:$0xff] }
 0x1d0   : > { %7221 = vmatpush2.bf16.msra.mxu0 %v10643_v14  ;;  %v11059_v14 = vcombine.low %v1369_v59, %v1377_v60  ;;  %v1577_v7 = vld [vmem:[%s12732_s18 + $0x1908] sm:$0xff] }
 0x1d1   : > { %7262 = vmatpush2.bf16.msra.mxu1 %v10899_v16  ;;  %7222 = vmatprep.subr.bf16.mxu0 %v10628_v17  ;;  %v11315_v16 = vcombine.low %v1625_v2, %v1633_v3  ;;  %v11044_v17 = vcombine.high %v1353_v10, %v1361_v11  ;;  %v1585_v5 = vld [vmem:[%s12732_s18 + $0x1948] sm:$0xff] }
 0x1d2   : > { %7263 = vmatprep.subr.bf16.mxu1 %v10884_v18  ;;  %v11300_v18 = vcombine.high %v1609_v12, %v1617_v13  ;;  %v1305_v42 = vld [vmem:[%s12732_s18 + $0x1088] sm:$0xff] }
 0x1d3   : > { %v1313_v43 = vld [vmem:[%s12732_s18 + $0x10c8] sm:$0xff] }
 0x1d4   : > { %7223 = vmatpush2.bf16.msra.mxu0 %v10627_v22  ;;  %v11043_v22 = vcombine.low %v1353_v10, %v1361_v11  ;;  %v1561_v50 = vld [vmem:[%s12732_s18 + $0x1888] sm:$0xff]  ;;  %v10995_v56 = vcombine.low %v1305_v42, %v1313_v43 }
 0x1d5   : > { %7264 = vmatpush2.bf16.msra.mxu1 %v10883_v23  ;;  %7224 = vmatprep.subr.bf16.mxu0 %v10612_v27  ;;  %v11299_v23 = vcombine.low %v1609_v12, %v1617_v13  ;;  %v11028_v27 = vcombine.high %v1337_v19, %v1345_v20  ;;  %v1569_v51 = vld [vmem:[%s12732_s18 + $0x18c8] sm:$0xff] }
 0x1d6   : > { %7265 = vmatprep.subr.bf16.mxu1 %v10868_v29  ;;  %v11284_v29 = vcombine.high %v1593_v46, %v1601_v21  ;;  %v1289_v36 = vld [vmem:[%s12732_s18 + $0x1008] sm:$0xff] }
 0x1d7   : > { %v1297_v37 = vld [vmem:[%s12732_s18 + $0x1048] sm:$0xff] }
 0x1d8   : > { %7225 = vmatpush2.bf16.msra.mxu0 %v10611_v32  ;;  %v11027_v32 = vcombine.low %v1337_v19, %v1345_v20  ;;  %v1553_v55 = vld [vmem:[%s12732_s18 + $0x1848] sm:$0xff] }
 0x1d9   : > { %7266 = vmatpush2.bf16.msra.mxu1 %v10867_v33  ;;  %7226 = vmatprep.subr.bf16.mxu0 %v10596_v34  ;;  %v11283_v33 = vcombine.low %v1593_v46, %v1601_v21  ;;  %v11012_v34 = vcombine.high %v1321_v30, %v1329_v31  ;;  %v1529_v60 = vld [vmem:[%s12732_s18 + $0x1788] sm:$0xff] }
 0x1da   : > { %7267 = vmatprep.subr.bf16.mxu1 %v10852_v38  ;;  %v11268_v38 = vcombine.high %v1577_v7, %v1585_v5  ;;  %v1785_v2 = vld [vmem:[%s12732_s18 + $0x1f88] sm:$0xff] }
 0x1db   : > { %v1793_v3 = vld [vmem:[%s12732_s18 + $0x1fc8] sm:$0xff] }
 0x1dc   : > { %7227 = vmatpush2.bf16.msra.mxu0 %v10595_v52  ;;  %v11011_v52 = vcombine.low %v1321_v30, %v1329_v31  ;;  %v1513_v10 = vld [vmem:[%s12732_s18 + $0x1708] sm:$0xff] }
 0x1dd   : > { %7268 = vmatpush2.bf16.msra.mxu1 %v10851_v53  ;;  %7278 = vmatprep.subr.bf16.mxu0 %v11092_v54  ;;  %v11267_v53 = vcombine.low %v1577_v7, %v1585_v5  ;;  %v10996_v54 = vcombine.high %v1305_v42, %v1313_v43  ;;  %v1521_v11 = vld [vmem:[%s12732_s18 + $0x1748] sm:$0xff] }
 0x1de   : > { %7319 = vmatprep.subr.bf16.mxu1 %v11348_v35  ;;  %v11252_v35 = vcombine.high %v1561_v50, %v1569_v51  ;;  %v1769_v12 = vld [vmem:[%s12732_s18 + $0x1f08] sm:$0xff] }
 0x1df   : > { %7229 = vmatmul.mubr.bf16.vlgmr.msra.gmra.mxu0 %v12878_v25  ;;  %v1777_v13 = vld [vmem:[%s12732_s18 + $0x1f48] sm:$0xff] }
 0x1e0   : > { %7270 = vmatmul.mubr.bf16.vlgmr.msra.gmra.mxu1 %v12882_v28  ;;  %7279 = vmatpush1.bf16.msra.mxu0 %v11091_v39  ;;  %v1545_v39 = vld [vmem:[%s12732_s18 + $0x1808] sm:$0xff] }
 0x1e1   : > { %7310 = vmatprep.mubr.bf16.mxu0 %v12902_v40  ;;  %7320 = vmatpush1.bf16.msra.mxu1 %v11347_v57  ;;  %v11251_v57 = vcombine.low %v1561_v50, %v1569_v51  ;;  %v11236_v59 = vcombine.high %v1545_v39, %v1553_v55  ;;  %v1497_v19 = vld [vmem:[%s12732_s18 + $0x1688] sm:$0xff] }
 0x1e2   : > { %7351 = vmatprep.mubr.bf16.mxu1 %v12904_v41  ;;  %7280 = vmatprep.subr.bf16.mxu0 %v11076_v58  ;;  %v10980_v58 = vcombine.high %v1289_v36, %v1297_v37  ;;  %v1505_v20 = vld [vmem:[%s12732_s18 + $0x16c8] sm:$0xff] }
 0x1e3   : > { %7321 = vmatprep.subr.bf16.mxu1 %v11332_v63  ;;  %v1537_v63 = vld [vmem:[%s12732_s18 + $0x17c8] sm:$0xff] }
 0x1e4   : > { %7281 = vmatpush1.bf16.msra.mxu0 %v11075_v4  ;;  %v10979_v4 = vcombine.low %v1289_v36, %v1297_v37  ;;  %v1753_v46 = vld [vmem:[%s12732_s18 + $0x1e88] sm:$0xff] }
 0x1e5   : > { %7322 = vmatpush1.bf16.msra.mxu1 %v11331_v6  ;;  %7282 = vmatprep.subr.bf16.mxu0 %v11060_v8  ;;  %v11235_v6 = vcombine.low %v1545_v39, %v1553_v55  ;;  %v11220_v8 = vcombine.high %v1529_v60, %v1537_v63  ;;  %v1761_v21 = vld [vmem:[%s12732_s18 + $0x1ec8] sm:$0xff] }
 0x1e6   : > { %7323 = vmatprep.subr.bf16.mxu1 %v11316_v9  ;;  %v11476_v9 = vcombine.high %v1785_v2, %v1793_v3  ;;  %v1481_v30 = vld [vmem:[%s12732_s18 + $0x1608] sm:$0xff] }
 0x1e7   : > { %v1489_v31 = vld [vmem:[%s12732_s18 + $0x1648] sm:$0xff] }
 0x1e8   : > { %7283 = vmatpush1.bf16.msra.mxu0 %v11059_v14  ;;  %v11219_v14 = vcombine.low %v1529_v60, %v1537_v63  ;;  %v1737_v7 = vld [vmem:[%s12732_s18 + $0x1e08] sm:$0xff] }
 0x1e9   : > { %7324 = vmatpush1.bf16.msra.mxu1 %v11315_v16  ;;  %7284 = vmatprep.subr.bf16.mxu0 %v11044_v17  ;;  %v11475_v16 = vcombine.low %v1785_v2, %v1793_v3  ;;  %v11204_v17 = vcombine.high %v1513_v10, %v1521_v11  ;;  %v1745_v5 = vld [vmem:[%s12732_s18 + $0x1e48] sm:$0xff] }
 0x1ea   : > { %7325 = vmatprep.subr.bf16.mxu1 %v11300_v18  ;;  %v11460_v18 = vcombine.high %v1769_v12, %v1777_v13  ;;  %v1465_v42 = vld [vmem:[%s12732_s18 + $0x1588] sm:$0xff] }
 0x1eb   : > { %v1473_v43 = vld [vmem:[%s12732_s18 + $0x15c8] sm:$0xff] }
 0x1ec   : > { %7285 = vmatpush1.bf16.msra.mxu0 %v11043_v22  ;;  %v11203_v22 = vcombine.low %v1513_v10, %v1521_v11  ;;  %v1721_v50 = vld [vmem:[%s12732_s18 + $0x1d88] sm:$0xff] }
 0x1ed   : > { %7326 = vmatpush1.bf16.msra.mxu1 %v11299_v23  ;;  %7286 = vmatprep.subr.bf16.mxu0 %v11028_v27  ;;  %v11459_v23 = vcombine.low %v1769_v12, %v1777_v13  ;;  %v11188_v27 = vcombine.high %v1497_v19, %v1505_v20  ;;  %v1729_v51 = vld [vmem:[%s12732_s18 + $0x1dc8] sm:$0xff] }
 0x1ee   : > { %7327 = vmatprep.subr.bf16.mxu1 %v11284_v29  ;;  %v11444_v29 = vcombine.high %v1753_v46, %v1761_v21  ;;  %v1449_v36 = vld [vmem:[%s12732_s18 + $0x1508] sm:$0xff] }
 0x1ef   : > { %v1457_v37 = vld [vmem:[%s12732_s18 + $0x1548] sm:$0xff] }
 0x1f0   : > { %7287 = vmatpush1.bf16.msra.mxu0 %v11027_v32  ;;  %v11187_v32 = vcombine.low %v1497_v19, %v1505_v20  ;;  %v1705_v39 = vld [vmem:[%s12732_s18 + $0x1d08] sm:$0xff]  ;;  %v890_v19 = vld [vmem:[%s12732_s18 + $0x390] sm:$0xff] }
 0x1f1   : > { %7328 = vmatpush1.bf16.msra.mxu1 %v11283_v33  ;;  %7288 = vmatprep.subr.bf16.mxu0 %v11012_v34  ;;  %v11443_v33 = vcombine.low %v1753_v46, %v1761_v21  ;;  %v11172_v34 = vcombine.high %v1481_v30, %v1489_v31  ;;  %v1713_v55 = vld [vmem:[%s12732_s18 + $0x1d48] sm:$0xff]  ;;  %v898_v20 = vld [vmem:[%s12732_s18 + $0x3d0] sm:$0xff] }
 0x1f2   : > { %7329 = vmatprep.subr.bf16.mxu1 %v11268_v38  ;;  %v11428_v38 = vcombine.high %v1737_v7, %v1745_v5  ;;  %v1433_v60 = vld [vmem:[%s12732_s18 + $0x1488] sm:$0xff]  ;;  %v1146_v46 = vld [vmem:[%s12732_s18 + $0xb90] sm:$0xff] }
 0x1f3   : > { %v1441_v63 = vld [vmem:[%s12732_s18 + $0x14c8] sm:$0xff]  ;;  %v1154_v21 = vld [vmem:[%s12732_s18 + $0xbd0] sm:$0xff] }
 0x1f4   : > { %7289 = vmatpush1.bf16.msra.mxu0 %v11011_v52  ;;  %v11171_v52 = vcombine.low %v1481_v30, %v1489_v31  ;;  %v1689_v2 = vld [vmem:[%s12732_s18 + $0x1c88] sm:$0xff]  ;;  %v10838_v30 = vcombine.high %v1146_v46, %v1154_v21  ;;  %v874_v31 = vld [vmem:[%s12732_s18 + $0x310] sm:$0xff] }
 0x1f5   : > { %7330 = vmatpush1.bf16.msra.mxu1 %v11267_v53  ;;  %7290 = vmatprep.subr.bf16.mxu0 %v10996_v54  ;;  %v11427_v53 = vcombine.low %v1737_v7, %v1745_v5  ;;  %v11156_v54 = vcombine.high %v1465_v42, %v1473_v43  ;;  %v1697_v3 = vld [vmem:[%s12732_s18 + $0x1cc8] sm:$0xff]  ;;  %v882_v7 = vld [vmem:[%s12732_s18 + $0x350] sm:$0xff]  ;;  %v10581_v5 = vcombine.low %v890_v19, %v898_v20 }
 0x1f6   : > { %7331 = vmatprep.subr.bf16.mxu1 %v11252_v35  ;;  %v11412_v35 = vcombine.high %v1721_v50, %v1729_v51  ;;  %v1417_v10 = vld [vmem:[%s12732_s18 + $0x1408] sm:$0xff] }
 0x1f7   : > { %v1425_v11 = vld [vmem:[%s12732_s18 + $0x1448] sm:$0xff] }
 0x1f8   : > { %7291 = vmatpush1.bf16.msra.mxu0 %v10995_v56  ;;  %v11155_v56 = vcombine.low %v1465_v42, %v1473_v43  ;;  %v1673_v12 = vld [vmem:[%s12732_s18 + $0x1c08] sm:$0xff]  ;;  %v10566_v43 = vcombine.high %v874_v31, %v882_v7 }
 0x1f9   : > { %7332 = vmatpush1.bf16.msra.mxu1 %v11251_v57  ;;  %7292 = vmatprep.subr.bf16.mxu0 %v10980_v58  ;;  %v11411_v57 = vcombine.low %v1721_v50, %v1729_v51  ;;  %v11140_v58 = vcombine.high %v1449_v36, %v1457_v37  ;;  %v1681_v13 = vld [vmem:[%s12732_s18 + $0x1c48] sm:$0xff]  ;;  %v858_v50 = vld [vmem:[%s12732_s18 + $0x290] sm:$0xff] }
 0x1fa   : > { %7333 = vmatprep.subr.bf16.mxu1 %v11236_v59  ;;  %v11396_v59 = vcombine.high %v1705_v39, %v1713_v55  ;;  %v866_v51 = vld [vmem:[%s12732_s18 + $0x2d0] sm:$0xff] }
 0x1fc   : > { %7293 = vmatpush1.bf16.msra.mxu0 %v10979_v4  ;;  %v11139_v4 = vcombine.low %v1449_v36, %v1457_v37 }
 0x1fd   : > { %7334 = vmatpush1.bf16.msra.mxu1 %v11235_v6  ;;  %7294 = vmatprep.subr.bf16.mxu0 %v11220_v8  ;;  %v11395_v6 = vcombine.low %v1705_v39, %v1713_v55  ;;  %v11124_v8 = vcombine.high %v1433_v60, %v1441_v63  ;;  %v10565_v39 = vcombine.low %v874_v31, %v882_v7  ;;  %v818_v31 = vld [vmem:[%s12732_s18 + $0x150] sm:$0xff] }
 0x1fe   : > { %7335 = vmatprep.subr.bf16.mxu1 %v11476_v9  ;;  %v11380_v9 = vcombine.high %v1689_v2, %v1697_v3  ;;  %v1066_v7 = vld [vmem:[%s12732_s18 + $0x910] sm:$0xff] }
 0x200   : > { %7295 = vmatpush2.bf16.msra.mxu0 %v11219_v14  ;;  %v11123_v14 = vcombine.low %v1433_v60, %v1441_v63 }
 0x201   : > { %7336 = vmatpush2.bf16.msra.mxu1 %v11475_v16  ;;  %7296 = vmatprep.subr.bf16.mxu0 %v11204_v17  ;;  %v11379_v16 = vcombine.low %v1689_v2, %v1697_v3  ;;  %v11108_v17 = vcombine.high %v1417_v10, %v1425_v11  ;;  %v842_v2 = vld [vmem:[%s12732_s18 + $0x210] sm:$0xff] }
 0x202   : > { %7337 = vmatprep.subr.bf16.mxu1 %v11460_v18  ;;  %v11364_v18 = vcombine.high %v1673_v12, %v1681_v13  ;;  %v850_v3 = vld [vmem:[%s12732_s18 + $0x250] sm:$0xff] }
 0x204   : > { %7297 = vmatpush2.bf16.msra.mxu0 %v11203_v22  ;;  %v11107_v22 = vcombine.low %v1417_v10, %v1425_v11  ;;  %v10549_v11 = vcombine.low %v858_v50, %v866_v51 }
 0x205   : > { %7338 = vmatpush2.bf16.msra.mxu1 %v11459_v23  ;;  %7298 = vmatprep.subr.bf16.mxu0 %v11188_v27  ;;  %v11363_v23 = vcombine.low %v1673_v12, %v1681_v13  ;;  %v10582_v27 = vcombine.high %v890_v19, %v898_v20  ;;  %v834_v19 = vld [vmem:[%s12732_s18 + $0x1d0] sm:$0xff] }
 0x206   : > { %7339 = vmatprep.subr.bf16.mxu1 %v11444_v29  ;;  %v13113_v29 = vld [vmem:[%s12738_s29] sm:$0xff] }
 0x207   : > { %v1811_v42 = vrot.slane %v13113_v29, %v12845_v48  ;;  %v1082_v20 = vld [vmem:[%s12732_s18 + $0x990] sm:$0xff] }
 0x208   : > { %7299 = vmatpush2.bf16.msra.mxu0 %v11187_v32  ;;  %v1807_v32 = vrot.slane %v13113_v29, %v12837_v45 }
 0x209   : > { %7340 = vmatpush2.bf16.msra.mxu1 %v11443_v33  ;;  %7300 = vmatprep.subr.bf16.mxu0 %v11172_v34  ;;  %v1130_v33 = vld [vmem:[%s12732_s18 + $0xb10] sm:$0xff] }
 0x20a   : > { %7341 = vmatprep.subr.bf16.mxu1 %v11428_v38  ;;  %v1138_v34 = vld [vmem:[%s12732_s18 + $0xb50] sm:$0xff]  ;;  %v10837_v38 = vcombine.low %v1146_v46, %v1154_v21  ;;  %v10533_v21 = vcombine.low %v842_v2, %v850_v3 }
 0x20b   : > { %v1090_v46 = vld [vmem:[%s12732_s18 + $0x9d0] sm:$0xff] }
 0x20c   : > { %7301 = vmatpush2.bf16.msra.mxu0 %v11171_v52 }
 0x20d   : > { %7342 = vmatpush2.bf16.msra.mxu1 %v11427_v53  ;;  %7302 = vmatprep.subr.bf16.mxu0 %v11156_v54  ;;  %v10822_v53 = vcombine.high %v1130_v33, %v1138_v34  ;;  %v1114_v54 = vld [vmem:[%s12732_s18 + $0xa90] sm:$0xff] }
 0x20e   : > { %7343 = vmatprep.subr.bf16.mxu1 %v11412_v35  ;;  %v1122_v35 = vld [vmem:[%s12732_s18 + $0xad0] sm:$0xff] }
 0x20f   : > { %v10806_v63 = vcombine.high %v1114_v54, %v1122_v35  ;;  %v10805_v13 = vcombine.low %v1114_v54, %v1122_v35 }
 0x210   : > { %7303 = vmatpush2.bf16.msra.mxu0 %v11155_v56  ;;  %v10821_v56 = vcombine.low %v1130_v33, %v1138_v34  ;;  %v10773_v33 = vcombine.low %v1082_v20, %v1090_v46 }
 0x211   : > { %7344 = vmatpush2.bf16.msra.mxu1 %v11411_v57  ;;  %7304 = vmatprep.subr.bf16.mxu0 %v11140_v58  ;;  %v10550_v57 = vcombine.high %v858_v50, %v866_v51  ;;  %v1050_v50 = vld [vmem:[%s12732_s18 + $0x890] sm:$0xff] }
 0x212   : > { %7345 = vmatprep.subr.bf16.mxu1 %v11396_v59  ;;  %v1058_v51 = vld [vmem:[%s12732_s18 + $0x8d0] sm:$0xff] }
 0x213   : > { %v10742_v35 = vcombine.high %v1050_v50, %v1058_v51 }
 0x214   : > { %7305 = vmatpush2.bf16.msra.mxu0 %v11139_v4 }
 0x215   : > { %7346 = vmatpush2.bf16.msra.mxu1 %v11395_v6  ;;  %7306 = vmatprep.subr.bf16.mxu0 %v11124_v8  ;;  %v1098_v6 = vld [vmem:[%s12732_s18 + $0xa10] sm:$0xff] }
 0x216   : > { %7347 = vmatprep.subr.bf16.mxu1 %v11380_v9  ;;  %v1106_v8 = vld [vmem:[%s12732_s18 + $0xa50] sm:$0xff] }
 0x218   : > { %7307 = vmatpush2.bf16.msra.mxu0 %v11123_v14  ;;  %v10534_v14 = vcombine.high %v842_v2, %v850_v3  ;;  %v1026_v2 = vld [vmem:[%s12732_s18 + $0x7d0] sm:$0xff] }
 0x219   : > { %7348 = vmatpush2.bf16.msra.mxu1 %v11379_v16  ;;  %7308 = vmatprep.subr.bf16.mxu0 %v11108_v17  ;;  %v10790_v17 = vcombine.high %v1098_v6, %v1106_v8  ;;  %v1274_v3 = vld [vmem:[%s12732_s18 + $0xf90] sm:$0xff] }
 0x21a   : > { %7349 = vmatprep.subr.bf16.mxu1 %v11364_v18  ;;  %v826_v18 = vld [vmem:[%s12732_s18 + $0x190] sm:$0xff] }
 0x21c   : > { %7309 = vmatpush2.bf16.msra.mxu0 %v11107_v22  ;;  %v10789_v22 = vcombine.low %v1098_v6, %v1106_v8 }
 0x21d   : > { %7350 = vmatpush2.bf16.msra.mxu1 %v11363_v23  ;;  %7360 = vmatprep.subr.bf16.mxu0 %v10582_v27  ;;  %v10518_v23 = vcombine.high %v826_v18, %v834_v19  ;;  %v10774_v27 = vcombine.high %v1082_v20, %v1090_v46  ;;  %v986_v46 = vld [vmem:[%s12732_s18 + $0x690] sm:$0xff] }
 0x21e   : > { %7401 = vmatprep.subr.bf16.mxu1 %v10838_v30  ;;  %v810_v30 = vld [vmem:[%s12732_s18 + $0x110] sm:$0xff] }
 0x21f   : > { %7311 = vmatmul.mubr.bf16.vlgmr.msra.gmra.mxu0 %v12978_v15  ;;  %v7066_v52 = vpop.f32.mrf.mxu0  ;;  %v10502_v34 = vcombine.high %v810_v30, %v818_v31 }
 0x220   : > { %7352 = vmatmul.mubr.bf16.vlgmr.msra.gmra.mxu1 %v12974_v44  ;;  %v7067_v36 = vadd.f32 %v7066_v52, %v1807_v32  ;;  %v7107_v37 = vpop.f32.mrf.mxu1  ;;  %7361 = vmatpush1.bf16.msra.mxu0 %v10581_v5  ;;  %v1074_v5 = vld [vmem:[%s12732_s18 + $0x950] sm:$0xff]  ;;  %v10517_v32 = vcombine.low %v826_v18, %v834_v19  ;;  %v10501_v52 = vcombine.low %v810_v30, %v818_v31 }
 0x221   : > { %7392 = vmatprep.mubr.bf16.mxu0 %v12876_v24  ;;  %7402 = vmatpush1.bf16.msra.mxu1 %v10837_v38  ;;  %v7068_v55 = vpop.f32.mrf.mxu0  ;;  %v10758_v38 = vcombine.high %v1066_v7, %v1074_v5 }
 0x222   : > { %v13130_v58 = vadd.f32 %v7107_v37, %v7067_v36  ;;  %7433 = vmatprep.mubr.bf16.mxu1 %v12880_v26  ;;  %v7069_v59 = vadd.f32 %v7068_v55, %v1811_v42  ;;  %v7109_v60 = vpop.f32.mrf.mxu1  ;;  %7362 = vmatprep.subr.bf16.mxu0 %v10566_v43  ;;  %v794_v42 = vld [vmem:[%s12732_s18 + $0x90] sm:$0xff] }
 0x223   : > { %7403 = vmatprep.subr.bf16.mxu1 %v10822_v53  ;;  %v7070_v4 = vpop.f32.mrf.mxu0  ;;  %v802_v43 = vld [vmem:[%s12732_s18 + $0xd0] sm:$0xff]  ;;  %v10757_v53 = vcombine.low %v1066_v7, %v1074_v5 }
 0x224   : > { %v13137_v9 = vadd.f32 %v7109_v60, %v7069_v59  ;;  %v7111_v10 = vpop.f32.mrf.mxu1  ;;  %7363 = vmatpush1.bf16.msra.mxu0 %v10565_v39  ;;  %v10486_v54 = vcombine.high %v794_v42, %v802_v43  ;;  %v778_v36 = vld [vmem:[%s12732_s18 + $0x10] sm:$0xff] }
 0x225   : > { %7404 = vmatpush1.bf16.msra.mxu1 %v10821_v56  ;;  %v7071_v12 = vpop.f32.mrf.mxu0  ;;  %7364 = vmatprep.subr.bf16.mxu0 %v10550_v57  ;;  %v786_v37 = vld [vmem:[%s12732_s18 + $0x50] sm:$0xff]  ;;  %v10485_v56 = vcombine.low %v794_v42, %v802_v43  ;;  %v10741_v57 = vcombine.low %v1050_v50, %v1058_v51 }
 0x226   : > { %v7112_v16 = vpop.f32.mrf.mxu1  ;;  %7405 = vmatprep.subr.bf16.mxu1 %v10806_v63  ;;  %v1034_v39 = vld [vmem:[%s12732_s18 + $0x810] sm:$0xff]  ;;  %v10470_v59 = vcombine.high %v778_v36, %v786_v37  ;;  %v10469_v6 = vcombine.low %v778_v36, %v786_v37 }
 0x227   : > { %v1042_v55 = vld [vmem:[%s12732_s18 + $0x850] sm:$0xff] }
 0x228   : > { %7365 = vmatpush1.bf16.msra.mxu0 %v10549_v11  ;;  %v10726_v60 = vcombine.high %v1034_v39, %v1042_v55  ;;  %v1018_v63 = vld [vmem:[%s12732_s18 + $0x790] sm:$0xff]  ;;  %v10725_v8 = vcombine.low %v1034_v39, %v1042_v55 }
 0x229   : > { %7406 = vmatpush1.bf16.msra.mxu1 %v10805_v13  ;;  %7366 = vmatprep.subr.bf16.mxu0 %v10534_v14  ;;  %v1282_v4 = vld [vmem:[%s12732_s18 + $0xfd0] sm:$0xff]  ;;  %v10710_v10 = vcombine.high %v1018_v63, %v1026_v2 }
 0x22a   : > { %7407 = vmatprep.subr.bf16.mxu1 %v10790_v17  ;;  %v10966_v11 = vcombine.high %v1274_v3, %v1282_v4  ;;  %v1002_v12 = vld [vmem:[%s12732_s18 + $0x710] sm:$0xff]  ;;  %v10709_v17 = vcombine.low %v1018_v63, %v1026_v2  ;;  %v10965_v18 = vcombine.low %v1274_v3, %v1282_v4 }
 0x22b   : > { %v1010_v13 = vld [vmem:[%s12732_s18 + $0x750] sm:$0xff] }
 0x22c   : > { %7367 = vmatpush1.bf16.msra.mxu0 %v10533_v21  ;;  %v1258_v14 = vld [vmem:[%s12732_s18 + $0xf10] sm:$0xff]  ;;  %v10694_v19 = vcombine.high %v1002_v12, %v1010_v13 }
 0x22d   : > { %7408 = vmatpush1.bf16.msra.mxu1 %v10789_v22  ;;  %7368 = vmatprep.subr.bf16.mxu0 %v10518_v23  ;;  %v1266_v16 = vld [vmem:[%s12732_s18 + $0xf50] sm:$0xff] }
 0x22e   : > { %7409 = vmatprep.subr.bf16.mxu1 %v10774_v27  ;;  %v10950_v20 = vcombine.high %v1258_v14, %v1266_v16  ;;  %v994_v21 = vld [vmem:[%s12732_s18 + $0x6d0] sm:$0xff]  ;;  %v10693_v27 = vcombine.low %v1002_v12, %v1010_v13  ;;  %v10949_v30 = vcombine.low %v1258_v14, %v1266_v16 }
 0x22f   : > { %v1242_v22 = vld [vmem:[%s12732_s18 + $0xe90] sm:$0xff]  ;;  %v10678_v31 = vcombine.high %v986_v46, %v994_v21 }
 0x230   : > { %7369 = vmatpush1.bf16.msra.mxu0 %v10517_v32  ;;  %v1250_v23 = vld [vmem:[%s12732_s18 + $0xed0] sm:$0xff] }
 0x231   : > { %7410 = vmatpush1.bf16.msra.mxu1 %v10773_v33  ;;  %7370 = vmatprep.subr.bf16.mxu0 %v10502_v34  ;;  %v10934_v7 = vcombine.high %v1242_v22, %v1250_v23  ;;  %v970_v5 = vld [vmem:[%s12732_s18 + $0x610] sm:$0xff]  ;;  %v10933_v42 = vcombine.low %v1242_v22, %v1250_v23 }
 0x232   : > { %7411 = vmatprep.subr.bf16.mxu1 %v10758_v38  ;;  %v978_v32 = vld [vmem:[%s12732_s18 + $0x650] sm:$0xff]  ;;  %v10677_v38 = vcombine.low %v986_v46, %v994_v21 }
 0x233   : > { %v1226_v33 = vld [vmem:[%s12732_s18 + $0xe10] sm:$0xff]  ;;  %v10662_v43 = vcombine.high %v970_v5, %v978_v32 }
 0x234   : > { %7371 = vmatpush1.bf16.msra.mxu0 %v10501_v52  ;;  %v1234_v34 = vld [vmem:[%s12732_s18 + $0xe50] sm:$0xff] }
 0x235   : > { %7412 = vmatpush1.bf16.msra.mxu1 %v10757_v53  ;;  %7372 = vmatprep.subr.bf16.mxu0 %v10486_v54  ;;  %v10918_v50 = vcombine.high %v1226_v33, %v1234_v34  ;;  %v954_v51 = vld [vmem:[%s12732_s18 + $0x590] sm:$0xff]  ;;  %v10917_v36 = vcombine.low %v1226_v33, %v1234_v34 }
 0x236   : > { %7413 = vmatprep.subr.bf16.mxu1 %v10742_v35  ;;  %v962_v52 = vld [vmem:[%s12732_s18 + $0x5d0] sm:$0xff]  ;;  %v10661_v35 = vcombine.low %v970_v5, %v978_v32 }
 0x237   : > { %v1210_v53 = vld [vmem:[%s12732_s18 + $0xd90] sm:$0xff]  ;;  %v10646_v37 = vcombine.high %v954_v51, %v962_v52 }
 0x238   : > { %7373 = vmatpush1.bf16.msra.mxu0 %v10485_v56  ;;  %v1218_v54 = vld [vmem:[%s12732_s18 + $0xdd0] sm:$0xff] }
 0x239   : > { %7414 = vmatpush1.bf16.msra.mxu1 %v10741_v57  ;;  %7374 = vmatprep.subr.bf16.mxu0 %v10470_v59  ;;  %v10902_v39 = vcombine.high %v1210_v53, %v1218_v54  ;;  %v938_v55 = vld [vmem:[%s12732_s18 + $0x510] sm:$0xff]  ;;  %v10901_v63 = vcombine.low %v1210_v53, %v1218_v54 }
 0x23a   : > { %7415 = vmatprep.subr.bf16.mxu1 %v10726_v60  ;;  %v946_v56 = vld [vmem:[%s12732_s18 + $0x550] sm:$0xff]  ;;  %v10645_v60 = vcombine.low %v954_v51, %v962_v52 }
 0x23b   : > { %v1194_v57 = vld [vmem:[%s12732_s18 + $0xd10] sm:$0xff]  ;;  %v10630_v2 = vcombine.high %v938_v55, %v946_v56 }
 0x23c   : > { %7375 = vmatpush1.bf16.msra.mxu0 %v10469_v6  ;;  %v1202_v59 = vld [vmem:[%s12732_s18 + $0xd50] sm:$0xff] }
 0x23d   : > { %7416 = vmatpush1.bf16.msra.mxu1 %v10725_v8  ;;  %7376 = vmatprep.subr.bf16.mxu0 %v10710_v10  ;;  %v10886_v3 = vcombine.high %v1194_v57, %v1202_v59  ;;  %v922_v4 = vld [vmem:[%s12732_s18 + $0x490] sm:$0xff]  ;;  %v10885_v12 = vcombine.low %v1194_v57, %v1202_v59 }
 0x23e   : > { %7417 = vmatprep.subr.bf16.mxu1 %v10966_v11  ;;  %v930_v6 = vld [vmem:[%s12732_s18 + $0x4d0] sm:$0xff]  ;;  %v10629_v11 = vcombine.low %v938_v55, %v946_v56 }
 0x23f   : > { %v1178_v8 = vld [vmem:[%s12732_s18 + $0xc90] sm:$0xff]  ;;  %v10614_v13 = vcombine.high %v922_v4, %v930_v6 }
 0x240   : > { %7377 = vmatpush2.bf16.msra.mxu0 %v10709_v17  ;;  %v1186_v10 = vld [vmem:[%s12732_s18 + $0xcd0] sm:$0xff] }
 0x241   : > { %7418 = vmatpush2.bf16.msra.mxu1 %v10965_v18  ;;  %7378 = vmatprep.subr.bf16.mxu0 %v10694_v19  ;;  %v10870_v14 = vcombine.high %v1178_v8, %v1186_v10  ;;  %v906_v16 = vld [vmem:[%s12732_s18 + $0x410] sm:$0xff]  ;;  %v10869_v46 = vcombine.low %v1178_v8, %v1186_v10 }
 0x242   : > { %7419 = vmatprep.subr.bf16.mxu1 %v10950_v20  ;;  %v914_v17 = vld [vmem:[%s12732_s18 + $0x450] sm:$0xff]  ;;  %v10613_v20 = vcombine.low %v922_v4, %v930_v6 }
 0x243   : > { %v1162_v18 = vld [vmem:[%s12732_s18 + $0xc10] sm:$0xff]  ;;  %v10598_v21 = vcombine.high %v906_v16, %v914_v17 }
 0x244   : > { %7379 = vmatpush2.bf16.msra.mxu0 %v10693_v27  ;;  %v1170_v19 = vld [vmem:[%s12732_s18 + $0xc50] sm:$0xff] }
 0x245   : > { %7420 = vmatpush2.bf16.msra.mxu1 %v10949_v30  ;;  %7380 = vmatprep.subr.bf16.mxu0 %v10678_v31  ;;  %v10854_v22 = vcombine.high %v1162_v18, %v1170_v19  ;;  %v1402_v23 = vld [vmem:[%s12732_s18 + $0x1390] sm:$0xff]  ;;  %v10853_v5 = vcombine.low %v1162_v18, %v1170_v19 }
 0x246   : > { %7421 = vmatprep.subr.bf16.mxu1 %v10934_v7  ;;  %v1410_v27 = vld [vmem:[%s12732_s18 + $0x13d0] sm:$0xff]  ;;  %v10597_v7 = vcombine.low %v906_v16, %v914_v17 }
 0x247   : > { %v1658_v30 = vld [vmem:[%s12732_s18 + $0x1b90] sm:$0xff]  ;;  %v11094_v32 = vcombine.high %v1402_v23, %v1410_v27 }
 0x248   : > { %7381 = vmatpush2.bf16.msra.mxu0 %v10677_v38  ;;  %v1666_v31 = vld [vmem:[%s12732_s18 + $0x1bd0] sm:$0xff] }
 0x249   : > { %7422 = vmatpush2.bf16.msra.mxu1 %v10933_v42  ;;  %7382 = vmatprep.subr.bf16.mxu0 %v10662_v43  ;;  %v11350_v33 = vcombine.high %v1658_v30, %v1666_v31  ;;  %v1386_v34 = vld [vmem:[%s12732_s18 + $0x1310] sm:$0xff]  ;;  %v11093_v42 = vcombine.low %v1402_v23, %v1410_v27  ;;  %v11349_v51 = vcombine.low %v1658_v30, %v1666_v31 }
 0x24a   : > { %7423 = vmatprep.subr.bf16.mxu1 %v10918_v50  ;;  %v1394_v38 = vld [vmem:[%s12732_s18 + $0x1350] sm:$0xff] }
 0x24b   : > { %v1642_v43 = vld [vmem:[%s12732_s18 + $0x1b10] sm:$0xff]  ;;  %v11078_v52 = vcombine.high %v1386_v34, %v1394_v38  ;;  %v11077_v57 = vcombine.low %v1386_v34, %v1394_v38 }
 0x24c   : > { %7383 = vmatpush2.bf16.msra.mxu0 %v10661_v35  ;;  %v1650_v50 = vld [vmem:[%s12732_s18 + $0x1b50] sm:$0xff] }
 0x24d   : > { %7424 = vmatpush2.bf16.msra.mxu1 %v10917_v36  ;;  %7384 = vmatprep.subr.bf16.mxu0 %v10646_v37  ;;  %v1370_v53 = vld [vmem:[%s12732_s18 + $0x1290] sm:$0xff]  ;;  %v11334_v36 = vcombine.high %v1642_v43, %v1650_v50 }
 0x24e   : > { %7425 = vmatprep.subr.bf16.mxu1 %v10902_v39  ;;  %v1378_v54 = vld [vmem:[%s12732_s18 + $0x12d0] sm:$0xff] }
 0x24f   : > { %v1626_v37 = vld [vmem:[%s12732_s18 + $0x1a90] sm:$0xff]  ;;  %v11061_v16 = vcombine.low %v1370_v53, %v1378_v54 }
 0x250   : > { %7385 = vmatpush2.bf16.msra.mxu0 %v10645_v60  ;;  %v1634_v39 = vld [vmem:[%s12732_s18 + $0x1ad0] sm:$0xff]  ;;  %v11333_v60 = vcombine.low %v1642_v43, %v1650_v50 }
 0x251   : > { %7426 = vmatpush2.bf16.msra.mxu1 %v10901_v63  ;;  %7386 = vmatprep.subr.bf16.mxu0 %v10630_v2  ;;  %v11062_v63 = vcombine.high %v1370_v53, %v1378_v54  ;;  %v11318_v4 = vcombine.high %v1626_v37, %v1634_v39  ;;  %v1354_v6 = vld [vmem:[%s12732_s18 + $0x1210] sm:$0xff]  ;;  %v11317_v17 = vcombine.low %v1626_v37, %v1634_v39 }
 0x252   : > { %7427 = vmatprep.subr.bf16.mxu1 %v10886_v3  ;;  %v1362_v8 = vld [vmem:[%s12732_s18 + $0x1250] sm:$0xff] }
 0x253   : > { %v11046_v18 = vcombine.high %v1354_v6, %v1362_v8  ;;  %v1602_v23 = vld [vmem:[%s12732_s18 + $0x19d0] sm:$0xff]  ;;  %v11045_v27 = vcombine.low %v1354_v6, %v1362_v8 }
 0x254   : > { %7387 = vmatpush2.bf16.msra.mxu0 %v10629_v11  ;;  %v1610_v11 = vld [vmem:[%s12732_s18 + $0x1a10] sm:$0xff] }
 0x255   : > { %7428 = vmatpush2.bf16.msra.mxu1 %v10885_v12  ;;  %7388 = vmatprep.subr.bf16.mxu0 %v10614_v13  ;;  %v1618_v12 = vld [vmem:[%s12732_s18 + $0x1a50] sm:$0xff] }
 0x256   : > { %7429 = vmatprep.subr.bf16.mxu1 %v10870_v14  ;;  %v11301_v30 = vcombine.low %v1610_v11, %v1618_v12  ;;  %v1586_v34 = vld [vmem:[%s12732_s18 + $0x1950] sm:$0xff] }
 0x257   : > { %v1562_v53 = vld [vmem:[%s12732_s18 + $0x1890] sm:$0xff] }
 0x258   : > { %7389 = vmatpush2.bf16.msra.mxu0 %v10613_v20  ;;  %v11302_v20 = vcombine.high %v1610_v11, %v1618_v12  ;;  %v1570_v54 = vld [vmem:[%s12732_s18 + $0x18d0] sm:$0xff] }
 0x259   : > { %7430 = vmatpush2.bf16.msra.mxu1 %v10869_v46  ;;  %7390 = vmatprep.subr.bf16.mxu0 %v10598_v21  ;;  %v1338_v46 = vld [vmem:[%s12732_s18 + $0x1190] sm:$0xff]  ;;  %v11254_v39 = vcombine.high %v1562_v53, %v1570_v54 }
 0x25a   : > { %7431 = vmatprep.subr.bf16.mxu1 %v10854_v22  ;;  %v1346_v21 = vld [vmem:[%s12732_s18 + $0x11d0] sm:$0xff] }
 0x25b   : > { %v1594_v22 = vld [vmem:[%s12732_s18 + $0x1990] sm:$0xff]  ;;  %v11030_v31 = vcombine.high %v1338_v46, %v1346_v21  ;;  %v11029_v38 = vcombine.low %v1338_v46, %v1346_v21 }
 0x25c   : > { %7391 = vmatpush2.bf16.msra.mxu0 %v10597_v7  ;;  %v11286_v7 = vcombine.high %v1594_v22, %v1602_v23  ;;  %v1538_v6 = vld [vmem:[%s12732_s18 + $0x17d0] sm:$0xff] }
 0x25d   : > { %7432 = vmatpush2.bf16.msra.mxu1 %v10853_v5  ;;  %7442 = vmatprep.subr.bf16.mxu0 %v11094_v32  ;;  %v1322_v5 = vld [vmem:[%s12732_s18 + $0x1110] sm:$0xff] }
 0x25e   : > { %7483 = vmatprep.subr.bf16.mxu1 %v11350_v33  ;;  %v1330_v32 = vld [vmem:[%s12732_s18 + $0x1150] sm:$0xff] }
 0x25f   : > { %v7148_v35 = vpop.f32.mrf.mxu0  ;;  %7393 = vmatmul.mubr.bf16.vlgmr.msra.gmra.mxu0 %v12878_v25  ;;  %v1578_v33 = vld [vmem:[%s12732_s18 + $0x1910] sm:$0xff]  ;;  %v11014_v43 = vcombine.high %v1322_v5, %v1330_v32 }
 0x260   : > { %v7149_v55 = vadd.f32 %v7148_v35, %v13130_v58  ;;  %v7189_v56 = vpop.f32.mrf.mxu1  ;;  %7434 = vmatmul.mubr.bf16.vlgmr.msra.gmra.mxu1 %v12882_v28  ;;  %7443 = vmatpush1.bf16.msra.mxu0 %v11093_v42  ;;  %v11285_v42 = vcombine.low %v1594_v22, %v1602_v23  ;;  %v11270_v50 = vcombine.high %v1578_v33, %v1586_v34  ;;  %v1786_v8 = vld [vmem:[%s12732_s18 + $0x1f90] sm:$0xff] }
 0x261   : > { %7474 = vmatprep.mubr.bf16.mxu0 %v12902_v40  ;;  %7484 = vmatpush1.bf16.msra.mxu1 %v11349_v51  ;;  %v7150_v59 = vpop.f32.mrf.mxu0  ;;  %v1306_v51 = vld [vmem:[%s12732_s18 + $0x1090] sm:$0xff]  ;;  %v11013_v35 = vcombine.low %v1322_v5, %v1330_v32 }
 0x262   : > { %v13203_v2 = vadd.f32 %v7189_v56, %v7149_v55  ;;  %7515 = vmatprep.mubr.bf16.mxu1 %v12904_v41  ;;  %v7151_v58 = vadd.f32 %v7150_v59, %v13137_v9  ;;  %v7191_v3 = vpop.f32.mrf.mxu1  ;;  %7444 = vmatprep.subr.bf16.mxu0 %v11078_v52  ;;  %v1314_v52 = vld [vmem:[%s12732_s18 + $0x10d0] sm:$0xff] }
 0x263   : > { %v7152_v10 = vpop.f32.mrf.mxu0  ;;  %7485 = vmatprep.subr.bf16.mxu1 %v11334_v36  ;;  %v11269_v36 = vcombine.low %v1578_v33, %v1586_v34  ;;  %v10998_v37 = vcombine.high %v1306_v51, %v1314_v52  ;;  %v1290_v55 = vld [vmem:[%s12732_s18 + $0x1010] sm:$0xff] }
 0x264   : > { %v13211_v13 = vadd.f32 %v7191_v3, %v7151_v58  ;;  %v7193_v14 = vpop.f32.mrf.mxu1  ;;  %7445 = vmatpush1.bf16.msra.mxu0 %v11077_v57  ;;  %v1298_v56 = vld [vmem:[%s12732_s18 + $0x1050] sm:$0xff] }
 0x265   : > { %7486 = vmatpush1.bf16.msra.mxu1 %v11333_v60  ;;  %v7153_v9 = vpop.f32.mrf.mxu0  ;;  %7446 = vmatprep.subr.bf16.mxu0 %v11062_v63  ;;  %v1546_v57 = vld [vmem:[%s12732_s18 + $0x1810] sm:$0xff]  ;;  %v10997_v60 = vcombine.low %v1306_v51, %v1314_v52  ;;  %v11253_v63 = vcombine.low %v1562_v53, %v1570_v54  ;;  %v10982_v58 = vcombine.high %v1290_v55, %v1298_v56 }
 0x266   : > { %v7194_v19 = vpop.f32.mrf.mxu1  ;;  %7487 = vmatprep.subr.bf16.mxu1 %v11318_v4  ;;  %v1554_v59 = vld [vmem:[%s12732_s18 + $0x1850] sm:$0xff]  ;;  %v10981_v11 = vcombine.low %v1290_v55, %v1298_v56  ;;  %12268 = vtanh.f32 %v13211_v13 }
 0x267   : > { %v11238_v3 = vcombine.high %v1546_v57, %v1554_v59  ;;  %v1530_v4 = vld [vmem:[%s12732_s18 + $0x1790] sm:$0xff]  ;;  %v11237_v12 = vcombine.low %v1546_v57, %v1554_v59 }
 0x268   : > { %7447 = vmatpush1.bf16.msra.mxu0 %v11061_v16  ;;  %v1794_v10 = vld [vmem:[%s12732_s18 + $0x1fd0] sm:$0xff]  ;;  %v11222_v14 = vcombine.high %v1530_v4, %v1538_v6 }
 0x269   : > { %7488 = vmatpush1.bf16.msra.mxu1 %v11317_v17  ;;  %7448 = vmatprep.subr.bf16.mxu0 %v11046_v18  ;;  %v11478_v16 = vcombine.high %v1786_v8, %v1794_v10  ;;  %v1514_v9 = vld [vmem:[%s12732_s18 + $0x1710] sm:$0xff]  ;;  %v11477_v46 = vcombine.low %v1786_v8, %v1794_v10 }
 0x26a   : > { %7489 = vmatprep.subr.bf16.mxu1 %v11302_v20  ;;  %v1522_v17 = vld [vmem:[%s12732_s18 + $0x1750] sm:$0xff]  ;;  %v11221_v20 = vcombine.low %v1530_v4, %v1538_v6 }
 0x26b   : > { %v1770_v18 = vld [vmem:[%s12732_s18 + $0x1f10] sm:$0xff]  ;;  %v11206_v21 = vcombine.high %v1514_v9, %v1522_v17 }
 0x26c   : > { %7449 = vmatpush1.bf16.msra.mxu0 %v11045_v27  ;;  %v1778_v19 = vld [vmem:[%s12732_s18 + $0x1f50] sm:$0xff] }
 0x26d   : > { %7490 = vmatpush1.bf16.msra.mxu1 %v11301_v30  ;;  %7450 = vmatprep.subr.bf16.mxu0 %v11030_v31  ;;  %v11462_v22 = vcombine.high %v1770_v18, %v1778_v19  ;;  %v1498_v23 = vld [vmem:[%s12732_s18 + $0x1690] sm:$0xff]  ;;  %v11461_v5 = vcombine.low %v1770_v18, %v1778_v19 }
 0x26e   : > { %7491 = vmatprep.subr.bf16.mxu1 %v11286_v7  ;;  %v1506_v27 = vld [vmem:[%s12732_s18 + $0x16d0] sm:$0xff]  ;;  %v11205_v7 = vcombine.low %v1514_v9, %v1522_v17 }
 0x26f   : > { %v1754_v30 = vld [vmem:[%s12732_s18 + $0x1e90] sm:$0xff]  ;;  %v11190_v32 = vcombine.high %v1498_v23, %v1506_v27 }
 0x270   : > { %7451 = vmatpush1.bf16.msra.mxu0 %v11029_v38  ;;  %v1762_v31 = vld [vmem:[%s12732_s18 + $0x1ed0] sm:$0xff] }
 0x271   : > { %7492 = vmatpush1.bf16.msra.mxu1 %v11285_v42  ;;  %7452 = vmatprep.subr.bf16.mxu0 %v11014_v43  ;;  %v11446_v33 = vcombine.high %v1754_v30, %v1762_v31  ;;  %v1482_v34 = vld [vmem:[%s12732_s18 + $0x1610] sm:$0xff]  ;;  %v11445_v51 = vcombine.low %v1754_v30, %v1762_v31  ;;  %v891_v31 = vld [vmem:[%s12732_s18 + $0x398] sm:$0xff] }
 0x272   : > { %7493 = vmatprep.subr.bf16.mxu1 %v11270_v50  ;;  %v1490_v38 = vld [vmem:[%s12732_s18 + $0x1650] sm:$0xff]  ;;  %v11189_v50 = vcombine.low %v1498_v23, %v1506_v27 }
 0x273   : > { %v1738_v42 = vld [vmem:[%s12732_s18 + $0x1e10] sm:$0xff]  ;;  %v11174_v52 = vcombine.high %v1482_v34, %v1490_v38 }
 0x274   : > { %7453 = vmatpush1.bf16.msra.mxu0 %v11013_v35  ;;  %v1746_v43 = vld [vmem:[%s12732_s18 + $0x1e50] sm:$0xff] }
 0x275   : > { %7494 = vmatpush1.bf16.msra.mxu1 %v11269_v36  ;;  %7454 = vmatprep.subr.bf16.mxu0 %v10998_v37  ;;  %v11430_v53 = vcombine.high %v1738_v42, %v1746_v43  ;;  %v1466_v54 = vld [vmem:[%s12732_s18 + $0x1590] sm:$0xff]  ;;  %v11429_v55 = vcombine.low %v1738_v42, %v1746_v43  ;;  %v875_v43 = vld [vmem:[%s12732_s18 + $0x318] sm:$0xff] }
 0x276   : > { %7495 = vmatprep.subr.bf16.mxu1 %v11254_v39  ;;  %v1474_v35 = vld [vmem:[%s12732_s18 + $0x15d0] sm:$0xff]  ;;  %v11173_v39 = vcombine.low %v1482_v34, %v1490_v38 }
 0x277   : > { %v1722_v36 = vld [vmem:[%s12732_s18 + $0x1d90] sm:$0xff]  ;;  %v11158_v56 = vcombine.high %v1466_v54, %v1474_v35 }
 0x278   : > { %7455 = vmatpush1.bf16.msra.mxu0 %v10997_v60  ;;  %v1730_v37 = vld [vmem:[%s12732_s18 + $0x1dd0] sm:$0xff] }
 0x279   : > { %7496 = vmatpush1.bf16.msra.mxu1 %v11253_v63  ;;  %7456 = vmatprep.subr.bf16.mxu0 %v10982_v58  ;;  %v11414_v57 = vcombine.high %v1722_v36, %v1730_v37  ;;  %v1450_v59 = vld [vmem:[%s12732_s18 + $0x1510] sm:$0xff]  ;;  %v11413_v4 = vcombine.low %v1722_v36, %v1730_v37  ;;  %v1819_v36 = vrot.slane %v13113_v29, %v12848_v49 }
 0x27a   : > { %7497 = vmatprep.subr.bf16.mxu1 %v11238_v3  ;;  %v1458_v60 = vld [vmem:[%s12732_s18 + $0x1550] sm:$0xff]  ;;  %v11157_v3 = vcombine.low %v1466_v54, %v1474_v35  ;;  %v1139_v54 = vld [vmem:[%s12732_s18 + $0xb58] sm:$0xff] }
 0x27b   : > { %v1706_v63 = vld [vmem:[%s12732_s18 + $0x1d10] sm:$0xff]  ;;  %v11142_v6 = vcombine.high %v1450_v59, %v1458_v60 }
 0x27c   : > { %7457 = vmatpush1.bf16.msra.mxu0 %v10981_v11  ;;  %v1714_v58 = vld [vmem:[%s12732_s18 + $0x1d50] sm:$0xff] }
 0x27d   : > { %7498 = vmatpush1.bf16.msra.mxu1 %v11237_v12  ;;  %7458 = vmatprep.subr.bf16.mxu0 %v11222_v14  ;;  %v11398_v8 = vcombine.high %v1706_v63, %v1714_v58  ;;  %v1434_v10 = vld [vmem:[%s12732_s18 + $0x1490] sm:$0xff]  ;;  %v11397_v9 = vcombine.low %v1706_v63, %v1714_v58 }
 0x27e   : > { %7499 = vmatprep.subr.bf16.mxu1 %v11478_v16  ;;  %v1442_v11 = vld [vmem:[%s12732_s18 + $0x14d0] sm:$0xff]  ;;  %v11141_v16 = vcombine.low %v1450_v59, %v1458_v60  ;;  %v1115_v59 = vld [vmem:[%s12732_s18 + $0xa98] sm:$0xff] }
 0x27f   : > { %v1690_v12 = vld [vmem:[%s12732_s18 + $0x1c90] sm:$0xff]  ;;  %v11126_v17 = vcombine.high %v1434_v10, %v1442_v11  ;;  %v1123_v60 = vld [vmem:[%s12732_s18 + $0xad8] sm:$0xff] }
 0x280   : > { %7459 = vmatpush2.bf16.msra.mxu0 %v11221_v20  ;;  %v1698_v14 = vld [vmem:[%s12732_s18 + $0x1cd0] sm:$0xff] }
 0x281   : > { %7500 = vmatpush2.bf16.msra.mxu1 %v11477_v46  ;;  %7460 = vmatprep.subr.bf16.mxu0 %v11206_v21  ;;  %v11382_v18 = vcombine.high %v1690_v12, %v1698_v14  ;;  %v1418_v19 = vld [vmem:[%s12732_s18 + $0x1410] sm:$0xff]  ;;  %v11381_v23 = vcombine.low %v1690_v12, %v1698_v14  ;;  %v10808_v12 = vcombine.high %v1115_v59, %v1123_v60  ;;  %v843_v14 = vld [vmem:[%s12732_s18 + $0x218] sm:$0xff] }
 0x282   : > { %7501 = vmatprep.subr.bf16.mxu1 %v11462_v22  ;;  %v1426_v20 = vld [vmem:[%s12732_s18 + $0x1450] sm:$0xff]  ;;  %v11125_v22 = vcombine.low %v1434_v10, %v1442_v11 }
 0x283   : > { %v1674_v46 = vld [vmem:[%s12732_s18 + $0x1c10] sm:$0xff]  ;;  %v11110_v27 = vcombine.high %v1418_v19, %v1426_v20 }
 0x284   : > { %7461 = vmatpush2.bf16.msra.mxu0 %v11205_v7  ;;  %v1682_v21 = vld [vmem:[%s12732_s18 + $0x1c50] sm:$0xff]  ;;  %v899_v7 = vld [vmem:[%s12732_s18 + $0x3d8] sm:$0xff] }
 0x285   : > { %7502 = vmatpush2.bf16.msra.mxu1 %v11461_v5  ;;  %7462 = vmatprep.subr.bf16.mxu0 %v11190_v32  ;;  %v11366_v30 = vcombine.high %v1674_v46, %v1682_v21  ;;  %v1147_v5 = vld [vmem:[%s12732_s18 + $0xb98] sm:$0xff]  ;;  %v11365_v34 = vcombine.low %v1674_v46, %v1682_v21  ;;  %v10584_v38 = vcombine.high %v891_v31, %v899_v7 }
 0x286   : > { %7503 = vmatprep.subr.bf16.mxu1 %v11446_v33  ;;  %v1155_v32 = vld [vmem:[%s12732_s18 + $0xbd8] sm:$0xff]  ;;  %v11109_v33 = vcombine.low %v1418_v19, %v1426_v20 }
 0x287   : > { %v10840_v42 = vcombine.high %v1147_v5, %v1155_v32  ;;  %v10839_v35 = vcombine.low %v1147_v5, %v1155_v32  ;;  %v1083_v5 = vld [vmem:[%s12732_s18 + $0x998] sm:$0xff] }
 0x288   : > { %7463 = vmatpush2.bf16.msra.mxu0 %v11189_v50  ;;  %v883_v50 = vld [vmem:[%s12732_s18 + $0x358] sm:$0xff] }
 0x289   : > { %7504 = vmatpush2.bf16.msra.mxu1 %v11445_v51  ;;  %7464 = vmatprep.subr.bf16.mxu0 %v11174_v52  ;;  %v1815_v51 = vrot.slane %v13113_v29, %v12842_v47  ;;  %v10583_v52 = vcombine.low %v891_v31, %v899_v7  ;;  %v10568_v37 = vcombine.high %v875_v43, %v883_v50  ;;  %v827_v31 = vld [vmem:[%s12732_s18 + $0x198] sm:$0xff] }
 0x28a   : > { %7505 = vmatprep.subr.bf16.mxu1 %v11430_v53  ;;  %v1131_v53 = vld [vmem:[%s12732_s18 + $0xb18] sm:$0xff] }
 0x28b   : > { %v835_v7 = vld [vmem:[%s12732_s18 + $0x1d8] sm:$0xff] }
 0x28c   : > { %7465 = vmatpush2.bf16.msra.mxu0 %v11173_v39  ;;  %v859_v39 = vld [vmem:[%s12732_s18 + $0x298] sm:$0xff] }
 0x28d   : > { %7506 = vmatpush2.bf16.msra.mxu1 %v11429_v55  ;;  %7466 = vmatprep.subr.bf16.mxu0 %v11158_v56  ;;  %v867_v55 = vld [vmem:[%s12732_s18 + $0x2d8] sm:$0xff] }
 0x28e   : > { %7507 = vmatprep.subr.bf16.mxu1 %v11414_v57  ;;  %v10824_v57 = vcombine.high %v1131_v53, %v1139_v54  ;;  %v10551_v46 = vcombine.low %v859_v39, %v867_v55  ;;  %v1091_v32 = vld [vmem:[%s12732_s18 + $0x9d8] sm:$0xff] }
 0x290   : > { %7467 = vmatpush2.bf16.msra.mxu0 %v11157_v3  ;;  %v10567_v3 = vcombine.low %v875_v43, %v883_v50  ;;  %v811_v43 = vld [vmem:[%s12732_s18 + $0x118] sm:$0xff] }
 0x291   : > { %7508 = vmatpush2.bf16.msra.mxu1 %v11413_v4  ;;  %7468 = vmatprep.subr.bf16.mxu0 %v11142_v6  ;;  %v10823_v4 = vcombine.low %v1131_v53, %v1139_v54  ;;  %v10552_v6 = vcombine.high %v859_v39, %v867_v55  ;;  %v819_v50 = vld [vmem:[%s12732_s18 + $0x158] sm:$0xff]  ;;  %v10519_v53 = vcombine.low %v827_v31, %v835_v7 }
 0x292   : > { %7509 = vmatprep.subr.bf16.mxu1 %v11398_v8  ;;  %v10775_v54 = vcombine.low %v1083_v5, %v1091_v32  ;;  %v803_v39 = vld [vmem:[%s12732_s18 + $0xd8] sm:$0xff] }
 0x293   : > { %v1051_v55 = vld [vmem:[%s12732_s18 + $0x898] sm:$0xff] }
 0x294   : > { %7469 = vmatpush2.bf16.msra.mxu0 %v11141_v16  ;;  %v851_v16 = vld [vmem:[%s12732_s18 + $0x258] sm:$0xff] }
 0x295   : > { %7510 = vmatpush2.bf16.msra.mxu1 %v11397_v9  ;;  %7470 = vmatprep.subr.bf16.mxu0 %v11126_v17  ;;  %v1099_v17 = vld [vmem:[%s12732_s18 + $0xa18] sm:$0xff] }
 0x296   : > { %7511 = vmatprep.subr.bf16.mxu1 %v11382_v18  ;;  %v1107_v18 = vld [vmem:[%s12732_s18 + $0xa58] sm:$0xff] }
 0x298   : > { %7471 = vmatpush2.bf16.msra.mxu0 %v11125_v22  ;;  %v10807_v22 = vcombine.low %v1115_v59, %v1123_v60 }
 0x299   : > { %7512 = vmatpush2.bf16.msra.mxu1 %v11381_v23  ;;  %7472 = vmatprep.subr.bf16.mxu0 %v11110_v27  ;;  %v10536_v23 = vcombine.high %v843_v14, %v851_v16 }
 0x29a   : > { %7513 = vmatprep.subr.bf16.mxu1 %v11366_v30  ;;  %v10792_v30 = vcombine.high %v1099_v17, %v1107_v18 }
 0x29c   : > { %7473 = vmatpush2.bf16.msra.mxu0 %v11109_v33  ;;  %v10535_v33 = vcombine.low %v843_v14, %v851_v16  ;;  %v1019_v14 = vld [vmem:[%s12732_s18 + $0x798] sm:$0xff] }
 0x29d   : > { %7514 = vmatpush2.bf16.msra.mxu1 %v11365_v34  ;;  %7524 = vmatprep.subr.bf16.mxu0 %v10584_v38  ;;  %v10791_v34 = vcombine.low %v1099_v17, %v1107_v18  ;;  %v10520_v38 = vcombine.high %v827_v31, %v835_v7  ;;  %v1027_v16 = vld [vmem:[%s12732_s18 + $0x7d8] sm:$0xff] }
 0x29e   : > { %7565 = vmatprep.subr.bf16.mxu1 %v10840_v42  ;;  %v10776_v42 = vcombine.high %v1083_v5, %v1091_v32  ;;  %v1283_v17 = vld [vmem:[%s12732_s18 + $0xfd8] sm:$0xff]  ;;  %v10711_v31 = vcombine.low %v1019_v14, %v1027_v16 }
 0x29f   : > { %v7230_v56 = vpop.f32.mrf.mxu0  ;;  %7475 = vmatmul.mubr.bf16.vlgmr.msra.gmra.mxu0 %v12978_v15 }
 0x2a0   : > { %v7231_v63 = vadd.f32 %v7230_v56, %v1815_v51  ;;  %v7271_v58 = vpop.f32.mrf.mxu1  ;;  %7516 = vmatmul.mubr.bf16.vlgmr.msra.gmra.mxu1 %v12974_v44  ;;  %7525 = vmatpush1.bf16.msra.mxu0 %v10583_v52  ;;  %v1067_v51 = vld [vmem:[%s12732_s18 + $0x918] sm:$0xff] }
 0x2a1   : > { %7556 = vmatprep.mubr.bf16.mxu0 %v12876_v24  ;;  %7566 = vmatpush1.bf16.msra.mxu1 %v10839_v35  ;;  %v7232_v29 = vpop.f32.mrf.mxu0  ;;  %v1075_v52 = vld [vmem:[%s12732_s18 + $0x958] sm:$0xff]  ;;  %v10504_v35 = vcombine.high %v811_v43, %v819_v50 }
 0x2a2   : > { %v13280_v8 = vadd.f32 %v7271_v58, %v7231_v63  ;;  %7597 = vmatprep.mubr.bf16.mxu1 %v12880_v26  ;;  %v7233_v10 = vadd.f32 %v7232_v29, %v1819_v36  ;;  %v7273_v11 = vpop.f32.mrf.mxu1  ;;  %7526 = vmatprep.subr.bf16.mxu0 %v10568_v37  ;;  %v10760_v36 = vcombine.high %v1067_v51, %v1075_v52  ;;  %v795_v37 = vld [vmem:[%s12732_s18 + $0x98] sm:$0xff] }
 0x2a3   : > { %v7234_v9 = vpop.f32.mrf.mxu0  ;;  %7567 = vmatprep.subr.bf16.mxu1 %v10824_v57  ;;  %v1059_v56 = vld [vmem:[%s12732_s18 + $0x8d8] sm:$0xff]  ;;  %v10503_v57 = vcombine.low %v811_v43, %v819_v50  ;;  %v10759_v59 = vcombine.low %v1067_v51, %v1075_v52  ;;  %v10488_v60 = vcombine.high %v795_v37, %v803_v39 }
 0x2a4   : > { %v13287_v19 = vadd.f32 %v7273_v11, %v7233_v10  ;;  %v7275_v20 = vpop.f32.mrf.mxu1  ;;  %7527 = vmatpush1.bf16.msra.mxu0 %v10567_v3  ;;  %v10744_v63 = vcombine.high %v1051_v55, %v1059_v56  ;;  %v779_v58 = vld [vmem:[%s12732_s18 + $0x18] sm:$0xff]  ;;  %v10743_v10 = vcombine.low %v1051_v55, %v1059_v56 }
 0x2a5   : > { %7568 = vmatpush1.bf16.msra.mxu1 %v10823_v4  ;;  %v7235_v21 = vpop.f32.mrf.mxu0  ;;  %7528 = vmatprep.subr.bf16.mxu0 %v10552_v6  ;;  %v787_v3 = vld [vmem:[%s12732_s18 + $0x58] sm:$0xff]  ;;  %v10487_v6 = vcombine.low %v795_v37, %v803_v39 }
 0x2a6   : > { %v7276_v27 = vpop.f32.mrf.mxu1  ;;  %7569 = vmatprep.subr.bf16.mxu1 %v10808_v12  ;;  %v1035_v29 = vld [vmem:[%s12732_s18 + $0x818] sm:$0xff]  ;;  %v10472_v11 = vcombine.high %v779_v58, %v787_v3  ;;  %v10471_v18 = vcombine.low %v779_v58, %v787_v3 }
 0x2a7   : > { %v1043_v4 = vld [vmem:[%s12732_s18 + $0x858] sm:$0xff] }
 0x2a8   : > { %7529 = vmatpush1.bf16.msra.mxu0 %v10551_v46  ;;  %v10728_v12 = vcombine.high %v1035_v29, %v1043_v4  ;;  %v1275_v9 = vld [vmem:[%s12732_s18 + $0xf98] sm:$0xff]  ;;  %v10727_v20 = vcombine.low %v1035_v29, %v1043_v4  ;;  %v10712_v46 = vcombine.high %v1019_v14, %v1027_v16 }
 0x2a9   : > { %7570 = vmatpush1.bf16.msra.mxu1 %v10807_v22  ;;  %7530 = vmatprep.subr.bf16.mxu0 %v10536_v23  ;;  %v10968_v21 = vcombine.high %v1275_v9, %v1283_v17  ;;  %v1003_v22 = vld [vmem:[%s12732_s18 + $0x718] sm:$0xff]  ;;  %v10967_v7 = vcombine.low %v1275_v9, %v1283_v17 }
 0x2aa   : > { %7571 = vmatprep.subr.bf16.mxu1 %v10792_v30  ;;  %v1011_v23 = vld [vmem:[%s12732_s18 + $0x758] sm:$0xff] }
 0x2ab   : > { %v1259_v27 = vld [vmem:[%s12732_s18 + $0xf18] sm:$0xff]  ;;  %v10696_v5 = vcombine.high %v1003_v22, %v1011_v23  ;;  %v10695_v43 = vcombine.low %v1003_v22, %v1011_v23 }
 0x2ac   : > { %7531 = vmatpush1.bf16.msra.mxu0 %v10535_v33  ;;  %v1267_v30 = vld [vmem:[%s12732_s18 + $0xf58] sm:$0xff] }
 0x2ad   : > { %7572 = vmatpush1.bf16.msra.mxu1 %v10791_v34  ;;  %7532 = vmatprep.subr.bf16.mxu0 %v10520_v38  ;;  %v10952_v32 = vcombine.high %v1259_v27, %v1267_v30  ;;  %v987_v33 = vld [vmem:[%s12732_s18 + $0x698] sm:$0xff]  ;;  %v10951_v50 = vcombine.low %v1259_v27, %v1267_v30 }
 0x2ae   : > { %7573 = vmatprep.subr.bf16.mxu1 %v10776_v42  ;;  %v995_v34 = vld [vmem:[%s12732_s18 + $0x6d8] sm:$0xff] }
 0x2af   : > { %v1243_v38 = vld [vmem:[%s12732_s18 + $0xe98] sm:$0xff]  ;;  %v10680_v51 = vcombine.high %v987_v33, %v995_v34  ;;  %v10679_v37 = vcombine.low %v987_v33, %v995_v34 }
 0x2b0   : > { %7533 = vmatpush1.bf16.msra.mxu0 %v10519_v53  ;;  %v1251_v42 = vld [vmem:[%s12732_s18 + $0xed8] sm:$0xff] }
 0x2b1   : > { %7574 = vmatpush1.bf16.msra.mxu1 %v10775_v54  ;;  %7534 = vmatprep.subr.bf16.mxu0 %v10504_v35  ;;  %v10936_v52 = vcombine.high %v1243_v38, %v1251_v42  ;;  %v971_v53 = vld [vmem:[%s12732_s18 + $0x618] sm:$0xff]  ;;  %v10935_v39 = vcombine.low %v1243_v38, %v1251_v42 }
 0x2b2   : > { %7575 = vmatprep.subr.bf16.mxu1 %v10760_v36  ;;  %v979_v54 = vld [vmem:[%s12732_s18 + $0x658] sm:$0xff] }
 0x2b3   : > { %v1227_v35 = vld [vmem:[%s12732_s18 + $0xe18] sm:$0xff]  ;;  %v10664_v55 = vcombine.high %v971_v53, %v979_v54  ;;  %v10663_v58 = vcombine.low %v971_v53, %v979_v54 }
 0x2b4   : > { %7535 = vmatpush1.bf16.msra.mxu0 %v10503_v57  ;;  %v1235_v36 = vld [vmem:[%s12732_s18 + $0xe58] sm:$0xff] }
 0x2b5   : > { %7576 = vmatpush1.bf16.msra.mxu1 %v10759_v59  ;;  %7536 = vmatprep.subr.bf16.mxu0 %v10488_v60  ;;  %v10920_v56 = vcombine.high %v1227_v35, %v1235_v36  ;;  %v955_v57 = vld [vmem:[%s12732_s18 + $0x598] sm:$0xff]  ;;  %v10919_v3 = vcombine.low %v1227_v35, %v1235_v36 }
 0x2b6   : > { %7577 = vmatprep.subr.bf16.mxu1 %v10744_v63  ;;  %v963_v59 = vld [vmem:[%s12732_s18 + $0x5d8] sm:$0xff] }
 0x2b7   : > { %v1211_v60 = vld [vmem:[%s12732_s18 + $0xd98] sm:$0xff]  ;;  %v10648_v29 = vcombine.high %v955_v57, %v963_v59  ;;  %v10647_v14 = vcombine.low %v955_v57, %v963_v59 }
 0x2b8   : > { %7537 = vmatpush1.bf16.msra.mxu0 %v10487_v6  ;;  %v1219_v63 = vld [vmem:[%s12732_s18 + $0xdd8] sm:$0xff] }
 0x2b9   : > { %7578 = vmatpush1.bf16.msra.mxu1 %v10743_v10  ;;  %7538 = vmatprep.subr.bf16.mxu0 %v10472_v11  ;;  %v10904_v4 = vcombine.high %v1211_v60, %v1219_v63  ;;  %v939_v6 = vld [vmem:[%s12732_s18 + $0x518] sm:$0xff]  ;;  %v10903_v16 = vcombine.low %v1211_v60, %v1219_v63 }
 0x2ba   : > { %7579 = vmatprep.subr.bf16.mxu1 %v10728_v12  ;;  %v947_v10 = vld [vmem:[%s12732_s18 + $0x558] sm:$0xff] }
 0x2bb   : > { %v1195_v11 = vld [vmem:[%s12732_s18 + $0xd18] sm:$0xff]  ;;  %v10632_v9 = vcombine.high %v939_v6, %v947_v10  ;;  %v10631_v22 = vcombine.low %v939_v6, %v947_v10 }
 0x2bc   : > { %7539 = vmatpush1.bf16.msra.mxu0 %v10471_v18  ;;  %v1203_v12 = vld [vmem:[%s12732_s18 + $0xd58] sm:$0xff] }
 0x2bd   : > { %7580 = vmatpush1.bf16.msra.mxu1 %v10727_v20  ;;  %7540 = vmatprep.subr.bf16.mxu0 %v10712_v46  ;;  %v10888_v17 = vcombine.high %v1195_v11, %v1203_v12  ;;  %v923_v18 = vld [vmem:[%s12732_s18 + $0x498] sm:$0xff]  ;;  %v10887_v23 = vcombine.low %v1195_v11, %v1203_v12 }
 0x2be   : > { %7581 = vmatprep.subr.bf16.mxu1 %v10968_v21  ;;  %v931_v20 = vld [vmem:[%s12732_s18 + $0x4d8] sm:$0xff] }
 0x2bf   : > { %v1179_v46 = vld [vmem:[%s12732_s18 + $0xc98] sm:$0xff]  ;;  %v10616_v27 = vcombine.high %v923_v18, %v931_v20  ;;  %v10615_v33 = vcombine.low %v923_v18, %v931_v20 }
 0x2c0   : > { %7541 = vmatpush2.bf16.msra.mxu0 %v10711_v31  ;;  %v1187_v21 = vld [vmem:[%s12732_s18 + $0xcd8] sm:$0xff] }
 0x2c1   : > { %7582 = vmatpush2.bf16.msra.mxu1 %v10967_v7  ;;  %7542 = vmatprep.subr.bf16.mxu0 %v10696_v5  ;;  %v10872_v30 = vcombine.high %v1179_v46, %v1187_v21  ;;  %v907_v31 = vld [vmem:[%s12732_s18 + $0x418] sm:$0xff]  ;;  %v10871_v34 = vcombine.low %v1179_v46, %v1187_v21 }
 0x2c2   : > { %7583 = vmatprep.subr.bf16.mxu1 %v10952_v32  ;;  %v915_v7 = vld [vmem:[%s12732_s18 + $0x458] sm:$0xff] }
 0x2c3   : > { %v1163_v5 = vld [vmem:[%s12732_s18 + $0xc18] sm:$0xff]  ;;  %v10600_v38 = vcombine.high %v907_v31, %v915_v7  ;;  %v10599_v53 = vcombine.low %v907_v31, %v915_v7 }
 0x2c4   : > { %7543 = vmatpush2.bf16.msra.mxu0 %v10695_v43  ;;  %v1171_v32 = vld [vmem:[%s12732_s18 + $0xc58] sm:$0xff] }
 0x2c5   : > { %7584 = vmatpush2.bf16.msra.mxu1 %v10951_v50  ;;  %7544 = vmatprep.subr.bf16.mxu0 %v10680_v51  ;;  %v10856_v42 = vcombine.high %v1163_v5, %v1171_v32  ;;  %v1403_v43 = vld [vmem:[%s12732_s18 + $0x1398] sm:$0xff]  ;;  %v10855_v54 = vcombine.low %v1163_v5, %v1171_v32 }
 0x2c6   : > { %7585 = vmatprep.subr.bf16.mxu1 %v10936_v52  ;;  %v1411_v50 = vld [vmem:[%s12732_s18 + $0x13d8] sm:$0xff] }
 0x2c7   : > { %v1659_v51 = vld [vmem:[%s12732_s18 + $0x1b98] sm:$0xff]  ;;  %v11096_v35 = vcombine.high %v1403_v43, %v1411_v50 }
 0x2c8   : > { %7545 = vmatpush2.bf16.msra.mxu0 %v10679_v37  ;;  %v1667_v52 = vld [vmem:[%s12732_s18 + $0x1bd8] sm:$0xff] }
 0x2c9   : > { %7586 = vmatpush2.bf16.msra.mxu1 %v10935_v39  ;;  %7546 = vmatprep.subr.bf16.mxu0 %v10664_v55  ;;  %v11352_v36 = vcombine.high %v1659_v51, %v1667_v52  ;;  %v1387_v37 = vld [vmem:[%s12732_s18 + $0x1318] sm:$0xff]  ;;  %v11095_v55 = vcombine.low %v1403_v43, %v1411_v50  ;;  %v11351_v59 = vcombine.low %v1659_v51, %v1667_v52 }
 0x2ca   : > { %7587 = vmatprep.subr.bf16.mxu1 %v10920_v56  ;;  %v1395_v39 = vld [vmem:[%s12732_s18 + $0x1358] sm:$0xff] }
 0x2cb   : > { %v1643_v56 = vld [vmem:[%s12732_s18 + $0x1b18] sm:$0xff]  ;;  %v11080_v60 = vcombine.high %v1387_v37, %v1395_v39  ;;  %v11079_v12 = vcombine.low %v1387_v37, %v1395_v39 }
 0x2cc   : > { %7547 = vmatpush2.bf16.msra.mxu0 %v10663_v58  ;;  %v1651_v57 = vld [vmem:[%s12732_s18 + $0x1b58] sm:$0xff] }
 0x2cd   : > { %7588 = vmatpush2.bf16.msra.mxu1 %v10919_v3  ;;  %7548 = vmatprep.subr.bf16.mxu0 %v10648_v29  ;;  %v1371_v63 = vld [vmem:[%s12732_s18 + $0x1298] sm:$0xff]  ;;  %v11336_v29 = vcombine.high %v1643_v56, %v1651_v57 }
 0x2ce   : > { %7589 = vmatprep.subr.bf16.mxu1 %v10904_v4  ;;  %v1379_v58 = vld [vmem:[%s12732_s18 + $0x12d8] sm:$0xff] }
 0x2cf   : > { %v1627_v4 = vld [vmem:[%s12732_s18 + $0x1a98] sm:$0xff]  ;;  %v11063_v7 = vcombine.low %v1371_v63, %v1379_v58 }
 0x2d0   : > { %7549 = vmatpush2.bf16.msra.mxu0 %v10647_v14  ;;  %v1635_v6 = vld [vmem:[%s12732_s18 + $0x1ad8] sm:$0xff] }
 0x2d1   : > { %7590 = vmatpush2.bf16.msra.mxu1 %v10903_v16  ;;  %7550 = vmatprep.subr.bf16.mxu0 %v10632_v9  ;;  %v11335_v16 = vcombine.low %v1643_v56, %v1651_v57  ;;  %v11064_v9 = vcombine.high %v1371_v63, %v1379_v58  ;;  %v11320_v20 = vcombine.high %v1627_v4, %v1635_v6  ;;  %v1355_v46 = vld [vmem:[%s12732_s18 + $0x1218] sm:$0xff] }
 0x2d2   : > { %7591 = vmatprep.subr.bf16.mxu1 %v10888_v17  ;;  %v1363_v21 = vld [vmem:[%s12732_s18 + $0x1258] sm:$0xff]  ;;  %v11319_v5 = vcombine.low %v1627_v4, %v1635_v6 }
 0x2d3   : > { %v11048_v32 = vcombine.high %v1355_v46, %v1363_v21  ;;  %v1595_v43 = vld [vmem:[%s12732_s18 + $0x1998] sm:$0xff]  ;;  %v11047_v51 = vcombine.low %v1355_v46, %v1363_v21 }
 0x2d4   : > { %7551 = vmatpush2.bf16.msra.mxu0 %v10631_v22  ;;  %v1603_v50 = vld [vmem:[%s12732_s18 + $0x19d8] sm:$0xff] }
 0x2d5   : > { %7592 = vmatpush2.bf16.msra.mxu1 %v10887_v23  ;;  %7552 = vmatprep.subr.bf16.mxu0 %v10616_v27  ;;  %v1611_v23 = vld [vmem:[%s12732_s18 + $0x1a18] sm:$0xff]  ;;  %v11287_v56 = vcombine.low %v1595_v43, %v1603_v50 }
 0x2d6   : > { %7593 = vmatprep.subr.bf16.mxu1 %v10872_v30  ;;  %v1619_v27 = vld [vmem:[%s12732_s18 + $0x1a58] sm:$0xff] }
 0x2d7   : > { %v11303_v52 = vcombine.low %v1611_v23, %v1619_v27  ;;  %v1579_v37 = vld [vmem:[%s12732_s18 + $0x1918] sm:$0xff] }
 0x2d8   : > { %7553 = vmatpush2.bf16.msra.mxu0 %v10615_v33  ;;  %v1587_v39 = vld [vmem:[%s12732_s18 + $0x1958] sm:$0xff] }
 0x2d9   : > { %7594 = vmatpush2.bf16.msra.mxu1 %v10871_v34  ;;  %7554 = vmatprep.subr.bf16.mxu0 %v10600_v38  ;;  %v11304_v34 = vcombine.high %v1611_v23, %v1619_v27  ;;  %v1339_v38 = vld [vmem:[%s12732_s18 + $0x1198] sm:$0xff]  ;;  %v11271_v4 = vcombine.low %v1579_v37, %v1587_v39 }
 0x2da   : > { %7595 = vmatprep.subr.bf16.mxu1 %v10856_v42  ;;  %v1347_v42 = vld [vmem:[%s12732_s18 + $0x11d8] sm:$0xff] }
 0x2db   : > { %v1315_v63 = vld [vmem:[%s12732_s18 + $0x10d8] sm:$0xff] }
 0x2dc   : > { %7555 = vmatpush2.bf16.msra.mxu0 %v10599_v53  ;;  %v11032_v53 = vcombine.high %v1339_v38, %v1347_v42  ;;  %v1563_v58 = vld [vmem:[%s12732_s18 + $0x1898] sm:$0xff] }
 0x2dd   : > { %7596 = vmatpush2.bf16.msra.mxu1 %v10855_v54  ;;  %7606 = vmatprep.subr.bf16.mxu0 %v11096_v35  ;;  %v11288_v54 = vcombine.high %v1595_v43, %v1603_v50  ;;  %v1323_v35 = vld [vmem:[%s12732_s18 + $0x1118] sm:$0xff] }
 0x2de   : > { %7647 = vmatprep.subr.bf16.mxu1 %v11352_v36  ;;  %v1331_v36 = vld [vmem:[%s12732_s18 + $0x1158] sm:$0xff] }
 0x2df   : > { %v7312_v3 = vpop.f32.mrf.mxu0  ;;  %7557 = vmatmul.mubr.bf16.vlgmr.msra.gmra.mxu0 %v12878_v25  ;;  %v11016_v57 = vcombine.high %v1323_v35, %v1331_v36  ;;  %v1531_v46 = vld [vmem:[%s12732_s18 + $0x1798] sm:$0xff] }
 0x2e0   : > { %v7313_v10 = vadd.f32 %v7312_v3, %v13280_v8  ;;  %v7353_v11 = vpop.f32.mrf.mxu1  ;;  %7598 = vmatmul.mubr.bf16.vlgmr.msra.gmra.mxu1 %v12882_v28  ;;  %7607 = vmatpush1.bf16.msra.mxu0 %v11095_v55  ;;  %v11031_v55 = vcombine.low %v1339_v38, %v1347_v42  ;;  %v1571_v3 = vld [vmem:[%s12732_s18 + $0x18d8] sm:$0xff] }
 0x2e1   : > { %7638 = vmatprep.mubr.bf16.mxu0 %v12902_v40  ;;  %7648 = vmatpush1.bf16.msra.mxu1 %v11351_v59  ;;  %v7314_v14 = vpop.f32.mrf.mxu0  ;;  %v11272_v59 = vcombine.high %v1579_v37, %v1587_v39  ;;  %v1539_v21 = vld [vmem:[%s12732_s18 + $0x17d8] sm:$0xff] }
 0x2e2   : > { %v13353_v17 = vadd.f32 %v7353_v11, %v7313_v10  ;;  %7679 = vmatprep.mubr.bf16.mxu1 %v12904_v41  ;;  %v7315_v8 = vadd.f32 %v7314_v14, %v13287_v19  ;;  %v7355_v18 = vpop.f32.mrf.mxu1  ;;  %7608 = vmatprep.subr.bf16.mxu0 %v11080_v60  ;;  %v1307_v60 = vld [vmem:[%s12732_s18 + $0x1098] sm:$0xff]  ;;  %v11256_v10 = vcombine.high %v1563_v58, %v1571_v3 }
 0x2e3   : > { %v7316_v22 = vpop.f32.mrf.mxu0  ;;  %7649 = vmatprep.subr.bf16.mxu1 %v11336_v29  ;;  %v11015_v29 = vcombine.low %v1323_v35, %v1331_v36  ;;  %v11000_v6 = vcombine.high %v1307_v60, %v1315_v63  ;;  %v1291_v11 = vld [vmem:[%s12732_s18 + $0x1018] sm:$0xff]  ;;  %v11223_v38 = vcombine.low %v1531_v46, %v1539_v21 }
 0x2e4   : > { %v13361_v30 = vadd.f32 %v7355_v18, %v7315_v8  ;;  %v7357_v31 = vpop.f32.mrf.mxu1  ;;  %7609 = vmatpush1.bf16.msra.mxu0 %v11079_v12  ;;  %v1299_v12 = vld [vmem:[%s12732_s18 + $0x1058] sm:$0xff]  ;;  %v11255_v8 = vcombine.low %v1563_v58, %v1571_v3 }
 0x2e5   : > { %7650 = vmatpush1.bf16.msra.mxu1 %v11335_v16  ;;  %v7317_v19 = vpop.f32.mrf.mxu0  ;;  %7610 = vmatprep.subr.bf16.mxu0 %v11064_v9  ;;  %v1547_v14 = vld [vmem:[%s12732_s18 + $0x1818] sm:$0xff]  ;;  %v10999_v9 = vcombine.low %v1307_v60, %v1315_v63  ;;  %v10984_v18 = vcombine.high %v1291_v11, %v1299_v12  ;;  %v10983_v27 = vcombine.low %v1291_v11, %v1299_v12 }
 0x2e6   : > { %v7358_v33 = vpop.f32.mrf.mxu1  ;;  %7651 = vmatprep.subr.bf16.mxu1 %v11320_v20  ;;  %v1555_v16 = vld [vmem:[%s12732_s18 + $0x1858] sm:$0xff]  ;;  %12270 = vtanh.f32 %v13361_v30 }
 0x2e7   : > { %v11240_v20 = vcombine.high %v1547_v14, %v1555_v16  ;;  %v1787_v22 = vld [vmem:[%s12732_s18 + $0x1f98] sm:$0xff]  ;;  %v11239_v31 = vcombine.low %v1547_v14, %v1555_v16  ;;  %12272 = vtanh.f32 %v13203_v2  ;;  %v11949_v2 = vld [vmem:[%s12740_s1 + $0x1a0] ss:$8 sps:$4 sm:$0xff]  }
 0x2e8   : > { %7611 = vmatpush1.bf16.msra.mxu0 %v11063_v7  ;;  %v1795_v23 = vld [vmem:[%s12732_s18 + $0x1fd8] sm:$0xff]  ;;  %v11224_v7 = vcombine.high %v1531_v46, %v1539_v21  ;;  %12274 = vtanh.f32 %v13353_v17 }
 0x2e9   : > { %7652 = vmatpush1.bf16.msra.mxu1 %v11319_v5  ;;  %7612 = vmatprep.subr.bf16.mxu0 %v11048_v32  ;;  %v11480_v19 = vcombine.high %v1787_v22, %v1795_v23  ;;  %v1515_v5 = vld [vmem:[%s12732_s18 + $0x1718] sm:$0xff]  ;;  %v11479_v42 = vcombine.low %v1787_v22, %v1795_v23 }
 0x2ea   : > { %7653 = vmatprep.subr.bf16.mxu1 %v11304_v34  ;;  %v1523_v32 = vld [vmem:[%s12732_s18 + $0x1758] sm:$0xff] }
 0x2eb   : > { %v1771_v33 = vld [vmem:[%s12732_s18 + $0x1f18] sm:$0xff]  ;;  %v11208_v43 = vcombine.high %v1515_v5, %v1523_v32  ;;  %v11207_v35 = vcombine.low %v1515_v5, %v1523_v32 }
 0x2ec   : > { %7613 = vmatpush1.bf16.msra.mxu0 %v11047_v51  ;;  %v1779_v34 = vld [vmem:[%s12732_s18 + $0x1f58] sm:$0xff] }
 0x2ed   : > { %7654 = vmatpush1.bf16.msra.mxu1 %v11303_v52  ;;  %7614 = vmatprep.subr.bf16.mxu0 %v11032_v53  ;;  %v11464_v50 = vcombine.high %v1771_v33, %v1779_v34  ;;  %v1499_v51 = vld [vmem:[%s12732_s18 + $0x1698] sm:$0xff]  ;;  %v11463_v36 = vcombine.low %v1771_v33, %v1779_v34 }
 0x2ee   : > { %7655 = vmatprep.subr.bf16.mxu1 %v11288_v54  ;;  %v1507_v52 = vld [vmem:[%s12732_s18 + $0x16d8] sm:$0xff] }
 0x2ef   : > { %v1755_v53 = vld [vmem:[%s12732_s18 + $0x1e98] sm:$0xff]  ;;  %v11192_v37 = vcombine.high %v1499_v51, %v1507_v52  ;;  %v11191_v60 = vcombine.low %v1499_v51, %v1507_v52 }
 0x2f0   : > { %7615 = vmatpush1.bf16.msra.mxu0 %v11031_v55  ;;  %v1763_v54 = vld [vmem:[%s12732_s18 + $0x1ed8] sm:$0xff] }
 0x2f1   : > { %7656 = vmatpush1.bf16.msra.mxu1 %v11287_v56  ;;  %7616 = vmatprep.subr.bf16.mxu0 %v11016_v57  ;;  %v11448_v39 = vcombine.high %v1755_v53, %v1763_v54  ;;  %v1483_v55 = vld [vmem:[%s12732_s18 + $0x1618] sm:$0xff]  ;;  %v11447_v63 = vcombine.low %v1755_v53, %v1763_v54 }
 0x2f2   : > { %7657 = vmatprep.subr.bf16.mxu1 %v11272_v59  ;;  %v1491_v56 = vld [vmem:[%s12732_s18 + $0x1658] sm:$0xff] }
 0x2f3   : > { %v1739_v57 = vld [vmem:[%s12732_s18 + $0x1e18] sm:$0xff]  ;;  %v11176_v58 = vcombine.high %v1483_v55, %v1491_v56  ;;  %v11175_v11 = vcombine.low %v1483_v55, %v1491_v56 }
 0x2f4   : > { %7617 = vmatpush1.bf16.msra.mxu0 %v11015_v29  ;;  %v1747_v59 = vld [vmem:[%s12732_s18 + $0x1e58] sm:$0xff] }
 0x2f5   : > { %7658 = vmatpush1.bf16.msra.mxu1 %v11271_v4  ;;  %7618 = vmatprep.subr.bf16.mxu0 %v11000_v6  ;;  %v11432_v3 = vcombine.high %v1739_v57, %v1747_v59  ;;  %v1467_v29 = vld [vmem:[%s12732_s18 + $0x1598] sm:$0xff]  ;;  %v11431_v12 = vcombine.low %v1739_v57, %v1747_v59 }
 0x2f6   : > { %7659 = vmatprep.subr.bf16.mxu1 %v11256_v10  ;;  %v1475_v4 = vld [vmem:[%s12732_s18 + $0x15d8] sm:$0xff] }
 0x2f7   : > { %v1723_v6 = vld [vmem:[%s12732_s18 + $0x1d98] sm:$0xff]  ;;  %v11160_v14 = vcombine.high %v1467_v29, %v1475_v4  ;;  %v11159_v46 = vcombine.low %v1467_v29, %v1475_v4  ;;  %v1132_v4 = vld [vmem:[%s12732_s18 + $0xb20] sm:$0xff] }
 0x2f8   : > { %7619 = vmatpush1.bf16.msra.mxu0 %v10999_v9  ;;  %v1731_v10 = vld [vmem:[%s12732_s18 + $0x1dd8] sm:$0xff] }
 0x2f9   : > { %7660 = vmatpush1.bf16.msra.mxu1 %v11255_v8  ;;  %7620 = vmatprep.subr.bf16.mxu0 %v10984_v18  ;;  %v11416_v16 = vcombine.high %v1723_v6, %v1731_v10  ;;  %v1451_v9 = vld [vmem:[%s12732_s18 + $0x1518] sm:$0xff]  ;;  %v11415_v21 = vcombine.low %v1723_v6, %v1731_v10  ;;  %v1140_v6 = vld [vmem:[%s12732_s18 + $0xb60] sm:$0xff] }
 0x2fa   : > { %7661 = vmatprep.subr.bf16.mxu1 %v11240_v20  ;;  %v1459_v8 = vld [vmem:[%s12732_s18 + $0x1558] sm:$0xff] }
 0x2fb   : > { %v1707_v18 = vld [vmem:[%s12732_s18 + $0x1d18] sm:$0xff]  ;;  %v11144_v22 = vcombine.high %v1451_v9, %v1459_v8  ;;  %v11143_v5 = vcombine.low %v1451_v9, %v1459_v8  ;;  %v10826_v8 = vcombine.high %v1132_v4, %v1140_v6 }
 0x2fc   : > { %7621 = vmatpush1.bf16.msra.mxu0 %v10983_v27  ;;  %v1715_v20 = vld [vmem:[%s12732_s18 + $0x1d58] sm:$0xff] }
 0x2fd   : > { %7662 = vmatpush1.bf16.msra.mxu1 %v11239_v31  ;;  %7622 = vmatprep.subr.bf16.mxu0 %v11224_v7  ;;  %v11400_v23 = vcombine.high %v1707_v18, %v1715_v20  ;;  %v1435_v27 = vld [vmem:[%s12732_s18 + $0x1498] sm:$0xff]  ;;  %v11399_v32 = vcombine.low %v1707_v18, %v1715_v20  ;;  %v1116_v18 = vld [vmem:[%s12732_s18 + $0xaa0] sm:$0xff] }
 0x2fe   : > { %7663 = vmatprep.subr.bf16.mxu1 %v11480_v19  ;;  %v1443_v31 = vld [vmem:[%s12732_s18 + $0x14d8] sm:$0xff]  ;;  %v1124_v20 = vld [vmem:[%s12732_s18 + $0xae0] sm:$0xff] }
 0x2ff   : > { %v1691_v7 = vld [vmem:[%s12732_s18 + $0x1c98] sm:$0xff]  ;;  %v11128_v33 = vcombine.high %v1435_v27, %v1443_v31  ;;  %v11127_v51 = vcombine.low %v1435_v27, %v1443_v31  ;;  %v10825_v27 = vcombine.low %v1132_v4, %v1140_v6  ;;  %v820_v4 = vld [vmem:[%s12732_s18 + $0x160] sm:$0xff] }
 0x300   : > { %7623 = vmatpush2.bf16.msra.mxu0 %v11223_v38  ;;  %v1699_v19 = vld [vmem:[%s12732_s18 + $0x1cd8] sm:$0xff]  ;;  %v1068_v6 = vld [vmem:[%s12732_s18 + $0x920] sm:$0xff] }
 0x301   : > { %7664 = vmatpush2.bf16.msra.mxu1 %v11479_v42  ;;  %7624 = vmatprep.subr.bf16.mxu0 %v11208_v43  ;;  %v11384_v34 = vcombine.high %v1691_v7, %v1699_v19  ;;  %v1419_v38 = vld [vmem:[%s12732_s18 + $0x1418] sm:$0xff]  ;;  %v11383_v52 = vcombine.low %v1691_v7, %v1699_v19 }
 0x302   : > { %7665 = vmatprep.subr.bf16.mxu1 %v11464_v50  ;;  %v1427_v42 = vld [vmem:[%s12732_s18 + $0x1458] sm:$0xff] }
 0x303   : > { %v1675_v43 = vld [vmem:[%s12732_s18 + $0x1c18] sm:$0xff]  ;;  %v11112_v53 = vcombine.high %v1419_v38, %v1427_v42  ;;  %v11111_v55 = vcombine.low %v1419_v38, %v1427_v42  ;;  %v1100_v42 = vld [vmem:[%s12732_s18 + $0xa20] sm:$0xff] }
 0x304   : > { %7625 = vmatpush2.bf16.msra.mxu0 %v11207_v35  ;;  %v1683_v50 = vld [vmem:[%s12732_s18 + $0x1c58] sm:$0xff]  ;;  %v892_v35 = vld [vmem:[%s12732_s18 + $0x3a0] sm:$0xff] }
 0x305   : > { %7666 = vmatpush2.bf16.msra.mxu1 %v11463_v36  ;;  %7626 = vmatprep.subr.bf16.mxu0 %v11192_v37  ;;  %v11368_v54 = vcombine.high %v1675_v43, %v1683_v50  ;;  %v900_v36 = vld [vmem:[%s12732_s18 + $0x3e0] sm:$0xff]  ;;  %v11367_v56 = vcombine.low %v1675_v43, %v1683_v50  ;;  %v11957_v17 = vld [vmem:[%s12740_s1 + $0x194] ss:$8 sps:$4 sm:$0xff]  }
 0x306   : > { %7667 = vmatprep.subr.bf16.mxu1 %v11448_v39  ;;  %v1148_v37 = vld [vmem:[%s12732_s18 + $0xba0] sm:$0xff]  ;;  %v10586_v57 = vcombine.high %v892_v35, %v900_v36  ;;  %v10585_v29 = vcombine.low %v892_v35, %v900_v36 }
 0x307   : > { %v1156_v39 = vld [vmem:[%s12732_s18 + $0xbe0] sm:$0xff] }
 0x308   : > { %7627 = vmatpush2.bf16.msra.mxu0 %v11191_v60  ;;  %v10842_v59 = vcombine.high %v1148_v37, %v1156_v39  ;;  %v876_v60 = vld [vmem:[%s12732_s18 + $0x320] sm:$0xff]  ;;  %v10841_v10 = vcombine.low %v1148_v37, %v1156_v39 }
 0x309   : > { %7668 = vmatpush2.bf16.msra.mxu1 %v11447_v63  ;;  %7628 = vmatprep.subr.bf16.mxu0 %v11176_v58  ;;  %v884_v63 = vld [vmem:[%s12732_s18 + $0x360] sm:$0xff] }
 0x30a   : > { %7669 = vmatprep.subr.bf16.mxu1 %v11432_v3  ;;  %v13418_v58 = vld [vmem:[%s12738_s29] sm:$0xff] }
 0x30b   : > { %v1823_v3 = vrot.slane %v13418_v58, %v12940_v1  ;;  %v1108_v43 = vld [vmem:[%s12732_s18 + $0xa60] sm:$0xff] }
 0x30c   : > { %7629 = vmatpush2.bf16.msra.mxu0 %v11175_v11  ;;  %v1827_v11 = vrot.slane %v13418_v58, %v12859_v61  ;;  %v10794_v37 = vcombine.high %v1100_v42, %v1108_v43  ;;  %v828_v39 = vld [vmem:[%s12732_s18 + $0x1a0] sm:$0xff] }
 0x30d   : > { %7670 = vmatpush2.bf16.msra.mxu1 %v11431_v12  ;;  %7630 = vmatprep.subr.bf16.mxu0 %v11160_v14  ;;  %v10570_v12 = vcombine.high %v876_v60, %v884_v63  ;;  %v860_v14 = vld [vmem:[%s12732_s18 + $0x2a0] sm:$0xff] }
 0x30e   : > { %7671 = vmatprep.subr.bf16.mxu1 %v11416_v16  ;;  %v868_v16 = vld [vmem:[%s12732_s18 + $0x2e0] sm:$0xff] }
 0x30f   : > { %v10554_v31 = vcombine.high %v860_v14, %v868_v16 }
 0x310   : > { %7631 = vmatpush2.bf16.msra.mxu0 %v11159_v46 }
 0x311   : > { %7672 = vmatpush2.bf16.msra.mxu1 %v11415_v21  ;;  %7632 = vmatprep.subr.bf16.mxu0 %v11144_v22  ;;  %v10569_v22 = vcombine.low %v876_v60, %v884_v63  ;;  %v10793_v60 = vcombine.low %v1100_v42, %v1108_v43  ;;  %v1020_v42 = vld [vmem:[%s12732_s18 + $0x7a0] sm:$0xff] }
 0x312   : > { %7673 = vmatprep.subr.bf16.mxu1 %v11400_v23  ;;  %v1028_v43 = vld [vmem:[%s12732_s18 + $0x7e0] sm:$0xff] }
 0x314   : > { %7633 = vmatpush2.bf16.msra.mxu0 %v11143_v5 }
 0x315   : > { %7674 = vmatpush2.bf16.msra.mxu1 %v11399_v32  ;;  %7634 = vmatprep.subr.bf16.mxu0 %v11128_v33  ;;  %v10810_v32 = vcombine.high %v1116_v18, %v1124_v20  ;;  %v844_v33 = vld [vmem:[%s12732_s18 + $0x220] sm:$0xff] }
 0x316   : > { %7675 = vmatprep.subr.bf16.mxu1 %v11384_v34  ;;  %v852_v34 = vld [vmem:[%s12732_s18 + $0x260] sm:$0xff] }
 0x317   : > { %v10538_v35 = vcombine.high %v844_v33, %v852_v34 }
 0x318   : > { %7635 = vmatpush2.bf16.msra.mxu0 %v11127_v51 }
 0x319   : > { %7676 = vmatpush2.bf16.msra.mxu1 %v11383_v52  ;;  %7636 = vmatprep.subr.bf16.mxu0 %v11112_v53  ;;  %v10553_v52 = vcombine.low %v860_v14, %v868_v16 }
 0x31a   : > { %7677 = vmatprep.subr.bf16.mxu1 %v11368_v54  ;;  %v10809_v54 = vcombine.low %v1116_v18, %v1124_v20  ;;  %v1052_v18 = vld [vmem:[%s12732_s18 + $0x8a0] sm:$0xff] }
 0x31b   : > { %v1060_v20 = vld [vmem:[%s12732_s18 + $0x8e0] sm:$0xff] }
 0x31c   : > { %7637 = vmatpush2.bf16.msra.mxu0 %v11111_v55  ;;  %v836_v55 = vld [vmem:[%s12732_s18 + $0x1e0] sm:$0xff] }
 0x31d   : > { %7678 = vmatpush2.bf16.msra.mxu1 %v11367_v56  ;;  %7688 = vmatprep.subr.bf16.mxu0 %v10586_v57  ;;  %v1084_v56 = vld [vmem:[%s12732_s18 + $0x9a0] sm:$0xff]  ;;  %v10522_v63 = vcombine.high %v828_v39, %v836_v55 }
 0x31e   : > { %7729 = vmatprep.subr.bf16.mxu1 %v10842_v59  ;;  %v1092_v57 = vld [vmem:[%s12732_s18 + $0x9e0] sm:$0xff]  ;;  %v10537_v59 = vcombine.low %v844_v33, %v852_v34  ;;  %v10745_v33 = vcombine.low %v1052_v18, %v1060_v20 }
 0x31f   : > { %v7394_v9 = vpop.f32.mrf.mxu0  ;;  %7639 = vmatmul.mubr.bf16.vlgmr.msra.gmra.mxu0 %v12978_v15 }
 0x320   : > { %v7395_v46 = vadd.f32 %v7394_v9, %v1823_v3  ;;  %v7435_v21 = vpop.f32.mrf.mxu1  ;;  %7680 = vmatmul.mubr.bf16.vlgmr.msra.gmra.mxu1 %v12974_v44  ;;  %7689 = vmatpush1.bf16.msra.mxu0 %v10585_v29  ;;  %v10778_v3 = vcombine.high %v1084_v56, %v1092_v57  ;;  %v812_v29 = vld [vmem:[%s12732_s18 + $0x120] sm:$0xff] }
 0x321   : > { %7720 = vmatprep.mubr.bf16.mxu0 %v12876_v24  ;;  %7730 = vmatpush1.bf16.msra.mxu1 %v10841_v10  ;;  %v7396_v23 = vpop.f32.mrf.mxu0  ;;  %v1076_v10 = vld [vmem:[%s12732_s18 + $0x960] sm:$0xff]  ;;  %v10506_v14 = vcombine.high %v812_v29, %v820_v4 }
 0x322   : > { %v13433_v7 = vadd.f32 %v7435_v21, %v7395_v46  ;;  %7761 = vmatprep.mubr.bf16.mxu1 %v12880_v26  ;;  %v7397_v19 = vadd.f32 %v7396_v23, %v1827_v11  ;;  %v7437_v5 = vpop.f32.mrf.mxu1  ;;  %7690 = vmatprep.subr.bf16.mxu0 %v10570_v12  ;;  %v10521_v11 = vcombine.low %v828_v39, %v836_v55  ;;  %v796_v9 = vld [vmem:[%s12732_s18 + $0xa0] sm:$0xff] }
 0x323   : > { %v7398_v38 = vpop.f32.mrf.mxu0  ;;  %7731 = vmatprep.subr.bf16.mxu1 %v10826_v8  ;;  %v10777_v12 = vcombine.low %v1084_v56, %v1092_v57  ;;  %v10762_v16 = vcombine.high %v1068_v6, %v1076_v10  ;;  %v804_v8 = vld [vmem:[%s12732_s18 + $0xe0] sm:$0xff]  ;;  %v10505_v46 = vcombine.low %v812_v29, %v820_v4  ;;  %v10761_v21 = vcombine.low %v1068_v6, %v1076_v10 }
 0x324   : > { %v13440_v50 = vadd.f32 %v7437_v5, %v7397_v19  ;;  %v7439_v51 = vpop.f32.mrf.mxu1  ;;  %7691 = vmatpush1.bf16.msra.mxu0 %v10569_v22  ;;  %v10490_v22 = vcombine.high %v796_v9, %v804_v8  ;;  %v10746_v23 = vcombine.high %v1052_v18, %v1060_v20  ;;  %v1036_v19 = vld [vmem:[%s12732_s18 + $0x820] sm:$0xff]  ;;  %v10713_v57 = vcombine.low %v1020_v42, %v1028_v43 }
 0x325   : > { %7732 = vmatpush1.bf16.msra.mxu1 %v10825_v27  ;;  %v7399_v53 = vpop.f32.mrf.mxu0  ;;  %7692 = vmatprep.subr.bf16.mxu0 %v10554_v31  ;;  %v780_v27 = vld [vmem:[%s12732_s18 + $0x20] sm:$0xff] }
 0x326   : > { %v7440_v36 = vpop.f32.mrf.mxu1  ;;  %7733 = vmatprep.subr.bf16.mxu1 %v10810_v32  ;;  %v788_v31 = vld [vmem:[%s12732_s18 + $0x60] sm:$0xff]  ;;  %v10489_v32 = vcombine.low %v796_v9, %v804_v8 }
 0x327   : > { %v1044_v5 = vld [vmem:[%s12732_s18 + $0x860] sm:$0xff]  ;;  %v10474_v34 = vcombine.high %v780_v27, %v788_v31  ;;  %v10473_v53 = vcombine.low %v780_v27, %v788_v31 }
 0x328   : > { %7693 = vmatpush1.bf16.msra.mxu0 %v10553_v52  ;;  %v10730_v38 = vcombine.high %v1036_v19, %v1044_v5  ;;  %v1276_v51 = vld [vmem:[%s12732_s18 + $0xfa0] sm:$0xff] }
 0x329   : > { %7734 = vmatpush1.bf16.msra.mxu1 %v10809_v54  ;;  %7694 = vmatprep.subr.bf16.mxu0 %v10538_v35  ;;  %v1284_v52 = vld [vmem:[%s12732_s18 + $0xfe0] sm:$0xff]  ;;  %v10729_v54 = vcombine.low %v1036_v19, %v1044_v5  ;;  %v10714_v35 = vcombine.high %v1020_v42, %v1028_v43 }
 0x32a   : > { %7735 = vmatprep.subr.bf16.mxu1 %v10794_v37  ;;  %v10970_v36 = vcombine.high %v1276_v51, %v1284_v52  ;;  %v1004_v37 = vld [vmem:[%s12732_s18 + $0x720] sm:$0xff] }
 0x32b   : > { %v1012_v39 = vld [vmem:[%s12732_s18 + $0x760] sm:$0xff] }
 0x32c   : > { %7695 = vmatpush1.bf16.msra.mxu0 %v10537_v59  ;;  %v1260_v55 = vld [vmem:[%s12732_s18 + $0xf20] sm:$0xff]  ;;  %v10969_v59 = vcombine.low %v1276_v51, %v1284_v52  ;;  %v10697_v10 = vcombine.low %v1004_v37, %v1012_v39 }
 0x32d   : > { %7736 = vmatpush1.bf16.msra.mxu1 %v10793_v60  ;;  %7696 = vmatprep.subr.bf16.mxu0 %v10522_v63  ;;  %v1268_v56 = vld [vmem:[%s12732_s18 + $0xf60] sm:$0xff]  ;;  %v10698_v60 = vcombine.high %v1004_v37, %v1012_v39 }
 0x32e   : > { %7737 = vmatprep.subr.bf16.mxu1 %v10778_v3  ;;  %v10954_v63 = vcombine.high %v1260_v55, %v1268_v56  ;;  %v988_v3 = vld [vmem:[%s12732_s18 + $0x6a0] sm:$0xff] }
 0x32f   : > { %v996_v29 = vld [vmem:[%s12732_s18 + $0x6e0] sm:$0xff] }
 0x330   : > { %7697 = vmatpush1.bf16.msra.mxu0 %v10521_v11  ;;  %v1244_v4 = vld [vmem:[%s12732_s18 + $0xea0] sm:$0xff]  ;;  %v10953_v11 = vcombine.low %v1260_v55, %v1268_v56  ;;  %v10681_v20 = vcombine.low %v988_v3, %v996_v29 }
 0x331   : > { %7738 = vmatpush1.bf16.msra.mxu1 %v10777_v12  ;;  %7698 = vmatprep.subr.bf16.mxu0 %v10506_v14  ;;  %v1252_v6 = vld [vmem:[%s12732_s18 + $0xee0] sm:$0xff]  ;;  %v10682_v12 = vcombine.high %v988_v3, %v996_v29 }
 0x332   : > { %7739 = vmatprep.subr.bf16.mxu1 %v10762_v16  ;;  %v10938_v14 = vcombine.high %v1244_v4, %v1252_v6  ;;  %v972_v16 = vld [vmem:[%s12732_s18 + $0x620] sm:$0xff] }
 0x333   : > { %v980_v9 = vld [vmem:[%s12732_s18 + $0x660] sm:$0xff] }
 0x334   : > { %7699 = vmatpush1.bf16.msra.mxu0 %v10505_v46  ;;  %v1228_v8 = vld [vmem:[%s12732_s18 + $0xe20] sm:$0xff]  ;;  %v10937_v46 = vcombine.low %v1244_v4, %v1252_v6  ;;  %v10665_v5 = vcombine.low %v972_v16, %v980_v9 }
 0x335   : > { %7740 = vmatpush1.bf16.msra.mxu1 %v10761_v21  ;;  %7700 = vmatprep.subr.bf16.mxu0 %v10490_v22  ;;  %v1236_v18 = vld [vmem:[%s12732_s18 + $0xe60] sm:$0xff]  ;;  %v10666_v21 = vcombine.high %v972_v16, %v980_v9 }
 0x336   : > { %7741 = vmatprep.subr.bf16.mxu1 %v10746_v23  ;;  %v10922_v22 = vcombine.high %v1228_v8, %v1236_v18  ;;  %v956_v23 = vld [vmem:[%s12732_s18 + $0x5a0] sm:$0xff] }
 0x337   : > { %v964_v27 = vld [vmem:[%s12732_s18 + $0x5e0] sm:$0xff] }
 0x338   : > { %7701 = vmatpush1.bf16.msra.mxu0 %v10489_v32  ;;  %v1212_v31 = vld [vmem:[%s12732_s18 + $0xda0] sm:$0xff]  ;;  %v10921_v32 = vcombine.low %v1228_v8, %v1236_v18  ;;  %v10649_v52 = vcombine.low %v956_v23, %v964_v27 }
 0x339   : > { %7742 = vmatpush1.bf16.msra.mxu1 %v10745_v33  ;;  %7702 = vmatprep.subr.bf16.mxu0 %v10474_v34  ;;  %v1220_v19 = vld [vmem:[%s12732_s18 + $0xde0] sm:$0xff]  ;;  %v10650_v33 = vcombine.high %v956_v23, %v964_v27 }
 0x33a   : > { %7743 = vmatprep.subr.bf16.mxu1 %v10730_v38  ;;  %v10906_v34 = vcombine.high %v1212_v31, %v1220_v19  ;;  %v940_v38 = vld [vmem:[%s12732_s18 + $0x520] sm:$0xff] }
 0x33b   : > { %v948_v42 = vld [vmem:[%s12732_s18 + $0x560] sm:$0xff] }
 0x33c   : > { %7703 = vmatpush1.bf16.msra.mxu0 %v10473_v53  ;;  %v1196_v43 = vld [vmem:[%s12732_s18 + $0xd20] sm:$0xff]  ;;  %v10905_v53 = vcombine.low %v1212_v31, %v1220_v19  ;;  %v10633_v56 = vcombine.low %v940_v38, %v948_v42 }
 0x33d   : > { %7744 = vmatpush1.bf16.msra.mxu1 %v10729_v54  ;;  %7704 = vmatprep.subr.bf16.mxu0 %v10714_v35  ;;  %v1204_v51 = vld [vmem:[%s12732_s18 + $0xd60] sm:$0xff]  ;;  %v10634_v54 = vcombine.high %v940_v38, %v948_v42 }
 0x33e   : > { %7745 = vmatprep.subr.bf16.mxu1 %v10970_v36  ;;  %v10890_v35 = vcombine.high %v1196_v43, %v1204_v51  ;;  %v924_v36 = vld [vmem:[%s12732_s18 + $0x4a0] sm:$0xff] }
 0x33f   : > { %v932_v37 = vld [vmem:[%s12732_s18 + $0x4e0] sm:$0xff] }
 0x340   : > { %7705 = vmatpush2.bf16.msra.mxu0 %v10713_v57  ;;  %v1180_v39 = vld [vmem:[%s12732_s18 + $0xca0] sm:$0xff]  ;;  %v10889_v57 = vcombine.low %v1196_v43, %v1204_v51  ;;  %v10617_v6 = vcombine.low %v924_v36, %v932_v37 }
 0x341   : > { %7746 = vmatpush2.bf16.msra.mxu1 %v10969_v59  ;;  %7706 = vmatprep.subr.bf16.mxu0 %v10698_v60  ;;  %v1188_v55 = vld [vmem:[%s12732_s18 + $0xce0] sm:$0xff]  ;;  %v10618_v59 = vcombine.high %v924_v36, %v932_v37 }
 0x342   : > { %7747 = vmatprep.subr.bf16.mxu1 %v10954_v63  ;;  %v10874_v60 = vcombine.high %v1180_v39, %v1188_v55  ;;  %v908_v63 = vld [vmem:[%s12732_s18 + $0x420] sm:$0xff] }
 0x343   : > { %v916_v3 = vld [vmem:[%s12732_s18 + $0x460] sm:$0xff] }
 0x344   : > { %7707 = vmatpush2.bf16.msra.mxu0 %v10697_v10  ;;  %v1164_v29 = vld [vmem:[%s12732_s18 + $0xc20] sm:$0xff]  ;;  %v10873_v10 = vcombine.low %v1180_v39, %v1188_v55  ;;  %v10601_v18 = vcombine.low %v908_v63, %v916_v3 }
 0x345   : > { %7748 = vmatpush2.bf16.msra.mxu1 %v10953_v11  ;;  %7708 = vmatprep.subr.bf16.mxu0 %v10682_v12  ;;  %v1172_v4 = vld [vmem:[%s12732_s18 + $0xc60] sm:$0xff]  ;;  %v10602_v11 = vcombine.high %v908_v63, %v916_v3 }
 0x346   : > { %7749 = vmatprep.subr.bf16.mxu1 %v10938_v14  ;;  %v10858_v12 = vcombine.high %v1164_v29, %v1172_v4  ;;  %v1404_v14 = vld [vmem:[%s12732_s18 + $0x13a0] sm:$0xff] }
 0x347   : > { %v1412_v16 = vld [vmem:[%s12732_s18 + $0x13e0] sm:$0xff] }
 0x348   : > { %7709 = vmatpush2.bf16.msra.mxu0 %v10681_v20  ;;  %v1660_v9 = vld [vmem:[%s12732_s18 + $0x1ba0] sm:$0xff]  ;;  %v10857_v20 = vcombine.low %v1164_v29, %v1172_v4  ;;  %v11097_v27 = vcombine.low %v1404_v14, %v1412_v16 }
 0x349   : > { %7750 = vmatpush2.bf16.msra.mxu1 %v10937_v46  ;;  %7710 = vmatprep.subr.bf16.mxu0 %v10666_v21  ;;  %v1668_v8 = vld [vmem:[%s12732_s18 + $0x1be0] sm:$0xff]  ;;  %v11098_v46 = vcombine.high %v1404_v14, %v1412_v16 }
 0x34a   : > { %7751 = vmatprep.subr.bf16.mxu1 %v10922_v22  ;;  %v11354_v21 = vcombine.high %v1660_v9, %v1668_v8  ;;  %v1388_v22 = vld [vmem:[%s12732_s18 + $0x1320] sm:$0xff] }
 0x34b   : > { %v1396_v23 = vld [vmem:[%s12732_s18 + $0x1360] sm:$0xff] }
 0x34c   : > { %7711 = vmatpush2.bf16.msra.mxu0 %v10665_v5  ;;  %v1644_v31 = vld [vmem:[%s12732_s18 + $0x1b20] sm:$0xff]  ;;  %v11353_v5 = vcombine.low %v1660_v9, %v1668_v8 }
 0x34d   : > { %7752 = vmatpush2.bf16.msra.mxu1 %v10921_v32  ;;  %7712 = vmatprep.subr.bf16.mxu0 %v10650_v33  ;;  %v1652_v19 = vld [vmem:[%s12732_s18 + $0x1b60] sm:$0xff]  ;;  %v11082_v32 = vcombine.high %v1388_v22, %v1396_v23 }
 0x34e   : > { %7753 = vmatprep.subr.bf16.mxu1 %v10906_v34  ;;  %v1372_v33 = vld [vmem:[%s12732_s18 + $0x12a0] sm:$0xff]  ;;  %v11338_v42 = vcombine.high %v1644_v31, %v1652_v19  ;;  %v11337_v36 = vcombine.low %v1644_v31, %v1652_v19 }
 0x34f   : > { %v1380_v34 = vld [vmem:[%s12732_s18 + $0x12e0] sm:$0xff] }
 0x350   : > { %7713 = vmatpush2.bf16.msra.mxu0 %v10649_v52  ;;  %v1628_v43 = vld [vmem:[%s12732_s18 + $0x1aa0] sm:$0xff]  ;;  %v11066_v37 = vcombine.high %v1372_v33, %v1380_v34 }
 0x351   : > { %7754 = vmatpush2.bf16.msra.mxu1 %v10905_v53  ;;  %7714 = vmatprep.subr.bf16.mxu0 %v10634_v54  ;;  %v1636_v51 = vld [vmem:[%s12732_s18 + $0x1ae0] sm:$0xff]  ;;  %v11081_v54 = vcombine.low %v1388_v22, %v1396_v23 }
 0x352   : > { %7755 = vmatprep.subr.bf16.mxu1 %v10890_v35  ;;  %v1612_v63 = vld [vmem:[%s12732_s18 + $0x1a20] sm:$0xff] }
 0x353   : > { %v1620_v3 = vld [vmem:[%s12732_s18 + $0x1a60] sm:$0xff] }
 0x354   : > { %7715 = vmatpush2.bf16.msra.mxu0 %v10633_v56  ;;  %v11322_v56 = vcombine.high %v1628_v43, %v1636_v51  ;;  %v11306_v14 = vcombine.high %v1612_v63, %v1620_v3  ;;  %v1340_v16 = vld [vmem:[%s12732_s18 + $0x11a0] sm:$0xff] }
 0x355   : > { %7756 = vmatpush2.bf16.msra.mxu1 %v10889_v57  ;;  %7716 = vmatprep.subr.bf16.mxu0 %v10618_v59  ;;  %v1356_v57 = vld [vmem:[%s12732_s18 + $0x1220] sm:$0xff] }
 0x356   : > { %7757 = vmatprep.subr.bf16.mxu1 %v10874_v60  ;;  %v1364_v59 = vld [vmem:[%s12732_s18 + $0x1260] sm:$0xff] }
 0x357   : > { %v1348_v9 = vld [vmem:[%s12732_s18 + $0x11e0] sm:$0xff] }
 0x358   : > { %7717 = vmatpush2.bf16.msra.mxu0 %v10617_v6  ;;  %v11065_v6 = vcombine.low %v1372_v33, %v1380_v34  ;;  %v1596_v8 = vld [vmem:[%s12732_s18 + $0x19a0] sm:$0xff] }
 0x359   : > { %7758 = vmatpush2.bf16.msra.mxu1 %v10873_v10  ;;  %7718 = vmatprep.subr.bf16.mxu0 %v10602_v11  ;;  %v11321_v10 = vcombine.low %v1628_v43, %v1636_v51  ;;  %v11050_v11 = vcombine.high %v1356_v57, %v1364_v59  ;;  %v1324_v23 = vld [vmem:[%s12732_s18 + $0x1120] sm:$0xff] }
 0x35a   : > { %7759 = vmatprep.subr.bf16.mxu1 %v10858_v12  ;;  %v1580_v31 = vld [vmem:[%s12732_s18 + $0x1920] sm:$0xff] }
 0x35b   : > { %v1588_v19 = vld [vmem:[%s12732_s18 + $0x1960] sm:$0xff] }
 0x35c   : > { %7719 = vmatpush2.bf16.msra.mxu0 %v10601_v18  ;;  %v1604_v18 = vld [vmem:[%s12732_s18 + $0x19e0] sm:$0xff]  ;;  %v11274_v34 = vcombine.high %v1580_v31, %v1588_v19 }
 0x35d   : > { %7760 = vmatpush2.bf16.msra.mxu1 %v10857_v20  ;;  %7770 = vmatprep.subr.bf16.mxu0 %v11098_v46  ;;  %v11049_v20 = vcombine.low %v1356_v57, %v1364_v59  ;;  %v11305_v46 = vcombine.low %v1612_v63, %v1620_v3  ;;  %v11290_v22 = vcombine.high %v1596_v8, %v1604_v18  ;;  %v1564_v43 = vld [vmem:[%s12732_s18 + $0x18a0] sm:$0xff] }
 0x35e   : > { %7811 = vmatprep.subr.bf16.mxu1 %v11354_v21  ;;  %v11034_v21 = vcombine.high %v1340_v16, %v1348_v9  ;;  %v1572_v51 = vld [vmem:[%s12732_s18 + $0x18e0] sm:$0xff] }
 0x35f   : > { %v7476_v38 = vpop.f32.mrf.mxu0  ;;  %7721 = vmatmul.mubr.bf16.vlgmr.msra.gmra.mxu0 %v12878_v25  ;;  %v11257_v57 = vcombine.low %v1564_v43, %v1572_v51  ;;  %v1532_v63 = vld [vmem:[%s12732_s18 + $0x17a0] sm:$0xff] }
 0x360   : > { %v7477_v52 = vadd.f32 %v7476_v38, %v13433_v7  ;;  %v7517_v53 = vpop.f32.mrf.mxu1  ;;  %7762 = vmatmul.mubr.bf16.vlgmr.msra.gmra.mxu1 %v12882_v28  ;;  %7771 = vmatpush1.bf16.msra.mxu0 %v11097_v27  ;;  %v1332_v27 = vld [vmem:[%s12732_s18 + $0x1160] sm:$0xff] }
 0x361   : > { %7802 = vmatprep.mubr.bf16.mxu0 %v12902_v40  ;;  %7812 = vmatpush1.bf16.msra.mxu1 %v11353_v5  ;;  %v7478_v35 = vpop.f32.mrf.mxu0  ;;  %v11033_v5 = vcombine.low %v1340_v16, %v1348_v9  ;;  %v11018_v33 = vcombine.high %v1324_v23, %v1332_v27  ;;  %v1308_v38 = vld [vmem:[%s12732_s18 + $0x10a0] sm:$0xff] }
 0x362   : > { %v13506_v39 = vadd.f32 %v7517_v53, %v7477_v52  ;;  %7843 = vmatprep.mubr.bf16.mxu1 %v12904_v41  ;;  %v7479_v7 = vadd.f32 %v7478_v35, %v13440_v50  ;;  %v7519_v55 = vpop.f32.mrf.mxu1  ;;  %7772 = vmatprep.subr.bf16.mxu0 %v11082_v32  ;;  %v11289_v32 = vcombine.low %v1596_v8, %v1604_v18  ;;  %v1540_v3 = vld [vmem:[%s12732_s18 + $0x17e0] sm:$0xff] }
 0x363   : > { %v7480_v60 = vpop.f32.mrf.mxu0  ;;  %7813 = vmatprep.subr.bf16.mxu1 %v11338_v42  ;;  %v1316_v42 = vld [vmem:[%s12732_s18 + $0x10e0] sm:$0xff]  ;;  %v11017_v52 = vcombine.low %v1324_v23, %v1332_v27  ;;  %v11273_v53 = vcombine.low %v1580_v31, %v1588_v19  ;;  %v11258_v35 = vcombine.high %v1564_v43, %v1572_v51  ;;  %v11225_v18 = vcombine.low %v1532_v63, %v1540_v3 }
 0x364   : > { %v13514_v29 = vadd.f32 %v7519_v55, %v7479_v7  ;;  %v7521_v4 = vpop.f32.mrf.mxu1  ;;  %7773 = vmatpush1.bf16.msra.mxu0 %v11081_v54  ;;  %v11002_v54 = vcombine.high %v1308_v38, %v1316_v42  ;;  %v1548_v7 = vld [vmem:[%s12732_s18 + $0x1820] sm:$0xff] }
 0x365   : > { %7814 = vmatpush1.bf16.msra.mxu1 %v11337_v36  ;;  %v7481_v50 = vpop.f32.mrf.mxu0  ;;  %7774 = vmatprep.subr.bf16.mxu0 %v11066_v37  ;;  %v1292_v36 = vld [vmem:[%s12732_s18 + $0x1020] sm:$0xff] }
 0x366   : > { %v7522_v12 = vpop.f32.mrf.mxu1  ;;  %7815 = vmatprep.subr.bf16.mxu1 %v11322_v56  ;;  %v1300_v37 = vld [vmem:[%s12732_s18 + $0x1060] sm:$0xff]  ;;  %v11001_v56 = vcombine.low %v1308_v38, %v1316_v42  ;;  %12276 = vtanh.f32 %v13514_v29  ;;  %v11955_v29 = vld [vmem:[%s12740_s1 + $0x190] ss:$8 sps:$4 sm:$0xff]  }
 0x367   : > { %v1556_v55 = vld [vmem:[%s12732_s18 + $0x1860] sm:$0xff]  ;;  %v10986_v59 = vcombine.high %v1292_v36, %v1300_v37  ;;  %v10985_v50 = vcombine.low %v1292_v36, %v1300_v37 }
 0x368   : > { %7775 = vmatpush1.bf16.msra.mxu0 %v11065_v6  ;;  %v11242_v60 = vcombine.high %v1548_v7, %v1556_v55  ;;  %v1788_v4 = vld [vmem:[%s12732_s18 + $0x1fa0] sm:$0xff] }
 0x369   : > { %7816 = vmatpush1.bf16.msra.mxu1 %v11321_v10  ;;  %7776 = vmatprep.subr.bf16.mxu0 %v11050_v11  ;;  %v1796_v6 = vld [vmem:[%s12732_s18 + $0x1fe0] sm:$0xff]  ;;  %v11241_v10 = vcombine.low %v1548_v7, %v1556_v55  ;;  %v11226_v11 = vcombine.high %v1532_v63, %v1540_v3 }
 0x36a   : > { %7817 = vmatprep.subr.bf16.mxu1 %v11306_v14  ;;  %v11482_v12 = vcombine.high %v1788_v4, %v1796_v6  ;;  %v1516_v14 = vld [vmem:[%s12732_s18 + $0x1720] sm:$0xff] }
 0x36b   : > { %v1524_v16 = vld [vmem:[%s12732_s18 + $0x1760] sm:$0xff] }
 0x36c   : > { %7777 = vmatpush1.bf16.msra.mxu0 %v11049_v20  ;;  %v1772_v9 = vld [vmem:[%s12732_s18 + $0x1f20] sm:$0xff]  ;;  %v11481_v20 = vcombine.low %v1788_v4, %v1796_v6  ;;  %v11209_v19 = vcombine.low %v1516_v14, %v1524_v16 }
 0x36d   : > { %7818 = vmatpush1.bf16.msra.mxu1 %v11305_v46  ;;  %7778 = vmatprep.subr.bf16.mxu0 %v11034_v21  ;;  %v1780_v8 = vld [vmem:[%s12732_s18 + $0x1f60] sm:$0xff]  ;;  %v11210_v46 = vcombine.high %v1516_v14, %v1524_v16 }
 0x36e   : > { %7819 = vmatprep.subr.bf16.mxu1 %v11290_v22  ;;  %v11466_v21 = vcombine.high %v1772_v9, %v1780_v8  ;;  %v1500_v22 = vld [vmem:[%s12732_s18 + $0x16a0] sm:$0xff] }
 0x36f   : > { %v1508_v23 = vld [vmem:[%s12732_s18 + $0x16e0] sm:$0xff] }
 0x370   : > { %7779 = vmatpush1.bf16.msra.mxu0 %v11033_v5  ;;  %v1756_v27 = vld [vmem:[%s12732_s18 + $0x1ea0] sm:$0xff]  ;;  %v11465_v5 = vcombine.low %v1772_v9, %v1780_v8  ;;  %v11193_v51 = vcombine.low %v1500_v22, %v1508_v23 }
 0x371   : > { %7820 = vmatpush1.bf16.msra.mxu1 %v11289_v32  ;;  %7780 = vmatprep.subr.bf16.mxu0 %v11018_v33  ;;  %v1764_v31 = vld [vmem:[%s12732_s18 + $0x1ee0] sm:$0xff]  ;;  %v11194_v32 = vcombine.high %v1500_v22, %v1508_v23 }
 0x372   : > { %7821 = vmatprep.subr.bf16.mxu1 %v11274_v34  ;;  %v11450_v33 = vcombine.high %v1756_v27, %v1764_v31  ;;  %v1484_v34 = vld [vmem:[%s12732_s18 + $0x1620] sm:$0xff] }
 0x373   : > { %v1492_v38 = vld [vmem:[%s12732_s18 + $0x1660] sm:$0xff] }
 0x374   : > { %7781 = vmatpush1.bf16.msra.mxu0 %v11017_v52  ;;  %v1740_v42 = vld [vmem:[%s12732_s18 + $0x1e20] sm:$0xff]  ;;  %v11449_v52 = vcombine.low %v1756_v27, %v1764_v31  ;;  %v11177_v55 = vcombine.low %v1484_v34, %v1492_v38 }
 0x375   : > { %7822 = vmatpush1.bf16.msra.mxu1 %v11273_v53  ;;  %7782 = vmatprep.subr.bf16.mxu0 %v11002_v54  ;;  %v1748_v43 = vld [vmem:[%s12732_s18 + $0x1e60] sm:$0xff]  ;;  %v11178_v53 = vcombine.high %v1484_v34, %v1492_v38  ;;  %v901_v34 = vld [vmem:[%s12732_s18 + $0x3e8] sm:$0xff] }
 0x376   : > { %7823 = vmatprep.subr.bf16.mxu1 %v11258_v35  ;;  %v11434_v54 = vcombine.high %v1740_v42, %v1748_v43  ;;  %v1468_v35 = vld [vmem:[%s12732_s18 + $0x15a0] sm:$0xff]  ;;  %v1149_v38 = vld [vmem:[%s12732_s18 + $0xba8] sm:$0xff] }
 0x377   : > { %v1476_v36 = vld [vmem:[%s12732_s18 + $0x15e0] sm:$0xff] }
 0x378   : > { %7783 = vmatpush1.bf16.msra.mxu0 %v11001_v56  ;;  %v1724_v37 = vld [vmem:[%s12732_s18 + $0x1da0] sm:$0xff]  ;;  %v11433_v56 = vcombine.low %v1740_v42, %v1748_v43  ;;  %v11161_v6 = vcombine.low %v1468_v35, %v1476_v36  ;;  %v1157_v42 = vld [vmem:[%s12732_s18 + $0xbe8] sm:$0xff] }
 0x379   : > { %7824 = vmatpush1.bf16.msra.mxu1 %v11257_v57  ;;  %7784 = vmatprep.subr.bf16.mxu0 %v10986_v59  ;;  %v1732_v7 = vld [vmem:[%s12732_s18 + $0x1de0] sm:$0xff]  ;;  %v11162_v57 = vcombine.high %v1468_v35, %v1476_v36  ;;  %v885_v35 = vld [vmem:[%s12732_s18 + $0x368] sm:$0xff]  ;;  %v1831_v36 = vrot.slane %v13418_v58, %v12937_v62 }
 0x37a   : > { %7825 = vmatprep.subr.bf16.mxu1 %v11242_v60  ;;  %v11418_v59 = vcombine.high %v1724_v37, %v1732_v7  ;;  %v1452_v60 = vld [vmem:[%s12732_s18 + $0x1520] sm:$0xff] }
 0x37b   : > { %v1460_v63 = vld [vmem:[%s12732_s18 + $0x1560] sm:$0xff] }
 0x37c   : > { %7785 = vmatpush1.bf16.msra.mxu0 %v10985_v50  ;;  %v1708_v3 = vld [vmem:[%s12732_s18 + $0x1d20] sm:$0xff]  ;;  %v11417_v50 = vcombine.low %v1724_v37, %v1732_v7  ;;  %v11145_v8 = vcombine.low %v1452_v60, %v1460_v63  ;;  %v1133_v7 = vld [vmem:[%s12732_s18 + $0xb28] sm:$0xff] }
 0x37d   : > { %7826 = vmatpush1.bf16.msra.mxu1 %v11241_v10  ;;  %7786 = vmatprep.subr.bf16.mxu0 %v11226_v11  ;;  %v1716_v4 = vld [vmem:[%s12732_s18 + $0x1d60] sm:$0xff]  ;;  %v11146_v10 = vcombine.high %v1452_v60, %v1460_v63  ;;  %v861_v60 = vld [vmem:[%s12732_s18 + $0x2a8] sm:$0xff] }
 0x37e   : > { %7827 = vmatprep.subr.bf16.mxu1 %v11482_v12  ;;  %v11402_v11 = vcombine.high %v1708_v3, %v1716_v4  ;;  %v1436_v12 = vld [vmem:[%s12732_s18 + $0x14a0] sm:$0xff]  ;;  %v869_v63 = vld [vmem:[%s12732_s18 + $0x2e8] sm:$0xff] }
 0x37f   : > { %v1444_v14 = vld [vmem:[%s12732_s18 + $0x14e0] sm:$0xff] }
 0x380   : > { %7787 = vmatpush2.bf16.msra.mxu0 %v11225_v18  ;;  %v1692_v16 = vld [vmem:[%s12732_s18 + $0x1ca0] sm:$0xff]  ;;  %v11401_v18 = vcombine.low %v1708_v3, %v1716_v4  ;;  %v11129_v31 = vcombine.low %v1436_v12, %v1444_v14 }
 0x381   : > { %7828 = vmatpush2.bf16.msra.mxu1 %v11481_v20  ;;  %7788 = vmatprep.subr.bf16.mxu0 %v11210_v46  ;;  %v1700_v9 = vld [vmem:[%s12732_s18 + $0x1ce0] sm:$0xff]  ;;  %v11130_v20 = vcombine.high %v1436_v12, %v1444_v14 }
 0x382   : > { %7829 = vmatprep.subr.bf16.mxu1 %v11466_v21  ;;  %v11386_v46 = vcombine.high %v1692_v16, %v1700_v9  ;;  %v1420_v21 = vld [vmem:[%s12732_s18 + $0x1420] sm:$0xff] }
 0x383   : > { %v1428_v22 = vld [vmem:[%s12732_s18 + $0x1460] sm:$0xff] }
 0x384   : > { %7789 = vmatpush2.bf16.msra.mxu0 %v11209_v19  ;;  %v1676_v23 = vld [vmem:[%s12732_s18 + $0x1c20] sm:$0xff]  ;;  %v11385_v19 = vcombine.low %v1692_v16, %v1700_v9  ;;  %v11113_v43 = vcombine.low %v1420_v21, %v1428_v22  ;;  %v10556_v16 = vcombine.high %v861_v60, %v869_v63 }
 0x385   : > { %7830 = vmatpush2.bf16.msra.mxu1 %v11465_v5  ;;  %7790 = vmatprep.subr.bf16.mxu0 %v11194_v32  ;;  %v1684_v27 = vld [vmem:[%s12732_s18 + $0x1c60] sm:$0xff]  ;;  %v11114_v5 = vcombine.high %v1420_v21, %v1428_v22  ;;  %v853_v21 = vld [vmem:[%s12732_s18 + $0x268] sm:$0xff] }
 0x386   : > { %7831 = vmatprep.subr.bf16.mxu1 %v11450_v33  ;;  %v11370_v32 = vcombine.high %v1676_v23, %v1684_v27  ;;  %v893_v33 = vld [vmem:[%s12732_s18 + $0x3a8] sm:$0xff] }
 0x387   : > { %v10587_v37 = vcombine.low %v893_v33, %v901_v34 }
 0x388   : > { %7791 = vmatpush2.bf16.msra.mxu0 %v11193_v51  ;;  %v11369_v51 = vcombine.low %v1676_v23, %v1684_v27  ;;  %v1101_v23 = vld [vmem:[%s12732_s18 + $0xa28] sm:$0xff] }
 0x389   : > { %7832 = vmatpush2.bf16.msra.mxu1 %v11449_v52  ;;  %7792 = vmatprep.subr.bf16.mxu0 %v11178_v53  ;;  %v10588_v52 = vcombine.high %v893_v33, %v901_v34  ;;  %v10844_v53 = vcombine.high %v1149_v38, %v1157_v42  ;;  %v1109_v27 = vld [vmem:[%s12732_s18 + $0xa68] sm:$0xff] }
 0x38a   : > { %7833 = vmatprep.subr.bf16.mxu1 %v11434_v54  ;;  %v877_v54 = vld [vmem:[%s12732_s18 + $0x328] sm:$0xff] }
 0x38b   : > { %v10571_v12 = vcombine.low %v877_v54, %v885_v35 }
 0x38c   : > { %7793 = vmatpush2.bf16.msra.mxu0 %v11177_v55  ;;  %v1141_v55 = vld [vmem:[%s12732_s18 + $0xb68] sm:$0xff] }
 0x38d   : > { %7834 = vmatpush2.bf16.msra.mxu1 %v11433_v56  ;;  %7794 = vmatprep.subr.bf16.mxu0 %v11162_v57  ;;  %v10843_v56 = vcombine.low %v1149_v38, %v1157_v42  ;;  %v1835_v57 = vrot.slane %v13418_v58, %v12862_v0  ;;  %v10828_v4 = vcombine.high %v1133_v7, %v1141_v55 }
 0x38e   : > { %7835 = vmatprep.subr.bf16.mxu1 %v11418_v59  ;;  %v10572_v59 = vcombine.high %v877_v54, %v885_v35  ;;  %v10827_v14 = vcombine.low %v1133_v7, %v1141_v55  ;;  %v10796_v42 = vcombine.high %v1101_v23, %v1109_v27  ;;  %v10795_v35 = vcombine.low %v1101_v23, %v1109_v27  ;;  %v813_v7 = vld [vmem:[%s12732_s18 + $0x128] sm:$0xff] }
 0x38f   : > { %v821_v55 = vld [vmem:[%s12732_s18 + $0x168] sm:$0xff] }
 0x390   : > { %7795 = vmatpush2.bf16.msra.mxu0 %v11161_v6  ;;  %v1117_v6 = vld [vmem:[%s12732_s18 + $0xaa8] sm:$0xff] }
 0x391   : > { %7836 = vmatpush2.bf16.msra.mxu1 %v11417_v50  ;;  %7796 = vmatprep.subr.bf16.mxu0 %v11146_v10  ;;  %v1125_v50 = vld [vmem:[%s12732_s18 + $0xae8] sm:$0xff] }
 0x392   : > { %7837 = vmatprep.subr.bf16.mxu1 %v11402_v11  ;;  %v10811_v33 = vcombine.low %v1117_v6, %v1125_v50  ;;  %v1021_v27 = vld [vmem:[%s12732_s18 + $0x7a8] sm:$0xff] }
 0x394   : > { %7797 = vmatpush2.bf16.msra.mxu0 %v11145_v8 }
 0x395   : > { %7838 = vmatpush2.bf16.msra.mxu1 %v11401_v18  ;;  %7798 = vmatprep.subr.bf16.mxu0 %v11130_v20  ;;  %v10812_v20 = vcombine.high %v1117_v6, %v1125_v50  ;;  %v805_v6 = vld [vmem:[%s12732_s18 + $0xe8] sm:$0xff] }
 0x396   : > { %7839 = vmatprep.subr.bf16.mxu1 %v11386_v46  ;;  %v845_v46 = vld [vmem:[%s12732_s18 + $0x228] sm:$0xff] }
 0x397   : > { %v10540_v34 = vcombine.high %v845_v46, %v853_v21  ;;  %v10539_v54 = vcombine.low %v845_v46, %v853_v21  ;;  %v1053_v50 = vld [vmem:[%s12732_s18 + $0x8a8] sm:$0xff] }
 0x398   : > { %7799 = vmatpush2.bf16.msra.mxu0 %v11129_v31 }
 0x399   : > { %7840 = vmatpush2.bf16.msra.mxu1 %v11385_v19  ;;  %7800 = vmatprep.subr.bf16.mxu0 %v11114_v5  ;;  %v10555_v5 = vcombine.low %v861_v60, %v869_v63  ;;  %v10508_v63 = vcombine.high %v813_v7, %v821_v55 }
 0x39a   : > { %7841 = vmatprep.subr.bf16.mxu1 %v11370_v32 }
 0x39c   : > { %7801 = vmatpush2.bf16.msra.mxu0 %v11113_v43  ;;  %v829_v43 = vld [vmem:[%s12732_s18 + $0x1a8] sm:$0xff] }
 0x39d   : > { %7842 = vmatpush2.bf16.msra.mxu1 %v11369_v51  ;;  %7852 = vmatprep.subr.bf16.mxu0 %v10588_v52  ;;  %v837_v51 = vld [vmem:[%s12732_s18 + $0x1e8] sm:$0xff] }
 0x39e   : > { %7893 = vmatprep.subr.bf16.mxu1 %v10844_v53  ;;  %v1085_v52 = vld [vmem:[%s12732_s18 + $0x9a8] sm:$0xff] }
 0x39f   : > { %v7558_v3 = vpop.f32.mrf.mxu0  ;;  %7803 = vmatmul.mubr.bf16.vlgmr.msra.gmra.mxu0 %v12978_v15  ;;  %v1093_v53 = vld [vmem:[%s12732_s18 + $0x9e8] sm:$0xff] }
 0x3a0   : > { %v7559_v10 = vadd.f32 %v7558_v3, %v1831_v36  ;;  %v7599_v11 = vpop.f32.mrf.mxu1  ;;  %7844 = vmatmul.mubr.bf16.vlgmr.msra.gmra.mxu1 %v12974_v44  ;;  %7853 = vmatpush1.bf16.msra.mxu0 %v10587_v37  ;;  %v10524_v36 = vcombine.high %v829_v43, %v837_v51  ;;  %v10780_v37 = vcombine.high %v1085_v52, %v1093_v53 }
 0x3a1   : > { %7884 = vmatprep.mubr.bf16.mxu0 %v12876_v24  ;;  %7894 = vmatpush1.bf16.msra.mxu1 %v10843_v56  ;;  %v7560_v58 = vpop.f32.mrf.mxu0  ;;  %v1069_v56 = vld [vmem:[%s12732_s18 + $0x928] sm:$0xff]  ;;  %v10779_v60 = vcombine.low %v1085_v52, %v1093_v53 }
 0x3a2   : > { %v13583_v9 = vadd.f32 %v7599_v11, %v7559_v10  ;;  %7925 = vmatprep.mubr.bf16.mxu1 %v12880_v26  ;;  %v7561_v8 = vadd.f32 %v7560_v58, %v1835_v57  ;;  %v7601_v18 = vpop.f32.mrf.mxu1  ;;  %7854 = vmatprep.subr.bf16.mxu0 %v10572_v59  ;;  %v1077_v57 = vld [vmem:[%s12732_s18 + $0x968] sm:$0xff]  ;;  %v10523_v59 = vcombine.low %v829_v43, %v837_v51 }
 0x3a3   : > { %v7562_v22 = vpop.f32.mrf.mxu0  ;;  %7895 = vmatprep.subr.bf16.mxu1 %v10828_v4  ;;  %v10764_v3 = vcombine.high %v1069_v56, %v1077_v57  ;;  %v797_v4 = vld [vmem:[%s12732_s18 + $0xa8] sm:$0xff]  ;;  %v10507_v11 = vcombine.low %v813_v7, %v821_v55 }
 0x3a4   : > { %v13590_v31 = vadd.f32 %v7601_v18, %v7561_v8  ;;  %v7603_v19 = vpop.f32.mrf.mxu1  ;;  %7855 = vmatpush1.bf16.msra.mxu0 %v10571_v12  ;;  %v1061_v10 = vld [vmem:[%s12732_s18 + $0x8e8] sm:$0xff]  ;;  %v10763_v12 = vcombine.low %v1069_v56, %v1077_v57  ;;  %v10492_v58 = vcombine.high %v797_v4, %v805_v6  ;;  %v10491_v46 = vcombine.low %v797_v4, %v805_v6 }
 0x3a5   : > { %7896 = vmatpush1.bf16.msra.mxu1 %v10827_v14  ;;  %v7563_v32 = vpop.f32.mrf.mxu0  ;;  %7856 = vmatprep.subr.bf16.mxu0 %v10556_v16  ;;  %v10748_v14 = vcombine.high %v1053_v50, %v1061_v10  ;;  %v781_v16 = vld [vmem:[%s12732_s18 + $0x28] sm:$0xff]  ;;  %v10747_v21 = vcombine.low %v1053_v50, %v1061_v10 }
 0x3a6   : > { %v7604_v38 = vpop.f32.mrf.mxu1  ;;  %7897 = vmatprep.subr.bf16.mxu1 %v10812_v20  ;;  %v789_v8 = vld [vmem:[%s12732_s18 + $0x68] sm:$0xff] }
 0x3a7   : > { %v1037_v18 = vld [vmem:[%s12732_s18 + $0x828] sm:$0xff]  ;;  %v10476_v22 = vcombine.high %v781_v16, %v789_v8 }
 0x3a8   : > { %7857 = vmatpush1.bf16.msra.mxu0 %v10555_v5  ;;  %v1045_v20 = vld [vmem:[%s12732_s18 + $0x868] sm:$0xff] }
 0x3a9   : > { %7898 = vmatpush1.bf16.msra.mxu1 %v10811_v33  ;;  %7858 = vmatprep.subr.bf16.mxu0 %v10540_v34  ;;  %v10732_v23 = vcombine.high %v1037_v18, %v1045_v20  ;;  %v1029_v19 = vld [vmem:[%s12732_s18 + $0x7e8] sm:$0xff]  ;;  %v10475_v33 = vcombine.low %v781_v16, %v789_v8  ;;  %v10731_v34 = vcombine.low %v1037_v18, %v1045_v20 }
 0x3aa   : > { %7899 = vmatprep.subr.bf16.mxu1 %v10796_v42  ;;  %v1277_v5 = vld [vmem:[%s12732_s18 + $0xfa8] sm:$0xff]  ;;  %v10716_v38 = vcombine.high %v1021_v27, %v1029_v19 }
 0x3ab   : > { %v1285_v32 = vld [vmem:[%s12732_s18 + $0xfe8] sm:$0xff] }
 0x3ac   : > { %7859 = vmatpush1.bf16.msra.mxu0 %v10539_v54  ;;  %v10972_v42 = vcombine.high %v1277_v5, %v1285_v32  ;;  %v1005_v43 = vld [vmem:[%s12732_s18 + $0x728] sm:$0xff]  ;;  %v10715_v54 = vcombine.low %v1021_v27, %v1029_v19 }
 0x3ad   : > { %7900 = vmatpush1.bf16.msra.mxu1 %v10795_v35  ;;  %7860 = vmatprep.subr.bf16.mxu0 %v10524_v36  ;;  %v1013_v51 = vld [vmem:[%s12732_s18 + $0x768] sm:$0xff]  ;;  %v10971_v35 = vcombine.low %v1277_v5, %v1285_v32 }
 0x3ae   : > { %7901 = vmatprep.subr.bf16.mxu1 %v10780_v37  ;;  %v1261_v52 = vld [vmem:[%s12732_s18 + $0xf28] sm:$0xff]  ;;  %v10700_v36 = vcombine.high %v1005_v43, %v1013_v51 }
 0x3af   : > { %v1269_v53 = vld [vmem:[%s12732_s18 + $0xf68] sm:$0xff] }
 0x3b0   : > { %7861 = vmatpush1.bf16.msra.mxu0 %v10523_v59  ;;  %v10956_v37 = vcombine.high %v1261_v52, %v1269_v53  ;;  %v989_v7 = vld [vmem:[%s12732_s18 + $0x6a8] sm:$0xff]  ;;  %v10699_v59 = vcombine.low %v1005_v43, %v1013_v51 }
 0x3b1   : > { %7902 = vmatpush1.bf16.msra.mxu1 %v10779_v60  ;;  %7862 = vmatprep.subr.bf16.mxu0 %v10508_v63  ;;  %v997_v55 = vld [vmem:[%s12732_s18 + $0x6e8] sm:$0xff]  ;;  %v10955_v60 = vcombine.low %v1261_v52, %v1269_v53 }
 0x3b2   : > { %7903 = vmatprep.subr.bf16.mxu1 %v10764_v3  ;;  %v1245_v56 = vld [vmem:[%s12732_s18 + $0xea8] sm:$0xff]  ;;  %v10684_v63 = vcombine.high %v989_v7, %v997_v55 }
 0x3b3   : > { %v1253_v57 = vld [vmem:[%s12732_s18 + $0xee8] sm:$0xff] }
 0x3b4   : > { %7863 = vmatpush1.bf16.msra.mxu0 %v10507_v11  ;;  %v10940_v3 = vcombine.high %v1245_v56, %v1253_v57  ;;  %v973_v4 = vld [vmem:[%s12732_s18 + $0x628] sm:$0xff]  ;;  %v10683_v11 = vcombine.low %v989_v7, %v997_v55 }
 0x3b5   : > { %7904 = vmatpush1.bf16.msra.mxu1 %v10763_v12  ;;  %7864 = vmatprep.subr.bf16.mxu0 %v10492_v58  ;;  %v981_v6 = vld [vmem:[%s12732_s18 + $0x668] sm:$0xff]  ;;  %v10939_v12 = vcombine.low %v1245_v56, %v1253_v57 }
 0x3b6   : > { %7905 = vmatprep.subr.bf16.mxu1 %v10748_v14  ;;  %v1229_v50 = vld [vmem:[%s12732_s18 + $0xe28] sm:$0xff]  ;;  %v10668_v58 = vcombine.high %v973_v4, %v981_v6 }
 0x3b7   : > { %v1237_v10 = vld [vmem:[%s12732_s18 + $0xe68] sm:$0xff] }
 0x3b8   : > { %7865 = vmatpush1.bf16.msra.mxu0 %v10491_v46  ;;  %v10924_v14 = vcombine.high %v1229_v50, %v1237_v10  ;;  %v957_v16 = vld [vmem:[%s12732_s18 + $0x5a8] sm:$0xff]  ;;  %v10667_v46 = vcombine.low %v973_v4, %v981_v6 }
 0x3b9   : > { %7906 = vmatpush1.bf16.msra.mxu1 %v10747_v21  ;;  %7866 = vmatprep.subr.bf16.mxu0 %v10476_v22  ;;  %v965_v8 = vld [vmem:[%s12732_s18 + $0x5e8] sm:$0xff]  ;;  %v10923_v21 = vcombine.low %v1229_v50, %v1237_v10 }
 0x3ba   : > { %7907 = vmatprep.subr.bf16.mxu1 %v10732_v23  ;;  %v1213_v18 = vld [vmem:[%s12732_s18 + $0xda8] sm:$0xff]  ;;  %v10652_v22 = vcombine.high %v957_v16, %v965_v8 }
 0x3bb   : > { %v1221_v20 = vld [vmem:[%s12732_s18 + $0xde8] sm:$0xff] }
 0x3bc   : > { %7867 = vmatpush1.bf16.msra.mxu0 %v10475_v33  ;;  %v10908_v23 = vcombine.high %v1213_v18, %v1221_v20  ;;  %v941_v27 = vld [vmem:[%s12732_s18 + $0x528] sm:$0xff]  ;;  %v10651_v33 = vcombine.low %v957_v16, %v965_v8 }
 0x3bd   : > { %7908 = vmatpush1.bf16.msra.mxu1 %v10731_v34  ;;  %7868 = vmatprep.subr.bf16.mxu0 %v10716_v38  ;;  %v949_v19 = vld [vmem:[%s12732_s18 + $0x568] sm:$0xff]  ;;  %v10907_v34 = vcombine.low %v1213_v18, %v1221_v20 }
 0x3be   : > { %7909 = vmatprep.subr.bf16.mxu1 %v10972_v42  ;;  %v1197_v5 = vld [vmem:[%s12732_s18 + $0xd28] sm:$0xff]  ;;  %v10636_v38 = vcombine.high %v941_v27, %v949_v19 }
 0x3bf   : > { %v1205_v32 = vld [vmem:[%s12732_s18 + $0xd68] sm:$0xff] }
 0x3c0   : > { %7869 = vmatpush2.bf16.msra.mxu0 %v10715_v54  ;;  %v10892_v42 = vcombine.high %v1197_v5, %v1205_v32  ;;  %v925_v43 = vld [vmem:[%s12732_s18 + $0x4a8] sm:$0xff]  ;;  %v10635_v54 = vcombine.low %v941_v27, %v949_v19 }
 0x3c1   : > { %7910 = vmatpush2.bf16.msra.mxu1 %v10971_v35  ;;  %7870 = vmatprep.subr.bf16.mxu0 %v10700_v36  ;;  %v933_v51 = vld [vmem:[%s12732_s18 + $0x4e8] sm:$0xff]  ;;  %v10891_v35 = vcombine.low %v1197_v5, %v1205_v32 }
 0x3c2   : > { %7911 = vmatprep.subr.bf16.mxu1 %v10956_v37  ;;  %v1181_v52 = vld [vmem:[%s12732_s18 + $0xca8] sm:$0xff]  ;;  %v10620_v36 = vcombine.high %v925_v43, %v933_v51 }
 0x3c3   : > { %v1189_v53 = vld [vmem:[%s12732_s18 + $0xce8] sm:$0xff] }
 0x3c4   : > { %7871 = vmatpush2.bf16.msra.mxu0 %v10699_v59  ;;  %v10876_v37 = vcombine.high %v1181_v52, %v1189_v53  ;;  %v909_v7 = vld [vmem:[%s12732_s18 + $0x428] sm:$0xff]  ;;  %v10619_v59 = vcombine.low %v925_v43, %v933_v51 }
 0x3c5   : > { %7912 = vmatpush2.bf16.msra.mxu1 %v10955_v60  ;;  %7872 = vmatprep.subr.bf16.mxu0 %v10684_v63  ;;  %v917_v55 = vld [vmem:[%s12732_s18 + $0x468] sm:$0xff]  ;;  %v10875_v60 = vcombine.low %v1181_v52, %v1189_v53 }
 0x3c6   : > { %7913 = vmatprep.subr.bf16.mxu1 %v10940_v3  ;;  %v1165_v56 = vld [vmem:[%s12732_s18 + $0xc28] sm:$0xff]  ;;  %v10604_v63 = vcombine.high %v909_v7, %v917_v55 }
 0x3c7   : > { %v1173_v57 = vld [vmem:[%s12732_s18 + $0xc68] sm:$0xff] }
 0x3c8   : > { %7873 = vmatpush2.bf16.msra.mxu0 %v10683_v11  ;;  %v10860_v3 = vcombine.high %v1165_v56, %v1173_v57  ;;  %v1405_v4 = vld [vmem:[%s12732_s18 + $0x13a8] sm:$0xff]  ;;  %v10603_v11 = vcombine.low %v909_v7, %v917_v55 }
 0x3c9   : > { %7914 = vmatpush2.bf16.msra.mxu1 %v10939_v12  ;;  %7874 = vmatprep.subr.bf16.mxu0 %v10668_v58  ;;  %v1413_v6 = vld [vmem:[%s12732_s18 + $0x13e8] sm:$0xff]  ;;  %v10859_v12 = vcombine.low %v1165_v56, %v1173_v57 }
 0x3ca   : > { %7915 = vmatprep.subr.bf16.mxu1 %v10924_v14  ;;  %v1661_v50 = vld [vmem:[%s12732_s18 + $0x1ba8] sm:$0xff]  ;;  %v11100_v58 = vcombine.high %v1405_v4, %v1413_v6  ;;  %v11099_v18 = vcombine.low %v1405_v4, %v1413_v6 }
 0x3cb   : > { %v1669_v10 = vld [vmem:[%s12732_s18 + $0x1be8] sm:$0xff] }
 0x3cc   : > { %7875 = vmatpush2.bf16.msra.mxu0 %v10667_v46  ;;  %v11356_v14 = vcombine.high %v1661_v50, %v1669_v10  ;;  %v1389_v16 = vld [vmem:[%s12732_s18 + $0x1328] sm:$0xff] }
 0x3cd   : > { %7916 = vmatpush2.bf16.msra.mxu1 %v10923_v21  ;;  %7876 = vmatprep.subr.bf16.mxu0 %v10652_v22  ;;  %v1397_v8 = vld [vmem:[%s12732_s18 + $0x1368] sm:$0xff]  ;;  %v11355_v21 = vcombine.low %v1661_v50, %v1669_v10 }
 0x3ce   : > { %7917 = vmatprep.subr.bf16.mxu1 %v10908_v23  ;;  %v1645_v20 = vld [vmem:[%s12732_s18 + $0x1b28] sm:$0xff]  ;;  %v11084_v22 = vcombine.high %v1389_v16, %v1397_v8 }
 0x3cf   : > { %v1653_v46 = vld [vmem:[%s12732_s18 + $0x1b68] sm:$0xff] }
 0x3d0   : > { %7877 = vmatpush2.bf16.msra.mxu0 %v10651_v33  ;;  %v1373_v23 = vld [vmem:[%s12732_s18 + $0x12a8] sm:$0xff]  ;;  %v11340_v5 = vcombine.high %v1645_v20, %v1653_v46  ;;  %v11339_v51 = vcombine.low %v1645_v20, %v1653_v46 }
 0x3d1   : > { %7918 = vmatpush2.bf16.msra.mxu1 %v10907_v34  ;;  %7878 = vmatprep.subr.bf16.mxu0 %v10636_v38  ;;  %v1381_v27 = vld [vmem:[%s12732_s18 + $0x12e8] sm:$0xff] }
 0x3d2   : > { %7919 = vmatprep.subr.bf16.mxu1 %v10892_v42  ;;  %v1629_v32 = vld [vmem:[%s12732_s18 + $0x1aa8] sm:$0xff]  ;;  %v11083_v42 = vcombine.low %v1389_v16, %v1397_v8  ;;  %v11068_v52 = vcombine.high %v1373_v23, %v1381_v27 }
 0x3d3   : > { %v1637_v33 = vld [vmem:[%s12732_s18 + $0x1ae8] sm:$0xff] }
 0x3d4   : > { %7879 = vmatpush2.bf16.msra.mxu0 %v10635_v54  ;;  %v1613_v55 = vld [vmem:[%s12732_s18 + $0x1a28] sm:$0xff] }
 0x3d5   : > { %7920 = vmatpush2.bf16.msra.mxu1 %v10891_v35  ;;  %7880 = vmatprep.subr.bf16.mxu0 %v10620_v36  ;;  %v11324_v35 = vcombine.high %v1629_v32, %v1637_v33  ;;  %v1357_v36 = vld [vmem:[%s12732_s18 + $0x1228] sm:$0xff] }
 0x3d6   : > { %7921 = vmatprep.subr.bf16.mxu1 %v10876_v37  ;;  %v1365_v37 = vld [vmem:[%s12732_s18 + $0x1268] sm:$0xff] }
 0x3d7   : > { %v1621_v56 = vld [vmem:[%s12732_s18 + $0x1a68] sm:$0xff] }
 0x3d8   : > { %7881 = vmatpush2.bf16.msra.mxu0 %v10619_v59  ;;  %v11308_v6 = vcombine.high %v1613_v55, %v1621_v56  ;;  %v1341_v50 = vld [vmem:[%s12732_s18 + $0x11a8] sm:$0xff] }
 0x3d9   : > { %7922 = vmatpush2.bf16.msra.mxu1 %v10875_v60  ;;  %7882 = vmatprep.subr.bf16.mxu0 %v10604_v63  ;;  %v11067_v60 = vcombine.low %v1373_v23, %v1381_v27  ;;  %v11323_v63 = vcombine.low %v1629_v32, %v1637_v33  ;;  %v1349_v10 = vld [vmem:[%s12732_s18 + $0x11e8] sm:$0xff] }
 0x3da   : > { %7923 = vmatprep.subr.bf16.mxu1 %v10860_v3  ;;  %v11052_v3 = vcombine.high %v1357_v36, %v1365_v37  ;;  %v11036_v16 = vcombine.high %v1341_v50, %v1349_v10  ;;  %v1333_v20 = vld [vmem:[%s12732_s18 + $0x1168] sm:$0xff] }
 0x3db   : > { %v1581_v46 = vld [vmem:[%s12732_s18 + $0x1928] sm:$0xff] }
 0x3dc   : > { %7883 = vmatpush2.bf16.msra.mxu0 %v10603_v11  ;;  %v1597_v11 = vld [vmem:[%s12732_s18 + $0x19a8] sm:$0xff] }
 0x3dd   : > { %7924 = vmatpush2.bf16.msra.mxu1 %v10859_v12  ;;  %7934 = vmatprep.subr.bf16.mxu0 %v11100_v58  ;;  %v1605_v12 = vld [vmem:[%s12732_s18 + $0x19e8] sm:$0xff]  ;;  %v11051_v58 = vcombine.low %v1357_v36, %v1365_v37 }
 0x3de   : > { %7975 = vmatprep.subr.bf16.mxu1 %v11356_v14  ;;  %v11307_v14 = vcombine.low %v1613_v55, %v1621_v56  ;;  %v11292_v8 = vcombine.high %v1597_v11, %v1605_v12  ;;  %v11291_v23 = vcombine.low %v1597_v11, %v1605_v12  ;;  %v1317_v32 = vld [vmem:[%s12732_s18 + $0x10e8] sm:$0xff] }
 0x3df   : > { %v7640_v19 = vpop.f32.mrf.mxu0  ;;  %7885 = vmatmul.mubr.bf16.vlgmr.msra.gmra.mxu0 %v12878_v25  ;;  %v1565_v33 = vld [vmem:[%s12732_s18 + $0x18a8] sm:$0xff] }
 0x3e0   : > { %v7641_v34 = vadd.f32 %v7640_v19, %v13583_v9  ;;  %v7681_v38 = vpop.f32.mrf.mxu1  ;;  %7926 = vmatmul.mubr.bf16.vlgmr.msra.gmra.mxu1 %v12882_v28  ;;  %7935 = vmatpush1.bf16.msra.mxu0 %v11099_v18  ;;  %v1325_v18 = vld [vmem:[%s12732_s18 + $0x1128] sm:$0xff] }
 0x3e1   : > { %7966 = vmatprep.mubr.bf16.mxu0 %v12902_v40  ;;  %7976 = vmatpush1.bf16.msra.mxu1 %v11355_v21  ;;  %v7642_v43 = vpop.f32.mrf.mxu0  ;;  %v1589_v21 = vld [vmem:[%s12732_s18 + $0x1968] sm:$0xff]  ;;  %v11020_v27 = vcombine.high %v1325_v18, %v1333_v20 }
 0x3e2   : > { %v13656_v53 = vadd.f32 %v7681_v38, %v7641_v34  ;;  %8007 = vmatprep.mubr.bf16.mxu1 %v12904_v41  ;;  %v7643_v9 = vadd.f32 %v7642_v43, %v13590_v31  ;;  %v7683_v54 = vpop.f32.mrf.mxu1  ;;  %7936 = vmatprep.subr.bf16.mxu0 %v11084_v22  ;;  %v11035_v22 = vcombine.low %v1341_v50, %v1349_v10  ;;  %v1573_v34 = vld [vmem:[%s12732_s18 + $0x18e8] sm:$0xff] }
 0x3e3   : > { %v7644_v7 = vpop.f32.mrf.mxu0  ;;  %7977 = vmatprep.subr.bf16.mxu1 %v11340_v5  ;;  %v11276_v19 = vcombine.high %v1581_v46, %v1589_v21  ;;  %v1309_v5 = vld [vmem:[%s12732_s18 + $0x10a8] sm:$0xff]  ;;  %v11019_v38 = vcombine.low %v1325_v18, %v1333_v20  ;;  %v11259_v37 = vcombine.low %v1565_v33, %v1573_v34 }
 0x3e4   : > { %v13664_v57 = vadd.f32 %v7683_v54, %v7643_v9  ;;  %v7685_v59 = vpop.f32.mrf.mxu1  ;;  %7937 = vmatpush1.bf16.msra.mxu0 %v11083_v42  ;;  %v11275_v42 = vcombine.low %v1581_v46, %v1589_v21  ;;  %v11004_v43 = vcombine.high %v1309_v5, %v1317_v32  ;;  %v1301_v9 = vld [vmem:[%s12732_s18 + $0x1068] sm:$0xff]  ;;  %v11003_v36 = vcombine.low %v1309_v5, %v1317_v32 }
 0x3e5   : > { %7978 = vmatpush1.bf16.msra.mxu1 %v11339_v51  ;;  %v7645_v31 = vpop.f32.mrf.mxu0  ;;  %7938 = vmatprep.subr.bf16.mxu0 %v11068_v52  ;;  %v11260_v51 = vcombine.high %v1565_v33, %v1573_v34  ;;  %v1293_v52 = vld [vmem:[%s12732_s18 + $0x1028] sm:$0xff] }
 0x3e6   : > { %v7686_v4 = vpop.f32.mrf.mxu1  ;;  %7979 = vmatprep.subr.bf16.mxu1 %v11324_v35  ;;  %v1549_v54 = vld [vmem:[%s12732_s18 + $0x1828] sm:$0xff]  ;;  %v10988_v7 = vcombine.high %v1293_v52, %v1301_v9  ;;  %12278 = vtanh.f32 %v13664_v57 }
 0x3e7   : > { %v1557_v35 = vld [vmem:[%s12732_s18 + $0x1868] sm:$0xff]  ;;  %12280 = vtanh.f32 %v13506_v39 }
 0x3e8   : > { %7939 = vmatpush1.bf16.msra.mxu0 %v11067_v60  ;;  %v11244_v55 = vcombine.high %v1549_v54, %v1557_v35  ;;  %v1533_v56 = vld [vmem:[%s12732_s18 + $0x17a8] sm:$0xff]  ;;  %12282 = vtanh.f32 %v13656_v53  ;;  %v12053_v53 = vld [vmem:[%s12740_s1 + $0x394] ss:$8 sps:$4 sm:$0xff]  }
 0x3e9   : > { %7980 = vmatpush1.bf16.msra.mxu1 %v11323_v63  ;;  %7940 = vmatprep.subr.bf16.mxu0 %v11052_v3  ;;  %v1541_v59 = vld [vmem:[%s12732_s18 + $0x17e8] sm:$0xff]  ;;  %v10987_v63 = vcombine.low %v1293_v52, %v1301_v9  ;;  %v11243_v3 = vcombine.low %v1549_v54, %v1557_v35 }
 0x3ea   : > { %7981 = vmatprep.subr.bf16.mxu1 %v11308_v6  ;;  %v1789_v60 = vld [vmem:[%s12732_s18 + $0x1fa8] sm:$0xff]  ;;  %v11228_v4 = vcombine.high %v1533_v56, %v1541_v59 }
 0x3eb   : > { %v1797_v31 = vld [vmem:[%s12732_s18 + $0x1fe8] sm:$0xff] }
 0x3ec   : > { %7941 = vmatpush1.bf16.msra.mxu0 %v11051_v58  ;;  %v11484_v6 = vcombine.high %v1789_v60, %v1797_v31  ;;  %v1517_v50 = vld [vmem:[%s12732_s18 + $0x1728] sm:$0xff]  ;;  %v11227_v58 = vcombine.low %v1533_v56, %v1541_v59 }
 0x3ed   : > { %7982 = vmatpush1.bf16.msra.mxu1 %v11307_v14  ;;  %7942 = vmatprep.subr.bf16.mxu0 %v11036_v16  ;;  %v1525_v10 = vld [vmem:[%s12732_s18 + $0x1768] sm:$0xff]  ;;  %v11483_v14 = vcombine.low %v1789_v60, %v1797_v31 }
 0x3ee   : > { %7983 = vmatprep.subr.bf16.mxu1 %v11292_v8  ;;  %v1773_v11 = vld [vmem:[%s12732_s18 + $0x1f28] sm:$0xff]  ;;  %v11212_v16 = vcombine.high %v1517_v50, %v1525_v10 }
 0x3ef   : > { %v1781_v12 = vld [vmem:[%s12732_s18 + $0x1f68] sm:$0xff] }
 0x3f0   : > { %7943 = vmatpush1.bf16.msra.mxu0 %v11035_v22  ;;  %v11468_v8 = vcombine.high %v1773_v11, %v1781_v12  ;;  %v1501_v18 = vld [vmem:[%s12732_s18 + $0x16a8] sm:$0xff]  ;;  %v11211_v22 = vcombine.low %v1517_v50, %v1525_v10 }
 0x3f1   : > { %7984 = vmatpush1.bf16.msra.mxu1 %v11291_v23  ;;  %7944 = vmatprep.subr.bf16.mxu0 %v11020_v27  ;;  %v1509_v20 = vld [vmem:[%s12732_s18 + $0x16e8] sm:$0xff]  ;;  %v11467_v23 = vcombine.low %v1773_v11, %v1781_v12 }
 0x3f2   : > { %7985 = vmatprep.subr.bf16.mxu1 %v11276_v19  ;;  %v1757_v46 = vld [vmem:[%s12732_s18 + $0x1ea8] sm:$0xff]  ;;  %v11196_v27 = vcombine.high %v1501_v18, %v1509_v20 }
 0x3f3   : > { %v1765_v21 = vld [vmem:[%s12732_s18 + $0x1ee8] sm:$0xff] }
 0x3f4   : > { %7945 = vmatpush1.bf16.msra.mxu0 %v11019_v38  ;;  %v11452_v19 = vcombine.high %v1757_v46, %v1765_v21  ;;  %v1485_v5 = vld [vmem:[%s12732_s18 + $0x1628] sm:$0xff]  ;;  %v11195_v38 = vcombine.low %v1501_v18, %v1509_v20 }
 0x3f5   : > { %7986 = vmatpush1.bf16.msra.mxu1 %v11275_v42  ;;  %7946 = vmatprep.subr.bf16.mxu0 %v11004_v43  ;;  %v1493_v32 = vld [vmem:[%s12732_s18 + $0x1668] sm:$0xff]  ;;  %v11451_v42 = vcombine.low %v1757_v46, %v1765_v21 }
 0x3f6   : > { %7987 = vmatprep.subr.bf16.mxu1 %v11260_v51  ;;  %v1741_v33 = vld [vmem:[%s12732_s18 + $0x1e28] sm:$0xff]  ;;  %v11180_v43 = vcombine.high %v1485_v5, %v1493_v32 }
 0x3f7   : > { %v1749_v34 = vld [vmem:[%s12732_s18 + $0x1e68] sm:$0xff] }
 0x3f8   : > { %7947 = vmatpush1.bf16.msra.mxu0 %v11003_v36  ;;  %v11436_v51 = vcombine.high %v1741_v33, %v1749_v34  ;;  %v1469_v52 = vld [vmem:[%s12732_s18 + $0x15a8] sm:$0xff]  ;;  %v11179_v36 = vcombine.low %v1485_v5, %v1493_v32  ;;  %v894_v5 = vld [vmem:[%s12732_s18 + $0x3b0] sm:$0xff] }
 0x3f9   : > { %7988 = vmatpush1.bf16.msra.mxu1 %v11259_v37  ;;  %7948 = vmatprep.subr.bf16.mxu0 %v10988_v7  ;;  %v1477_v9 = vld [vmem:[%s12732_s18 + $0x15e8] sm:$0xff]  ;;  %v11435_v37 = vcombine.low %v1741_v33, %v1749_v34  ;;  %v902_v32 = vld [vmem:[%s12732_s18 + $0x3f0] sm:$0xff] }
 0x3fa   : > { %7989 = vmatprep.subr.bf16.mxu1 %v11244_v55  ;;  %v1725_v54 = vld [vmem:[%s12732_s18 + $0x1da8] sm:$0xff]  ;;  %v11164_v7 = vcombine.high %v1469_v52, %v1477_v9  ;;  %v1150_v33 = vld [vmem:[%s12732_s18 + $0xbb0] sm:$0xff] }
 0x3fb   : > { %v1733_v35 = vld [vmem:[%s12732_s18 + $0x1de8] sm:$0xff]  ;;  %v1158_v34 = vld [vmem:[%s12732_s18 + $0xbf0] sm:$0xff] }
 0x3fc   : > { %7949 = vmatpush1.bf16.msra.mxu0 %v10987_v63  ;;  %v11420_v55 = vcombine.high %v1725_v54, %v1733_v35  ;;  %v1453_v56 = vld [vmem:[%s12732_s18 + $0x1528] sm:$0xff]  ;;  %v11163_v63 = vcombine.low %v1469_v52, %v1477_v9  ;;  %v10846_v52 = vcombine.high %v1150_v33, %v1158_v34  ;;  %v878_v9 = vld [vmem:[%s12732_s18 + $0x330] sm:$0xff] }
 0x3fd   : > { %7990 = vmatpush1.bf16.msra.mxu1 %v11243_v3  ;;  %7950 = vmatprep.subr.bf16.mxu0 %v11228_v4  ;;  %v1461_v59 = vld [vmem:[%s12732_s18 + $0x1568] sm:$0xff]  ;;  %v11419_v3 = vcombine.low %v1725_v54, %v1733_v35  ;;  %v886_v54 = vld [vmem:[%s12732_s18 + $0x370] sm:$0xff] }
 0x3fe   : > { %7991 = vmatprep.subr.bf16.mxu1 %v11484_v6  ;;  %v1709_v60 = vld [vmem:[%s12732_s18 + $0x1d28] sm:$0xff]  ;;  %v11148_v4 = vcombine.high %v1453_v56, %v1461_v59 }
 0x3ff   : > { %v1717_v31 = vld [vmem:[%s12732_s18 + $0x1d68] sm:$0xff] }
 0x400   : > { %7951 = vmatpush2.bf16.msra.mxu0 %v11227_v58  ;;  %v11404_v6 = vcombine.high %v1709_v60, %v1717_v31  ;;  %v1437_v50 = vld [vmem:[%s12732_s18 + $0x14a8] sm:$0xff]  ;;  %v11147_v58 = vcombine.low %v1453_v56, %v1461_v59  ;;  %v10574_v59 = vcombine.high %v878_v9, %v886_v54 }
 0x401   : > { %7992 = vmatpush2.bf16.msra.mxu1 %v11483_v14  ;;  %7952 = vmatprep.subr.bf16.mxu0 %v11212_v16  ;;  %v1445_v10 = vld [vmem:[%s12732_s18 + $0x14e8] sm:$0xff]  ;;  %v11403_v14 = vcombine.low %v1709_v60, %v1717_v31  ;;  %v862_v60 = vld [vmem:[%s12732_s18 + $0x2b0] sm:$0xff] }
 0x402   : > { %7993 = vmatprep.subr.bf16.mxu1 %v11468_v8  ;;  %v1693_v11 = vld [vmem:[%s12732_s18 + $0x1ca8] sm:$0xff]  ;;  %v11132_v16 = vcombine.high %v1437_v50, %v1445_v10  ;;  %v870_v31 = vld [vmem:[%s12732_s18 + $0x2f0] sm:$0xff] }
 0x403   : > { %v1701_v12 = vld [vmem:[%s12732_s18 + $0x1ce8] sm:$0xff] }
 0x404   : > { %7953 = vmatpush2.bf16.msra.mxu0 %v11211_v22  ;;  %v11388_v8 = vcombine.high %v1693_v11, %v1701_v12  ;;  %v1421_v18 = vld [vmem:[%s12732_s18 + $0x1428] sm:$0xff]  ;;  %v11131_v22 = vcombine.low %v1437_v50, %v1445_v10  ;;  %v10573_v10 = vcombine.low %v878_v9, %v886_v54  ;;  %v1094_v9 = vld [vmem:[%s12732_s18 + $0x9f0] sm:$0xff] }
 0x405   : > { %7994 = vmatpush2.bf16.msra.mxu1 %v11467_v23  ;;  %7954 = vmatprep.subr.bf16.mxu0 %v11196_v27  ;;  %v1429_v20 = vld [vmem:[%s12732_s18 + $0x1468] sm:$0xff]  ;;  %v11387_v23 = vcombine.low %v1693_v11, %v1701_v12  ;;  %v10558_v12 = vcombine.high %v862_v60, %v870_v31 }
 0x406   : > { %7995 = vmatprep.subr.bf16.mxu1 %v11452_v19  ;;  %v1677_v46 = vld [vmem:[%s12732_s18 + $0x1c28] sm:$0xff]  ;;  %v11116_v27 = vcombine.high %v1421_v18, %v1429_v20 }
 0x407   : > { %v1685_v21 = vld [vmem:[%s12732_s18 + $0x1c68] sm:$0xff] }
 0x408   : > { %7955 = vmatpush2.bf16.msra.mxu0 %v11195_v38  ;;  %v11372_v19 = vcombine.high %v1677_v46, %v1685_v21  ;;  %v11115_v38 = vcombine.low %v1421_v18, %v1429_v20  ;;  %v846_v18 = vld [vmem:[%s12732_s18 + $0x230] sm:$0xff]  ;;  %v11960_v57 = vld [vmem:[%s12740_s1 + $0x84] ss:$8 sps:$4 sm:$0xff]   ;;  %v12045_v39 = vld [vmem:[%s12740_s1 + $0x3a0] ss:$8 sps:$4 sm:$0xff]  }
 0x409   : > { %7996 = vmatpush2.bf16.msra.mxu1 %v11451_v42  ;;  %7956 = vmatprep.subr.bf16.mxu0 %v11180_v43  ;;  %v11371_v42 = vcombine.low %v1677_v46, %v1685_v21  ;;  %v13719_v43 = vld [vmem:[%s12738_s29 + $0x8] sm:$0xff]  ;;  %v854_v20 = vld [vmem:[%s12732_s18 + $0x270] sm:$0xff] }
 0x40a   : > { %7997 = vmatprep.subr.bf16.mxu1 %v11436_v51  ;;  %v10590_v51 = vcombine.high %v894_v5, %v902_v32  ;;  %v1839_v35 = vrot.slane %v13719_v43, %v12837_v45  ;;  %v1843_v56 = vrot.slane %v13719_v43, %v12845_v48  ;;  %v1126_v45 = vld [vmem:[%s12732_s18 + $0xaf0] sm:$0xff]  ;;  %v10541_v54 = vcombine.low %v846_v18, %v854_v20 }
 0x40b   : > { %v1102_v21 = vld [vmem:[%s12732_s18 + $0xa30] sm:$0xff] }
 0x40c   : > { %7957 = vmatpush2.bf16.msra.mxu0 %v11179_v36  ;;  %v10589_v36 = vcombine.low %v894_v5, %v902_v32 }
 0x40d   : > { %7998 = vmatpush2.bf16.msra.mxu1 %v11435_v37  ;;  %7958 = vmatprep.subr.bf16.mxu0 %v11164_v7  ;;  %v1134_v37 = vld [vmem:[%s12732_s18 + $0xb30] sm:$0xff] }
 0x40e   : > { %7999 = vmatprep.subr.bf16.mxu1 %v11420_v55  ;;  %v1142_v7 = vld [vmem:[%s12732_s18 + $0xb70] sm:$0xff]  ;;  %v10845_v55 = vcombine.low %v1150_v33, %v1158_v34  ;;  %v10542_v33 = vcombine.high %v846_v18, %v854_v20 }
 0x40f   : > { %v10829_v11 = vcombine.low %v1134_v37, %v1142_v7  ;;  %v1046_v18 = vld [vmem:[%s12732_s18 + $0x870] sm:$0xff] }
 0x410   : > { %7959 = vmatpush2.bf16.msra.mxu0 %v11163_v63 }
 0x411   : > { %8000 = vmatpush2.bf16.msra.mxu1 %v11419_v3  ;;  %7960 = vmatprep.subr.bf16.mxu0 %v11148_v4  ;;  %v10830_v3 = vcombine.high %v1134_v37, %v1142_v7  ;;  %v1118_v4 = vld [vmem:[%s12732_s18 + $0xab0] sm:$0xff] }
 0x412   : > { %8001 = vmatprep.subr.bf16.mxu1 %v11404_v6  ;;  %v10813_v32 = vcombine.low %v1118_v4, %v1126_v45  ;;  %v814_v7 = vld [vmem:[%s12732_s18 + $0x130] sm:$0xff] }
 0x414   : > { %7961 = vmatpush2.bf16.msra.mxu0 %v11147_v58 }
 0x415   : > { %8002 = vmatpush2.bf16.msra.mxu1 %v11403_v14  ;;  %7962 = vmatprep.subr.bf16.mxu0 %v11132_v16 }
 0x416   : > { %8003 = vmatprep.subr.bf16.mxu1 %v11388_v8  ;;  %v10814_v8 = vcombine.high %v1118_v4, %v1126_v45  ;;  %v798_v4 = vld [vmem:[%s12732_s18 + $0xb0] sm:$0xff] }
 0x417   : > { %v806_v45 = vld [vmem:[%s12732_s18 + $0xf0] sm:$0xff] }
 0x418   : > { %7963 = vmatpush2.bf16.msra.mxu0 %v11131_v22  ;;  %v1110_v22 = vld [vmem:[%s12732_s18 + $0xa70] sm:$0xff]  ;;  %v10493_v20 = vcombine.low %v798_v4, %v806_v45 }
 0x419   : > { %8004 = vmatpush2.bf16.msra.mxu1 %v11387_v23  ;;  %7964 = vmatprep.subr.bf16.mxu0 %v11116_v27 }
 0x41a   : > { %8005 = vmatprep.subr.bf16.mxu1 %v11372_v19  ;;  %v10557_v19 = vcombine.low %v862_v60, %v870_v31 }
 0x41c   : > { %7965 = vmatpush2.bf16.msra.mxu0 %v11115_v38  ;;  %v10798_v38 = vcombine.high %v1102_v21, %v1110_v22 }
 0x41d   : > { %8006 = vmatpush2.bf16.msra.mxu1 %v11371_v42  ;;  %8016 = vmatprep.subr.bf16.mxu0 %v10590_v51  ;;  %v830_v42 = vld [vmem:[%s12732_s18 + $0x1b0] sm:$0xff] }
 0x41e   : > { %8057 = vmatprep.subr.bf16.mxu1 %v10846_v52  ;;  %v838_v51 = vld [vmem:[%s12732_s18 + $0x1f0] sm:$0xff] }
 0x41f   : > { %v7722_v63 = vpop.f32.mrf.mxu0  ;;  %7967 = vmatmul.mubr.bf16.vlgmr.msra.gmra.mxu0 %v12978_v15  ;;  %v1086_v52 = vld [vmem:[%s12732_s18 + $0x9b0] sm:$0xff]  ;;  %v10525_v60 = vcombine.low %v830_v42, %v838_v51 }
 0x420   : > { %v7723_v6 = vadd.f32 %v7722_v63, %v1839_v35  ;;  %v7763_v50 = vpop.f32.mrf.mxu1  ;;  %8008 = vmatmul.mubr.bf16.vlgmr.msra.gmra.mxu1 %v12974_v44  ;;  %8017 = vmatpush1.bf16.msra.mxu0 %v10589_v36  ;;  %v10797_v35 = vcombine.low %v1102_v21, %v1110_v22  ;;  %v10526_v36 = vcombine.high %v830_v42, %v838_v51  ;;  %v1006_v51 = vld [vmem:[%s12732_s18 + $0x730] sm:$0xff] }
 0x421   : > { %8048 = vmatprep.mubr.bf16.mxu0 %v12876_v24  ;;  %8058 = vmatpush1.bf16.msra.mxu1 %v10845_v55  ;;  %v7724_v48 = vpop.f32.mrf.mxu0  ;;  %v10782_v37 = vcombine.high %v1086_v52, %v1094_v9  ;;  %v822_v55 = vld [vmem:[%s12732_s18 + $0x170] sm:$0xff]  ;;  %v10781_v31 = vcombine.low %v1086_v52, %v1094_v9 }
 0x422   : > { %v13736_v58 = vadd.f32 %v7763_v50, %v7723_v6  ;;  %8089 = vmatprep.mubr.bf16.mxu1 %v12880_v26  ;;  %v7725_v14 = vadd.f32 %v7724_v48, %v1843_v56  ;;  %v7765_v16 = vpop.f32.mrf.mxu1  ;;  %8018 = vmatprep.subr.bf16.mxu0 %v10574_v59  ;;  %v1070_v56 = vld [vmem:[%s12732_s18 + $0x930] sm:$0xff]  ;;  %v10510_v63 = vcombine.high %v814_v7, %v822_v55 }
 0x423   : > { %v7726_v46 = vpop.f32.mrf.mxu0  ;;  %8059 = vmatprep.subr.bf16.mxu1 %v10830_v3  ;;  %v1078_v59 = vld [vmem:[%s12732_s18 + $0x970] sm:$0xff] }
 0x424   : > { %v13743_v23 = vadd.f32 %v7765_v16, %v7725_v14  ;;  %v7767_v27 = vpop.f32.mrf.mxu1  ;;  %8019 = vmatpush1.bf16.msra.mxu0 %v10573_v10  ;;  %v10766_v3 = vcombine.high %v1070_v56, %v1078_v59  ;;  %v1054_v6 = vld [vmem:[%s12732_s18 + $0x8b0] sm:$0xff]  ;;  %v10509_v10 = vcombine.low %v814_v7, %v822_v55  ;;  %v10765_v48 = vcombine.low %v1070_v56, %v1078_v59 }
 0x425   : > { %8060 = vmatpush1.bf16.msra.mxu1 %v10829_v11  ;;  %v7727_v5 = vpop.f32.mrf.mxu0  ;;  %8020 = vmatprep.subr.bf16.mxu0 %v10558_v12  ;;  %v1062_v50 = vld [vmem:[%s12732_s18 + $0x8f0] sm:$0xff]  ;;  %v10494_v11 = vcombine.high %v798_v4, %v806_v45 }
 0x426   : > { %v7768_v34 = vpop.f32.mrf.mxu1  ;;  %8061 = vmatprep.subr.bf16.mxu1 %v10814_v8  ;;  %v10750_v12 = vcombine.high %v1054_v6, %v1062_v50  ;;  %v782_v14 = vld [vmem:[%s12732_s18 + $0x30] sm:$0xff]  ;;  %v10749_v46 = vcombine.low %v1054_v6, %v1062_v50 }
 0x427   : > { %v790_v16 = vld [vmem:[%s12732_s18 + $0x70] sm:$0xff] }
 0x428   : > { %8021 = vmatpush1.bf16.msra.mxu0 %v10557_v19  ;;  %v1038_v8 = vld [vmem:[%s12732_s18 + $0x830] sm:$0xff]  ;;  %v10478_v21 = vcombine.high %v782_v14, %v790_v16 }
 0x429   : > { %8062 = vmatpush1.bf16.msra.mxu1 %v10813_v32  ;;  %8022 = vmatprep.subr.bf16.mxu0 %v10542_v33  ;;  %v10734_v22 = vcombine.high %v1038_v8, %v1046_v18  ;;  %v1022_v27 = vld [vmem:[%s12732_s18 + $0x7b0] sm:$0xff]  ;;  %v10477_v33 = vcombine.low %v782_v14, %v790_v16  ;;  %v10733_v34 = vcombine.low %v1038_v8, %v1046_v18 }
 0x42a   : > { %8063 = vmatprep.subr.bf16.mxu1 %v10798_v38  ;;  %v1030_v19 = vld [vmem:[%s12732_s18 + $0x7f0] sm:$0xff] }
 0x42b   : > { %v1278_v5 = vld [vmem:[%s12732_s18 + $0xfb0] sm:$0xff]  ;;  %v10718_v38 = vcombine.high %v1022_v27, %v1030_v19 }
 0x42c   : > { %8023 = vmatpush1.bf16.msra.mxu0 %v10541_v54  ;;  %v1286_v32 = vld [vmem:[%s12732_s18 + $0xff0] sm:$0xff] }
 0x42d   : > { %8064 = vmatpush1.bf16.msra.mxu1 %v10797_v35  ;;  %8024 = vmatprep.subr.bf16.mxu0 %v10526_v36  ;;  %v10974_v42 = vcombine.high %v1278_v5, %v1286_v32  ;;  %v1014_v52 = vld [vmem:[%s12732_s18 + $0x770] sm:$0xff]  ;;  %v10717_v35 = vcombine.low %v1022_v27, %v1030_v19  ;;  %v10973_v36 = vcombine.low %v1278_v5, %v1286_v32 }
 0x42e   : > { %8065 = vmatprep.subr.bf16.mxu1 %v10782_v37  ;;  %v1262_v9 = vld [vmem:[%s12732_s18 + $0xf30] sm:$0xff]  ;;  %v10702_v37 = vcombine.high %v1006_v51, %v1014_v52 }
 0x42f   : > { %v1270_v54 = vld [vmem:[%s12732_s18 + $0xf70] sm:$0xff] }
 0x430   : > { %8025 = vmatpush1.bf16.msra.mxu0 %v10525_v60  ;;  %v10958_v7 = vcombine.high %v1262_v9, %v1270_v54  ;;  %v990_v55 = vld [vmem:[%s12732_s18 + $0x6b0] sm:$0xff] }
 0x431   : > { %8066 = vmatpush1.bf16.msra.mxu1 %v10781_v31  ;;  %8026 = vmatprep.subr.bf16.mxu0 %v10510_v63  ;;  %v998_v56 = vld [vmem:[%s12732_s18 + $0x6f0] sm:$0xff]  ;;  %v10701_v31 = vcombine.low %v1006_v51, %v1014_v52  ;;  %v10957_v63 = vcombine.low %v1262_v9, %v1270_v54 }
 0x432   : > { %8067 = vmatprep.subr.bf16.mxu1 %v10766_v3  ;;  %v1246_v59 = vld [vmem:[%s12732_s18 + $0xeb0] sm:$0xff]  ;;  %v10686_v3 = vcombine.high %v990_v55, %v998_v56 }
 0x433   : > { %v1254_v60 = vld [vmem:[%s12732_s18 + $0xef0] sm:$0xff] }
 0x434   : > { %8027 = vmatpush1.bf16.msra.mxu0 %v10509_v10  ;;  %v10942_v4 = vcombine.high %v1246_v59, %v1254_v60  ;;  %v974_v45 = vld [vmem:[%s12732_s18 + $0x630] sm:$0xff] }
 0x435   : > { %8068 = vmatpush1.bf16.msra.mxu1 %v10765_v48  ;;  %8028 = vmatprep.subr.bf16.mxu0 %v10494_v11  ;;  %v982_v6 = vld [vmem:[%s12732_s18 + $0x670] sm:$0xff]  ;;  %v10685_v48 = vcombine.low %v990_v55, %v998_v56  ;;  %v10941_v11 = vcombine.low %v1246_v59, %v1254_v60 }
 0x436   : > { %8069 = vmatprep.subr.bf16.mxu1 %v10750_v12  ;;  %v1230_v50 = vld [vmem:[%s12732_s18 + $0xe30] sm:$0xff]  ;;  %v10670_v12 = vcombine.high %v974_v45, %v982_v6 }
 0x437   : > { %v1238_v10 = vld [vmem:[%s12732_s18 + $0xe70] sm:$0xff] }
 0x438   : > { %8029 = vmatpush1.bf16.msra.mxu0 %v10493_v20  ;;  %v10926_v14 = vcombine.high %v1230_v50, %v1238_v10  ;;  %v958_v16 = vld [vmem:[%s12732_s18 + $0x5b0] sm:$0xff] }
 0x439   : > { %8070 = vmatpush1.bf16.msra.mxu1 %v10749_v46  ;;  %8030 = vmatprep.subr.bf16.mxu0 %v10478_v21  ;;  %v966_v8 = vld [vmem:[%s12732_s18 + $0x5f0] sm:$0xff]  ;;  %v10669_v46 = vcombine.low %v974_v45, %v982_v6  ;;  %v10925_v21 = vcombine.low %v1230_v50, %v1238_v10 }
 0x43a   : > { %8071 = vmatprep.subr.bf16.mxu1 %v10734_v22  ;;  %v1214_v18 = vld [vmem:[%s12732_s18 + $0xdb0] sm:$0xff]  ;;  %v10654_v22 = vcombine.high %v958_v16, %v966_v8 }
 0x43b   : > { %v1222_v20 = vld [vmem:[%s12732_s18 + $0xdf0] sm:$0xff] }
 0x43c   : > { %8031 = vmatpush1.bf16.msra.mxu0 %v10477_v33  ;;  %v10910_v27 = vcombine.high %v1214_v18, %v1222_v20  ;;  %v942_v19 = vld [vmem:[%s12732_s18 + $0x530] sm:$0xff] }
 0x43d   : > { %8072 = vmatpush1.bf16.msra.mxu1 %v10733_v34  ;;  %8032 = vmatprep.subr.bf16.mxu0 %v10718_v38  ;;  %v950_v5 = vld [vmem:[%s12732_s18 + $0x570] sm:$0xff]  ;;  %v10653_v34 = vcombine.low %v958_v16, %v966_v8  ;;  %v10909_v38 = vcombine.low %v1214_v18, %v1222_v20 }
 0x43e   : > { %8073 = vmatprep.subr.bf16.mxu1 %v10974_v42  ;;  %v1198_v32 = vld [vmem:[%s12732_s18 + $0xd30] sm:$0xff]  ;;  %v10638_v42 = vcombine.high %v942_v19, %v950_v5 }
 0x43f   : > { %v1206_v33 = vld [vmem:[%s12732_s18 + $0xd70] sm:$0xff] }
 0x440   : > { %8033 = vmatpush2.bf16.msra.mxu0 %v10717_v35  ;;  %v10894_v51 = vcombine.high %v1198_v32, %v1206_v33  ;;  %v926_v52 = vld [vmem:[%s12732_s18 + $0x4b0] sm:$0xff] }
 0x441   : > { %8074 = vmatpush2.bf16.msra.mxu1 %v10973_v36  ;;  %8034 = vmatprep.subr.bf16.mxu0 %v10702_v37  ;;  %v934_v9 = vld [vmem:[%s12732_s18 + $0x4f0] sm:$0xff]  ;;  %v10637_v36 = vcombine.low %v942_v19, %v950_v5  ;;  %v10893_v37 = vcombine.low %v1198_v32, %v1206_v33 }
 0x442   : > { %8075 = vmatprep.subr.bf16.mxu1 %v10958_v7  ;;  %v1182_v54 = vld [vmem:[%s12732_s18 + $0xcb0] sm:$0xff]  ;;  %v10622_v7 = vcombine.high %v926_v52, %v934_v9 }
 0x443   : > { %v1190_v35 = vld [vmem:[%s12732_s18 + $0xcf0] sm:$0xff] }
 0x444   : > { %8035 = vmatpush2.bf16.msra.mxu0 %v10701_v31  ;;  %v10878_v55 = vcombine.high %v1182_v54, %v1190_v35  ;;  %v910_v56 = vld [vmem:[%s12732_s18 + $0x430] sm:$0xff] }
 0x445   : > { %8076 = vmatpush2.bf16.msra.mxu1 %v10957_v63  ;;  %8036 = vmatprep.subr.bf16.mxu0 %v10686_v3  ;;  %v918_v59 = vld [vmem:[%s12732_s18 + $0x470] sm:$0xff]  ;;  %v10621_v63 = vcombine.low %v926_v52, %v934_v9  ;;  %v10877_v3 = vcombine.low %v1182_v54, %v1190_v35 }
 0x446   : > { %8077 = vmatprep.subr.bf16.mxu1 %v10942_v4  ;;  %v1166_v60 = vld [vmem:[%s12732_s18 + $0xc30] sm:$0xff]  ;;  %v10606_v4 = vcombine.high %v910_v56, %v918_v59 }
 0x447   : > { %v1174_v31 = vld [vmem:[%s12732_s18 + $0xc70] sm:$0xff] }
 0x448   : > { %8037 = vmatpush2.bf16.msra.mxu0 %v10685_v48  ;;  %v10862_v45 = vcombine.high %v1166_v60, %v1174_v31  ;;  %v1406_v6 = vld [vmem:[%s12732_s18 + $0x13b0] sm:$0xff] }
 0x449   : > { %8078 = vmatpush2.bf16.msra.mxu1 %v10941_v11  ;;  %8038 = vmatprep.subr.bf16.mxu0 %v10670_v12  ;;  %v1414_v50 = vld [vmem:[%s12732_s18 + $0x13f0] sm:$0xff]  ;;  %v10605_v11 = vcombine.low %v910_v56, %v918_v59  ;;  %v10861_v12 = vcombine.low %v1166_v60, %v1174_v31 }
 0x44a   : > { %8079 = vmatprep.subr.bf16.mxu1 %v10926_v14  ;;  %v1662_v10 = vld [vmem:[%s12732_s18 + $0x1bb0] sm:$0xff]  ;;  %v11102_v14 = vcombine.high %v1406_v6, %v1414_v50  ;;  %v11101_v20 = vcombine.low %v1406_v6, %v1414_v50 }
 0x44b   : > { %v1670_v48 = vld [vmem:[%s12732_s18 + $0x1bf0] sm:$0xff] }
 0x44c   : > { %8039 = vmatpush2.bf16.msra.mxu0 %v10669_v46  ;;  %v11358_v16 = vcombine.high %v1662_v10, %v1670_v48  ;;  %v1390_v8 = vld [vmem:[%s12732_s18 + $0x1330] sm:$0xff] }
 0x44d   : > { %8080 = vmatpush2.bf16.msra.mxu1 %v10925_v21  ;;  %8040 = vmatprep.subr.bf16.mxu0 %v10654_v22  ;;  %v1398_v18 = vld [vmem:[%s12732_s18 + $0x1370] sm:$0xff]  ;;  %v11357_v22 = vcombine.low %v1662_v10, %v1670_v48 }
 0x44e   : > { %8081 = vmatprep.subr.bf16.mxu1 %v10910_v27  ;;  %v1646_v46 = vld [vmem:[%s12732_s18 + $0x1b30] sm:$0xff]  ;;  %v11086_v27 = vcombine.high %v1390_v8, %v1398_v18  ;;  %v11085_v52 = vcombine.low %v1390_v8, %v1398_v18 }
 0x44f   : > { %v1654_v21 = vld [vmem:[%s12732_s18 + $0x1b70] sm:$0xff] }
 0x450   : > { %8041 = vmatpush2.bf16.msra.mxu0 %v10653_v34  ;;  %v1374_v19 = vld [vmem:[%s12732_s18 + $0x12b0] sm:$0xff]  ;;  %v11342_v33 = vcombine.high %v1646_v46, %v1654_v21  ;;  %v11341_v54 = vcombine.low %v1646_v46, %v1654_v21 }
 0x451   : > { %8082 = vmatpush2.bf16.msra.mxu1 %v10909_v38  ;;  %8042 = vmatprep.subr.bf16.mxu0 %v10638_v42  ;;  %v1382_v5 = vld [vmem:[%s12732_s18 + $0x12f0] sm:$0xff] }
 0x452   : > { %8083 = vmatprep.subr.bf16.mxu1 %v10894_v51  ;;  %v1630_v34 = vld [vmem:[%s12732_s18 + $0x1ab0] sm:$0xff]  ;;  %v11070_v35 = vcombine.high %v1374_v19, %v1382_v5 }
 0x453   : > { %v1638_v38 = vld [vmem:[%s12732_s18 + $0x1af0] sm:$0xff] }
 0x454   : > { %8043 = vmatpush2.bf16.msra.mxu0 %v10637_v36  ;;  %v1366_v56 = vld [vmem:[%s12732_s18 + $0x1270] sm:$0xff] }
 0x455   : > { %8084 = vmatpush2.bf16.msra.mxu1 %v10893_v37  ;;  %8044 = vmatprep.subr.bf16.mxu0 %v10622_v7  ;;  %v11326_v7 = vcombine.high %v1630_v34, %v1638_v38  ;;  %v1614_v60 = vld [vmem:[%s12732_s18 + $0x1a30] sm:$0xff] }
 0x456   : > { %8085 = vmatprep.subr.bf16.mxu1 %v10878_v55  ;;  %v1358_v55 = vld [vmem:[%s12732_s18 + $0x1230] sm:$0xff] }
 0x457   : > { %v1622_v31 = vld [vmem:[%s12732_s18 + $0x1a70] sm:$0xff]  ;;  %v11054_v6 = vcombine.high %v1358_v55, %v1366_v56 }
 0x458   : > { %8045 = vmatpush2.bf16.msra.mxu0 %v10621_v63  ;;  %v11310_v10 = vcombine.high %v1614_v60, %v1622_v31  ;;  %v1342_v48 = vld [vmem:[%s12732_s18 + $0x11b0] sm:$0xff]  ;;  %v11309_v8 = vcombine.low %v1614_v60, %v1622_v31 }
 0x459   : > { %8086 = vmatpush2.bf16.msra.mxu1 %v10877_v3  ;;  %8046 = vmatprep.subr.bf16.mxu0 %v10606_v4  ;;  %v11069_v4 = vcombine.low %v1374_v19, %v1382_v5  ;;  %v1326_v46 = vld [vmem:[%s12732_s18 + $0x1130] sm:$0xff] }
 0x45a   : > { %8087 = vmatprep.subr.bf16.mxu1 %v10862_v45  ;;  %v11325_v45 = vcombine.low %v1630_v34, %v1638_v38  ;;  %v1334_v21 = vld [vmem:[%s12732_s18 + $0x1170] sm:$0xff] }
 0x45b   : > { %v1310_v34 = vld [vmem:[%s12732_s18 + $0x10b0] sm:$0xff] }
 0x45c   : > { %8047 = vmatpush2.bf16.msra.mxu0 %v10605_v11  ;;  %v1350_v11 = vld [vmem:[%s12732_s18 + $0x11f0] sm:$0xff] }
 0x45d   : > { %8088 = vmatpush2.bf16.msra.mxu1 %v10861_v12  ;;  %8098 = vmatprep.subr.bf16.mxu0 %v11102_v14  ;;  %v1598_v12 = vld [vmem:[%s12732_s18 + $0x19b0] sm:$0xff]  ;;  %v11038_v18 = vcombine.high %v1342_v48, %v1350_v11  ;;  %v11037_v19 = vcombine.low %v1342_v48, %v1350_v11 }
 0x45e   : > { %8139 = vmatprep.subr.bf16.mxu1 %v11358_v16  ;;  %v1606_v14 = vld [vmem:[%s12732_s18 + $0x19f0] sm:$0xff]  ;;  %v11053_v16 = vcombine.low %v1358_v55, %v1366_v56 }
 0x45f   : > { %v7804_v32 = vpop.f32.mrf.mxu0  ;;  %8049 = vmatmul.mubr.bf16.vlgmr.msra.gmra.mxu0 %v12878_v25  ;;  %v11293_v5 = vcombine.low %v1598_v12, %v1606_v14  ;;  %v1318_v38 = vld [vmem:[%s12732_s18 + $0x10f0] sm:$0xff] }
 0x460   : > { %v7805_v42 = vadd.f32 %v7804_v32, %v13736_v58  ;;  %v7845_v51 = vpop.f32.mrf.mxu1  ;;  %8090 = vmatmul.mubr.bf16.vlgmr.msra.gmra.mxu1 %v12882_v28  ;;  %8099 = vmatpush1.bf16.msra.mxu0 %v11101_v20  ;;  %v11294_v20 = vcombine.high %v1598_v12, %v1606_v14  ;;  %v11022_v32 = vcombine.high %v1326_v46, %v1334_v21  ;;  %v1558_v55 = vld [vmem:[%s12732_s18 + $0x1870] sm:$0xff] }
 0x461   : > { %8130 = vmatprep.mubr.bf16.mxu0 %v12902_v40  ;;  %8140 = vmatpush1.bf16.msra.mxu1 %v11357_v22  ;;  %v7806_v9 = vpop.f32.mrf.mxu0  ;;  %v1582_v22 = vld [vmem:[%s12732_s18 + $0x1930] sm:$0xff]  ;;  %v11005_v56 = vcombine.low %v1310_v34, %v1318_v38 }
 0x462   : > { %v13809_v36 = vadd.f32 %v7845_v51, %v7805_v42  ;;  %8171 = vmatprep.mubr.bf16.mxu1 %v12904_v41  ;;  %v7807_v58 = vadd.f32 %v7806_v9, %v13743_v23  ;;  %v7847_v37 = vpop.f32.mrf.mxu1  ;;  %8100 = vmatprep.subr.bf16.mxu0 %v11086_v27  ;;  %v1590_v27 = vld [vmem:[%s12732_s18 + $0x1970] sm:$0xff] }
 0x463   : > { %v7808_v59 = vpop.f32.mrf.mxu0  ;;  %8141 = vmatprep.subr.bf16.mxu1 %v11342_v33  ;;  %v11278_v33 = vcombine.high %v1582_v22, %v1590_v27  ;;  %v1566_v42 = vld [vmem:[%s12732_s18 + $0x18b0] sm:$0xff]  ;;  %v11277_v9 = vcombine.low %v1582_v22, %v1590_v27 }
 0x464   : > { %v13817_v63 = vadd.f32 %v7847_v37, %v7807_v58  ;;  %v7849_v3 = vpop.f32.mrf.mxu1  ;;  %8101 = vmatpush1.bf16.msra.mxu0 %v11085_v52  ;;  %v1574_v51 = vld [vmem:[%s12732_s18 + $0x18f0] sm:$0xff]  ;;  %v11021_v52 = vcombine.low %v1326_v46, %v1334_v21 }
 0x465   : > { %8142 = vmatpush1.bf16.msra.mxu1 %v11341_v54  ;;  %v7809_v23 = vpop.f32.mrf.mxu0  ;;  %8102 = vmatprep.subr.bf16.mxu0 %v11070_v35  ;;  %v11006_v54 = vcombine.high %v1310_v34, %v1318_v38  ;;  %v11262_v35 = vcombine.high %v1566_v42, %v1574_v51  ;;  %v1294_v58 = vld [vmem:[%s12732_s18 + $0x1030] sm:$0xff]  ;;  %v11261_v59 = vcombine.low %v1566_v42, %v1574_v51 }
 0x466   : > { %v7850_v50 = vpop.f32.mrf.mxu1  ;;  %8143 = vmatprep.subr.bf16.mxu1 %v11326_v7  ;;  %v1302_v37 = vld [vmem:[%s12732_s18 + $0x1070] sm:$0xff]  ;;  %12284 = vtanh.f32 %v13817_v63 }
 0x467   : > { %v1550_v7 = vld [vmem:[%s12732_s18 + $0x1830] sm:$0xff]  ;;  %v10990_v60 = vcombine.high %v1294_v58, %v1302_v37 }
 0x468   : > { %8103 = vmatpush1.bf16.msra.mxu0 %v11069_v4  ;;  %v11246_v31 = vcombine.high %v1550_v7, %v1558_v55  ;;  %v1534_v3 = vld [vmem:[%s12732_s18 + $0x17b0] sm:$0xff]  ;;  %v11245_v50 = vcombine.low %v1550_v7, %v1558_v55 }
 0x469   : > { %8144 = vmatpush1.bf16.msra.mxu1 %v11325_v45  ;;  %8104 = vmatprep.subr.bf16.mxu0 %v11054_v6  ;;  %v1542_v4 = vld [vmem:[%s12732_s18 + $0x17f0] sm:$0xff]  ;;  %v10989_v6 = vcombine.low %v1294_v58, %v1302_v37 }
 0x46a   : > { %8145 = vmatprep.subr.bf16.mxu1 %v11310_v10  ;;  %v1790_v23 = vld [vmem:[%s12732_s18 + $0x1fb0] sm:$0xff]  ;;  %v11230_v10 = vcombine.high %v1534_v3, %v1542_v4 }
 0x46b   : > { %v1798_v45 = vld [vmem:[%s12732_s18 + $0x1ff0] sm:$0xff] }
 0x46c   : > { %8105 = vmatpush1.bf16.msra.mxu0 %v11053_v16  ;;  %v11486_v48 = vcombine.high %v1790_v23, %v1798_v45  ;;  %v1518_v11 = vld [vmem:[%s12732_s18 + $0x1730] sm:$0xff] }
 0x46d   : > { %8146 = vmatpush1.bf16.msra.mxu1 %v11309_v8  ;;  %8106 = vmatprep.subr.bf16.mxu0 %v11038_v18  ;;  %v1526_v12 = vld [vmem:[%s12732_s18 + $0x1770] sm:$0xff]  ;;  %v11229_v8 = vcombine.low %v1534_v3, %v1542_v4  ;;  %v11485_v18 = vcombine.low %v1790_v23, %v1798_v45 }
 0x46e   : > { %8147 = vmatprep.subr.bf16.mxu1 %v11294_v20  ;;  %v1774_v14 = vld [vmem:[%s12732_s18 + $0x1f30] sm:$0xff]  ;;  %v11214_v20 = vcombine.high %v1518_v11, %v1526_v12 }
 0x46f   : > { %v1782_v16 = vld [vmem:[%s12732_s18 + $0x1f70] sm:$0xff] }
 0x470   : > { %8107 = vmatpush1.bf16.msra.mxu0 %v11037_v19  ;;  %v11470_v46 = vcombine.high %v1774_v14, %v1782_v16  ;;  %v1502_v21 = vld [vmem:[%s12732_s18 + $0x16b0] sm:$0xff] }
 0x471   : > { %8148 = vmatpush1.bf16.msra.mxu1 %v11293_v5  ;;  %8108 = vmatprep.subr.bf16.mxu0 %v11022_v32  ;;  %v1510_v22 = vld [vmem:[%s12732_s18 + $0x16f0] sm:$0xff]  ;;  %v11213_v5 = vcombine.low %v1518_v11, %v1526_v12  ;;  %v11469_v32 = vcombine.low %v1774_v14, %v1782_v16 }
 0x472   : > { %8149 = vmatprep.subr.bf16.mxu1 %v11278_v33  ;;  %v1758_v27 = vld [vmem:[%s12732_s18 + $0x1eb0] sm:$0xff]  ;;  %v11198_v33 = vcombine.high %v1502_v21, %v1510_v22 }
 0x473   : > { %v1766_v19 = vld [vmem:[%s12732_s18 + $0x1ef0] sm:$0xff] }
 0x474   : > { %8109 = vmatpush1.bf16.msra.mxu0 %v11021_v52  ;;  %v11454_v34 = vcombine.high %v1758_v27, %v1766_v19  ;;  %v1486_v38 = vld [vmem:[%s12732_s18 + $0x1630] sm:$0xff] }
 0x475   : > { %8150 = vmatpush1.bf16.msra.mxu1 %v11277_v9  ;;  %8110 = vmatprep.subr.bf16.mxu0 %v11006_v54  ;;  %v1494_v42 = vld [vmem:[%s12732_s18 + $0x1670] sm:$0xff]  ;;  %v11197_v9 = vcombine.low %v1502_v21, %v1510_v22  ;;  %v11453_v54 = vcombine.low %v1758_v27, %v1766_v19 }
 0x476   : > { %8151 = vmatprep.subr.bf16.mxu1 %v11262_v35  ;;  %v1742_v51 = vld [vmem:[%s12732_s18 + $0x1e30] sm:$0xff]  ;;  %v11182_v35 = vcombine.high %v1486_v38, %v1494_v42 }
 0x477   : > { %v1750_v52 = vld [vmem:[%s12732_s18 + $0x1e70] sm:$0xff] }
 0x478   : > { %8111 = vmatpush1.bf16.msra.mxu0 %v11005_v56  ;;  %v11438_v58 = vcombine.high %v1742_v51, %v1750_v52  ;;  %v1470_v37 = vld [vmem:[%s12732_s18 + $0x15b0] sm:$0xff] }
 0x479   : > { %8152 = vmatpush1.bf16.msra.mxu1 %v11261_v59  ;;  %8112 = vmatprep.subr.bf16.mxu0 %v10990_v60  ;;  %v1478_v7 = vld [vmem:[%s12732_s18 + $0x15f0] sm:$0xff]  ;;  %v11181_v59 = vcombine.low %v1486_v38, %v1494_v42  ;;  %v11437_v60 = vcombine.low %v1742_v51, %v1750_v52  ;;  %v895_v42 = vld [vmem:[%s12732_s18 + $0x3b8] sm:$0xff] }
 0x47a   : > { %8153 = vmatprep.subr.bf16.mxu1 %v11246_v31  ;;  %v1726_v55 = vld [vmem:[%s12732_s18 + $0x1db0] sm:$0xff]  ;;  %v11166_v31 = vcombine.high %v1470_v37, %v1478_v7  ;;  %v903_v51 = vld [vmem:[%s12732_s18 + $0x3f8] sm:$0xff] }
 0x47b   : > { %v1734_v56 = vld [vmem:[%s12732_s18 + $0x1df0] sm:$0xff]  ;;  %v1151_v52 = vld [vmem:[%s12732_s18 + $0xbb8] sm:$0xff] }
 0x47c   : > { %8113 = vmatpush1.bf16.msra.mxu0 %v10989_v6  ;;  %v11422_v3 = vcombine.high %v1726_v55, %v1734_v56  ;;  %v1454_v4 = vld [vmem:[%s12732_s18 + $0x1530] sm:$0xff] }
 0x47d   : > { %8154 = vmatpush1.bf16.msra.mxu1 %v11245_v50  ;;  %8114 = vmatprep.subr.bf16.mxu0 %v11230_v10  ;;  %v1462_v23 = vld [vmem:[%s12732_s18 + $0x1570] sm:$0xff]  ;;  %v11165_v50 = vcombine.low %v1470_v37, %v1478_v7  ;;  %v11421_v10 = vcombine.low %v1726_v55, %v1734_v56  ;;  %v879_v7 = vld [vmem:[%s12732_s18 + $0x338] sm:$0xff]  ;;  %v1847_v56 = vrot.slane %v13719_v43, %v12842_v47 }
 0x47e   : > { %8155 = vmatprep.subr.bf16.mxu1 %v11486_v48  ;;  %v1710_v45 = vld [vmem:[%s12732_s18 + $0x1d30] sm:$0xff]  ;;  %v11150_v48 = vcombine.high %v1454_v4, %v1462_v23  ;;  %v887_v55 = vld [vmem:[%s12732_s18 + $0x378] sm:$0xff] }
 0x47f   : > { %v1718_v6 = vld [vmem:[%s12732_s18 + $0x1d70] sm:$0xff]  ;;  %v1127_v47 = vld [vmem:[%s12732_s18 + $0xaf8] sm:$0xff] }
 0x480   : > { %8115 = vmatpush2.bf16.msra.mxu0 %v11229_v8  ;;  %v11406_v11 = vcombine.high %v1710_v45, %v1718_v6  ;;  %v1438_v12 = vld [vmem:[%s12732_s18 + $0x14b0] sm:$0xff] }
 0x481   : > { %8156 = vmatpush2.bf16.msra.mxu1 %v11485_v18  ;;  %8116 = vmatprep.subr.bf16.mxu0 %v11214_v20  ;;  %v1446_v14 = vld [vmem:[%s12732_s18 + $0x14f0] sm:$0xff]  ;;  %v11149_v18 = vcombine.low %v1454_v4, %v1462_v23  ;;  %v11405_v20 = vcombine.low %v1710_v45, %v1718_v6  ;;  %v1851_v4 = vrot.slane %v13719_v43, %v12848_v49  ;;  %v863_v45 = vld [vmem:[%s12732_s18 + $0x2b8] sm:$0xff] }
 0x482   : > { %8157 = vmatprep.subr.bf16.mxu1 %v11470_v46  ;;  %v1694_v16 = vld [vmem:[%s12732_s18 + $0x1cb0] sm:$0xff]  ;;  %v11134_v46 = vcombine.high %v1438_v12, %v1446_v14  ;;  %v10576_v23 = vcombine.high %v879_v7, %v887_v55  ;;  %v871_v6 = vld [vmem:[%s12732_s18 + $0x2f8] sm:$0xff] }
 0x483   : > { %v1702_v8 = vld [vmem:[%s12732_s18 + $0x1cf0] sm:$0xff] }
 0x484   : > { %8117 = vmatpush2.bf16.msra.mxu0 %v11213_v5  ;;  %v11390_v21 = vcombine.high %v1694_v16, %v1702_v8  ;;  %v1422_v22 = vld [vmem:[%s12732_s18 + $0x1430] sm:$0xff] }
 0x485   : > { %8158 = vmatpush2.bf16.msra.mxu1 %v11469_v32  ;;  %8118 = vmatprep.subr.bf16.mxu0 %v11198_v33  ;;  %v1430_v27 = vld [vmem:[%s12732_s18 + $0x1470] sm:$0xff]  ;;  %v11133_v32 = vcombine.low %v1438_v12, %v1446_v14  ;;  %v11389_v33 = vcombine.low %v1694_v16, %v1702_v8  ;;  %v10575_v14 = vcombine.low %v879_v7, %v887_v55 }
 0x486   : > { %8159 = vmatprep.subr.bf16.mxu1 %v11454_v34  ;;  %v1678_v19 = vld [vmem:[%s12732_s18 + $0x1c30] sm:$0xff]  ;;  %v11118_v34 = vcombine.high %v1422_v22, %v1430_v27  ;;  %v10560_v16 = vcombine.high %v863_v45, %v871_v6 }
 0x487   : > { %v1686_v5 = vld [vmem:[%s12732_s18 + $0x1c70] sm:$0xff] }
 0x488   : > { %8119 = vmatpush2.bf16.msra.mxu0 %v11197_v9  ;;  %v11374_v38 = vcombine.high %v1678_v19, %v1686_v5  ;;  %v1159_v9 = vld [vmem:[%s12732_s18 + $0xbf8] sm:$0xff] }
 0x489   : > { %8160 = vmatpush2.bf16.msra.mxu1 %v11453_v54  ;;  %8120 = vmatprep.subr.bf16.mxu0 %v11182_v35  ;;  %v11117_v54 = vcombine.low %v1422_v22, %v1430_v27  ;;  %v11373_v35 = vcombine.low %v1678_v19, %v1686_v5  ;;  %v10848_v37 = vcombine.high %v1151_v52, %v1159_v9  ;;  %v855_v22 = vld [vmem:[%s12732_s18 + $0x278] sm:$0xff] }
 0x48a   : > { %8161 = vmatprep.subr.bf16.mxu1 %v11438_v58  ;;  %v10592_v58 = vcombine.high %v895_v42, %v903_v51  ;;  %v1111_v19 = vld [vmem:[%s12732_s18 + $0xa78] sm:$0xff] }
 0x48b   : > { %v12051_v63 = vld [vmem:[%s12740_s1 + $0x390] ss:$8 sps:$4 sm:$0xff]  }
 0x48c   : > { %8121 = vmatpush2.bf16.msra.mxu0 %v11181_v59  ;;  %v10591_v59 = vcombine.low %v895_v42, %v903_v51 }
 0x48d   : > { %8162 = vmatpush2.bf16.msra.mxu1 %v11437_v60  ;;  %8122 = vmatprep.subr.bf16.mxu0 %v11166_v31  ;;  %v1135_v60 = vld [vmem:[%s12732_s18 + $0xb38] sm:$0xff] }
 0x48e   : > { %8163 = vmatprep.subr.bf16.mxu1 %v11422_v3  ;;  %v1143_v31 = vld [vmem:[%s12732_s18 + $0xb78] sm:$0xff]  ;;  %v10847_v3 = vcombine.low %v1151_v52, %v1159_v9 }
 0x48f   : > { %v10831_v43 = vcombine.low %v1135_v60, %v1143_v31  ;;  %v831_v52 = vld [vmem:[%s12732_s18 + $0x1b8] sm:$0xff] }
 0x490   : > { %8123 = vmatpush2.bf16.msra.mxu0 %v11165_v50  ;;  %v839_v9 = vld [vmem:[%s12732_s18 + $0x1f8] sm:$0xff] }
 0x491   : > { %8164 = vmatpush2.bf16.msra.mxu1 %v11421_v10  ;;  %8124 = vmatprep.subr.bf16.mxu0 %v11150_v48  ;;  %v10832_v10 = vcombine.high %v1135_v60, %v1143_v31  ;;  %v1119_v48 = vld [vmem:[%s12732_s18 + $0xab8] sm:$0xff]  ;;  %v10528_v7 = vcombine.high %v831_v52, %v839_v9 }
 0x492   : > { %8165 = vmatprep.subr.bf16.mxu1 %v11406_v11  ;;  %v1071_v60 = vld [vmem:[%s12732_s18 + $0x938] sm:$0xff] }
 0x493   : > { %v1079_v31 = vld [vmem:[%s12732_s18 + $0x978] sm:$0xff] }
 0x494   : > { %8125 = vmatpush2.bf16.msra.mxu0 %v11149_v18 }
 0x495   : > { %8166 = vmatpush2.bf16.msra.mxu1 %v11405_v20  ;;  %8126 = vmatprep.subr.bf16.mxu0 %v11134_v46  ;;  %v10816_v46 = vcombine.high %v1119_v48, %v1127_v47 }
 0x496   : > { %8167 = vmatprep.subr.bf16.mxu1 %v11390_v21  ;;  %v847_v21 = vld [vmem:[%s12732_s18 + $0x238] sm:$0xff] }
 0x498   : > { %8127 = vmatpush2.bf16.msra.mxu0 %v11133_v32 }
 0x499   : > { %8168 = vmatpush2.bf16.msra.mxu1 %v11389_v33  ;;  %8128 = vmatprep.subr.bf16.mxu0 %v11118_v34  ;;  %v10559_v33 = vcombine.low %v863_v45, %v871_v6  ;;  %v10815_v34 = vcombine.low %v1119_v48, %v1127_v47  ;;  %v10768_v45 = vcombine.high %v1071_v60, %v1079_v31  ;;  %v799_v6 = vld [vmem:[%s12732_s18 + $0xb8] sm:$0xff] }
 0x49a   : > { %8169 = vmatprep.subr.bf16.mxu1 %v11374_v38  ;;  %v10544_v38 = vcombine.high %v847_v21, %v855_v22  ;;  %v1063_v48 = vld [vmem:[%s12732_s18 + $0x8f8] sm:$0xff] }
 0x49c   : > { %8129 = vmatpush2.bf16.msra.mxu0 %v11117_v54  ;;  %v1087_v54 = vld [vmem:[%s12732_s18 + $0x9b8] sm:$0xff] }
 0x49d   : > { %8170 = vmatpush2.bf16.msra.mxu1 %v11373_v35  ;;  %8180 = vmatprep.subr.bf16.mxu0 %v10592_v58  ;;  %v1095_v35 = vld [vmem:[%s12732_s18 + $0x9f8] sm:$0xff]  ;;  %v10543_v58 = vcombine.low %v847_v21, %v855_v22 }
 0x49e   : > { %8221 = vmatprep.subr.bf16.mxu1 %v10848_v37  ;;  %v10784_v55 = vcombine.high %v1087_v54, %v1095_v35 }
 0x49f   : > { %v7886_v50 = vpop.f32.mrf.mxu0  ;;  %8131 = vmatmul.mubr.bf16.vlgmr.msra.gmra.mxu0 %v12978_v15 }
 0x4a0   : > { %v7887_v11 = vadd.f32 %v7886_v50, %v1847_v56  ;;  %v7927_v12 = vpop.f32.mrf.mxu1  ;;  %8172 = vmatmul.mubr.bf16.vlgmr.msra.gmra.mxu1 %v12974_v44  ;;  %8181 = vmatpush1.bf16.msra.mxu0 %v10591_v59  ;;  %v815_v56 = vld [vmem:[%s12732_s18 + $0x138] sm:$0xff] }
 0x4a1   : > { %8212 = vmatprep.mubr.bf16.mxu0 %v12876_v24  ;;  %8222 = vmatpush1.bf16.msra.mxu1 %v10847_v3  ;;  %v7888_v49 = vpop.f32.mrf.mxu0  ;;  %v1103_v24 = vld [vmem:[%s12732_s18 + $0xa38] sm:$0xff]  ;;  %v10527_v3 = vcombine.low %v831_v52, %v839_v9 }
 0x4a2   : > { %v13886_v8 = vadd.f32 %v7927_v12, %v7887_v11  ;;  %8253 = vmatprep.mubr.bf16.mxu1 %v12880_v26  ;;  %v7889_v18 = vadd.f32 %v7888_v49, %v1851_v4  ;;  %v7929_v20 = vpop.f32.mrf.mxu1  ;;  %8182 = vmatprep.subr.bf16.mxu0 %v10576_v23  ;;  %v10800_v51 = vcombine.high %v1103_v24, %v1111_v19  ;;  %v823_v59 = vld [vmem:[%s12732_s18 + $0x178] sm:$0xff] }
 0x4a3   : > { %v7890_v27 = vpop.f32.mrf.mxu0  ;;  %8223 = vmatprep.subr.bf16.mxu1 %v10832_v10  ;;  %v10799_v37 = vcombine.low %v1103_v24, %v1111_v19  ;;  %v10783_v4 = vcombine.low %v1087_v54, %v1095_v35  ;;  %v10512_v23 = vcombine.high %v815_v56, %v823_v59  ;;  %v807_v50 = vld [vmem:[%s12732_s18 + $0xf8] sm:$0xff]  ;;  %v10511_v47 = vcombine.low %v815_v56, %v823_v59 }
 0x4a4   : > { %v13893_v5 = vadd.f32 %v7929_v20, %v7889_v18  ;;  %v7931_v32 = vpop.f32.mrf.mxu1  ;;  %8183 = vmatpush1.bf16.msra.mxu0 %v10575_v14  ;;  %v1055_v10 = vld [vmem:[%s12732_s18 + $0x8b8] sm:$0xff]  ;;  %v10767_v11 = vcombine.low %v1071_v60, %v1079_v31  ;;  %v10496_v12 = vcombine.high %v799_v6, %v807_v50  ;;  %v10495_v20 = vcombine.low %v799_v6, %v807_v50 }
 0x4a5   : > { %8224 = vmatpush1.bf16.msra.mxu1 %v10831_v43  ;;  %v7891_v26 = vpop.f32.mrf.mxu0  ;;  %8184 = vmatprep.subr.bf16.mxu0 %v10560_v16  ;;  %v10752_v14 = vcombine.high %v1055_v10, %v1063_v48  ;;  %v783_v49 = vld [vmem:[%s12732_s18 + $0x38] sm:$0xff] }
 0x4a6   : > { %v7932_v42 = vpop.f32.mrf.mxu1  ;;  %8225 = vmatprep.subr.bf16.mxu1 %v10816_v46  ;;  %v791_v43 = vld [vmem:[%s12732_s18 + $0x78] sm:$0xff]  ;;  %v10751_v46 = vcombine.low %v1055_v10, %v1063_v48 }
 0x4a7   : > { %v1039_v16 = vld [vmem:[%s12732_s18 + $0x838] sm:$0xff]  ;;  %v10480_v21 = vcombine.high %v783_v49, %v791_v43 }
 0x4a8   : > { %8185 = vmatpush1.bf16.msra.mxu0 %v10559_v33  ;;  %v1047_v18 = vld [vmem:[%s12732_s18 + $0x878] sm:$0xff]  ;;  %v10479_v33 = vcombine.low %v783_v49, %v791_v43 }
 0x4a9   : > { %8226 = vmatpush1.bf16.msra.mxu1 %v10815_v34  ;;  %8186 = vmatprep.subr.bf16.mxu0 %v10544_v38  ;;  %v10736_v22 = vcombine.high %v1039_v16, %v1047_v18  ;;  %v1023_v27 = vld [vmem:[%s12732_s18 + $0x7b8] sm:$0xff]  ;;  %v10735_v26 = vcombine.low %v1039_v16, %v1047_v18 }
 0x4aa   : > { %8227 = vmatprep.subr.bf16.mxu1 %v10800_v51  ;;  %v1031_v24 = vld [vmem:[%s12732_s18 + $0x7f8] sm:$0xff] }
 0x4ab   : > { %v1279_v19 = vld [vmem:[%s12732_s18 + $0xfb8] sm:$0xff]  ;;  %v10720_v34 = vcombine.high %v1023_v27, %v1031_v24  ;;  %v10719_v54 = vcombine.low %v1023_v27, %v1031_v24 }
 0x4ac   : > { %8187 = vmatpush1.bf16.msra.mxu0 %v10543_v58  ;;  %v1287_v32 = vld [vmem:[%s12732_s18 + $0xff8] sm:$0xff] }
 0x4ad   : > { %8228 = vmatpush1.bf16.msra.mxu1 %v10799_v37  ;;  %8188 = vmatprep.subr.bf16.mxu0 %v10528_v7  ;;  %v10976_v38 = vcombine.high %v1279_v19, %v1287_v32  ;;  %v1007_v42 = vld [vmem:[%s12732_s18 + $0x738] sm:$0xff]  ;;  %v10975_v35 = vcombine.low %v1279_v19, %v1287_v32 }
 0x4ae   : > { %8229 = vmatprep.subr.bf16.mxu1 %v10784_v55  ;;  %v1015_v51 = vld [vmem:[%s12732_s18 + $0x778] sm:$0xff] }
 0x4af   : > { %v1263_v52 = vld [vmem:[%s12732_s18 + $0xf38] sm:$0xff]  ;;  %v10704_v58 = vcombine.high %v1007_v42, %v1015_v51  ;;  %v10703_v60 = vcombine.low %v1007_v42, %v1015_v51 }
 0x4b0   : > { %8189 = vmatpush1.bf16.msra.mxu0 %v10527_v3  ;;  %v1271_v9 = vld [vmem:[%s12732_s18 + $0xf78] sm:$0xff] }
 0x4b1   : > { %8230 = vmatpush1.bf16.msra.mxu1 %v10783_v4  ;;  %8190 = vmatprep.subr.bf16.mxu0 %v10512_v23  ;;  %v10960_v37 = vcombine.high %v1263_v52, %v1271_v9  ;;  %v991_v7 = vld [vmem:[%s12732_s18 + $0x6b8] sm:$0xff]  ;;  %v10959_v31 = vcombine.low %v1263_v52, %v1271_v9 }
 0x4b2   : > { %8231 = vmatprep.subr.bf16.mxu1 %v10768_v45  ;;  %v999_v55 = vld [vmem:[%s12732_s18 + $0x6f8] sm:$0xff] }
 0x4b3   : > { %v1247_v56 = vld [vmem:[%s12732_s18 + $0xeb8] sm:$0xff]  ;;  %v10688_v3 = vcombine.high %v991_v7, %v999_v55  ;;  %v10687_v10 = vcombine.low %v991_v7, %v999_v55 }
 0x4b4   : > { %8191 = vmatpush1.bf16.msra.mxu0 %v10511_v47  ;;  %v1255_v59 = vld [vmem:[%s12732_s18 + $0xef8] sm:$0xff] }
 0x4b5   : > { %8232 = vmatpush1.bf16.msra.mxu1 %v10767_v11  ;;  %8192 = vmatprep.subr.bf16.mxu0 %v10496_v12  ;;  %v10944_v4 = vcombine.high %v1247_v56, %v1255_v59  ;;  %v975_v23 = vld [vmem:[%s12732_s18 + $0x638] sm:$0xff]  ;;  %v10943_v48 = vcombine.low %v1247_v56, %v1255_v59 }
 0x4b6   : > { %8233 = vmatprep.subr.bf16.mxu1 %v10752_v14  ;;  %v983_v45 = vld [vmem:[%s12732_s18 + $0x678] sm:$0xff] }
 0x4b7   : > { %v1231_v6 = vld [vmem:[%s12732_s18 + $0xe38] sm:$0xff]  ;;  %v10672_v47 = vcombine.high %v975_v23, %v983_v45  ;;  %v10671_v16 = vcombine.low %v975_v23, %v983_v45 }
 0x4b8   : > { %8193 = vmatpush1.bf16.msra.mxu0 %v10495_v20  ;;  %v1239_v50 = vld [vmem:[%s12732_s18 + $0xe78] sm:$0xff] }
 0x4b9   : > { %8234 = vmatpush1.bf16.msra.mxu1 %v10751_v46  ;;  %8194 = vmatprep.subr.bf16.mxu0 %v10480_v21  ;;  %v10928_v11 = vcombine.high %v1231_v6, %v1239_v50  ;;  %v959_v12 = vld [vmem:[%s12732_s18 + $0x5b8] sm:$0xff]  ;;  %v10927_v18 = vcombine.low %v1231_v6, %v1239_v50 }
 0x4ba   : > { %8235 = vmatprep.subr.bf16.mxu1 %v10736_v22  ;;  %v967_v14 = vld [vmem:[%s12732_s18 + $0x5f8] sm:$0xff] }
 0x4bb   : > { %v1215_v49 = vld [vmem:[%s12732_s18 + $0xdb8] sm:$0xff]  ;;  %v10656_v20 = vcombine.high %v959_v12, %v967_v14  ;;  %v10655_v19 = vcombine.low %v959_v12, %v967_v14 }
 0x4bc   : > { %8195 = vmatpush1.bf16.msra.mxu0 %v10479_v33  ;;  %v1223_v43 = vld [vmem:[%s12732_s18 + $0xdf8] sm:$0xff] }
 0x4bd   : > { %8236 = vmatpush1.bf16.msra.mxu1 %v10735_v26  ;;  %8196 = vmatprep.subr.bf16.mxu0 %v10720_v34  ;;  %v10912_v46 = vcombine.high %v1215_v49, %v1223_v43  ;;  %v943_v21 = vld [vmem:[%s12732_s18 + $0x538] sm:$0xff]  ;;  %v10911_v32 = vcombine.low %v1215_v49, %v1223_v43 }
 0x4be   : > { %8237 = vmatprep.subr.bf16.mxu1 %v10976_v38  ;;  %v951_v22 = vld [vmem:[%s12732_s18 + $0x578] sm:$0xff] }
 0x4bf   : > { %v1199_v27 = vld [vmem:[%s12732_s18 + $0xd38] sm:$0xff]  ;;  %v10640_v33 = vcombine.high %v943_v21, %v951_v22  ;;  %v10639_v52 = vcombine.low %v943_v21, %v951_v22 }
 0x4c0   : > { %8197 = vmatpush2.bf16.msra.mxu0 %v10719_v54  ;;  %v1207_v24 = vld [vmem:[%s12732_s18 + $0xd78] sm:$0xff] }
 0x4c1   : > { %8238 = vmatpush2.bf16.msra.mxu1 %v10975_v35  ;;  %8198 = vmatprep.subr.bf16.mxu0 %v10704_v58  ;;  %v10896_v26 = vcombine.high %v1199_v27, %v1207_v24  ;;  %v927_v34 = vld [vmem:[%s12732_s18 + $0x4b8] sm:$0xff]  ;;  %v10895_v9 = vcombine.low %v1199_v27, %v1207_v24 }
 0x4c2   : > { %8239 = vmatprep.subr.bf16.mxu1 %v10960_v37  ;;  %v935_v38 = vld [vmem:[%s12732_s18 + $0x4f8] sm:$0xff] }
 0x4c3   : > { %v1183_v42 = vld [vmem:[%s12732_s18 + $0xcb8] sm:$0xff]  ;;  %v10624_v54 = vcombine.high %v927_v34, %v935_v38  ;;  %v10623_v56 = vcombine.low %v927_v34, %v935_v38 }
 0x4c4   : > { %8199 = vmatpush2.bf16.msra.mxu0 %v10703_v60  ;;  %v1191_v51 = vld [vmem:[%s12732_s18 + $0xcf8] sm:$0xff] }
 0x4c5   : > { %8240 = vmatpush2.bf16.msra.mxu1 %v10959_v31  ;;  %8200 = vmatprep.subr.bf16.mxu0 %v10688_v3  ;;  %v10880_v35 = vcombine.high %v1183_v42, %v1191_v51  ;;  %v911_v58 = vld [vmem:[%s12732_s18 + $0x438] sm:$0xff]  ;;  %v10879_v59 = vcombine.low %v1183_v42, %v1191_v51 }
 0x4c6   : > { %8241 = vmatprep.subr.bf16.mxu1 %v10944_v4  ;;  %v919_v37 = vld [vmem:[%s12732_s18 + $0x478] sm:$0xff] }
 0x4c7   : > { %v1167_v7 = vld [vmem:[%s12732_s18 + $0xc38] sm:$0xff]  ;;  %v10608_v60 = vcombine.high %v911_v58, %v919_v37  ;;  %v10607_v6 = vcombine.low %v911_v58, %v919_v37 }
 0x4c8   : > { %8201 = vmatpush2.bf16.msra.mxu0 %v10687_v10  ;;  %v1175_v55 = vld [vmem:[%s12732_s18 + $0xc78] sm:$0xff] }
 0x4c9   : > { %8242 = vmatpush2.bf16.msra.mxu1 %v10943_v48  ;;  %8202 = vmatprep.subr.bf16.mxu0 %v10672_v47  ;;  %v10864_v31 = vcombine.high %v1167_v7, %v1175_v55  ;;  %v1407_v3 = vld [vmem:[%s12732_s18 + $0x13b8] sm:$0xff]  ;;  %v10863_v50 = vcombine.low %v1167_v7, %v1175_v55 }
 0x4ca   : > { %8243 = vmatprep.subr.bf16.mxu1 %v10928_v11  ;;  %v1415_v4 = vld [vmem:[%s12732_s18 + $0x13f8] sm:$0xff] }
 0x4cb   : > { %v1663_v23 = vld [vmem:[%s12732_s18 + $0x1bb8] sm:$0xff]  ;;  %v11104_v10 = vcombine.high %v1407_v3, %v1415_v4  ;;  %v11103_v12 = vcombine.low %v1407_v3, %v1415_v4 }
 0x4cc   : > { %8203 = vmatpush2.bf16.msra.mxu0 %v10671_v16  ;;  %v1671_v45 = vld [vmem:[%s12732_s18 + $0x1bf8] sm:$0xff] }
 0x4cd   : > { %8244 = vmatpush2.bf16.msra.mxu1 %v10927_v18  ;;  %8204 = vmatprep.subr.bf16.mxu0 %v10656_v20  ;;  %v11360_v48 = vcombine.high %v1663_v23, %v1671_v45  ;;  %v1391_v47 = vld [vmem:[%s12732_s18 + $0x1338] sm:$0xff]  ;;  %v11359_v43 = vcombine.low %v1663_v23, %v1671_v45 }
 0x4ce   : > { %8245 = vmatprep.subr.bf16.mxu1 %v10912_v46  ;;  %v1399_v11 = vld [vmem:[%s12732_s18 + $0x1378] sm:$0xff] }
 0x4cf   : > { %v1647_v14 = vld [vmem:[%s12732_s18 + $0x1b38] sm:$0xff]  ;;  %v11088_v16 = vcombine.high %v1391_v47, %v1399_v11 }
 0x4d0   : > { %8205 = vmatpush2.bf16.msra.mxu0 %v10655_v19  ;;  %v1655_v49 = vld [vmem:[%s12732_s18 + $0x1b78] sm:$0xff] }
 0x4d1   : > { %8246 = vmatpush2.bf16.msra.mxu1 %v10911_v32  ;;  %8206 = vmatprep.subr.bf16.mxu0 %v10640_v33  ;;  %v1375_v18 = vld [vmem:[%s12732_s18 + $0x12b8] sm:$0xff]  ;;  %v11344_v21 = vcombine.high %v1647_v14, %v1655_v49  ;;  %v11087_v32 = vcombine.low %v1391_v47, %v1399_v11 }
 0x4d2   : > { %8247 = vmatprep.subr.bf16.mxu1 %v10896_v26  ;;  %v1383_v20 = vld [vmem:[%s12732_s18 + $0x12f8] sm:$0xff]  ;;  %v11343_v26 = vcombine.low %v1647_v14, %v1655_v49 }
 0x4d3   : > { %v1631_v22 = vld [vmem:[%s12732_s18 + $0x1ab8] sm:$0xff] }
 0x4d4   : > { %8207 = vmatpush2.bf16.msra.mxu0 %v10639_v52  ;;  %v1639_v27 = vld [vmem:[%s12732_s18 + $0x1af8] sm:$0xff] }
 0x4d5   : > { %8248 = vmatpush2.bf16.msra.mxu1 %v10895_v9  ;;  %8208 = vmatprep.subr.bf16.mxu0 %v10624_v54  ;;  %v11328_v42 = vcombine.high %v1631_v22, %v1639_v27  ;;  %v1367_v51 = vld [vmem:[%s12732_s18 + $0x1278] sm:$0xff]  ;;  %v11327_v58 = vcombine.low %v1631_v22, %v1639_v27 }
 0x4d6   : > { %8249 = vmatprep.subr.bf16.mxu1 %v10880_v35  ;;  %v1623_v9 = vld [vmem:[%s12732_s18 + $0x1a78] sm:$0xff] }
 0x4d7   : > { %v1311_v49 = vld [vmem:[%s12732_s18 + $0x10b8] sm:$0xff] }
 0x4d8   : > { %8209 = vmatpush2.bf16.msra.mxu0 %v10623_v56  ;;  %v1343_v56 = vld [vmem:[%s12732_s18 + $0x11b8] sm:$0xff] }
 0x4d9   : > { %8250 = vmatpush2.bf16.msra.mxu1 %v10879_v59  ;;  %8210 = vmatprep.subr.bf16.mxu0 %v10608_v60  ;;  %v1351_v59 = vld [vmem:[%s12732_s18 + $0x11f8] sm:$0xff] }
 0x4da   : > { %8251 = vmatprep.subr.bf16.mxu1 %v10864_v31  ;;  %v1599_v60 = vld [vmem:[%s12732_s18 + $0x19b8] sm:$0xff]  ;;  %v11040_v23 = vcombine.high %v1343_v56, %v1351_v59  ;;  %v11039_v47 = vcombine.low %v1343_v56, %v1351_v59 }
 0x4db   : > { %v1607_v31 = vld [vmem:[%s12732_s18 + $0x19f8] sm:$0xff] }
 0x4dc   : > { %8211 = vmatpush2.bf16.msra.mxu0 %v10607_v6  ;;  %v11296_v45 = vcombine.high %v1599_v60, %v1607_v31  ;;  %v1327_v6 = vld [vmem:[%s12732_s18 + $0x1138] sm:$0xff]  ;;  %v11295_v11 = vcombine.low %v1599_v60, %v1607_v31 }
 0x4dd   : > { %8252 = vmatpush2.bf16.msra.mxu1 %v10863_v50  ;;  %8262 = vmatprep.subr.bf16.mxu0 %v11104_v10  ;;  %v1335_v50 = vld [vmem:[%s12732_s18 + $0x1178] sm:$0xff] }
 0x4de   : > { %8303 = vmatprep.subr.bf16.mxu1 %v11360_v48  ;;  %v1583_v10 = vld [vmem:[%s12732_s18 + $0x1938] sm:$0xff] }
 0x4df   : > { %v7968_v46 = vpop.f32.mrf.mxu0  ;;  %8213 = vmatmul.mubr.bf16.vlgmr.msra.gmra.mxu0 %v12878_v25  ;;  %v11072_v25 = vcombine.high %v1375_v18, %v1383_v20  ;;  %v1591_v48 = vld [vmem:[%s12732_s18 + $0x1978] sm:$0xff] }
 0x4e0   : > { %v7969_v24 = vadd.f32 %v7968_v46, %v13886_v8  ;;  %v8009_v19 = vpop.f32.mrf.mxu1  ;;  %8254 = vmatmul.mubr.bf16.vlgmr.msra.gmra.mxu1 %v12882_v28  ;;  %8263 = vmatpush1.bf16.msra.mxu0 %v11103_v12  ;;  %v1359_v28 = vld [vmem:[%s12732_s18 + $0x1238] sm:$0xff]  ;;  %v11024_v12 = vcombine.high %v1327_v6, %v1335_v50  ;;  %v11280_v14 = vcombine.high %v1583_v10, %v1591_v48 }
 0x4e1   : > { %8294 = vmatprep.mubr.bf16.mxu0 %v12902_v40  ;;  %8304 = vmatpush1.bf16.msra.mxu1 %v11359_v43  ;;  %v7970_v33 = vpop.f32.mrf.mxu0  ;;  %v1615_v40 = vld [vmem:[%s12732_s18 + $0x1a38] sm:$0xff]  ;;  %v11056_v37 = vcombine.high %v1359_v28, %v1367_v51  ;;  %v11055_v3 = vcombine.low %v1359_v28, %v1367_v51  ;;  %v11279_v46 = vcombine.low %v1583_v10, %v1591_v48 }
 0x4e2   : > { %v13959_v34 = vadd.f32 %v8009_v19, %v7969_v24  ;;  %8335 = vmatprep.mubr.bf16.mxu1 %v12904_v41  ;;  %v7971_v8 = vadd.f32 %v7970_v33, %v13893_v5  ;;  %v8011_v38 = vpop.f32.mrf.mxu1  ;;  %8264 = vmatprep.subr.bf16.mxu0 %v11088_v16  ;;  %v11071_v41 = vcombine.low %v1375_v18, %v1383_v20  ;;  %v1319_v43 = vld [vmem:[%s12732_s18 + $0x10f8] sm:$0xff] }
 0x4e3   : > { %v7972_v52 = vpop.f32.mrf.mxu0  ;;  %8305 = vmatprep.subr.bf16.mxu1 %v11344_v21  ;;  %v11312_v55 = vcombine.high %v1615_v40, %v1623_v9  ;;  %v11311_v4 = vcombine.low %v1615_v40, %v1623_v9  ;;  %v1567_v16 = vld [vmem:[%s12732_s18 + $0x18b8] sm:$0xff]  ;;  %v11023_v20 = vcombine.low %v1327_v6, %v1335_v50  ;;  %v11008_v21 = vcombine.high %v1311_v49, %v1319_v43 }
 0x4e4   : > { %v13967_v54 = vadd.f32 %v8011_v38, %v7971_v8  ;;  %v8013_v35 = vpop.f32.mrf.mxu1  ;;  %8265 = vmatpush1.bf16.msra.mxu0 %v11087_v32  ;;  %v1575_v18 = vld [vmem:[%s12732_s18 + $0x18f8] sm:$0xff]  ;;  %v11007_v33 = vcombine.low %v1311_v49, %v1319_v43 }
 0x4e5   : > { %8306 = vmatpush1.bf16.msra.mxu1 %v11343_v26  ;;  %v7973_v5 = vpop.f32.mrf.mxu0  ;;  %8266 = vmatprep.subr.bf16.mxu0 %v11072_v25  ;;  %v11264_v22 = vcombine.high %v1567_v16, %v1575_v18  ;;  %v1295_v27 = vld [vmem:[%s12732_s18 + $0x1038] sm:$0xff]  ;;  %v11263_v26 = vcombine.low %v1567_v16, %v1575_v18 }
 0x4e6   : > { %v8014_v7 = vpop.f32.mrf.mxu1  ;;  %8307 = vmatprep.subr.bf16.mxu1 %v11328_v42  ;;  %v1303_v24 = vld [vmem:[%s12732_s18 + $0x1078] sm:$0xff]  ;;  %12286 = vtanh.f32 %v13967_v54  ;;  %v12059_v54 = vld [vmem:[%s12740_s1 + $0x384] ss:$8 sps:$4 sm:$0xff]  }
 0x4e7   : > { %v1551_v19 = vld [vmem:[%s12732_s18 + $0x1838] sm:$0xff]  ;;  %v10992_v25 = vcombine.high %v1295_v27, %v1303_v24  ;;  %v10991_v52 = vcombine.low %v1295_v27, %v1303_v24  ;;  %12288 = vtanh.f32 %v13809_v36  ;;  %v12141_v36 = vld [vmem:[%s12740_s1 + $0x5a0] ss:$8 sps:$4 sm:$0xff]  }
 0x4e8   : > { %8267 = vmatpush1.bf16.msra.mxu0 %v11071_v41  ;;  %v1559_v32 = vld [vmem:[%s12732_s18 + $0x1878] sm:$0xff]  ;;  %12290 = vtanh.f32 %v13959_v34 }
 0x4e9   : > { %8308 = vmatpush1.bf16.msra.mxu1 %v11327_v58  ;;  %8268 = vmatprep.subr.bf16.mxu0 %v11056_v37  ;;  %v11248_v8 = vcombine.high %v1551_v19, %v1559_v32  ;;  %v1535_v38 = vld [vmem:[%s12732_s18 + $0x17b8] sm:$0xff]  ;;  %v11247_v40 = vcombine.low %v1551_v19, %v1559_v32 }
 0x4ea   : > { %8309 = vmatprep.subr.bf16.mxu1 %v11312_v55  ;;  %v1543_v42 = vld [vmem:[%s12732_s18 + $0x17f8] sm:$0xff] }
 0x4eb   : > { %v1791_v28 = vld [vmem:[%s12732_s18 + $0x1fb8] sm:$0xff]  ;;  %v11232_v9 = vcombine.high %v1535_v38, %v1543_v42  ;;  %v11231_v7 = vcombine.low %v1535_v38, %v1543_v42 }
 0x4ec   : > { %8269 = vmatpush1.bf16.msra.mxu0 %v11055_v3  ;;  %v1799_v51 = vld [vmem:[%s12732_s18 + $0x1ff8] sm:$0xff] }
 0x4ed   : > { %8310 = vmatpush1.bf16.msra.mxu1 %v11311_v4  ;;  %8270 = vmatprep.subr.bf16.mxu0 %v11040_v23  ;;  %v11488_v35 = vcombine.high %v1791_v28, %v1799_v51  ;;  %v1519_v41 = vld [vmem:[%s12732_s18 + $0x1738] sm:$0xff]  ;;  %v11487_v55 = vcombine.low %v1791_v28, %v1799_v51 }
 0x4ee   : > { %8311 = vmatprep.subr.bf16.mxu1 %v11296_v45  ;;  %v1527_v5 = vld [vmem:[%s12732_s18 + $0x1778] sm:$0xff] }
 0x4ef   : > { %v1775_v58 = vld [vmem:[%s12732_s18 + $0x1f38] sm:$0xff]  ;;  %v11216_v56 = vcombine.high %v1519_v41, %v1527_v5  ;;  %v11215_v23 = vcombine.low %v1519_v41, %v1527_v5 }
 0x4f0   : > { %8271 = vmatpush1.bf16.msra.mxu0 %v11039_v47  ;;  %v1783_v37 = vld [vmem:[%s12732_s18 + $0x1f78] sm:$0xff] }
 0x4f1   : > { %8312 = vmatpush1.bf16.msra.mxu1 %v11295_v11  ;;  %8272 = vmatprep.subr.bf16.mxu0 %v11024_v12  ;;  %v11472_v59 = vcombine.high %v1775_v58, %v1783_v37  ;;  %v1503_v60 = vld [vmem:[%s12732_s18 + $0x16b8] sm:$0xff]  ;;  %v11471_v45 = vcombine.low %v1775_v58, %v1783_v37 }
 0x4f2   : > { %8313 = vmatprep.subr.bf16.mxu1 %v11280_v14  ;;  %v1511_v31 = vld [vmem:[%s12732_s18 + $0x16f8] sm:$0xff] }
 0x4f3   : > { %v1759_v3 = vld [vmem:[%s12732_s18 + $0x1eb8] sm:$0xff]  ;;  %v11200_v6 = vcombine.high %v1503_v60, %v1511_v31  ;;  %v11199_v12 = vcombine.low %v1503_v60, %v1511_v31 }
 0x4f4   : > { %8273 = vmatpush1.bf16.msra.mxu0 %v11023_v20  ;;  %v1767_v4 = vld [vmem:[%s12732_s18 + $0x1ef8] sm:$0xff] }
 0x4f5   : > { %8314 = vmatpush1.bf16.msra.mxu1 %v11279_v46  ;;  %8274 = vmatprep.subr.bf16.mxu0 %v11008_v21  ;;  %v11456_v50 = vcombine.high %v1759_v3, %v1767_v4  ;;  %v1487_v10 = vld [vmem:[%s12732_s18 + $0x1638] sm:$0xff]  ;;  %v11455_v14 = vcombine.low %v1759_v3, %v1767_v4 }
 0x4f6   : > { %8315 = vmatprep.subr.bf16.mxu1 %v11264_v22  ;;  %v1495_v48 = vld [vmem:[%s12732_s18 + $0x1678] sm:$0xff] }
 0x4f7   : > { %v1743_v47 = vld [vmem:[%s12732_s18 + $0x1e38] sm:$0xff]  ;;  %v11184_v49 = vcombine.high %v1487_v10, %v1495_v48  ;;  %v11183_v21 = vcombine.low %v1487_v10, %v1495_v48 }
 0x4f8   : > { %8275 = vmatpush1.bf16.msra.mxu0 %v11007_v33  ;;  %v1751_v11 = vld [vmem:[%s12732_s18 + $0x1e78] sm:$0xff] }
 0x4f9   : > { %8316 = vmatpush1.bf16.msra.mxu1 %v11263_v26  ;;  %8276 = vmatprep.subr.bf16.mxu0 %v10992_v25  ;;  %v11440_v43 = vcombine.high %v1743_v47, %v1751_v11  ;;  %v1471_v16 = vld [vmem:[%s12732_s18 + $0x15b8] sm:$0xff]  ;;  %v11439_v22 = vcombine.low %v1743_v47, %v1751_v11  ;;  %v11876_v11 = vld [vmem:[%s12740_s1 + $0x64] ss:$8 sps:$4 sm:$0xff]  }
 0x4fa   : > { %8317 = vmatprep.subr.bf16.mxu1 %v11248_v8  ;;  %v1479_v18 = vld [vmem:[%s12732_s18 + $0x15f8] sm:$0xff] }
 0x4fb   : > { %v1727_v20 = vld [vmem:[%s12732_s18 + $0x1db8] sm:$0xff]  ;;  %v11168_v27 = vcombine.high %v1471_v16, %v1479_v18  ;;  %v11167_v25 = vcombine.low %v1471_v16, %v1479_v18  ;;  %v11874_v18 = vld [vmem:[%s12740_s1 + $0x60] ss:$8 sps:$4 sm:$0xff]  }
 0x4fc   : > { %8277 = vmatpush1.bf16.msra.mxu0 %v10991_v52  ;;  %v1735_v46 = vld [vmem:[%s12732_s18 + $0x1df8] sm:$0xff] }
 0x4fd   : > { %8318 = vmatpush1.bf16.msra.mxu1 %v11247_v40  ;;  %8278 = vmatprep.subr.bf16.mxu0 %v11232_v9  ;;  %v11424_v24 = vcombine.high %v1727_v20, %v1735_v46  ;;  %v1455_v19 = vld [vmem:[%s12732_s18 + $0x1538] sm:$0xff]  ;;  %v11423_v8 = vcombine.low %v1727_v20, %v1735_v46 }
 0x4fe   : > { %8319 = vmatprep.subr.bf16.mxu1 %v11488_v35  ;;  %v1463_v32 = vld [vmem:[%s12732_s18 + $0x1578] sm:$0xff] }
 0x4ff   : > { %v1711_v33 = vld [vmem:[%s12732_s18 + $0x1d38] sm:$0xff]  ;;  %v11152_v38 = vcombine.high %v1455_v19, %v1463_v32  ;;  %v11151_v9 = vcombine.low %v1455_v19, %v1463_v32 }
 0x500   : > { %8279 = vmatpush2.bf16.msra.mxu0 %v11231_v7  ;;  %v1719_v26 = vld [vmem:[%s12732_s18 + $0x1d78] sm:$0xff] }
 0x501   : > { %8320 = vmatpush2.bf16.msra.mxu1 %v11487_v55  ;;  %8280 = vmatprep.subr.bf16.mxu0 %v11216_v56  ;;  %v11408_v42 = vcombine.high %v1711_v33, %v1719_v26  ;;  %v1439_v28 = vld [vmem:[%s12732_s18 + $0x14b8] sm:$0xff]  ;;  %v11407_v35 = vcombine.low %v1711_v33, %v1719_v26 }
 0x502   : > { %8321 = vmatprep.subr.bf16.mxu1 %v11472_v59  ;;  %v1447_v51 = vld [vmem:[%s12732_s18 + $0x14f8] sm:$0xff] }
 0x503   : > { %v1695_v52 = vld [vmem:[%s12732_s18 + $0x1cb8] sm:$0xff]  ;;  %v11136_v41 = vcombine.high %v1439_v28, %v1447_v51  ;;  %v11135_v13 = vcombine.low %v1439_v28, %v1447_v51  ;;  %v11889_v28 = vld [vmem:[%s12740_s1 + $0x140] ss:$8 sps:$4 sm:$0xff]  }
 0x504   : > { %8281 = vmatpush2.bf16.msra.mxu0 %v11215_v23  ;;  %v1703_v40 = vld [vmem:[%s12732_s18 + $0x1cf8] sm:$0xff]  ;;  %v12269_v23 = vpop.eup %12268 }
 0x505   : > { %8322 = vmatpush2.bf16.msra.mxu1 %v11471_v45  ;;  %8282 = vmatprep.subr.bf16.mxu0 %v11200_v6  ;;  %v11392_v5 = vcombine.high %v1695_v52, %v1703_v40  ;;  %v1423_v58 = vld [vmem:[%s12732_s18 + $0x1438] sm:$0xff]  ;;  %v11391_v30 = vcombine.low %v1695_v52, %v1703_v40  ;;  %v12271_v10 = vpop.eup %12270 }
 0x506   : > { %8323 = vmatprep.subr.bf16.mxu1 %v11456_v50  ;;  %v1431_v37 = vld [vmem:[%s12732_s18 + $0x1478] sm:$0xff]  ;;  %v8363_v16 = vpack.c.bf16 %v12271_v10, %v12271_v10  ;;  %v11922_v10 = vld [vmem:[%s12740_s1 + $0xe0] ss:$8 sps:$4 sm:$0xff]  }
 0x507   : > { %v1679_v7 = vld [vmem:[%s12732_s18 + $0x1c38] sm:$0xff]  ;;  %v11120_v56 = vcombine.high %v1423_v58, %v1431_v37  ;;  %v11119_v60 = vcombine.low %v1423_v58, %v1431_v37  ;;  %v11901_v58 = vld [vmem:[%s12740_s1 + $0x120] ss:$8 sps:$4 sm:$0xff]  }
 0x508   : > { %8283 = vmatpush2.bf16.msra.mxu0 %v11199_v12  ;;  %v1687_v55 = vld [vmem:[%s12732_s18 + $0x1c78] sm:$0xff] }
 0x509   : > { %8324 = vmatpush2.bf16.msra.mxu1 %v11455_v14  ;;  %8284 = vmatprep.subr.bf16.mxu0 %v11184_v49  ;;  %v11376_v59 = vcombine.high %v1679_v7, %v1687_v55  ;;  %v11375_v31 = vcombine.low %v1679_v7, %v1687_v55  ;;  %v11870_v3 = vld [vmem:[%s12740_s1 + $0x74] ss:$8 sps:$4 sm:$0xff]   ;;  %v11868_v50 = vld [vmem:[%s12740_s1 + $0x70] ss:$8 sps:$4 sm:$0xff]   ;;  %v8361_v14 = vpack.c.bf16 %v12269_v23, %v12269_v23  ;;  %v11879_v49 = vld [vmem:[%s12740_s1 + $0x164] ss:$8 sps:$4 sm:$0xff]  }
 0x50a   : > { %8325 = vmatprep.subr.bf16.mxu1 %v11440_v43  ;;  %v11873_v4 = vld [vmem:[%s12740_s1 + $0x174] ss:$8 sps:$4 sm:$0xff]   ;;  %v11871_v48 = vld [vmem:[%s12740_s1 + $0x170] ss:$8 sps:$4 sm:$0xff]  }
 0x50b   : > { %v14022_v45 = vld [vmem:[%s12738_s29 + $0x8] sm:$0xff] }
 0x50c   : > { %8285 = vmatpush2.bf16.msra.mxu0 %v11183_v21  ;;  %v1855_v6 = vrot.slane %v14022_v45, %v12940_v1  ;;  %v1859_v47 = vrot.slane %v14022_v45, %v12859_v61  ;;  %v11877_v61 = vld [vmem:[%s12740_s1 + $0x160] ss:$8 sps:$4 sm:$0xff]   ;;  %v11882_v46 = vld [vmem:[%s12740_s1 + $0x54] ss:$8 sps:$4 sm:$0xff]   ;;  %v11880_v32 = vld [vmem:[%s12740_s1 + $0x50] ss:$8 sps:$4 sm:$0xff]  }
 0x50d   : > { %8326 = vmatpush2.bf16.msra.mxu1 %v11439_v22  ;;  %8286 = vmatprep.subr.bf16.mxu0 %v11168_v27  ;;  %v11885_v27 = vld [vmem:[%s12740_s1 + $0x154] ss:$8 sps:$4 sm:$0xff]   ;;  %v11883_v26 = vld [vmem:[%s12740_s1 + $0x150] ss:$8 sps:$4 sm:$0xff]  }
 0x50e   : > { %8327 = vmatprep.subr.bf16.mxu1 %v11424_v24  ;;  %v11894_v51 = vld [vmem:[%s12740_s1 + $0x34] ss:$8 sps:$4 sm:$0xff]   ;;  %v11892_v40 = vld [vmem:[%s12740_s1 + $0x30] ss:$8 sps:$4 sm:$0xff]  }
 0x50f   : > { %v11897_v52 = vld [vmem:[%s12740_s1 + $0x134] ss:$8 sps:$4 sm:$0xff]   ;;  %v11904_v55 = vld [vmem:[%s12740_s1 + $0x10] ss:$8 sps:$4 sm:$0xff]  }
 0x510   : > { %8287 = vmatpush2.bf16.msra.mxu0 %v11167_v25  ;;  %v11888_v25 = vld [vmem:[%s12740_s1 + $0x44] ss:$8 sps:$4 sm:$0xff]   ;;  %v11906_v37 = vld [vmem:[%s12740_s1 + $0x14] ss:$8 sps:$4 sm:$0xff]   ;;  %v11919_v23 = vld [vmem:[%s12740_s1 + $0x1f0] ss:$8 sps:$4 sm:$0xff]  }
 0x511   : > { %8328 = vmatpush2.bf16.msra.mxu1 %v11423_v8  ;;  %8288 = vmatprep.subr.bf16.mxu0 %v11152_v38  ;;  %v11891_v38 = vld [vmem:[%s12740_s1 + $0x144] ss:$8 sps:$4 sm:$0xff]   ;;  %v11909_v7 = vld [vmem:[%s12740_s1 + $0x114] ss:$8 sps:$4 sm:$0xff]   ;;  %v12144_v34 = vld [vmem:[%s12740_s1 + $0x490] ss:$8 sps:$4 sm:$0xff]  }
 0x512   : > { %8329 = vmatprep.subr.bf16.mxu1 %v11408_v42  ;;  %v11886_v42 = vld [vmem:[%s12740_s1 + $0x40] ss:$8 sps:$4 sm:$0xff]  }
 0x514   : > { %8289 = vmatpush2.bf16.msra.mxu0 %v11151_v9  ;;  %v11895_v9 = vld [vmem:[%s12740_s1 + $0x130] ss:$8 sps:$4 sm:$0xff]  }
 0x515   : > { %8330 = vmatpush2.bf16.msra.mxu1 %v11407_v35  ;;  %8290 = vmatprep.subr.bf16.mxu0 %v11136_v41  ;;  %v11900_v35 = vld [vmem:[%s12740_s1 + $0x24] ss:$8 sps:$4 sm:$0xff]  }
 0x516   : > { %8331 = vmatprep.subr.bf16.mxu1 %v11392_v5  ;;  %v11903_v41 = vld [vmem:[%s12740_s1 + $0x124] ss:$8 sps:$4 sm:$0xff]   ;;  %v11898_v5 = vld [vmem:[%s12740_s1 + $0x20] ss:$8 sps:$4 sm:$0xff]  }
 0x518   : > { %8291 = vmatpush2.bf16.msra.mxu0 %v11135_v13  ;;  %v11907_v13 = vld [vmem:[%s12740_s1 + $0x110] ss:$8 sps:$4 sm:$0xff]  }
 0x519   : > { %8332 = vmatpush2.bf16.msra.mxu1 %v11391_v30  ;;  %8292 = vmatprep.subr.bf16.mxu0 %v11120_v56  ;;  %v11912_v30 = vld [vmem:[%s12740_s1 + $0x4] ss:$8 sps:$4 sm:$0xff]  }
 0x51a   : > { %8333 = vmatprep.subr.bf16.mxu1 %v11376_v59  ;;  %v11915_v56 = vld [vmem:[%s12740_s1 + $0x104] ss:$8 sps:$4 sm:$0xff]   ;;  %v11910_v59 = vld [vmem:[%s12740_s1] ss:$8 sps:$4 sm:$0xff]  }
 0x51c   : > { %8293 = vmatpush2.bf16.msra.mxu0 %v11119_v60  ;;  %v11913_v60 = vld [vmem:[%s12740_s1 + $0x100] ss:$8 sps:$4 sm:$0xff]  }
 0x51d   : > { %8334 = vmatpush2.bf16.msra.mxu1 %v11375_v31  ;;  %9912 = vmatprep.subr.bf16.mxu0 %v11870_v3  ;;  %v11918_v31 = vld [vmem:[%s12740_s1 + $0xf4] ss:$8 sps:$4 sm:$0xff]  }
 0x51e   : > { %9953 = vmatprep.subr.bf16.mxu1 %v11873_v4  ;;  %v11921_v3 = vld [vmem:[%s12740_s1 + $0x1f4] ss:$8 sps:$4 sm:$0xff]   ;;  %v11916_v4 = vld [vmem:[%s12740_s1 + $0xf0] ss:$8 sps:$4 sm:$0xff]  }
 0x51f   : > { %v8050_v12 = vpop.f32.mrf.mxu0  ;;  %8295 = vmatmul.mubr.bf16.vlgmr.msra.gmra.mxu0 %v12978_v15 }
 0x520   : > { %v8051_v43 = vadd.f32 %v8050_v12, %v1855_v6  ;;  %v8091_v1 = vpop.f32.mrf.mxu1  ;;  %8336 = vmatmul.mubr.bf16.vlgmr.msra.gmra.mxu1 %v12974_v44  ;;  %9913 = vmatpush1.bf16.msra.mxu0 %v11868_v50  ;;  %v11924_v6 = vld [vmem:[%s12740_s1 + $0xe4] ss:$8 sps:$4 sm:$0xff]   ;;  %v11928_v12 = vld [vmem:[%s12740_s1 + $0xd0] ss:$8 sps:$4 sm:$0xff]  }
 0x521   : > { %9944 = vmatprep.mubr.bf16.mxu0 %v8361_v14  ;;  %9954 = vmatpush1.bf16.msra.mxu1 %v11871_v48  ;;  %v8052_v20 = vpop.f32.mrf.mxu0  ;;  %v11927_v50 = vld [vmem:[%s12740_s1 + $0x1e4] ss:$8 sps:$4 sm:$0xff]   ;;  %v11925_v48 = vld [vmem:[%s12740_s1 + $0x1e0] ss:$8 sps:$4 sm:$0xff]   ;;  %v11931_v14 = vld [vmem:[%s12740_s1 + $0x1d0] ss:$8 sps:$4 sm:$0xff]  }
 0x522   : > { %v14037_v21 = vadd.f32 %v8091_v1, %v8051_v43  ;;  %9985 = vmatprep.mubr.bf16.mxu1 %v8363_v16  ;;  %v8053_v15 = vadd.f32 %v8052_v20, %v1859_v47  ;;  %v8093_v22 = vpop.f32.mrf.mxu1  ;;  %9914 = vmatprep.subr.bf16.mxu0 %v11876_v11  ;;  %v11930_v47 = vld [vmem:[%s12740_s1 + $0xd4] ss:$8 sps:$4 sm:$0xff]   ;;  %v11939_v43 = vld [vmem:[%s12740_s1 + $0x1c4] ss:$8 sps:$4 sm:$0xff]   ;;  %v11934_v1 = vld [vmem:[%s12740_s1 + $0xc0] ss:$8 sps:$4 sm:$0xff]  }
 0x523   : > { %v8054_v44 = vpop.f32.mrf.mxu0  ;;  %9955 = vmatprep.subr.bf16.mxu1 %v11879_v49  ;;  %v11933_v11 = vld [vmem:[%s12740_s1 + $0x1d4] ss:$8 sps:$4 sm:$0xff]   ;;  %v11936_v49 = vld [vmem:[%s12740_s1 + $0xc4] ss:$8 sps:$4 sm:$0xff]   ;;  %v11937_v16 = vld [vmem:[%s12740_s1 + $0x1c0] ss:$8 sps:$4 sm:$0xff]  }
 0x524   : > { %v14040_v24 = vadd.f32 %v8093_v22, %v8053_v15  ;;  %v8095_v19 = vpop.f32.mrf.mxu1  ;;  %9915 = vmatpush1.bf16.msra.mxu0 %v11874_v18  ;;  %v11942_v18 = vld [vmem:[%s12740_s1 + $0xb4] ss:$8 sps:$4 sm:$0xff]   ;;  %v11948_v15 = vld [vmem:[%s12740_s1 + $0xa4] ss:$8 sps:$4 sm:$0xff]  }
 0x525   : > { %9956 = vmatpush1.bf16.msra.mxu1 %v11877_v61  ;;  %v8055_v33 = vpop.f32.mrf.mxu0  ;;  %9916 = vmatprep.subr.bf16.mxu0 %v11882_v46  ;;  %v11945_v20 = vld [vmem:[%s12740_s1 + $0x1b4] ss:$8 sps:$4 sm:$0xff]   ;;  %v11940_v61 = vld [vmem:[%s12740_s1 + $0xb0] ss:$8 sps:$4 sm:$0xff]   ;;  %v11951_v22 = vld [vmem:[%s12740_s1 + $0x1a4] ss:$8 sps:$4 sm:$0xff]  }
 0x526   : > { %v8096_v8 = vpop.f32.mrf.mxu1  ;;  %9957 = vmatprep.subr.bf16.mxu1 %v11885_v27  ;;  %v11943_v46 = vld [vmem:[%s12740_s1 + $0x1b0] ss:$8 sps:$4 sm:$0xff]   ;;  %v11946_v27 = vld [vmem:[%s12740_s1 + $0xa0] ss:$8 sps:$4 sm:$0xff]   ;;  %v11954_v44 = vld [vmem:[%s12740_s1 + $0x94] ss:$8 sps:$4 sm:$0xff]  }
 0x527   : > { %v11952_v19 = vld [vmem:[%s12740_s1 + $0x90] ss:$8 sps:$4 sm:$0xff]   ;;  %v11958_v33 = vld [vmem:[%s12740_s1 + $0x80] ss:$8 sps:$4 sm:$0xff]   ;;  %v12273_v8 = vpop.eup %12272 }
 0x528   : > { %9917 = vmatpush1.bf16.msra.mxu0 %v11880_v32  ;;  %v11963_v32 = vld [vmem:[%s12740_s1 + $0x184] ss:$8 sps:$4 sm:$0xff]  }
 0x529   : > { %9958 = vmatpush1.bf16.msra.mxu1 %v11883_v26  ;;  %9918 = vmatprep.subr.bf16.mxu0 %v11888_v25  ;;  %v11961_v26 = vld [vmem:[%s12740_s1 + $0x180] ss:$8 sps:$4 sm:$0xff]   ;;  %v11966_v25 = vld [vmem:[%s12740_s1 + $0x274] ss:$8 sps:$4 sm:$0xff]  }
 0x52a   : > { %9959 = vmatprep.subr.bf16.mxu1 %v11891_v38  ;;  %v11969_v38 = vld [vmem:[%s12740_s1 + $0x374] ss:$8 sps:$4 sm:$0xff]  }
 0x52c   : > { %9919 = vmatpush1.bf16.msra.mxu0 %v11886_v42  ;;  %v12275_v42 = vpop.eup %12274 }
 0x52d   : > { %9960 = vmatpush1.bf16.msra.mxu1 %v11889_v28  ;;  %9920 = vmatprep.subr.bf16.mxu0 %v11894_v51  ;;  %v12277_v28 = vpop.eup %12276  ;;  %v11964_v51 = vld [vmem:[%s12740_s1 + $0x270] ss:$8 sps:$4 sm:$0xff]  }
 0x52e   : > { %9961 = vmatprep.subr.bf16.mxu1 %v11897_v52  ;;  %v12279_v52 = vpop.eup %12278 }
 0x530   : > { %9921 = vmatpush1.bf16.msra.mxu0 %v11892_v40  ;;  %v8360_v40 = vpack.c.bf16 %v12273_v8, %v12273_v8  ;;  %v12020_v8 = vld [vmem:[%s12740_s1 + $0x2e4] ss:$8 sps:$4 sm:$0xff]  }
 0x531   : > { %9962 = vmatpush1.bf16.msra.mxu1 %v11895_v9  ;;  %9922 = vmatprep.subr.bf16.mxu0 %v11900_v35  ;;  %v11967_v9 = vld [vmem:[%s12740_s1 + $0x370] ss:$8 sps:$4 sm:$0xff]   ;;  %v8362_v35 = vpack.c.bf16 %v12275_v42, %v12275_v42  ;;  %v12018_v42 = vld [vmem:[%s12740_s1 + $0x2e0] ss:$8 sps:$4 sm:$0xff]  }
 0x532   : > { %9963 = vmatprep.subr.bf16.mxu1 %v11903_v41  ;;  %v11972_v41 = vld [vmem:[%s12740_s1 + $0x264] ss:$8 sps:$4 sm:$0xff]  }
 0x534   : > { %9923 = vmatpush1.bf16.msra.mxu0 %v11898_v5 }
 0x535   : > { %9964 = vmatpush1.bf16.msra.mxu1 %v11901_v58  ;;  %9924 = vmatprep.subr.bf16.mxu0 %v11906_v37  ;;  %v8365_v58 = vpack.c.bf16 %v12277_v28, %v12277_v28  ;;  %v11975_v37 = vld [vmem:[%s12740_s1 + $0x364] ss:$8 sps:$4 sm:$0xff]   ;;  %v12021_v28 = vld [vmem:[%s12740_s1 + $0x3e0] ss:$8 sps:$4 sm:$0xff]  }
 0x536   : > { %9965 = vmatprep.subr.bf16.mxu1 %v11909_v7 }
 0x538   : > { %9925 = vmatpush1.bf16.msra.mxu0 %v11904_v55 }
 0x539   : > { %9966 = vmatpush1.bf16.msra.mxu1 %v11907_v13  ;;  %9926 = vmatprep.subr.bf16.mxu0 %v11912_v30  ;;  %v8367_v13 = vpack.c.bf16 %v12279_v52, %v12279_v52  ;;  %v11970_v30 = vld [vmem:[%s12740_s1 + $0x260] ss:$8 sps:$4 sm:$0xff]   ;;  %v12029_v52 = vld [vmem:[%s12740_s1 + $0x3d4] ss:$8 sps:$4 sm:$0xff]  }
 0x53a   : > { %9967 = vmatprep.subr.bf16.mxu1 %v11915_v56 }
 0x53c   : > { %9927 = vmatpush1.bf16.msra.mxu0 %v11910_v59  ;;  %v11973_v59 = vld [vmem:[%s12740_s1 + $0x360] ss:$8 sps:$4 sm:$0xff]  }
 0x53d   : > { %9968 = vmatpush1.bf16.msra.mxu1 %v11913_v60  ;;  %9928 = vmatprep.subr.bf16.mxu0 %v11918_v31  ;;  %v11978_v60 = vld [vmem:[%s12740_s1 + $0x254] ss:$8 sps:$4 sm:$0xff]  }
 0x53e   : > { %9969 = vmatprep.subr.bf16.mxu1 %v11921_v3 }
 0x540   : > { %9929 = vmatpush2.bf16.msra.mxu0 %v11916_v4  ;;  %v11981_v4 = vld [vmem:[%s12740_s1 + $0x354] ss:$8 sps:$4 sm:$0xff]  }
 0x541   : > { %9970 = vmatpush2.bf16.msra.mxu1 %v11919_v23  ;;  %9930 = vmatprep.subr.bf16.mxu0 %v11924_v6 }
 0x542   : > { %9971 = vmatprep.subr.bf16.mxu1 %v11927_v50 }
 0x544   : > { %9931 = vmatpush2.bf16.msra.mxu0 %v11922_v10  ;;  %v11976_v10 = vld [vmem:[%s12740_s1 + $0x250] ss:$8 sps:$4 sm:$0xff]  }
 0x545   : > { %9972 = vmatpush2.bf16.msra.mxu1 %v11925_v48  ;;  %9932 = vmatprep.subr.bf16.mxu0 %v11930_v47  ;;  %v11984_v47 = vld [vmem:[%s12740_s1 + $0x244] ss:$8 sps:$4 sm:$0xff]  }
 0x546   : > { %9973 = vmatprep.subr.bf16.mxu1 %v11933_v11 }
 0x548   : > { %9933 = vmatpush2.bf16.msra.mxu0 %v11928_v12  ;;  %v11987_v12 = vld [vmem:[%s12740_s1 + $0x344] ss:$8 sps:$4 sm:$0xff]  }
 0x549   : > { %9974 = vmatpush2.bf16.msra.mxu1 %v11931_v14  ;;  %9934 = vmatprep.subr.bf16.mxu0 %v11936_v49  ;;  %v11982_v14 = vld [vmem:[%s12740_s1 + $0x240] ss:$8 sps:$4 sm:$0xff]  }
 0x54a   : > { %9975 = vmatprep.subr.bf16.mxu1 %v11939_v43  ;;  %v11985_v49 = vld [vmem:[%s12740_s1 + $0x340] ss:$8 sps:$4 sm:$0xff]   ;;  %v11990_v43 = vld [vmem:[%s12740_s1 + $0x234] ss:$8 sps:$4 sm:$0xff]  }
 0x54c   : > { %9935 = vmatpush2.bf16.msra.mxu0 %v11934_v1  ;;  %v11993_v1 = vld [vmem:[%s12740_s1 + $0x334] ss:$8 sps:$4 sm:$0xff]  }
 0x54d   : > { %9976 = vmatpush2.bf16.msra.mxu1 %v11937_v16  ;;  %9936 = vmatprep.subr.bf16.mxu0 %v11942_v18  ;;  %v11988_v16 = vld [vmem:[%s12740_s1 + $0x230] ss:$8 sps:$4 sm:$0xff]  }
 0x54e   : > { %9977 = vmatprep.subr.bf16.mxu1 %v11945_v20  ;;  %v11991_v18 = vld [vmem:[%s12740_s1 + $0x330] ss:$8 sps:$4 sm:$0xff]   ;;  %v11996_v20 = vld [vmem:[%s12740_s1 + $0x224] ss:$8 sps:$4 sm:$0xff]  }
 0x550   : > { %9937 = vmatpush2.bf16.msra.mxu0 %v11940_v61  ;;  %v11999_v61 = vld [vmem:[%s12740_s1 + $0x324] ss:$8 sps:$4 sm:$0xff]  }
 0x551   : > { %9978 = vmatpush2.bf16.msra.mxu1 %v11943_v46  ;;  %9938 = vmatprep.subr.bf16.mxu0 %v11948_v15  ;;  %v11994_v46 = vld [vmem:[%s12740_s1 + $0x220] ss:$8 sps:$4 sm:$0xff]  }
 0x552   : > { %9979 = vmatprep.subr.bf16.mxu1 %v11951_v22  ;;  %v11997_v15 = vld [vmem:[%s12740_s1 + $0x320] ss:$8 sps:$4 sm:$0xff]   ;;  %v12002_v22 = vld [vmem:[%s12740_s1 + $0x214] ss:$8 sps:$4 sm:$0xff]  }
 0x554   : > { %9939 = vmatpush2.bf16.msra.mxu0 %v11946_v27  ;;  %v12005_v27 = vld [vmem:[%s12740_s1 + $0x314] ss:$8 sps:$4 sm:$0xff]  }
 0x555   : > { %9980 = vmatpush2.bf16.msra.mxu1 %v11949_v2  ;;  %9940 = vmatprep.subr.bf16.mxu0 %v11954_v44  ;;  %v12000_v2 = vld [vmem:[%s12740_s1 + $0x210] ss:$8 sps:$4 sm:$0xff]  }
 0x556   : > { %9981 = vmatprep.subr.bf16.mxu1 %v11957_v17  ;;  %v12003_v44 = vld [vmem:[%s12740_s1 + $0x310] ss:$8 sps:$4 sm:$0xff]   ;;  %v12008_v17 = vld [vmem:[%s12740_s1 + $0x204] ss:$8 sps:$4 sm:$0xff]  }
 0x558   : > { %9941 = vmatpush2.bf16.msra.mxu0 %v11952_v19  ;;  %v12011_v19 = vld [vmem:[%s12740_s1 + $0x304] ss:$8 sps:$4 sm:$0xff]  }
 0x559   : > { %9982 = vmatpush2.bf16.msra.mxu1 %v11955_v29  ;;  %9942 = vmatprep.subr.bf16.mxu0 %v11960_v57  ;;  %v12006_v29 = vld [vmem:[%s12740_s1 + $0x200] ss:$8 sps:$4 sm:$0xff]  }
 0x55a   : > { %9983 = vmatprep.subr.bf16.mxu1 %v11963_v32  ;;  %v12009_v57 = vld [vmem:[%s12740_s1 + $0x300] ss:$8 sps:$4 sm:$0xff]   ;;  %v12014_v32 = vld [vmem:[%s12740_s1 + $0x2f4] ss:$8 sps:$4 sm:$0xff]  }
 0x55c   : > { %9943 = vmatpush2.bf16.msra.mxu0 %v11958_v33  ;;  %v12017_v33 = vld [vmem:[%s12740_s1 + $0x3f4] ss:$8 sps:$4 sm:$0xff]  }
 0x55d   : > { %9984 = vmatpush2.bf16.msra.mxu1 %v11961_v26  ;;  %9994 = vmatprep.subr.bf16.mxu0 %v11966_v25  ;;  %v12012_v26 = vld [vmem:[%s12740_s1 + $0x2f0] ss:$8 sps:$4 sm:$0xff]  }
 0x55e   : > { %10035 = vmatprep.subr.bf16.mxu1 %v11969_v38  ;;  %v12015_v25 = vld [vmem:[%s12740_s1 + $0x3f0] ss:$8 sps:$4 sm:$0xff]   ;;  %v12023_v38 = vld [vmem:[%s12740_s1 + $0x3e4] ss:$8 sps:$4 sm:$0xff]  }
 0x55f   : > { %v8132_v5 = vpop.f32.mrf.mxu0  ;;  %9945 = vmatmul.mubr.bf16.vlgmr.msra.gmra.mxu0 %v8360_v40  ;;  %v12024_v40 = vld [vmem:[%s12740_s1 + $0x2d0] ss:$8 sps:$4 sm:$0xff]  }
 0x560   : > { %v8133_v7 = vadd.f32 %v8132_v5, %v14037_v21  ;;  %v8173_v55 = vpop.f32.mrf.mxu1  ;;  %9986 = vmatmul.mubr.bf16.vlgmr.msra.gmra.mxu1 %v8362_v35  ;;  %9995 = vmatpush1.bf16.msra.mxu0 %v11964_v51  ;;  %v12026_v51 = vld [vmem:[%s12740_s1 + $0x2d4] ss:$8 sps:$4 sm:$0xff]   ;;  %v12032_v35 = vld [vmem:[%s12740_s1 + $0x2c4] ss:$8 sps:$4 sm:$0xff]   ;;  %v12030_v5 = vld [vmem:[%s12740_s1 + $0x2c0] ss:$8 sps:$4 sm:$0xff]  }
 0x561   : > { %10026 = vmatprep.mubr.bf16.mxu0 %v8365_v58  ;;  %10036 = vmatpush1.bf16.msra.mxu1 %v11967_v9  ;;  %v8134_v56 = vpop.f32.mrf.mxu0  ;;  %v12027_v9 = vld [vmem:[%s12740_s1 + $0x3d0] ss:$8 sps:$4 sm:$0xff]   ;;  %v12033_v58 = vld [vmem:[%s12740_s1 + $0x3c0] ss:$8 sps:$4 sm:$0xff]  }
 0x562   : > { %v14110_v31 = vadd.f32 %v8173_v55, %v8133_v7  ;;  %10067 = vmatprep.mubr.bf16.mxu1 %v8367_v13  ;;  %v8135_v3 = vadd.f32 %v8134_v56, %v14040_v24  ;;  %v8175_v21 = vpop.f32.mrf.mxu1  ;;  %9996 = vmatprep.subr.bf16.mxu0 %v11972_v41  ;;  %v11979_v24 = vld [vmem:[%s12740_s1 + $0x350] ss:$8 sps:$4 sm:$0xff]   ;;  %v12035_v41 = vld [vmem:[%s12740_s1 + $0x3c4] ss:$8 sps:$4 sm:$0xff]   ;;  %v12041_v7 = vld [vmem:[%s12740_s1 + $0x3b4] ss:$8 sps:$4 sm:$0xff]  }
 0x563   : > { %v8136_v23 = vpop.f32.mrf.mxu0  ;;  %10037 = vmatprep.subr.bf16.mxu1 %v11975_v37  ;;  %v12038_v37 = vld [vmem:[%s12740_s1 + $0x2b4] ss:$8 sps:$4 sm:$0xff]   ;;  %v12036_v55 = vld [vmem:[%s12740_s1 + $0x2b0] ss:$8 sps:$4 sm:$0xff]   ;;  %v12047_v56 = vld [vmem:[%s12740_s1 + $0x3a4] ss:$8 sps:$4 sm:$0xff]  }
 0x564   : > { %v14114_v6 = vadd.f32 %v8175_v21, %v8135_v3  ;;  %v8177_v50 = vpop.f32.mrf.mxu1  ;;  %9997 = vmatpush1.bf16.msra.mxu0 %v11970_v30  ;;  %v12039_v13 = vld [vmem:[%s12740_s1 + $0x3b0] ss:$8 sps:$4 sm:$0xff]   ;;  %v12044_v30 = vld [vmem:[%s12740_s1 + $0x2a4] ss:$8 sps:$4 sm:$0xff]   ;;  %v12057_v23 = vld [vmem:[%s12740_s1 + $0x380] ss:$8 sps:$4 sm:$0xff]  }
 0x565   : > { %10038 = vmatpush1.bf16.msra.mxu1 %v11973_v59  ;;  %v8137_v48 = vpop.f32.mrf.mxu0  ;;  %9998 = vmatprep.subr.bf16.mxu0 %v11978_v60  ;;  %v12042_v59 = vld [vmem:[%s12740_s1 + $0x2a0] ss:$8 sps:$4 sm:$0xff]   ;;  %v12050_v60 = vld [vmem:[%s12740_s1 + $0x294] ss:$8 sps:$4 sm:$0xff]   ;;  %v12048_v3 = vld [vmem:[%s12740_s1 + $0x290] ss:$8 sps:$4 sm:$0xff]  }
 0x566   : > { %v8178_v11 = vpop.f32.mrf.mxu1  ;;  %10039 = vmatprep.subr.bf16.mxu1 %v11981_v4  ;;  %v12056_v21 = vld [vmem:[%s12740_s1 + $0x284] ss:$8 sps:$4 sm:$0xff]   ;;  %v12054_v4 = vld [vmem:[%s12740_s1 + $0x280] ss:$8 sps:$4 sm:$0xff]   ;;  %v12062_v50 = vld [vmem:[%s12740_s1 + $0x474] ss:$8 sps:$4 sm:$0xff]   ;;  %12292 = vtanh.f32 %v14114_v6 }
 0x567   : > { %v12065_v48 = vld [vmem:[%s12740_s1 + $0x574] ss:$8 sps:$4 sm:$0xff]   ;;  %v1863_v11 = vrot.slane %v14022_v45, %v12937_v62  ;;  %v12155_v6 = vld [vmem:[%s12740_s1 + $0x584] ss:$8 sps:$4 sm:$0xff]  }
 0x568   : > { %9999 = vmatpush1.bf16.msra.mxu0 %v11976_v10  ;;  %v12281_v10 = vpop.eup %12280 }
 0x569   : > { %10040 = vmatpush1.bf16.msra.mxu1 %v11979_v24  ;;  %10000 = vmatprep.subr.bf16.mxu0 %v11984_v47  ;;  %v12283_v24 = vpop.eup %12282 }
 0x56a   : > { %10041 = vmatprep.subr.bf16.mxu1 %v11987_v12  ;;  %v12285_v47 = vpop.eup %12284  ;;  %v12060_v12 = vld [vmem:[%s12740_s1 + $0x470] ss:$8 sps:$4 sm:$0xff]  }
 0x56c   : > { %10001 = vmatpush1.bf16.msra.mxu0 %v11982_v14  ;;  %v12287_v14 = vpop.eup %12286 }
 0x56d   : > { %10042 = vmatpush1.bf16.msra.mxu1 %v11985_v49  ;;  %10002 = vmatprep.subr.bf16.mxu0 %v11990_v43  ;;  %v8364_v49 = vpack.c.bf16 %v12281_v10, %v12281_v10  ;;  %v12063_v43 = vld [vmem:[%s12740_s1 + $0x570] ss:$8 sps:$4 sm:$0xff]   ;;  %v8371_v62 = vpack.c.bf16 %v12287_v14, %v12287_v14  ;;  %v12122_v10 = vld [vmem:[%s12740_s1 + $0x4d4] ss:$8 sps:$4 sm:$0xff]   ;;  %v12126_v14 = vld [vmem:[%s12740_s1 + $0x4c0] ss:$8 sps:$4 sm:$0xff]  }
 0x56e   : > { %10043 = vmatprep.subr.bf16.mxu1 %v11993_v1  ;;  %v8366_v1 = vpack.c.bf16 %v12283_v24, %v12283_v24  ;;  %v12120_v24 = vld [vmem:[%s12740_s1 + $0x4d0] ss:$8 sps:$4 sm:$0xff]  }
 0x570   : > { %10003 = vmatpush1.bf16.msra.mxu0 %v11988_v16  ;;  %v12068_v16 = vld [vmem:[%s12740_s1 + $0x464] ss:$8 sps:$4 sm:$0xff]  }
 0x571   : > { %10044 = vmatpush1.bf16.msra.mxu1 %v11991_v18  ;;  %10004 = vmatprep.subr.bf16.mxu0 %v11996_v20  ;;  %v8369_v20 = vpack.c.bf16 %v12285_v47, %v12285_v47  ;;  %v12123_v47 = vld [vmem:[%s12740_s1 + $0x5d0] ss:$8 sps:$4 sm:$0xff]  }
 0x572   : > { %10045 = vmatprep.subr.bf16.mxu1 %v11999_v61  ;;  %v12071_v61 = vld [vmem:[%s12740_s1 + $0x564] ss:$8 sps:$4 sm:$0xff]  }
 0x574   : > { %10005 = vmatpush1.bf16.msra.mxu0 %v11994_v46 }
 0x575   : > { %10046 = vmatpush1.bf16.msra.mxu1 %v11997_v15  ;;  %10006 = vmatprep.subr.bf16.mxu0 %v12002_v22  ;;  %v12066_v22 = vld [vmem:[%s12740_s1 + $0x460] ss:$8 sps:$4 sm:$0xff]  }
 0x576   : > { %10047 = vmatprep.subr.bf16.mxu1 %v12005_v27 }
 0x578   : > { %10007 = vmatpush1.bf16.msra.mxu0 %v12000_v2  ;;  %v12069_v2 = vld [vmem:[%s12740_s1 + $0x560] ss:$8 sps:$4 sm:$0xff]  }
 0x579   : > { %10048 = vmatpush1.bf16.msra.mxu1 %v12003_v44  ;;  %10008 = vmatprep.subr.bf16.mxu0 %v12008_v17  ;;  %v12074_v44 = vld [vmem:[%s12740_s1 + $0x454] ss:$8 sps:$4 sm:$0xff]  }
 0x57a   : > { %10049 = vmatprep.subr.bf16.mxu1 %v12011_v19 }
 0x57c   : > { %10009 = vmatpush1.bf16.msra.mxu0 %v12006_v29  ;;  %v12077_v29 = vld [vmem:[%s12740_s1 + $0x554] ss:$8 sps:$4 sm:$0xff]  }
 0x57d   : > { %10050 = vmatpush1.bf16.msra.mxu1 %v12009_v57  ;;  %10010 = vmatprep.subr.bf16.mxu0 %v12014_v32 }
 0x57e   : > { %10051 = vmatprep.subr.bf16.mxu1 %v12017_v33  ;;  %v12072_v33 = vld [vmem:[%s12740_s1 + $0x450] ss:$8 sps:$4 sm:$0xff]  }
 0x580   : > { %10011 = vmatpush2.bf16.msra.mxu0 %v12012_v26 }
 0x581   : > { %10052 = vmatpush2.bf16.msra.mxu1 %v12015_v25  ;;  %10012 = vmatprep.subr.bf16.mxu0 %v12020_v8  ;;  %v12075_v25 = vld [vmem:[%s12740_s1 + $0x550] ss:$8 sps:$4 sm:$0xff]   ;;  %v12080_v8 = vld [vmem:[%s12740_s1 + $0x444] ss:$8 sps:$4 sm:$0xff]  }
 0x582   : > { %10053 = vmatprep.subr.bf16.mxu1 %v12023_v38 }
 0x584   : > { %10013 = vmatpush2.bf16.msra.mxu0 %v12018_v42  ;;  %v12083_v42 = vld [vmem:[%s12740_s1 + $0x544] ss:$8 sps:$4 sm:$0xff]  }
 0x585   : > { %10054 = vmatpush2.bf16.msra.mxu1 %v12021_v28  ;;  %10014 = vmatprep.subr.bf16.mxu0 %v12026_v51  ;;  %v12078_v28 = vld [vmem:[%s12740_s1 + $0x440] ss:$8 sps:$4 sm:$0xff]  }
 0x586   : > { %10055 = vmatprep.subr.bf16.mxu1 %v12029_v52  ;;  %v12081_v51 = vld [vmem:[%s12740_s1 + $0x540] ss:$8 sps:$4 sm:$0xff]   ;;  %v12086_v52 = vld [vmem:[%s12740_s1 + $0x434] ss:$8 sps:$4 sm:$0xff]  }
 0x588   : > { %10015 = vmatpush2.bf16.msra.mxu0 %v12024_v40  ;;  %v12089_v40 = vld [vmem:[%s12740_s1 + $0x534] ss:$8 sps:$4 sm:$0xff]  }
 0x589   : > { %10056 = vmatpush2.bf16.msra.mxu1 %v12027_v9  ;;  %10016 = vmatprep.subr.bf16.mxu0 %v12032_v35  ;;  %v12084_v9 = vld [vmem:[%s12740_s1 + $0x430] ss:$8 sps:$4 sm:$0xff]  }
 0x58a   : > { %10057 = vmatprep.subr.bf16.mxu1 %v12035_v41  ;;  %v12087_v35 = vld [vmem:[%s12740_s1 + $0x530] ss:$8 sps:$4 sm:$0xff]   ;;  %v12092_v41 = vld [vmem:[%s12740_s1 + $0x424] ss:$8 sps:$4 sm:$0xff]  }
 0x58c   : > { %10017 = vmatpush2.bf16.msra.mxu0 %v12030_v5  ;;  %v12095_v5 = vld [vmem:[%s12740_s1 + $0x524] ss:$8 sps:$4 sm:$0xff]  }
 0x58d   : > { %10058 = vmatpush2.bf16.msra.mxu1 %v12033_v58  ;;  %10018 = vmatprep.subr.bf16.mxu0 %v12038_v37  ;;  %v12090_v58 = vld [vmem:[%s12740_s1 + $0x420] ss:$8 sps:$4 sm:$0xff]  }
 0x58e   : > { %10059 = vmatprep.subr.bf16.mxu1 %v12041_v7  ;;  %v12093_v37 = vld [vmem:[%s12740_s1 + $0x520] ss:$8 sps:$4 sm:$0xff]   ;;  %v12098_v7 = vld [vmem:[%s12740_s1 + $0x414] ss:$8 sps:$4 sm:$0xff]  }
 0x590   : > { %10019 = vmatpush2.bf16.msra.mxu0 %v12036_v55  ;;  %v12101_v55 = vld [vmem:[%s12740_s1 + $0x514] ss:$8 sps:$4 sm:$0xff]  }
 0x591   : > { %10060 = vmatpush2.bf16.msra.mxu1 %v12039_v13  ;;  %10020 = vmatprep.subr.bf16.mxu0 %v12044_v30  ;;  %v12096_v13 = vld [vmem:[%s12740_s1 + $0x410] ss:$8 sps:$4 sm:$0xff]  }
 0x592   : > { %10061 = vmatprep.subr.bf16.mxu1 %v12047_v56  ;;  %v12099_v30 = vld [vmem:[%s12740_s1 + $0x510] ss:$8 sps:$4 sm:$0xff]   ;;  %v12104_v56 = vld [vmem:[%s12740_s1 + $0x404] ss:$8 sps:$4 sm:$0xff]  }
 0x594   : > { %10021 = vmatpush2.bf16.msra.mxu0 %v12042_v59  ;;  %v12107_v59 = vld [vmem:[%s12740_s1 + $0x504] ss:$8 sps:$4 sm:$0xff]  }
 0x595   : > { %10062 = vmatpush2.bf16.msra.mxu1 %v12045_v39  ;;  %10022 = vmatprep.subr.bf16.mxu0 %v12050_v60  ;;  %v12102_v39 = vld [vmem:[%s12740_s1 + $0x400] ss:$8 sps:$4 sm:$0xff]  }
 0x596   : > { %10063 = vmatprep.subr.bf16.mxu1 %v12053_v53  ;;  %v12105_v60 = vld [vmem:[%s12740_s1 + $0x500] ss:$8 sps:$4 sm:$0xff]   ;;  %v12110_v53 = vld [vmem:[%s12740_s1 + $0x4f4] ss:$8 sps:$4 sm:$0xff]  }
 0x598   : > { %10023 = vmatpush2.bf16.msra.mxu0 %v12048_v3  ;;  %v12113_v3 = vld [vmem:[%s12740_s1 + $0x5f4] ss:$8 sps:$4 sm:$0xff]  }
 0x599   : > { %10064 = vmatpush2.bf16.msra.mxu1 %v12051_v63  ;;  %10024 = vmatprep.subr.bf16.mxu0 %v12056_v21  ;;  %v12108_v63 = vld [vmem:[%s12740_s1 + $0x4f0] ss:$8 sps:$4 sm:$0xff]  }
 0x59a   : > { %10065 = vmatprep.subr.bf16.mxu1 %v12059_v54  ;;  %v12111_v21 = vld [vmem:[%s12740_s1 + $0x5f0] ss:$8 sps:$4 sm:$0xff]   ;;  %v12116_v54 = vld [vmem:[%s12740_s1 + $0x4e4] ss:$8 sps:$4 sm:$0xff]  }
 0x59c   : > { %10025 = vmatpush2.bf16.msra.mxu0 %v12054_v4  ;;  %v12119_v4 = vld [vmem:[%s12740_s1 + $0x5e4] ss:$8 sps:$4 sm:$0xff]  }
 0x59d   : > { %10066 = vmatpush2.bf16.msra.mxu1 %v12057_v23  ;;  %10076 = vmatprep.subr.bf16.mxu0 %v12062_v50  ;;  %v12114_v23 = vld [vmem:[%s12740_s1 + $0x4e0] ss:$8 sps:$4 sm:$0xff]  }
 0x59e   : > { %10117 = vmatprep.subr.bf16.mxu1 %v12065_v48  ;;  %v12117_v50 = vld [vmem:[%s12740_s1 + $0x5e0] ss:$8 sps:$4 sm:$0xff]   ;;  %v12125_v48 = vld [vmem:[%s12740_s1 + $0x5d4] ss:$8 sps:$4 sm:$0xff]  }
 0x59f   : > { %v8214_v18 = vpop.f32.mrf.mxu0  ;;  %10027 = vmatmul.mubr.bf16.vlgmr.msra.gmra.mxu0 %v8364_v49  ;;  %v12129_v49 = vld [vmem:[%s12740_s1 + $0x5c0] ss:$8 sps:$4 sm:$0xff]  }
 0x5a0   : > { %v8215_v46 = vadd.f32 %v8214_v18, %v1863_v11  ;;  %v8255_v15 = vpop.f32.mrf.mxu1  ;;  %10068 = vmatmul.mubr.bf16.vlgmr.msra.gmra.mxu1 %v8366_v1  ;;  %10077 = vmatpush1.bf16.msra.mxu0 %v12060_v12  ;;  %v12128_v11 = vld [vmem:[%s12740_s1 + $0x4c4] ss:$8 sps:$4 sm:$0xff]   ;;  %v12137_v1 = vld [vmem:[%s12740_s1 + $0x5b4] ss:$8 sps:$4 sm:$0xff]   ;;  %v12135_v18 = vld [vmem:[%s12740_s1 + $0x5b0] ss:$8 sps:$4 sm:$0xff]  }
 0x5a1   : > { %10108 = vmatprep.mubr.bf16.mxu0 %v8369_v20  ;;  %10118 = vmatpush1.bf16.msra.mxu1 %v12063_v43  ;;  %v14183_v27 = vpop.f32.mrf.mxu0  ;;  %v12131_v12 = vld [vmem:[%s12740_s1 + $0x5c4] ss:$8 sps:$4 sm:$0xff]   ;;  %v12134_v43 = vld [vmem:[%s12740_s1 + $0x4b4] ss:$8 sps:$4 sm:$0xff]  }
 0x5a2   : > { %v14187_v17 = vadd.f32 %v8255_v15, %v8215_v46  ;;  %10149 = vmatprep.mubr.bf16.mxu1 %v8371_v62  ;;  %v14189_v19 = vpop.f32.mrf.mxu1  ;;  %10078 = vmatprep.subr.bf16.mxu0 %v12068_v16  ;;  %v12132_v16 = vld [vmem:[%s12740_s1 + $0x4b0] ss:$8 sps:$4 sm:$0xff]   ;;  %v12140_v20 = vld [vmem:[%s12740_s1 + $0x4a4] ss:$8 sps:$4 sm:$0xff]   ;;  %v12138_v46 = vld [vmem:[%s12740_s1 + $0x4a0] ss:$8 sps:$4 sm:$0xff]  }
 0x5a3   : > { %v8218_v57 = vpop.f32.mrf.mxu0  ;;  %10119 = vmatprep.subr.bf16.mxu1 %v12071_v61  ;;  %v12143_v61 = vld [vmem:[%s12740_s1 + $0x5a4] ss:$8 sps:$4 sm:$0xff]   ;;  %v12146_v15 = vld [vmem:[%s12740_s1 + $0x494] ss:$8 sps:$4 sm:$0xff]  }
 0x5a4   : > { %v8259_v32 = vpop.f32.mrf.mxu1  ;;  %10079 = vmatpush1.bf16.msra.mxu0 %v12066_v22  ;;  %v12149_v62 = vld [vmem:[%s12740_s1 + $0x594] ss:$8 sps:$4 sm:$0xff]   ;;  %v12147_v22 = vld [vmem:[%s12740_s1 + $0x590] ss:$8 sps:$4 sm:$0xff]   ;;  %v12153_v57 = vld [vmem:[%s12740_s1 + $0x580] ss:$8 sps:$4 sm:$0xff]  }
 0x5a5   : > { %10120 = vmatpush1.bf16.msra.mxu1 %v12069_v2  ;;  %v8219_v26 = vpop.f32.mrf.mxu0  ;;  %10080 = vmatprep.subr.bf16.mxu0 %v12074_v44  ;;  %v12152_v2 = vld [vmem:[%s12740_s1 + $0x484] ss:$8 sps:$4 sm:$0xff]   ;;  %v1867_v44 = vrot.slane %v14022_v45, %v12862_v0  ;;  %v12158_v32 = vld [vmem:[%s12740_s1 + $0x674] ss:$8 sps:$4 sm:$0xff]   ;;  %v12159_v45 = vld [vmem:[%s12740_s1 + $0x770] ss:$8 sps:$4 sm:$0xff]  }
 0x5a6   : > { %v8260_v38 = vpop.f32.mrf.mxu1  ;;  %10121 = vmatprep.subr.bf16.mxu1 %v12077_v29  ;;  %v12150_v29 = vld [vmem:[%s12740_s1 + $0x480] ss:$8 sps:$4 sm:$0xff]   ;;  %v12161_v26 = vld [vmem:[%s12740_s1 + $0x774] ss:$8 sps:$4 sm:$0xff]  }
 0x5a7   : > { %v8217_v38 = vadd.f32 %v14183_v27, %v1867_v44  ;;  %v12213_v44 = vld [vmem:[%s12740_s1 + $0x7e0] ss:$8 sps:$4 sm:$0xff]  }
 0x5a8   : > { %10081 = vmatpush1.bf16.msra.mxu0 %v12072_v33  ;;  %v12289_v33 = vpop.eup %12288 }
 0x5a9   : > { %10122 = vmatpush1.bf16.msra.mxu1 %v12075_v25  ;;  %10082 = vmatprep.subr.bf16.mxu0 %v12080_v8  ;;  %v12291_v25 = vpop.eup %12290  ;;  %v8368_v0 = vpack.c.bf16 %v12289_v33, %v12289_v33  ;;  %v8258_v27 = vadd.f32 %v14189_v19, %v8217_v38  ;;  %v12219_v33 = vld [vmem:[%s12740_s1 + $0x7d0] ss:$8 sps:$4 sm:$0xff]   ;;  %v12222_v38 = vld [vmem:[%s12740_s1 + $0x6c0] ss:$8 sps:$4 sm:$0xff]  }
 0x5aa   : > { %10123 = vmatprep.subr.bf16.mxu1 %v12083_v42  ;;  %v12293_v8 = vpop.eup %12292  ;;  %v12156_v42 = vld [vmem:[%s12740_s1 + $0x670] ss:$8 sps:$4 sm:$0xff]  }
 0x5ac   : > { %10083 = vmatpush1.bf16.msra.mxu0 %v12078_v28  ;;  %v8370_v28 = vpack.c.bf16 %v12291_v25, %v12291_v25 }
 0x5ad   : > { %10124 = vmatpush1.bf16.msra.mxu1 %v12081_v51  ;;  %10084 = vmatprep.subr.bf16.mxu0 %v12086_v52  ;;  %v12164_v51 = vld [vmem:[%s12740_s1 + $0x664] ss:$8 sps:$4 sm:$0xff]  }
 0x5ae   : > { %10125 = vmatprep.subr.bf16.mxu1 %v12089_v40  ;;  %v12167_v52 = vld [vmem:[%s12740_s1 + $0x764] ss:$8 sps:$4 sm:$0xff]  }
 0x5b0   : > { %10085 = vmatpush1.bf16.msra.mxu0 %v12084_v9  ;;  %v8373_v9 = vpack.c.bf16 %v12293_v8, %v12293_v8  ;;  %v12227_v8 = vld [vmem:[%s12740_s1 + $0x7c4] ss:$8 sps:$4 sm:$0xff]  }
 0x5b1   : > { %10126 = vmatpush1.bf16.msra.mxu1 %v12087_v35  ;;  %10086 = vmatprep.subr.bf16.mxu0 %v12092_v41  ;;  %v12162_v41 = vld [vmem:[%s12740_s1 + $0x660] ss:$8 sps:$4 sm:$0xff]  }
 0x5b2   : > { %10127 = vmatprep.subr.bf16.mxu1 %v12095_v5 }
 0x5b4   : > { %10087 = vmatpush1.bf16.msra.mxu0 %v12090_v58  ;;  %v12165_v58 = vld [vmem:[%s12740_s1 + $0x760] ss:$8 sps:$4 sm:$0xff]  }
 0x5b5   : > { %10128 = vmatpush1.bf16.msra.mxu1 %v12093_v37  ;;  %10088 = vmatprep.subr.bf16.mxu0 %v12098_v7  ;;  %v12170_v37 = vld [vmem:[%s12740_s1 + $0x654] ss:$8 sps:$4 sm:$0xff]  }
 0x5b6   : > { %10129 = vmatprep.subr.bf16.mxu1 %v12101_v55 }
 0x5b8   : > { %10089 = vmatpush1.bf16.msra.mxu0 %v12096_v13  ;;  %v12173_v13 = vld [vmem:[%s12740_s1 + $0x754] ss:$8 sps:$4 sm:$0xff]  }
 0x5b9   : > { %10130 = vmatpush1.bf16.msra.mxu1 %v12099_v30  ;;  %10090 = vmatprep.subr.bf16.mxu0 %v12104_v56 }
 0x5ba   : > { %10131 = vmatprep.subr.bf16.mxu1 %v12107_v59  ;;  %v12168_v59 = vld [vmem:[%s12740_s1 + $0x650] ss:$8 sps:$4 sm:$0xff]  }
 0x5bc   : > { %10091 = vmatpush1.bf16.msra.mxu0 %v12102_v39 }
 0x5bd   : > { %10132 = vmatpush1.bf16.msra.mxu1 %v12105_v60  ;;  %10092 = vmatprep.subr.bf16.mxu0 %v12110_v53  ;;  %v12171_v60 = vld [vmem:[%s12740_s1 + $0x750] ss:$8 sps:$4 sm:$0xff]   ;;  %v12176_v53 = vld [vmem:[%s12740_s1 + $0x644] ss:$8 sps:$4 sm:$0xff]  }
 0x5be   : > { %10133 = vmatprep.subr.bf16.mxu1 %v12113_v3 }
 0x5c0   : > { %10093 = vmatpush2.bf16.msra.mxu0 %v12108_v63  ;;  %v12179_v63 = vld [vmem:[%s12740_s1 + $0x744] ss:$8 sps:$4 sm:$0xff]  }
 0x5c1   : > { %10134 = vmatpush2.bf16.msra.mxu1 %v12111_v21  ;;  %10094 = vmatprep.subr.bf16.mxu0 %v12116_v54  ;;  %v12174_v21 = vld [vmem:[%s12740_s1 + $0x640] ss:$8 sps:$4 sm:$0xff]  }
 0x5c2   : > { %10135 = vmatprep.subr.bf16.mxu1 %v12119_v4  ;;  %v12177_v54 = vld [vmem:[%s12740_s1 + $0x740] ss:$8 sps:$4 sm:$0xff]   ;;  %v12182_v4 = vld [vmem:[%s12740_s1 + $0x634] ss:$8 sps:$4 sm:$0xff]  }
 0x5c4   : > { %10095 = vmatpush2.bf16.msra.mxu0 %v12114_v23  ;;  %v12185_v23 = vld [vmem:[%s12740_s1 + $0x734] ss:$8 sps:$4 sm:$0xff]  }
 0x5c5   : > { %10136 = vmatpush2.bf16.msra.mxu1 %v12117_v50  ;;  %10096 = vmatprep.subr.bf16.mxu0 %v12122_v10  ;;  %v12180_v50 = vld [vmem:[%s12740_s1 + $0x630] ss:$8 sps:$4 sm:$0xff]  }
 0x5c6   : > { %10137 = vmatprep.subr.bf16.mxu1 %v12125_v48  ;;  %v12183_v10 = vld [vmem:[%s12740_s1 + $0x730] ss:$8 sps:$4 sm:$0xff]   ;;  %v12188_v48 = vld [vmem:[%s12740_s1 + $0x624] ss:$8 sps:$4 sm:$0xff]  }
 0x5c8   : > { %10097 = vmatpush2.bf16.msra.mxu0 %v12120_v24  ;;  %v12191_v24 = vld [vmem:[%s12740_s1 + $0x724] ss:$8 sps:$4 sm:$0xff]  }
 0x5c9   : > { %10138 = vmatpush2.bf16.msra.mxu1 %v12123_v47  ;;  %10098 = vmatprep.subr.bf16.mxu0 %v12128_v11  ;;  %v12186_v47 = vld [vmem:[%s12740_s1 + $0x620] ss:$8 sps:$4 sm:$0xff]  }
 0x5ca   : > { %10139 = vmatprep.subr.bf16.mxu1 %v12131_v12  ;;  %v12189_v11 = vld [vmem:[%s12740_s1 + $0x720] ss:$8 sps:$4 sm:$0xff]   ;;  %v12194_v12 = vld [vmem:[%s12740_s1 + $0x614] ss:$8 sps:$4 sm:$0xff]  }
 0x5cc   : > { %10099 = vmatpush2.bf16.msra.mxu0 %v12126_v14  ;;  %v12197_v14 = vld [vmem:[%s12740_s1 + $0x714] ss:$8 sps:$4 sm:$0xff]  }
 0x5cd   : > { %10140 = vmatpush2.bf16.msra.mxu1 %v12129_v49  ;;  %10100 = vmatprep.subr.bf16.mxu0 %v12134_v43 }
 0x5ce   : > { %10141 = vmatprep.subr.bf16.mxu1 %v12137_v1  ;;  %v12192_v1 = vld [vmem:[%s12740_s1 + $0x610] ss:$8 sps:$4 sm:$0xff]  }
 0x5d0   : > { %10101 = vmatpush2.bf16.msra.mxu0 %v12132_v16  ;;  %v12195_v16 = vld [vmem:[%s12740_s1 + $0x710] ss:$8 sps:$4 sm:$0xff]  }
 0x5d1   : > { %10142 = vmatpush2.bf16.msra.mxu1 %v12135_v18  ;;  %10102 = vmatprep.subr.bf16.mxu0 %v12140_v20  ;;  %v12200_v18 = vld [vmem:[%s12740_s1 + $0x604] ss:$8 sps:$4 sm:$0xff]  }
 0x5d2   : > { %10143 = vmatprep.subr.bf16.mxu1 %v12143_v61  ;;  %v12203_v20 = vld [vmem:[%s12740_s1 + $0x704] ss:$8 sps:$4 sm:$0xff]   ;;  %v12198_v61 = vld [vmem:[%s12740_s1 + $0x600] ss:$8 sps:$4 sm:$0xff]  }
 0x5d4   : > { %10103 = vmatpush2.bf16.msra.mxu0 %v12138_v46  ;;  %v12201_v46 = vld [vmem:[%s12740_s1 + $0x700] ss:$8 sps:$4 sm:$0xff]  }
 0x5d5   : > { %10144 = vmatpush2.bf16.msra.mxu1 %v12141_v36  ;;  %10104 = vmatprep.subr.bf16.mxu0 %v12146_v15  ;;  %v12206_v36 = vld [vmem:[%s12740_s1 + $0x6f4] ss:$8 sps:$4 sm:$0xff]  }
 0x5d6   : > { %10145 = vmatprep.subr.bf16.mxu1 %v12149_v62  ;;  %v12209_v15 = vld [vmem:[%s12740_s1 + $0x7f4] ss:$8 sps:$4 sm:$0xff]   ;;  %v12204_v62 = vld [vmem:[%s12740_s1 + $0x6f0] ss:$8 sps:$4 sm:$0xff]  }
 0x5d8   : > { %10105 = vmatpush2.bf16.msra.mxu0 %v12144_v34  ;;  %v12207_v34 = vld [vmem:[%s12740_s1 + $0x7f0] ss:$8 sps:$4 sm:$0xff]  }
 0x5d9   : > { %10146 = vmatpush2.bf16.msra.mxu1 %v12147_v22  ;;  %10106 = vmatprep.subr.bf16.mxu0 %v12152_v2  ;;  %v12212_v22 = vld [vmem:[%s12740_s1 + $0x6e4] ss:$8 sps:$4 sm:$0xff]  }
 0x5da   : > { %10147 = vmatprep.subr.bf16.mxu1 %v12155_v6  ;;  %v12215_v2 = vld [vmem:[%s12740_s1 + $0x7e4] ss:$8 sps:$4 sm:$0xff]   ;;  %v12210_v6 = vld [vmem:[%s12740_s1 + $0x6e0] ss:$8 sps:$4 sm:$0xff]  }
 0x5dc   : > { %10107 = vmatpush2.bf16.msra.mxu0 %v12150_v29  ;;  %v12218_v29 = vld [vmem:[%s12740_s1 + $0x6d4] ss:$8 sps:$4 sm:$0xff]  }
 0x5dd   : > { %10148 = vmatpush2.bf16.msra.mxu1 %v12153_v57  ;;  %10158 = vmatprep.subr.bf16.mxu0 %v12158_v32  ;;  %v12221_v57 = vld [vmem:[%s12740_s1 + $0x7d4] ss:$8 sps:$4 sm:$0xff]   ;;  %v12216_v32 = vld [vmem:[%s12740_s1 + $0x6d0] ss:$8 sps:$4 sm:$0xff]  }
 0x5de   : > { %10199 = vmatprep.subr.bf16.mxu1 %v12161_v26  ;;  %v12224_v26 = vld [vmem:[%s12740_s1 + $0x6c4] ss:$8 sps:$4 sm:$0xff]  }
 0x5df   : > { %v14258_v40 = vpop.f32.mrf.mxu0  ;;  %10109 = vmatmul.mubr.bf16.vlgmr.msra.gmra.mxu0 %v8368_v0  ;;  %v12230_v0 = vld [vmem:[%s12740_s1 + $0x6b4] ss:$8 sps:$4 sm:$0xff]  }
 0x5e0   : > { %v14261_v35 = vpop.f32.mrf.mxu1  ;;  %10150 = vmatmul.mubr.bf16.vlgmr.msra.gmra.mxu1 %v8370_v28  ;;  %10159 = vmatpush1.bf16.msra.mxu0 %v12156_v42  ;;  %v8297_v25 = vadd.f32 %v14258_v40, %v14187_v17  ;;  %v12225_v42 = vld [vmem:[%s12740_s1 + $0x7c0] ss:$8 sps:$4 sm:$0xff]   ;;  %v12233_v28 = vld [vmem:[%s12740_s1 + $0x7b4] ss:$8 sps:$4 sm:$0xff]   ;;  %v12228_v17 = vld [vmem:[%s12740_s1 + $0x6b0] ss:$8 sps:$4 sm:$0xff]  }
 0x5e1   : > { %10190 = vmatprep.mubr.bf16.mxu0 %v8373_v9  ;;  %10200 = vmatpush1.bf16.msra.mxu1 %v12159_v45  ;;  %v8298_v5 = vpop.f32.mrf.mxu0  ;;  %v12239_v40 = vld [vmem:[%s12740_s1 + $0x7a4] ss:$8 sps:$4 sm:$0xff]   ;;  %v12234_v9 = vld [vmem:[%s12740_s1 + $0x6a0] ss:$8 sps:$4 sm:$0xff]  }
 0x5e2   : > { %v8299_v7 = vadd.f32 %v8298_v5, %v8258_v27  ;;  %v8339_v55 = vpop.f32.mrf.mxu1  ;;  %10160 = vmatprep.subr.bf16.mxu0 %v12164_v51  ;;  %10201 = vmatprep.subr.bf16.mxu1 %v12167_v52  ;;  %v8338_v45 = vadd.f32 %v14261_v35, %v8297_v25  ;;  %v12231_v51 = vld [vmem:[%s12740_s1 + $0x7b0] ss:$8 sps:$4 sm:$0xff]   ;;  %v12236_v52 = vld [vmem:[%s12740_s1 + $0x6a4] ss:$8 sps:$4 sm:$0xff]   ;;  %v12237_v27 = vld [vmem:[%s12740_s1 + $0x7a0] ss:$8 sps:$4 sm:$0xff]  }
 0x5e3   : > { %v8300_v19 = vpop.f32.mrf.mxu0  ;;  %v12242_v35 = vld [vmem:[%s12740_s1 + $0x694] ss:$8 sps:$4 sm:$0xff]   ;;  %v12243_v5 = vld [vmem:[%s12740_s1 + $0x790] ss:$8 sps:$4 sm:$0xff]  }
 0x5e4   : > { %v8340_v30 = vadd.f32 %v8339_v55, %v8299_v7  ;;  %v8341_v56 = vpop.f32.mrf.mxu1  ;;  %10161 = vmatpush1.bf16.msra.mxu0 %v12162_v41  ;;  %v12240_v41 = vld [vmem:[%s12740_s1 + $0x690] ss:$8 sps:$4 sm:$0xff]   ;;  %v12246_v7 = vld [vmem:[%s12740_s1 + $0x680] ss:$8 sps:$4 sm:$0xff]  }
 0x5e5   : > { %10202 = vmatpush1.bf16.msra.mxu1 %v12165_v58  ;;  %v8301_v39 = vpop.f32.mrf.mxu0  ;;  %10162 = vmatprep.subr.bf16.mxu0 %v12170_v37  ;;  %v12248_v58 = vld [vmem:[%s12740_s1 + $0x684] ss:$8 sps:$4 sm:$0xff]   ;;  %v12249_v55 = vld [vmem:[%s12740_s1 + $0x780] ss:$8 sps:$4 sm:$0xff]  }
 0x5e6   : > { %12294 = vtanh.f32 %v8340_v30  ;;  %v8342_v3 = vpop.f32.mrf.mxu1  ;;  %10203 = vmatprep.subr.bf16.mxu1 %v12173_v13  ;;  %v12251_v37 = vld [vmem:[%s12740_s1 + $0x784] ss:$8 sps:$4 sm:$0xff]  }
 0x5e7   : > { %12296 = vtanh.f32 %v14110_v31  ;;  %v12245_v31 = vld [vmem:[%s12740_s1 + $0x794] ss:$8 sps:$4 sm:$0xff]  }
 0x5e8   : > { %10163 = vmatpush1.bf16.msra.mxu0 %v12168_v59  ;;  %12298 = vtanh.f32 %v8338_v45 }
 0x5e9   : > { %10204 = vmatpush1.bf16.msra.mxu1 %v12171_v60  ;;  %10164 = vmatprep.subr.bf16.mxu0 %v12176_v53 }
 0x5ea   : > { %10205 = vmatprep.subr.bf16.mxu1 %v12179_v63 }
 0x5ec   : > { %10165 = vmatpush1.bf16.msra.mxu0 %v12174_v21 }
 0x5ed   : > { %10206 = vmatpush1.bf16.msra.mxu1 %v12177_v54  ;;  %10166 = vmatprep.subr.bf16.mxu0 %v12182_v4 }
 0x5ee   : > { %10207 = vmatprep.subr.bf16.mxu1 %v12185_v23 }
 0x5f0   : > { %10167 = vmatpush1.bf16.msra.mxu0 %v12180_v50 }
 0x5f1   : > { %10208 = vmatpush1.bf16.msra.mxu1 %v12183_v10  ;;  %10168 = vmatprep.subr.bf16.mxu0 %v12188_v48 }
 0x5f2   : > { %10209 = vmatprep.subr.bf16.mxu1 %v12191_v24 }
 0x5f3   : > { %v12295_v49 = vpop.eup %12294 }
 0x5f4   : > { %10169 = vmatpush1.bf16.msra.mxu0 %v12186_v47  ;;  %v8375_v43 = vpack.c.bf16 %v12295_v49, %v12295_v49  ;;  %v12297_v13 = vpop.eup %12296 }
 0x5f5   : > { %10210 = vmatpush1.bf16.msra.mxu1 %v12189_v11  ;;  %10170 = vmatprep.subr.bf16.mxu0 %v12194_v12  ;;  %v12299_v19 = vpop.eup %12298  ;;  %v8372_v30 = vpack.c.bf16 %v12297_v13, %v12297_v13 }
 0x5f6   : > { %10231 = vmatprep.mubr.bf16.mxu1 %v8375_v43  ;;  %10211 = vmatprep.subr.bf16.mxu1 %v12197_v14  ;;  %v8374_v56 = vpack.c.bf16 %v12299_v19, %v12299_v19 }
 0x5f8   : > { %10171 = vmatpush1.bf16.msra.mxu0 %v12192_v1 }
 0x5f9   : > { %10212 = vmatpush1.bf16.msra.mxu1 %v12195_v16  ;;  %10172 = vmatprep.subr.bf16.mxu0 %v12200_v18 }
 0x5fa   : > { %10213 = vmatprep.subr.bf16.mxu1 %v12203_v20 }
 0x5fc   : > { %10173 = vmatpush1.bf16.msra.mxu0 %v12198_v61 }
 0x5fd   : > { %10214 = vmatpush1.bf16.msra.mxu1 %v12201_v46  ;;  %10174 = vmatprep.subr.bf16.mxu0 %v12206_v36 }
 0x5fe   : > { %10215 = vmatprep.subr.bf16.mxu1 %v12209_v15 }
 0x600   : > { %10175 = vmatpush2.bf16.msra.mxu0 %v12204_v62 }
 0x601   : > { %10216 = vmatpush2.bf16.msra.mxu1 %v12207_v34  ;;  %10176 = vmatprep.subr.bf16.mxu0 %v12212_v22 }
 0x602   : > { %10217 = vmatprep.subr.bf16.mxu1 %v12215_v2 }
 0x604   : > { %10177 = vmatpush2.bf16.msra.mxu0 %v12210_v6 }
 0x605   : > { %10218 = vmatpush2.bf16.msra.mxu1 %v12213_v44  ;;  %10178 = vmatprep.subr.bf16.mxu0 %v12218_v29 }
 0x606   : > { %10219 = vmatprep.subr.bf16.mxu1 %v12221_v57 }
 0x608   : > { %10179 = vmatpush2.bf16.msra.mxu0 %v12216_v32 }
 0x609   : > { %10220 = vmatpush2.bf16.msra.mxu1 %v12219_v33  ;;  %10180 = vmatprep.subr.bf16.mxu0 %v12224_v26 }
 0x60a   : > { %10221 = vmatprep.subr.bf16.mxu1 %v12227_v8 }
 0x60c   : > { %10181 = vmatpush2.bf16.msra.mxu0 %v12222_v38 }
 0x60d   : > { %10222 = vmatpush2.bf16.msra.mxu1 %v12225_v42  ;;  %10182 = vmatprep.subr.bf16.mxu0 %v12230_v0 }
 0x60e   : > { %10223 = vmatprep.subr.bf16.mxu1 %v12233_v28 }
 0x610   : > { %10183 = vmatpush2.bf16.msra.mxu0 %v12228_v17 }
 0x611   : > { %10224 = vmatpush2.bf16.msra.mxu1 %v12231_v51  ;;  %10184 = vmatprep.subr.bf16.mxu0 %v12236_v52 }
 0x612   : > { %10225 = vmatprep.subr.bf16.mxu1 %v12239_v40 }
 0x614   : > { %10185 = vmatpush2.bf16.msra.mxu0 %v12234_v9 }
 0x615   : > { %10226 = vmatpush2.bf16.msra.mxu1 %v12237_v27  ;;  %10186 = vmatprep.subr.bf16.mxu0 %v12242_v35 }
 0x616   : > { %10227 = vmatprep.subr.bf16.mxu1 %v12245_v31 }
 0x618   : > { %10187 = vmatpush2.bf16.msra.mxu0 %v12240_v41 }
 0x619   : > { %10228 = vmatpush2.bf16.msra.mxu1 %v12243_v5  ;;  %10188 = vmatprep.subr.bf16.mxu0 %v12248_v58 }
 0x61a   : > { %10229 = vmatprep.subr.bf16.mxu1 %v12251_v37 }
 0x61c   : > { %10189 = vmatpush2.bf16.msra.mxu0 %v12246_v7 }
 0x61d   : > { %10230 = vmatpush2.bf16.msra.mxu1 %v12249_v55 }
 0x61f   : > { %v9946_v59 = vpop.f32.mrf.mxu0  ;;  %10191 = vmatmul.mubr.bf16.vlgmr.msra.gmra.mxu0 %v8372_v30 }
 0x620   : > { %v9987_v39 = vpop.f32.mrf.mxu1  ;;  %10232 = vmatmul.mubr.bf16.vlgmr.msra.gmra.mxu1 %v8374_v56 }
 0x621   : > { %v9988_v60 = vadd.f32 %v9987_v39, %v9946_v59  ;;  %v9948_v53 = vpop.f32.mrf.mxu0 }
 0x622   : > { %v9989_v3 = vpop.f32.mrf.mxu1 }
 0x623   : > { %v9990_v63 = vadd.f32 %v9989_v3, %v9948_v53  ;;  %v9950_v21 = vpop.f32.mrf.mxu0 }
 0x624   : > { %v9991_v54 = vpop.f32.mrf.mxu1 }
 0x625   : > { %v9951_v4 = vpop.f32.mrf.mxu0 }
 0x626   : > { %v9992_v23 = vpop.f32.mrf.mxu1 }
 0x65f   : > { %v10028_v50 = vpop.f32.mrf.mxu0 }
 0x660   : > { %v10029_v10 = vadd.f32 %v10028_v50, %v9988_v60  ;;  %v10069_v48 = vpop.f32.mrf.mxu1 }
 0x661   : > { %v10030_v24 = vpop.f32.mrf.mxu0 }
 0x662   : > { %v10070_v47 = vadd.f32 %v10069_v48, %v10029_v10  ;;  %v10031_v11 = vadd.f32 %v10030_v24, %v9990_v63  ;;  %v10071_v12 = vpop.f32.mrf.mxu1 }
 0x663   : > { %v10032_v14 = vpop.f32.mrf.mxu0 }
 0x664   : > { %v10072_v49 = vadd.f32 %v10071_v12, %v10031_v11  ;;  %v10073_v43 = vpop.f32.mrf.mxu1 }
 0x665   : > { %v10033_v1 = vpop.f32.mrf.mxu0 }
 0x666   : > { %v10074_v16 = vpop.f32.mrf.mxu1 }
 0x69f   : > { %v10110_v18 = vpop.f32.mrf.mxu0 }
 0x6a0   : > { %v10151_v20 = vpop.f32.mrf.mxu1  ;;  %v10111_v22 = vadd.f32 %v10110_v18, %v10070_v47 }
 0x6a1   : > { %v10112_v61 = vpop.f32.mrf.mxu0 }
 0x6a2   : > { %v10153_v46 = vpop.f32.mrf.mxu1  ;;  %v10113_v2 = vadd.f32 %v10112_v61, %v10072_v49  ;;  %v10152_v6 = vadd.f32 %v10151_v20, %v10111_v22 }
 0x6a3   : > { %v10114_v36 = vpop.f32.mrf.mxu0 }
 0x6a4   : > { %v10155_v15 = vpop.f32.mrf.mxu1  ;;  %v10154_v29 = vadd.f32 %v10153_v46, %v10113_v2 }
 0x6a5   : > { %v10115_v62 = vpop.f32.mrf.mxu0 }
 0x6a6   : > { %v10156_v34 = vpop.f32.mrf.mxu1 }
 0x6df   : > { %v10192_v44 = vpop.f32.mrf.mxu0 }
 0x6e0   : > { %v10193_v57 = vadd.f32 %v10192_v44, %v10152_v6  ;;  %v10233_v32 = vpop.f32.mrf.mxu1 }
 0x6e1   : > { %v10194_v33 = vpop.f32.mrf.mxu0 }
 0x6e2   : > { %v10234_v26 = vadd.f32 %v10233_v32, %v10193_v57  ;;  %v10195_v25 = vadd.f32 %v10194_v33, %v10154_v29  ;;  %v10235_v8 = vpop.f32.mrf.mxu1 }
 0x6e3   : > { %v10196_v38 = vpop.f32.mrf.mxu0 }
 0x6e4   : > { %10243 = vst [vmem:[%s414_s27] sm:$0xff] %v10234_v26  ;;  %v10236_v42 = vadd.f32 %v10235_v8, %v10195_v25  ;;  %v10237_v0 = vpop.f32.mrf.mxu1 }
 0x6e5   : > { %v10197_v45 = vpop.f32.mrf.mxu0 }
 0x6e6   : > { %10244 = vst [vmem:[%s414_s27 + $0x8] sm:$0xff] %v10236_v42  ;;  %v10238_v28 = vpop.f32.mrf.mxu1 }
 0x6e7 PF: > { %s24_s26 = sadd.s32 1, %s12526_s26   ;;  %s14369_s20 = sld [smem:[#allocation17_spill]] }
 0x6e8   : > { %p21_p12 = scmp.ge.s32.totalorder %s24_s26, 4   ;;  %s14370_s21 = smov %s12510_s22 }
 0x6e9   : > { %s14371_s22 = smov %s12514_s23  ;;  %s14372_s23 = smov %s12669_s14 }
 0x6ea   : > { %s14373_s24 = smov %s12522_s25  ;;  %23 = sbr.rel (!%p21_p12) target bundleno = 10 (0xa), region = 133 }
 0x6ed   : > { %s14374_s25 = smov %s14369_s20 }
 0x6ef   :  { %10276 = vsyncpa [#allocation4], 1 }
 0x6f0   :  { %10278 = vsyncpa [#allocation4 + $0x1], 1 }
 0x6f1   :  { %10279 = vsyncpa [#allocation6], 1 }
 0x6f2   :  { %10280 = vsyncpa [#allocation9], 1 }
 0x6f3   :  { %10282 = vsyncpa [#allocation9 + $0x1], 1 }
 0x6f4   :  { %10283 = vsyncpa [#allocation12], 1 }
 0x6f5   :  { %10285 = vsyncpa [#allocation12 + $0x1], 1 }

</bundles_post_ra>
